<compile_context>
chip_gen: v6e
topology: v6e:2x2x1
jax: 0.10.0
libtpu: 0.0.40
codegen_flags: <defaults>
</compile_context>

<pallas_src>
import functools

import jax
import jax.numpy as jnp
from jax.experimental import pallas as pl
from jax.experimental.pallas import tpu as pltpu


# --------------------------------------------------------------------------
# tiling helpers
# --------------------------------------------------------------------------
_TM_CAND = (1024, 512, 256, 128, 64, 32, 16)
_TN_CAND = (512, 256, 128)
_TK_CAND = (1024, 768, 512, 384, 256, 128)


def _pick_tile(dim, candidates, small=2048):
    """Largest candidate that evenly divides `dim`; otherwise the full dim if
    it is small, else the largest small power-of-two divisor.  The fallback is
    capped so an awkward dim can never produce a VMEM-blowing block."""
    for c in candidates:
        if c <= dim and dim % c == 0:
            return c
    if dim <= small:
        return dim
    for c in (64, 32, 16, 8):
        if dim % c == 0:
            return c
    return dim


def _pad_rows(a, mult):
    """Pad rows to a multiple of `mult` (16 = bf16 sublane packing).  Only ever
    hits the tiny (batch, nz) first-layer operand; zero rows contribute
    nothing to the fused BN statistics."""
    m = a.shape[0]
    mp = ((m + mult - 1) // mult) * mult
    if mp == m:
        return a
    return jnp.pad(a, ((0, mp - m), (0, 0)))


def _vmem_limit(tm, tn, tk, out_bytes=2):
    # double-buffered A/B/out + f32 accumulator + stats with headroom,
    # clamped well below v7x's 64 MiB physical VMEM (v5e default scoped is
    # only 16 MiB, so we always raise it explicitly).
    need = (2 * (tm * tk * 2 + tk * tn * 2 + tm * tn * out_bytes)
            + tm * tn * 4 + 4 * tn * 4)
    return int(max(32 << 20, min(2 * need, 56 << 20)))


# --------------------------------------------------------------------------
# Pallas kernel 1: tiled bf16 matmul, f32 accumulator, optional fused tanh
#   grid = (M_tiles, N_tiles, K_tiles) = (i, j, k);  k is the reduction axis.
# --------------------------------------------------------------------------
def _mm_kernel(a_ref, b_ref, y_ref, acc_ref, *, act):
    k = pl.program_id(2)

    @pl.when(k == 0)
    def _():
        acc_ref[...] = jnp.zeros_like(acc_ref)

    acc_ref[...] += jnp.dot(a_ref[...], b_ref[...],
                            preferred_element_type=jnp.float32)

    @pl.when(k == pl.num_programs(2) - 1)
    def _():
        y = acc_ref[...]
        if act == "tanh":
            y = jnp.tanh(y)
        y_ref[...] = y.astype(y_ref.dtype)


def matmul_act_pallas(a, b, *, act=None, out_dtype=jnp.bfloat16):
    m0 = a.shape[0]
    a = _pad_rows(a, 16)
    M, K = a.shape
    _, N = b.shape
    tm = _pick_tile(M, _TM_CAND)
    tn = _pick_tile(N, _TN_CAND)
    tk = _pick_tile(K, _TK_CAND)
    y = pl.pallas_call(
        functools.partial(_mm_kernel, act=act),
        out_shape=jax.ShapeDtypeStruct((M, N), out_dtype),
        grid_spec=pltpu.PrefetchScalarGridSpec(
            num_scalar_prefetch=0,
            grid=(M // tm, N // tn, K // tk),
            in_specs=[pl.BlockSpec((tm, tk), lambda i, j, k: (i, k)),
                      pl.BlockSpec((tk, tn), lambda i, j, k: (k, j))],
            out_specs=pl.BlockSpec((tm, tn), lambda i, j, k: (i, j)),
            scratch_shapes=[pltpu.VMEM((tm, tn), jnp.float32)]),
        compiler_params=pltpu.CompilerParams(
            dimension_semantics=("parallel", "parallel", "arbitrary"),
            vmem_limit_bytes=_vmem_limit(tm, tn, tk)),
    )(a, b)
    return y[:m0]


# --------------------------------------------------------------------------
# Pallas kernel 2: same matmul with per-column sum / sum-of-squares fused in
# the epilogue (BatchNorm batch statistics -> no extra HBM read pass).
# Stats are written as per-M-tile partials (num_M_tiles, 2, N) so the M axis
# stays "parallel" (v7x megacore) without racing on a shared accumulator.
# y is emitted in bf16; the stats are computed from the f32 accumulator.
# --------------------------------------------------------------------------
def _mm_stats_kernel(a_ref, b_ref, y_ref, st_ref, acc_ref):
    k = pl.program_id(2)

    @pl.when(k == 0)
    def _():
        acc_ref[...] = jnp.zeros_like(acc_ref)

    acc_ref[...] += jnp.dot(a_ref[...], b_ref[...],
                            preferred_element_type=jnp.float32)

    @pl.when(k == pl.num_programs(2) - 1)
    def _():
        y = acc_ref[...]
        y_ref[...] = y.astype(y_ref.dtype)
        s = jnp.sum(y, axis=0, keepdims=True)
        q = jnp.sum(y * y, axis=0, keepdims=True)
        st_ref[...] = jnp.concatenate([s, q], axis=0).reshape(st_ref.shape)


def matmul_stats_pallas(a, b):
    m0 = a.shape[0]
    a = _pad_rows(a, 16)
    M, K = a.shape
    _, N = b.shape
    tm = _pick_tile(M, _TM_CAND)
    tn = _pick_tile(N, _TN_CAND)
    tk = _pick_tile(K, _TK_CAND)
    n_i = M // tm
    y, st = pl.pallas_call(
        _mm_stats_kernel,
        out_shape=(jax.ShapeDtypeStruct((M, N), jnp.bfloat16),
                   jax.ShapeDtypeStruct((n_i, 2, N), jnp.float32)),
        grid_spec=pltpu.PrefetchScalarGridSpec(
            num_scalar_prefetch=0,
            grid=(n_i, N // tn, K // tk),
            in_specs=[pl.BlockSpec((tm, tk), lambda i, j, k: (i, k)),
                      pl.BlockSpec((tk, tn), lambda i, j, k: (k, j))],
            out_specs=(pl.BlockSpec((tm, tn), lambda i, j, k: (i, j)),
                       pl.BlockSpec((1, 2, tn), lambda i, j, k: (i, 0, j))),
            scratch_shapes=[pltpu.VMEM((tm, tn), jnp.float32)]),
        compiler_params=pltpu.CompilerParams(
            dimension_semantics=("parallel", "parallel", "arbitrary"),
            vmem_limit_bytes=_vmem_limit(tm, tn, tk)),
    )(a, b)
    return y[:m0], st


# --------------------------------------------------------------------------
# Pallas kernel 3: fused per-column affine (BN apply) + ReLU (bf16 in/out)
# --------------------------------------------------------------------------
def _affine_relu_kernel(x_ref, sc_ref, sh_ref, o_ref):
    v = x_ref[...].astype(jnp.float32) * sc_ref[...] + sh_ref[...]
    o_ref[...] = jnp.maximum(v, 0.0).astype(o_ref.dtype)


def affine_relu_pallas(x2d, scale_cols, shift_cols, out_dtype=jnp.bfloat16):
    M, C = x2d.shape
    tm = _pick_tile(M, _TM_CAND)
    tc = _pick_tile(C, _TN_CAND)
    return pl.pallas_call(
        _affine_relu_kernel,
        out_shape=jax.ShapeDtypeStruct((M, C), out_dtype),
        grid_spec=pltpu.PrefetchScalarGridSpec(
            num_scalar_prefetch=0,
            grid=(M // tm, C // tc),
            in_specs=[pl.BlockSpec((tm, tc), lambda m, c: (m, c)),
                      pl.BlockSpec((1, tc), lambda m, c: (0, c)),
                      pl.BlockSpec((1, tc), lambda m, c: (0, c))],
            out_specs=pl.BlockSpec((tm, tc), lambda m, c: (m, c))),
        compiler_params=pltpu.CompilerParams(
            dimension_semantics=("parallel", "parallel")),
    )(x2d,
      scale_cols.reshape(1, C).astype(jnp.float32),
      shift_cols.reshape(1, C).astype(jnp.float32))


# --------------------------------------------------------------------------
# Pallas kernel 4: fused BN-affine + ReLU + sub-pixel pixel-shuffle.
#   Input  y2d : (n*h*w, 4*cout), columns parity-major (p = 2r + c).
#   Output     : (n*h, 2, w, 2*cout) bf16, a free-reshape view of the NHWC
#                (n, 2h, 2w, cout) activation -> lane-dense stores, and the
#                separate XLA 6-D pixel-shuffle transpose disappears.
# --------------------------------------------------------------------------
def _affine_relu_shuffle_kernel(y_ref, sc_ref, sh_ref, o_ref, *, cout, w, tyy):
    r = pl.program_id(1)
    v = y_ref[...].astype(jnp.float32) * sc_ref[...] + sh_ref[...]
    v = jnp.maximum(v, 0.0)
    two_c = 2 * cout
    half = jnp.where(r == 0, v[:, :two_c], v[:, two_c:])
    o_ref[...] = half.reshape(tyy, 1, w, two_c).astype(o_ref.dtype)


def affine_relu_shuffle_pallas(y2d, scale_cols, shift_cols, n, h, w, cout):
    M, C4 = y2d.shape
    nh = n * h
    tyy = 1
    for t in range(min(max(256 // w, 1), nh), 0, -1):
        if nh % t == 0:
            tyy = t
            break
    trow = tyy * w
    out4 = pl.pallas_call(
        functools.partial(_affine_relu_shuffle_kernel, cout=cout, w=w, tyy=tyy),
        out_shape=jax.ShapeDtypeStruct((nh, 2, w, 2 * cout), jnp.bfloat16),
        grid_spec=pltpu.PrefetchScalarGridSpec(
            num_scalar_prefetch=0,
            grid=(nh // tyy, 2),
            in_specs=[pl.BlockSpec((trow, C4), lambda i, r: (i, 0)),
                      pl.BlockSpec((1, C4), lambda i, r: (0, 0)),
                      pl.BlockSpec((1, C4), lambda i, r: (0, 0))],
            out_specs=pl.BlockSpec((tyy, 1, w, 2 * cout),
                                   lambda i, r: (i, r, 0, 0))),
        compiler_params=pltpu.CompilerParams(
            dimension_semantics=("parallel", "arbitrary"),
            vmem_limit_bytes=32 << 20),
    )(y2d,
      scale_cols.reshape(1, C4).astype(jnp.float32),
      shift_cols.reshape(1, C4).astype(jnp.float32))
    return out4.reshape(n, 2 * h, 2 * w, cout)


# --------------------------------------------------------------------------
# glue: shifted-slab im2col (sub-pixel ConvTranspose2d), pixel shuffle, BN fold
# --------------------------------------------------------------------------
def _shift_stack(x_nhwc, pad_amt, nshift, oh, ow):
    """(N,H,W,C) -> (N*oh*ow, nshift*nshift*C) bf16, slab (dy,dx)-major.
    TODO(synk): still materialized by XLA; fold into the matmul kernel."""
    xp = jnp.pad(x_nhwc, ((0, 0), (pad_amt, pad_amt), (pad_amt, pad_amt), (0, 0)))
    slabs = [xp[:, dy:dy + oh, dx:dx + ow, :]
             for dy in range(nshift) for dx in range(nshift)]
    a = jnp.concatenate(slabs, axis=-1)
    n, c = x_nhwc.shape[0], x_nhwc.shape[3]
    return a.reshape(n * oh * ow, nshift * nshift * c).astype(jnp.bfloat16)


def _pixel_shuffle(y2d, n, h, w, cout):
    """(N*H*W, 4*Cout) parity-major columns -> (N, 2H, 2W, Cout)."""
    y = y2d.reshape(n, h, w, 2, 2, cout)
    y = jnp.transpose(y, (0, 1, 3, 2, 4, 5))
    return y.reshape(n, 2 * h, 2 * w, cout)


def _bn_scale_shift(st, gamma, beta, groups, count, eps=1e-5):
    """Fold per-M-tile stats partials into per-column (scale, shift).

    st is (num_M_tiles, 2, groups*cout); columns are `groups` copies of the
    channel axis (group-major).  Training-mode BatchNorm2d (biased variance).
    """
    cout = gamma.shape[0]
    s = st[:, 0, :].sum(axis=0).reshape(groups, cout).sum(axis=0)
    q = st[:, 1, :].sum(axis=0).reshape(groups, cout).sum(axis=0)
    mean = s / count
    var = jnp.maximum(q / count - mean * mean, 0.0)
    scale = gamma * jax.lax.rsqrt(var + eps)
    shift = beta - mean * scale
    return jnp.tile(scale, groups), jnp.tile(shift, groups)


# --------------------------------------------------------------------------
# weight repacking (done once, in __init__)
# --------------------------------------------------------------------------
def _subpixel_weight(w, min_cols=None):
    """ConvTranspose2d(k=4, s=2, p=1) weight (Cin,Cout,4,4) -> (9*Cin, 4*Cout).

    Rows: 3x3 input shifts x Cin (shift-major); columns: 4 output parities x
    Cout (parity-major).  Optionally zero-padded to >= min_cols columns so the
    matmul output stays lane-dense (used for the last layer where 4*nc = 4).
    """
    cin, cout = w.shape[0], w.shape[1]
    b = jnp.zeros((3, 3, cin, 4, cout), jnp.float32)
    for r in range(2):
        for c in range(2):
            par = 2 * r + c
            for dy in range(2):
                for dx in range(2):
                    b = b.at[r + dy, c + dx, :, par, :].set(
                        w[:, :, 3 - r - 2 * dy, 3 - c - 2 * dx])
    mat = b.reshape(9 * cin, 4 * cout)
    if min_cols is not None and mat.shape[1] < min_cols:
        mat = jnp.pad(mat, ((0, 0), (0, min_cols - mat.shape[1])))
    return mat.astype(jnp.bfloat16)


def _first_layer_weights(w):
    """ConvTranspose2d(k=4, s=1, p=0) weight (Cin,Cout,4,4) ->
      B1x1: (Cin, 16*Cout) for 1x1 spatial inputs (columns (kh,kw)-major),
      Bgen: (16*Cin, Cout) full-conv (flipped-kernel) form for general inputs.
    """
    cin, cout = w.shape[0], w.shape[1]
    b1 = jnp.transpose(w, (0, 2, 3, 1)).reshape(cin, 16 * cout).astype(jnp.bfloat16)
    bg = jnp.transpose(w[:, :, ::-1, ::-1], (2, 3, 0, 1)).reshape(
        16 * cin, cout).astype(jnp.bfloat16)
    return b1, bg


# --------------------------------------------------------------------------
# forward (whole thing is jitted once)
# --------------------------------------------------------------------------
def _generator_forward(params, x_nchw, *, nc):
    x = x_nchw.astype(jnp.float32)
    n = x.shape[0]

    # ---- layer 0: ConvTranspose2d(nz, 16*ngf, 4, 1, 0) + BN + ReLU -------
    p0 = params[0]
    cout0 = p0["gamma"].shape[0]
    if x.shape[2] == 1 and x.shape[3] == 1:
        a = x.reshape(n, -1).astype(jnp.bfloat16)
        y, st = matmul_stats_pallas(a, p0["B1x1"])              # (n, 16*cout0)
        sc, sh = _bn_scale_shift(st, p0["gamma"], p0["beta"], 16, n * 16)
        ya = affine_relu_pallas(y, sc, sh)
        x = ya.reshape(n, 4, 4, cout0)
    else:
        # general spatial input: stride-1/pad-0 transposed conv == full conv
        xin = jnp.transpose(x, (0, 2, 3, 1))
        oh, ow = xin.shape[1] + 3, xin.shape[2] + 3
        a = _shift_stack(xin, 3, 4, oh, ow)
        y, st = matmul_stats_pallas(a, p0["Bgen"])              # (n*oh*ow, cout0)
        sc, sh = _bn_scale_shift(st, p0["gamma"], p0["beta"], 1, n * oh * ow)
        ya = affine_relu_pallas(y, sc, sh)
        x = ya.reshape(n, oh, ow, cout0)

    # ---- layers 1-3: ConvTranspose2d(.., 4, 2, 1) + BN + ReLU ------------
    for li in range(1, 4):
        p = params[li]
        cout = p["gamma"].shape[0]
        _, h, w, _ = x.shape
        a = _shift_stack(x, 1, 3, h, w)                         # (n*h*w, 9*cin)
        y, st = matmul_stats_pallas(a, p["B"])                  # bf16 (n*h*w, 4*cout)
        sc, sh = _bn_scale_shift(st, p["gamma"], p["beta"], 4, n * h * w * 4)
        if w % 8 == 0:
            # fused affine + ReLU + sub-pixel shuffle, lane-dense NHWC store
            x = affine_relu_shuffle_pallas(y, sc, sh, n, h, w, cout)
        else:
            # w=4 layer: sublane-split reshape would be unaligned; keep the
            # plain affine kernel + XLA shuffle on this tiny activation.
            ya = affine_relu_pallas(y, sc, sh)
            x = _pixel_shuffle(ya, n, h, w, cout)

    # ---- layer 4: ConvTranspose2d(ngf, nc, 4, 2, 1) + fused Tanh ---------
    p = params[4]
    _, h, w, _ = x.shape
    a = _shift_stack(x, 1, 3, h, w)
    y = matmul_act_pallas(a, p["B"], act="tanh", out_dtype=jnp.bfloat16)
    y = y[:, :4 * nc].astype(jnp.float32)                       # drop pad cols
    out = _pixel_shuffle(y, n, h, w, nc)                        # (n, 2h, 2w, nc)
    return jnp.transpose(out, (0, 3, 1, 2))                     # back to NCHW


class GeneratorPallas:
    """DCGAN Generator forward (training-mode BN statistics) on Pallas TPU."""

    def __init__(self, nz=200, ngf=64, nc=1, key=jax.random.PRNGKey(42)):
        self.nz, self.ngf, self.nc = nz, ngf, nc
        chans = [nz, ngf * 16, ngf * 8, ngf * 4, ngf, nc]
        keys = jax.random.split(key, 10)
        params = []
        self.raw_weights, self.gammas, self.betas = [], [], []
        for li in range(5):
            cin, cout = chans[li], chans[li + 1]
            # deterministic DCGAN-style init: N(0, 0.02)
            w = 0.02 * jax.random.normal(keys[li], (cin, cout, 4, 4), jnp.float32)
            self.raw_weights.append(w)
            p = {}
            if li == 0:
                p["B1x1"], p["Bgen"] = _first_layer_weights(w)
            elif li < 4:
                p["B"] = _subpixel_weight(w)
            else:
                # pad last layer to >=128 lane-dense output columns
                min_cols = ((4 * cout + 127) // 128) * 128
                p["B"] = _subpixel_weight(w, min_cols=min_cols)
            if li < 4:
                g = 1.0 + 0.02 * jax.random.normal(keys[5 + li], (cout,), jnp.float32)
                b = jnp.zeros((cout,), jnp.float32)
                p["gamma"], p["beta"] = g, b
                self.gammas.append(g)
                self.betas.append(b)
            params.append(p)
        self.params = tuple(params)
        # TODO(synk): nn.BatchNorm2d running_mean/running_var bookkeeping is
        # not reproduced (does not affect the training-mode forward output).
        self._fwd = jax.jit(functools.partial(_generator_forward, nc=nc))

    def __call__(self, x_nchw):
        return self._fwd(self.params, x_nchw)


# --------------------------------------------------------------------------
# pure-JAX f32 reference (mirrors the PyTorch module) for validation
# --------------------------------------------------------------------------
def _ref_conv_transpose(x, w, stride, pad):
    n, cin, h, wdt = x.shape
    _, cout, k, _ = w.shape
    hd, wd = (h - 1) * stride + 1, (wdt - 1) * stride + 1
    xu = jnp.zeros((n, cin, hd, wd), jnp.float32).at[:, :, ::stride, ::stride].set(x)
    p = k - 1 - pad
    xp = jnp.pad(xu, ((0, 0), (0, 0), (p, p), (p, p)))
    hout, wout = hd + 2 * p - k + 1, wd + 2 * p - k + 1
    wk = w[:, :, ::-1, ::-1]
    out = jnp.zeros((n, cout, hout, wout), jnp.float32)
    for kh in range(k):
        for kw in range(k):
            out = out + jnp.einsum("nchw,cd->ndhw",
                                   xp[:, :, kh:kh + hout, kw:kw + wout],
                                   wk[:, :, kh, kw])
    return out


def _ref_forward(raw_weights, gammas, betas, x_nchw, eps=1e-5):
    x = x_nchw.astype(jnp.float32)
    strides, pads = [1, 2, 2, 2, 2], [0, 1, 1, 1, 1]
    for li in range(5):
        x = _ref_conv_transpose(x, raw_weights[li], strides[li], pads[li])
        if li < 4:
            mean = x.mean(axis=(0, 2, 3), keepdims=True)
            var = x.var(axis=(0, 2, 3), keepdims=True)
            g = gammas[li].reshape(1, -1, 1, 1)
            b = betas[li].reshape(1, -1, 1, 1)
            x = (x - mean) * jax.lax.rsqrt(var + eps) * g + b
            x = jnp.maximum(x, 0.0)
    return jnp.tanh(x)


if __name__ == "__main__":
    # Small, architecture-consistent shapes: batch=2, nz=32, ngf=8, nc=1.
    batch, nz, ngf, nc = 2, 32, 8, 1
    gen = GeneratorPallas(nz=nz, ngf=ngf, nc=nc, key=jax.random.PRNGKey(1))
    z = jax.random.normal(jax.random.PRNGKey(0), (batch, nz, 1, 1), jnp.float32)

    out = jax.block_until_ready(gen(z))
    assert out.shape == (batch, nc, 64, 64), out.shape
    assert bool(jnp.all(jnp.isfinite(out)))
    assert bool(jnp.all(jnp.abs(out) <= 1.0 + 1e-6))   # tanh range

    # validate against a pure-JAX f32 reference (bf16 MXU operands + bf16
    # intermediate activations -> loose tolerance)
    ref = jax.block_until_ready(
        _ref_forward(gen.raw_weights, gen.gammas, gen.betas, z))
    max_err = float(jnp.max(jnp.abs(out - ref)))
    assert max_err < 8e-2, f"max abs err vs reference: {max_err}"

    print("KERNEL_OK")
</pallas_src>

<mosaic_0001>
module attributes {stable_mosaic.version = 11 : i64} {
  func.func @_mm_stats_kernel(%arg0: i32, %arg1: i32, %arg2: i32, %arg3: memref<16x32xbf16, #tpu.memory_space<vmem>>, %arg4: memref<32x512xbf16, #tpu.memory_space<vmem>>, %arg5: memref<16x512xbf16, #tpu.memory_space<vmem>>, %arg6: memref<1x2x512xf32, #tpu.memory_space<vmem>>, %arg7: memref<16x512xf32, #tpu.memory_space<vmem>>) attributes {dimension_semantics = [#tpu.dimension_semantics<parallel>, #tpu.dimension_semantics<parallel>, #tpu.dimension_semantics<arbitrary>], iteration_bounds = array<i64: 1, 4, 1>, scalar_prefetch = 0 : i64, scratch_operands = 1 : i64, tpu.core_type = #tpu.core_type<tc>, window_params = [{transform_indices = @transform_0, window_bounds = array<i64: 16, 32>}, {transform_indices = @transform_1, window_bounds = array<i64: 32, 512>}, {transform_indices = @transform_2, window_bounds = array<i64: 16, 512>}, {transform_indices = @transform_3, window_bounds = array<i64: 1, 2, 512>}]} {
    %c0_i32 = arith.constant 0 : i32
    %0 = arith.cmpi eq, %arg2, %c0_i32 : i32
    %1 = arith.extui %0 : i1 to i32
    %c0_i32_0 = arith.constant 0 : i32
    %2 = arith.cmpi ne, %1, %c0_i32_0 : i32
    scf.if %2 {
      %cst_10 = arith.constant 0.000000e+00 : f32
      %12 = vector.broadcast %cst_10 : f32 to vector<16x512xf32>
      %c0_11 = arith.constant 0 : index
      %c0_12 = arith.constant 0 : index
      %13 = vector.load %arg7[%c0_11, %c0_12] : memref<16x512xf32, #tpu.memory_space<vmem>>, vector<16x512xf32>
      tpu.vector_store %arg7[%c0_11, %c0_12], %12 {strides = array<i32>} : memref<16x512xf32, #tpu.memory_space<vmem>>, vector<16x512xf32>,
    } else {
    }
    %c0 = arith.constant 0 : index
    %c0_1 = arith.constant 0 : index
    %3 = vector.load %arg7[%c0, %c0_1] : memref<16x512xf32, #tpu.memory_space<vmem>>, vector<16x512xf32>
    %c0_2 = arith.constant 0 : index
    %c0_3 = arith.constant 0 : index
    %4 = vector.load %arg3[%c0_2, %c0_3] : memref<16x32xbf16, #tpu.memory_space<vmem>>, vector<16x32xbf16>
    %c0_4 = arith.constant 0 : index
    %c0_5 = arith.constant 0 : index
    %5 = vector.load %arg4[%c0_4, %c0_5] : memref<32x512xbf16, #tpu.memory_space<vmem>>, vector<32x512xbf16>
    %cst = arith.constant dense<0.000000e+00> : vector<16x512xf32>
    %6 = tpu.matmul %4, %5, %cst {dimension_numbers = #tpu.dot_dimension_numbers<[1], [0], [0], [1], [0, 0, 1, 1], [], []>} : vector<16x32xbf16>, vector<32x512xbf16>, vector<16x512xf32> -> vector<16x512xf32>
    %7 = arith.addf %3, %6 : vector<16x512xf32>
    %c0_6 = arith.constant 0 : index
    %c0_7 = arith.constant 0 : index
    %8 = vector.load %arg7[%c0_6, %c0_7] : memref<16x512xf32, #tpu.memory_space<vmem>>, vector<16x512xf32>
    tpu.vector_store %arg7[%c0_6, %c0_7], %7 {strides = array<i32>} : memref<16x512xf32, #tpu.memory_space<vmem>>, vector<16x512xf32>,
    %c0_i32_8 = arith.constant 0 : i32
    %9 = arith.cmpi eq, %arg2, %c0_i32_8 : i32
    %10 = arith.extui %9 : i1 to i32
    %c0_i32_9 = arith.constant 0 : i32
    %11 = arith.cmpi ne, %10, %c0_i32_9 : i32
    scf.if %11 {
      %c0_10 = arith.constant 0 : index
      %c0_11 = arith.constant 0 : index
      %12 = vector.load %arg7[%c0_10, %c0_11] : memref<16x512xf32, #tpu.memory_space<vmem>>, vector<16x512xf32>
      %13 = arith.truncf %12 : vector<16x512xf32> to vector<16x512xbf16>
      %c0_12 = arith.constant 0 : index
      %c0_13 = arith.constant 0 : index
      %14 = vector.load %arg5[%c0_12, %c0_13] : memref<16x512xbf16, #tpu.memory_space<vmem>>, vector<16x512xbf16>
      tpu.vector_store %arg5[%c0_12, %c0_13], %13 {strides = array<i32>} : memref<16x512xbf16, #tpu.memory_space<vmem>>, vector<16x512xbf16>,
      %cst_14 = arith.constant dense<0.000000e+00> : vector<512xf32>
      %15 = vector.multi_reduction <add>, %12, %cst_14 [0] : vector<16x512xf32> to vector<512xf32>
      %16 = vector.shape_cast %15 : vector<512xf32> to vector<1x512xf32>
      %17 = arith.mulf %12, %12 : vector<16x512xf32>
      %cst_15 = arith.constant dense<0.000000e+00> : vector<512xf32>
      %18 = vector.multi_reduction <add>, %17, %cst_15 [0] : vector<16x512xf32> to vector<512xf32>
      %19 = vector.shape_cast %18 : vector<512xf32> to vector<1x512xf32>
      %20 = tpu.concatenate %16, %19 in 0 : vector<1x512xf32>, vector<1x512xf32> -> vector<2x512xf32>
      %21 = vector.shape_cast %20 : vector<2x512xf32> to vector<1x2x512xf32>
      %c0_16 = arith.constant 0 : index
      %c0_17 = arith.constant 0 : index
      %c0_18 = arith.constant 0 : index
      %22 = vector.load %arg6[%c0_16, %c0_17, %c0_18] : memref<1x2x512xf32, #tpu.memory_space<vmem>>, vector<1x2x512xf32>
      tpu.vector_store %arg6[%c0_16, %c0_17, %c0_18], %21 {strides = array<i32>} : memref<1x2x512xf32, #tpu.memory_space<vmem>>, vector<1x2x512xf32>,
    } else {
    }
    return
  }
  func.func @transform_0(%arg0: i32, %arg1: i32, %arg2: i32) -> (i32, i32) {
    %c0_i32 = arith.constant 0 : i32
    return %arg0, %arg2 : i32, i32
  }
  func.func @transform_1(%arg0: i32, %arg1: i32, %arg2: i32) -> (i32, i32) {
    %c0_i32 = arith.constant 0 : i32
    return %arg2, %arg1 : i32, i32
  }
  func.func @transform_2(%arg0: i32, %arg1: i32, %arg2: i32) -> (i32, i32) {
    %c0_i32 = arith.constant 0 : i32
    return %arg0, %arg1 : i32, i32
  }
  func.func @transform_3(%arg0: i32, %arg1: i32, %arg2: i32) -> (i32, i32, i32) {
    %c0_i32 = arith.constant 0 : i32
    %c0_i32_0 = arith.constant 0 : i32
    return %arg0, %c0_i32, %arg1 : i32, i32, i32
  }
}

module attributes {stable_mosaic.version = 11 : i64} {
  func.func @_affine_relu_kernel(%arg0: i32, %arg1: i32, %arg2: memref<2x512xbf16, #tpu.memory_space<vmem>>, %arg3: memref<1x512xf32, #tpu.memory_space<vmem>>, %arg4: memref<1x512xf32, #tpu.memory_space<vmem>>, %arg5: memref<2x512xbf16, #tpu.memory_space<vmem>>) attributes {dimension_semantics = [#tpu.dimension_semantics<parallel>, #tpu.dimension_semantics<parallel>], iteration_bounds = array<i64: 1, 4>, scalar_prefetch = 0 : i64, scratch_operands = 0 : i64, tpu.core_type = #tpu.core_type<tc>, window_params = [{transform_indices = @transform_0, window_bounds = array<i64: 2, 512>}, {transform_indices = @transform_1, window_bounds = array<i64: 1, 512>}, {transform_indices = @transform_2, window_bounds = array<i64: 1, 512>}, {transform_indices = @transform_3, window_bounds = array<i64: 2, 512>}]} {
    %c0 = arith.constant 0 : index
    %c0_0 = arith.constant 0 : index
    %0 = vector.load %arg2[%c0, %c0_0] : memref<2x512xbf16, #tpu.memory_space<vmem>>, vector<2x512xbf16>
    %1 = arith.extf %0 : vector<2x512xbf16> to vector<2x512xf32>
    %c0_1 = arith.constant 0 : index
    %c0_2 = arith.constant 0 : index
    %2 = vector.load %arg3[%c0_1, %c0_2] : memref<1x512xf32, #tpu.memory_space<vmem>>, vector<1x512xf32>
    %3 = vector.broadcast %2 : vector<1x512xf32> to vector<2x512xf32>
    %4 = arith.mulf %1, %3 : vector<2x512xf32>
    %c0_3 = arith.constant 0 : index
    %c0_4 = arith.constant 0 : index
    %5 = vector.load %arg4[%c0_3, %c0_4] : memref<1x512xf32, #tpu.memory_space<vmem>>, vector<1x512xf32>
    %6 = vector.broadcast %5 : vector<1x512xf32> to vector<2x512xf32>
    %7 = arith.addf %4, %6 : vector<2x512xf32>
    %cst = arith.constant 0.000000e+00 : f32
    %8 = vector.broadcast %cst : f32 to vector<2x512xf32>
    %9 = arith.maximumf %7, %8 : vector<2x512xf32>
    %10 = arith.truncf %9 : vector<2x512xf32> to vector<2x512xbf16>
    %c0_5 = arith.constant 0 : index
    %c0_6 = arith.constant 0 : index
    %11 = vector.load %arg5[%c0_5, %c0_6] : memref<2x512xbf16, #tpu.memory_space<vmem>>, vector<2x512xbf16>
    tpu.vector_store %arg5[%c0_5, %c0_6], %10 {strides = array<i32>} : memref<2x512xbf16, #tpu.memory_space<vmem>>, vector<2x512xbf16>,
    return
  }
  func.func @transform_0(%arg0: i32, %arg1: i32) -> (i32, i32) {
    %c0_i32 = arith.constant 0 : i32
    return %arg0, %arg1 : i32, i32
  }
  func.func @transform_1(%arg0: i32, %arg1: i32) -> (i32, i32) {
    %c0_i32 = arith.constant 0 : i32
    %c0_i32_0 = arith.constant 0 : i32
    return %c0_i32, %arg1 : i32, i32
  }
  func.func @transform_2(%arg0: i32, %arg1: i32) -> (i32, i32) {
    %c0_i32 = arith.constant 0 : i32
    %c0_i32_0 = arith.constant 0 : i32
    return %c0_i32, %arg1 : i32, i32
  }
  func.func @transform_3(%arg0: i32, %arg1: i32) -> (i32, i32) {
    %c0_i32 = arith.constant 0 : i32
    return %arg0, %arg1 : i32, i32
  }
}

module attributes {stable_mosaic.version = 11 : i64} {
  func.func @_mm_stats_kernel(%arg0: i32, %arg1: i32, %arg2: i32, %arg3: memref<32x384xbf16, #tpu.memory_space<vmem>>, %arg4: memref<384x256xbf16, #tpu.memory_space<vmem>>, %arg5: memref<32x256xbf16, #tpu.memory_space<vmem>>, %arg6: memref<1x2x256xf32, #tpu.memory_space<vmem>>, %arg7: memref<32x256xf32, #tpu.memory_space<vmem>>) attributes {dimension_semantics = [#tpu.dimension_semantics<parallel>, #tpu.dimension_semantics<parallel>, #tpu.dimension_semantics<arbitrary>], iteration_bounds = array<i64: 1, 1, 3>, scalar_prefetch = 0 : i64, scratch_operands = 1 : i64, tpu.core_type = #tpu.core_type<tc>, window_params = [{transform_indices = @transform_0, window_bounds = array<i64: 32, 384>}, {transform_indices = @transform_1, window_bounds = array<i64: 384, 256>}, {transform_indices = @transform_2, window_bounds = array<i64: 32, 256>}, {transform_indices = @transform_3, window_bounds = array<i64: 1, 2, 256>}]} {
    %c0_i32 = arith.constant 0 : i32
    %0 = arith.cmpi eq, %arg2, %c0_i32 : i32
    %1 = arith.extui %0 : i1 to i32
    %c0_i32_0 = arith.constant 0 : i32
    %2 = arith.cmpi ne, %1, %c0_i32_0 : i32
    scf.if %2 {
      %cst_9 = arith.constant 0.000000e+00 : f32
      %12 = vector.broadcast %cst_9 : f32 to vector<32x256xf32>
      %c0_10 = arith.constant 0 : index
      %c0_11 = arith.constant 0 : index
      %13 = vector.load %arg7[%c0_10, %c0_11] : memref<32x256xf32, #tpu.memory_space<vmem>>, vector<32x256xf32>
      tpu.vector_store %arg7[%c0_10, %c0_11], %12 {strides = array<i32>} : memref<32x256xf32, #tpu.memory_space<vmem>>, vector<32x256xf32>,
    } else {
    }
    %c0 = arith.constant 0 : index
    %c0_1 = arith.constant 0 : index
    %3 = vector.load %arg7[%c0, %c0_1] : memref<32x256xf32, #tpu.memory_space<vmem>>, vector<32x256xf32>
    %c0_2 = arith.constant 0 : index
    %c0_3 = arith.constant 0 : index
    %4 = vector.load %arg3[%c0_2, %c0_3] : memref<32x384xbf16, #tpu.memory_space<vmem>>, vector<32x384xbf16>
    %c0_4 = arith.constant 0 : index
    %c0_5 = arith.constant 0 : index
    %5 = vector.load %arg4[%c0_4, %c0_5] : memref<384x256xbf16, #tpu.memory_space<vmem>>, vector<384x256xbf16>
    %cst = arith.constant dense<0.000000e+00> : vector<32x256xf32>
    %6 = tpu.matmul %4, %5, %cst {dimension_numbers = #tpu.dot_dimension_numbers<[1], [0], [0], [1], [0, 0, 1, 1], [], []>} : vector<32x384xbf16>, vector<384x256xbf16>, vector<32x256xf32> -> vector<32x256xf32>
    %7 = arith.addf %3, %6 : vector<32x256xf32>
    %c0_6 = arith.constant 0 : index
    %c0_7 = arith.constant 0 : index
    %8 = vector.load %arg7[%c0_6, %c0_7] : memref<32x256xf32, #tpu.memory_space<vmem>>, vector<32x256xf32>
    tpu.vector_store %arg7[%c0_6, %c0_7], %7 {strides = array<i32>} : memref<32x256xf32, #tpu.memory_space<vmem>>, vector<32x256xf32>,
    %c2_i32 = arith.constant 2 : i32
    %9 = arith.cmpi eq, %arg2, %c2_i32 : i32
    %10 = arith.extui %9 : i1 to i32
    %c0_i32_8 = arith.constant 0 : i32
    %11 = arith.cmpi ne, %10, %c0_i32_8 : i32
    scf.if %11 {
      %c0_9 = arith.constant 0 : index
      %c0_10 = arith.constant 0 : index
      %12 = vector.load %arg7[%c0_9, %c0_10] : memref<32x256xf32, #tpu.memory_space<vmem>>, vector<32x256xf32>
      %13 = arith.truncf %12 : vector<32x256xf32> to vector<32x256xbf16>
      %c0_11 = arith.constant 0 : index
      %c0_12 = arith.constant 0 : index
      %14 = vector.load %arg5[%c0_11, %c0_12] : memref<32x256xbf16, #tpu.memory_space<vmem>>, vector<32x256xbf16>
      tpu.vector_store %arg5[%c0_11, %c0_12], %13 {strides = array<i32>} : memref<32x256xbf16, #tpu.memory_space<vmem>>, vector<32x256xbf16>,
      %cst_13 = arith.constant dense<0.000000e+00> : vector<256xf32>
      %15 = vector.multi_reduction <add>, %12, %cst_13 [0] : vector<32x256xf32> to vector<256xf32>
      %16 = vector.shape_cast %15 : vector<256xf32> to vector<1x256xf32>
      %17 = arith.mulf %12, %12 : vector<32x256xf32>
      %cst_14 = arith.constant dense<0.000000e+00> : vector<256xf32>
      %18 = vector.multi_reduction <add>, %17, %cst_14 [0] : vector<32x256xf32> to vector<256xf32>
      %19 = vector.shape_cast %18 : vector<256xf32> to vector<1x256xf32>
      %20 = tpu.concatenate %16, %19 in 0 : vector<1x256xf32>, vector<1x256xf32> -> vector<2x256xf32>
      %21 = vector.shape_cast %20 : vector<2x256xf32> to vector<1x2x256xf32>
      %c0_15 = arith.constant 0 : index
      %c0_16 = arith.constant 0 : index
      %c0_17 = arith.constant 0 : index
      %22 = vector.load %arg6[%c0_15, %c0_16, %c0_17] : memref<1x2x256xf32, #tpu.memory_space<vmem>>, vector<1x2x256xf32>
      tpu.vector_store %arg6[%c0_15, %c0_16, %c0_17], %21 {strides = array<i32>} : memref<1x2x256xf32, #tpu.memory_space<vmem>>, vector<1x2x256xf32>,
    } else {
    }
    return
  }
  func.func @transform_0(%arg0: i32, %arg1: i32, %arg2: i32) -> (i32, i32) {
    %c0_i32 = arith.constant 0 : i32
    return %arg0, %arg2 : i32, i32
  }
  func.func @transform_1(%arg0: i32, %arg1: i32, %arg2: i32) -> (i32, i32) {
    %c0_i32 = arith.constant 0 : i32
    return %arg2, %arg1 : i32, i32
  }
  func.func @transform_2(%arg0: i32, %arg1: i32, %arg2: i32) -> (i32, i32) {
    %c0_i32 = arith.constant 0 : i32
    return %arg0, %arg1 : i32, i32
  }
  func.func @transform_3(%arg0: i32, %arg1: i32, %arg2: i32) -> (i32, i32, i32) {
    %c0_i32 = arith.constant 0 : i32
    %c0_i32_0 = arith.constant 0 : i32
    return %arg0, %c0_i32, %arg1 : i32, i32, i32
  }
}

module attributes {stable_mosaic.version = 11 : i64} {
  func.func @_affine_relu_kernel(%arg0: i32, %arg1: i32, %arg2: memref<32x256xbf16, #tpu.memory_space<vmem>>, %arg3: memref<1x256xf32, #tpu.memory_space<vmem>>, %arg4: memref<1x256xf32, #tpu.memory_space<vmem>>, %arg5: memref<32x256xbf16, #tpu.memory_space<vmem>>) attributes {dimension_semantics = [#tpu.dimension_semantics<parallel>, #tpu.dimension_semantics<parallel>], iteration_bounds = array<i64: 1, 1>, scalar_prefetch = 0 : i64, scratch_operands = 0 : i64, tpu.core_type = #tpu.core_type<tc>, window_params = [{transform_indices = @transform_0, window_bounds = array<i64: 32, 256>}, {transform_indices = @transform_1, window_bounds = array<i64: 1, 256>}, {transform_indices = @transform_2, window_bounds = array<i64: 1, 256>}, {transform_indices = @transform_3, window_bounds = array<i64: 32, 256>}]} {
    %c0 = arith.constant 0 : index
    %c0_0 = arith.constant 0 : index
    %0 = vector.load %arg2[%c0, %c0_0] : memref<32x256xbf16, #tpu.memory_space<vmem>>, vector<32x256xbf16>
    %1 = arith.extf %0 : vector<32x256xbf16> to vector<32x256xf32>
    %c0_1 = arith.constant 0 : index
    %c0_2 = arith.constant 0 : index
    %2 = vector.load %arg3[%c0_1, %c0_2] : memref<1x256xf32, #tpu.memory_space<vmem>>, vector<1x256xf32>
    %3 = vector.broadcast %2 : vector<1x256xf32> to vector<32x256xf32>
    %4 = arith.mulf %1, %3 : vector<32x256xf32>
    %c0_3 = arith.constant 0 : index
    %c0_4 = arith.constant 0 : index
    %5 = vector.load %arg4[%c0_3, %c0_4] : memref<1x256xf32, #tpu.memory_space<vmem>>, vector<1x256xf32>
    %6 = vector.broadcast %5 : vector<1x256xf32> to vector<32x256xf32>
    %7 = arith.addf %4, %6 : vector<32x256xf32>
    %cst = arith.constant 0.000000e+00 : f32
    %8 = vector.broadcast %cst : f32 to vector<32x256xf32>
    %9 = arith.maximumf %7, %8 : vector<32x256xf32>
    %10 = arith.truncf %9 : vector<32x256xf32> to vector<32x256xbf16>
    %c0_5 = arith.constant 0 : index
    %c0_6 = arith.constant 0 : index
    %11 = vector.load %arg5[%c0_5, %c0_6] : memref<32x256xbf16, #tpu.memory_space<vmem>>, vector<32x256xbf16>
    tpu.vector_store %arg5[%c0_5, %c0_6], %10 {strides = array<i32>} : memref<32x256xbf16, #tpu.memory_space<vmem>>, vector<32x256xbf16>,
    return
  }
  func.func @transform_0(%arg0: i32, %arg1: i32) -> (i32, i32) {
    %c0_i32 = arith.constant 0 : i32
    return %arg0, %arg1 : i32, i32
  }
  func.func @transform_1(%arg0: i32, %arg1: i32) -> (i32, i32) {
    %c0_i32 = arith.constant 0 : i32
    %c0_i32_0 = arith.constant 0 : i32
    return %c0_i32, %arg1 : i32, i32
  }
  func.func @transform_2(%arg0: i32, %arg1: i32) -> (i32, i32) {
    %c0_i32 = arith.constant 0 : i32
    %c0_i32_0 = arith.constant 0 : i32
    return %c0_i32, %arg1 : i32, i32
  }
  func.func @transform_3(%arg0: i32, %arg1: i32) -> (i32, i32) {
    %c0_i32 = arith.constant 0 : i32
    return %arg0, %arg1 : i32, i32
  }
}

module attributes {stable_mosaic.version = 11 : i64} {
  func.func @_mm_stats_kernel(%arg0: i32, %arg1: i32, %arg2: i32, %arg3: memref<128x576xbf16, #tpu.memory_space<vmem>>, %arg4: memref<576x128xbf16, #tpu.memory_space<vmem>>, %arg5: memref<128x128xbf16, #tpu.memory_space<vmem>>, %arg6: memref<1x2x128xf32, #tpu.memory_space<vmem>>, %arg7: memref<128x128xf32, #tpu.memory_space<vmem>>) attributes {dimension_semantics = [#tpu.dimension_semantics<parallel>, #tpu.dimension_semantics<parallel>, #tpu.dimension_semantics<arbitrary>], iteration_bounds = array<i64: 1, 1, 1>, scalar_prefetch = 0 : i64, scratch_operands = 1 : i64, tpu.core_type = #tpu.core_type<tc>, window_params = [{transform_indices = @transform_0, window_bounds = array<i64: 128, 576>}, {transform_indices = @transform_1, window_bounds = array<i64: 576, 128>}, {transform_indices = @transform_2, window_bounds = array<i64: 128, 128>}, {transform_indices = @transform_3, window_bounds = array<i64: 1, 2, 128>}]} {
    %c0_i32 = arith.constant 0 : i32
    %0 = arith.cmpi eq, %arg2, %c0_i32 : i32
    %1 = arith.extui %0 : i1 to i32
    %c0_i32_0 = arith.constant 0 : i32
    %2 = arith.cmpi ne, %1, %c0_i32_0 : i32
    scf.if %2 {
      %cst_10 = arith.constant 0.000000e+00 : f32
      %12 = vector.broadcast %cst_10 : f32 to vector<128x128xf32>
      %c0_11 = arith.constant 0 : index
      %c0_12 = arith.constant 0 : index
      %13 = vector.load %arg7[%c0_11, %c0_12] : memref<128x128xf32, #tpu.memory_space<vmem>>, vector<128x128xf32>
      tpu.vector_store %arg7[%c0_11, %c0_12], %12 {strides = array<i32>} : memref<128x128xf32, #tpu.memory_space<vmem>>, vector<128x128xf32>,
    } else {
    }
    %c0 = arith.constant 0 : index
    %c0_1 = arith.constant 0 : index
    %3 = vector.load %arg7[%c0, %c0_1] : memref<128x128xf32, #tpu.memory_space<vmem>>, vector<128x128xf32>
    %c0_2 = arith.constant 0 : index
    %c0_3 = arith.constant 0 : index
    %4 = vector.load %arg3[%c0_2, %c0_3] : memref<128x576xbf16, #tpu.memory_space<vmem>>, vector<128x576xbf16>
    %c0_4 = arith.constant 0 : index
    %c0_5 = arith.constant 0 : index
    %5 = vector.load %arg4[%c0_4, %c0_5] : memref<576x128xbf16, #tpu.memory_space<vmem>>, vector<576x128xbf16>
    %cst = arith.constant dense<0.000000e+00> : vector<128x128xf32>
    %6 = tpu.matmul %4, %5, %cst {dimension_numbers = #tpu.dot_dimension_numbers<[1], [0], [0], [1], [0, 0, 1, 1], [], []>} : vector<128x576xbf16>, vector<576x128xbf16>, vector<128x128xf32> -> vector<128x128xf32>
    %7 = arith.addf %3, %6 : vector<128x128xf32>
    %c0_6 = arith.constant 0 : index
    %c0_7 = arith.constant 0 : index
    %8 = vector.load %arg7[%c0_6, %c0_7] : memref<128x128xf32, #tpu.memory_space<vmem>>, vector<128x128xf32>
    tpu.vector_store %arg7[%c0_6, %c0_7], %7 {strides = array<i32>} : memref<128x128xf32, #tpu.memory_space<vmem>>, vector<128x128xf32>,
    %c0_i32_8 = arith.constant 0 : i32
    %9 = arith.cmpi eq, %arg2, %c0_i32_8 : i32
    %10 = arith.extui %9 : i1 to i32
    %c0_i32_9 = arith.constant 0 : i32
    %11 = arith.cmpi ne, %10, %c0_i32_9 : i32
    scf.if %11 {
      %c0_10 = arith.constant 0 : index
      %c0_11 = arith.constant 0 : index
      %12 = vector.load %arg7[%c0_10, %c0_11] : memref<128x128xf32, #tpu.memory_space<vmem>>, vector<128x128xf32>
      %13 = arith.truncf %12 : vector<128x128xf32> to vector<128x128xbf16>
      %c0_12 = arith.constant 0 : index
      %c0_13 = arith.constant 0 : index
      %14 = vector.load %arg5[%c0_12, %c0_13] : memref<128x128xbf16, #tpu.memory_space<vmem>>, vector<128x128xbf16>
      tpu.vector_store %arg5[%c0_12, %c0_13], %13 {strides = array<i32>} : memref<128x128xbf16, #tpu.memory_space<vmem>>, vector<128x128xbf16>,
      %cst_14 = arith.constant dense<0.000000e+00> : vector<128xf32>
      %15 = vector.multi_reduction <add>, %12, %cst_14 [0] : vector<128x128xf32> to vector<128xf32>
      %16 = vector.shape_cast %15 : vector<128xf32> to vector<1x128xf32>
      %17 = arith.mulf %12, %12 : vector<128x128xf32>
      %cst_15 = arith.constant dense<0.000000e+00> : vector<128xf32>
      %18 = vector.multi_reduction <add>, %17, %cst_15 [0] : vector<128x128xf32> to vector<128xf32>
      %19 = vector.shape_cast %18 : vector<128xf32> to vector<1x128xf32>
      %20 = tpu.concatenate %16, %19 in 0 : vector<1x128xf32>, vector<1x128xf32> -> vector<2x128xf32>
      %21 = vector.shape_cast %20 : vector<2x128xf32> to vector<1x2x128xf32>
      %c0_16 = arith.constant 0 : index
      %c0_17 = arith.constant 0 : index
      %c0_18 = arith.constant 0 : index
      %22 = vector.load %arg6[%c0_16, %c0_17, %c0_18] : memref<1x2x128xf32, #tpu.memory_space<vmem>>, vector<1x2x128xf32>
      tpu.vector_store %arg6[%c0_16, %c0_17, %c0_18], %21 {strides = array<i32>} : memref<1x2x128xf32, #tpu.memory_space<vmem>>, vector<1x2x128xf32>,
    } else {
    }
    return
  }
  func.func @transform_0(%arg0: i32, %arg1: i32, %arg2: i32) -> (i32, i32) {
    %c0_i32 = arith.constant 0 : i32
    return %arg0, %arg2 : i32, i32
  }
  func.func @transform_1(%arg0: i32, %arg1: i32, %arg2: i32) -> (i32, i32) {
    %c0_i32 = arith.constant 0 : i32
    return %arg2, %arg1 : i32, i32
  }
  func.func @transform_2(%arg0: i32, %arg1: i32, %arg2: i32) -> (i32, i32) {
    %c0_i32 = arith.constant 0 : i32
    return %arg0, %arg1 : i32, i32
  }
  func.func @transform_3(%arg0: i32, %arg1: i32, %arg2: i32) -> (i32, i32, i32) {
    %c0_i32 = arith.constant 0 : i32
    %c0_i32_0 = arith.constant 0 : i32
    return %arg0, %c0_i32, %arg1 : i32, i32, i32
  }
}

module attributes {stable_mosaic.version = 11 : i64} {
  func.func @_affine_relu_shuffle_kernel(%arg0: i32, %arg1: i32, %arg2: memref<128x128xbf16, #tpu.memory_space<vmem>>, %arg3: memref<1x128xf32, #tpu.memory_space<vmem>>, %arg4: memref<1x128xf32, #tpu.memory_space<vmem>>, %arg5: memref<16x1x8x64xbf16, #tpu.memory_space<vmem>>) attributes {dimension_semantics = [#tpu.dimension_semantics<parallel>, #tpu.dimension_semantics<arbitrary>], iteration_bounds = array<i64: 1, 2>, scalar_prefetch = 0 : i64, scratch_operands = 0 : i64, tpu.core_type = #tpu.core_type<tc>, window_params = [{transform_indices = @transform_0, window_bounds = array<i64: 128, 128>}, {pipeline_mode = #tpu.pipeline_mode<synchronous>, transform_indices = @transform_1, window_bounds = array<i64: 1, 128>}, {pipeline_mode = #tpu.pipeline_mode<synchronous>, transform_indices = @transform_2, window_bounds = array<i64: 1, 128>}, {transform_indices = @transform_3, window_bounds = array<i64: 16, 1, 8, 64>}]} {
    %c0 = arith.constant 0 : index
    %c0_0 = arith.constant 0 : index
    %0 = vector.load %arg2[%c0, %c0_0] : memref<128x128xbf16, #tpu.memory_space<vmem>>, vector<128x128xbf16>
    %1 = arith.extf %0 : vector<128x128xbf16> to vector<128x128xf32>
    %c0_1 = arith.constant 0 : index
    %c0_2 = arith.constant 0 : index
    %2 = vector.load %arg3[%c0_1, %c0_2] : memref<1x128xf32, #tpu.memory_space<vmem>>, vector<1x128xf32>
    %3 = vector.broadcast %2 : vector<1x128xf32> to vector<128x128xf32>
    %4 = arith.mulf %1, %3 : vector<128x128xf32>
    %c0_3 = arith.constant 0 : index
    %c0_4 = arith.constant 0 : index
    %5 = vector.load %arg4[%c0_3, %c0_4] : memref<1x128xf32, #tpu.memory_space<vmem>>, vector<1x128xf32>
    %6 = vector.broadcast %5 : vector<1x128xf32> to vector<128x128xf32>
    %7 = arith.addf %4, %6 : vector<128x128xf32>
    %cst = arith.constant 0.000000e+00 : f32
    %8 = vector.broadcast %cst : f32 to vector<128x128xf32>
    %9 = arith.maximumf %7, %8 : vector<128x128xf32>
    %c0_i32 = arith.constant 0 : i32
    %10 = arith.cmpi eq, %arg1, %c0_i32 : i32
    %11 = vector.extract_strided_slice %9 {offsets = [0, 0], sizes = [128, 64], strides = [1, 1]} : vector<128x128xf32> to vector<128x64xf32>
    %12 = vector.extract_strided_slice %9 {offsets = [0, 64], sizes = [128, 64], strides = [1, 1]} : vector<128x128xf32> to vector<128x64xf32>
    %13 = arith.select %10, %11, %12 : vector<128x64xf32>
    %14 = vector.shape_cast %13 : vector<128x64xf32> to vector<16x1x8x64xf32>
    %15 = arith.truncf %14 : vector<16x1x8x64xf32> to vector<16x1x8x64xbf16>
    %c0_5 = arith.constant 0 : index
    %c0_6 = arith.constant 0 : index
    %c0_7 = arith.constant 0 : index
    %c0_8 = arith.constant 0 : index
    %16 = vector.load %arg5[%c0_5, %c0_6, %c0_7, %c0_8] : memref<16x1x8x64xbf16, #tpu.memory_space<vmem>>, vector<16x1x8x64xbf16>
    tpu.vector_store %arg5[%c0_5, %c0_6, %c0_7, %c0_8], %15 {strides = array<i32>} : memref<16x1x8x64xbf16, #tpu.memory_space<vmem>>, vector<16x1x8x64xbf16>,
    return
  }
  func.func @transform_0(%arg0: i32, %arg1: i32) -> (i32, i32) {
    %c0_i32 = arith.constant 0 : i32
    %c0_i32_0 = arith.constant 0 : i32
    return %arg0, %c0_i32 : i32, i32
  }
  func.func @transform_1(%arg0: i32, %arg1: i32) -> (i32, i32) {
    %c0_i32 = arith.constant 0 : i32
    %c0_i32_0 = arith.constant 0 : i32
    %c0_i32_1 = arith.constant 0 : i32
    return %c0_i32, %c0_i32_0 : i32, i32
  }
  func.func @transform_2(%arg0: i32, %arg1: i32) -> (i32, i32) {
    %c0_i32 = arith.constant 0 : i32
    %c0_i32_0 = arith.constant 0 : i32
    %c0_i32_1 = arith.constant 0 : i32
    return %c0_i32, %c0_i32_0 : i32, i32
  }
  func.func @transform_3(%arg0: i32, %arg1: i32) -> (i32, i32, i32, i32) {
    %c0_i32 = arith.constant 0 : i32
    %c0_i32_0 = arith.constant 0 : i32
    %c0_i32_1 = arith.constant 0 : i32
    return %arg0, %arg1, %c0_i32, %c0_i32_0 : i32, i32, i32, i32
  }
}

module attributes {stable_mosaic.version = 11 : i64} {
  func.func @_mm_stats_kernel(%arg0: i32, %arg1: i32, %arg2: i32, %arg3: memref<512x288xbf16, #tpu.memory_space<vmem>>, %arg4: memref<288x32xbf16, #tpu.memory_space<vmem>>, %arg5: memref<512x32xbf16, #tpu.memory_space<vmem>>, %arg6: memref<1x2x32xf32, #tpu.memory_space<vmem>>, %arg7: memref<512x32xf32, #tpu.memory_space<vmem>>) attributes {dimension_semantics = [#tpu.dimension_semantics<parallel>, #tpu.dimension_semantics<parallel>, #tpu.dimension_semantics<arbitrary>], iteration_bounds = array<i64: 1, 1, 1>, scalar_prefetch = 0 : i64, scratch_operands = 1 : i64, tpu.core_type = #tpu.core_type<tc>, window_params = [{transform_indices = @transform_0, window_bounds = array<i64: 512, 288>}, {transform_indices = @transform_1, window_bounds = array<i64: 288, 32>}, {transform_indices = @transform_2, window_bounds = array<i64: 512, 32>}, {transform_indices = @transform_3, window_bounds = array<i64: 1, 2, 32>}]} {
    %c0_i32 = arith.constant 0 : i32
    %0 = arith.cmpi eq, %arg2, %c0_i32 : i32
    %1 = arith.extui %0 : i1 to i32
    %c0_i32_0 = arith.constant 0 : i32
    %2 = arith.cmpi ne, %1, %c0_i32_0 : i32
    scf.if %2 {
      %cst_10 = arith.constant 0.000000e+00 : f32
      %12 = vector.broadcast %cst_10 : f32 to vector<512x32xf32>
      %c0_11 = arith.constant 0 : index
      %c0_12 = arith.constant 0 : index
      %13 = vector.load %arg7[%c0_11, %c0_12] : memref<512x32xf32, #tpu.memory_space<vmem>>, vector<512x32xf32>
      tpu.vector_store %arg7[%c0_11, %c0_12], %12 {strides = array<i32>} : memref<512x32xf32, #tpu.memory_space<vmem>>, vector<512x32xf32>,
    } else {
    }
    %c0 = arith.constant 0 : index
    %c0_1 = arith.constant 0 : index
    %3 = vector.load %arg7[%c0, %c0_1] : memref<512x32xf32, #tpu.memory_space<vmem>>, vector<512x32xf32>
    %c0_2 = arith.constant 0 : index
    %c0_3 = arith.constant 0 : index
    %4 = vector.load %arg3[%c0_2, %c0_3] : memref<512x288xbf16, #tpu.memory_space<vmem>>, vector<512x288xbf16>
    %c0_4 = arith.constant 0 : index
    %c0_5 = arith.constant 0 : index
    %5 = vector.load %arg4[%c0_4, %c0_5] : memref<288x32xbf16, #tpu.memory_space<vmem>>, vector<288x32xbf16>
    %cst = arith.constant dense<0.000000e+00> : vector<512x32xf32>
    %6 = tpu.matmul %4, %5, %cst {dimension_numbers = #tpu.dot_dimension_numbers<[1], [0], [0], [1], [0, 0, 1, 1], [], []>} : vector<512x288xbf16>, vector<288x32xbf16>, vector<512x32xf32> -> vector<512x32xf32>
    %7 = arith.addf %3, %6 : vector<512x32xf32>
    %c0_6 = arith.constant 0 : index
    %c0_7 = arith.constant 0 : index
    %8 = vector.load %arg7[%c0_6, %c0_7] : memref<512x32xf32, #tpu.memory_space<vmem>>, vector<512x32xf32>
    tpu.vector_store %arg7[%c0_6, %c0_7], %7 {strides = array<i32>} : memref<512x32xf32, #tpu.memory_space<vmem>>, vector<512x32xf32>,
    %c0_i32_8 = arith.constant 0 : i32
    %9 = arith.cmpi eq, %arg2, %c0_i32_8 : i32
    %10 = arith.extui %9 : i1 to i32
    %c0_i32_9 = arith.constant 0 : i32
    %11 = arith.cmpi ne, %10, %c0_i32_9 : i32
    scf.if %11 {
      %c0_10 = arith.constant 0 : index
      %c0_11 = arith.constant 0 : index
      %12 = vector.load %arg7[%c0_10, %c0_11] : memref<512x32xf32, #tpu.memory_space<vmem>>, vector<512x32xf32>
      %13 = arith.truncf %12 : vector<512x32xf32> to vector<512x32xbf16>
      %c0_12 = arith.constant 0 : index
      %c0_13 = arith.constant 0 : index
      %14 = vector.load %arg5[%c0_12, %c0_13] : memref<512x32xbf16, #tpu.memory_space<vmem>>, vector<512x32xbf16>
      tpu.vector_store %arg5[%c0_12, %c0_13], %13 {strides = array<i32>} : memref<512x32xbf16, #tpu.memory_space<vmem>>, vector<512x32xbf16>,
      %cst_14 = arith.constant dense<0.000000e+00> : vector<32xf32>
      %15 = vector.multi_reduction <add>, %12, %cst_14 [0] : vector<512x32xf32> to vector<32xf32>
      %16 = vector.shape_cast %15 : vector<32xf32> to vector<1x32xf32>
      %17 = arith.mulf %12, %12 : vector<512x32xf32>
      %cst_15 = arith.constant dense<0.000000e+00> : vector<32xf32>
      %18 = vector.multi_reduction <add>, %17, %cst_15 [0] : vector<512x32xf32> to vector<32xf32>
      %19 = vector.shape_cast %18 : vector<32xf32> to vector<1x32xf32>
      %20 = tpu.concatenate %16, %19 in 0 : vector<1x32xf32>, vector<1x32xf32> -> vector<2x32xf32>
      %21 = vector.shape_cast %20 : vector<2x32xf32> to vector<1x2x32xf32>
      %c0_16 = arith.constant 0 : index
      %c0_17 = arith.constant 0 : index
      %c0_18 = arith.constant 0 : index
      %22 = vector.load %arg6[%c0_16, %c0_17, %c0_18] : memref<1x2x32xf32, #tpu.memory_space<vmem>>, vector<1x2x32xf32>
      tpu.vector_store %arg6[%c0_16, %c0_17, %c0_18], %21 {strides = array<i32>} : memref<1x2x32xf32, #tpu.memory_space<vmem>>, vector<1x2x32xf32>,
    } else {
    }
    return
  }
  func.func @transform_0(%arg0: i32, %arg1: i32, %arg2: i32) -> (i32, i32) {
    %c0_i32 = arith.constant 0 : i32
    return %arg0, %arg2 : i32, i32
  }
  func.func @transform_1(%arg0: i32, %arg1: i32, %arg2: i32) -> (i32, i32) {
    %c0_i32 = arith.constant 0 : i32
    return %arg2, %arg1 : i32, i32
  }
  func.func @transform_2(%arg0: i32, %arg1: i32, %arg2: i32) -> (i32, i32) {
    %c0_i32 = arith.constant 0 : i32
    return %arg0, %arg1 : i32, i32
  }
  func.func @transform_3(%arg0: i32, %arg1: i32, %arg2: i32) -> (i32, i32, i32) {
    %c0_i32 = arith.constant 0 : i32
    %c0_i32_0 = arith.constant 0 : i32
    return %arg0, %c0_i32, %arg1 : i32, i32, i32
  }
}

module attributes {stable_mosaic.version = 11 : i64} {
  func.func @_affine_relu_shuffle_kernel(%arg0: i32, %arg1: i32, %arg2: memref<256x32xbf16, #tpu.memory_space<vmem>>, %arg3: memref<1x32xf32, #tpu.memory_space<vmem>>, %arg4: memref<1x32xf32, #tpu.memory_space<vmem>>, %arg5: memref<16x1x16x16xbf16, #tpu.memory_space<vmem>>) attributes {dimension_semantics = [#tpu.dimension_semantics<parallel>, #tpu.dimension_semantics<arbitrary>], iteration_bounds = array<i64: 2, 2>, scalar_prefetch = 0 : i64, scratch_operands = 0 : i64, tpu.core_type = #tpu.core_type<tc>, window_params = [{transform_indices = @transform_0, window_bounds = array<i64: 256, 32>}, {pipeline_mode = #tpu.pipeline_mode<synchronous>, transform_indices = @transform_1, window_bounds = array<i64: 1, 32>}, {pipeline_mode = #tpu.pipeline_mode<synchronous>, transform_indices = @transform_2, window_bounds = array<i64: 1, 32>}, {transform_indices = @transform_3, window_bounds = array<i64: 16, 1, 16, 16>}]} {
    %c0 = arith.constant 0 : index
    %c0_0 = arith.constant 0 : index
    %0 = vector.load %arg2[%c0, %c0_0] : memref<256x32xbf16, #tpu.memory_space<vmem>>, vector<256x32xbf16>
    %1 = arith.extf %0 : vector<256x32xbf16> to vector<256x32xf32>
    %c0_1 = arith.constant 0 : index
    %c0_2 = arith.constant 0 : index
    %2 = vector.load %arg3[%c0_1, %c0_2] : memref<1x32xf32, #tpu.memory_space<vmem>>, vector<1x32xf32>
    %3 = vector.broadcast %2 : vector<1x32xf32> to vector<256x32xf32>
    %4 = arith.mulf %1, %3 : vector<256x32xf32>
    %c0_3 = arith.constant 0 : index
    %c0_4 = arith.constant 0 : index
    %5 = vector.load %arg4[%c0_3, %c0_4] : memref<1x32xf32, #tpu.memory_space<vmem>>, vector<1x32xf32>
    %6 = vector.broadcast %5 : vector<1x32xf32> to vector<256x32xf32>
    %7 = arith.addf %4, %6 : vector<256x32xf32>
    %cst = arith.constant 0.000000e+00 : f32
    %8 = vector.broadcast %cst : f32 to vector<256x32xf32>
    %9 = arith.maximumf %7, %8 : vector<256x32xf32>
    %c0_i32 = arith.constant 0 : i32
    %10 = arith.cmpi eq, %arg1, %c0_i32 : i32
    %11 = vector.extract_strided_slice %9 {offsets = [0, 0], sizes = [256, 16], strides = [1, 1]} : vector<256x32xf32> to vector<256x16xf32>
    %12 = vector.extract_strided_slice %9 {offsets = [0, 16], sizes = [256, 16], strides = [1, 1]} : vector<256x32xf32> to vector<256x16xf32>
    %13 = arith.select %10, %11, %12 : vector<256x16xf32>
    %14 = vector.shape_cast %13 : vector<256x16xf32> to vector<16x1x16x16xf32>
    %15 = arith.truncf %14 : vector<16x1x16x16xf32> to vector<16x1x16x16xbf16>
    %c0_5 = arith.constant 0 : index
    %c0_6 = arith.constant 0 : index
    %c0_7 = arith.constant 0 : index
    %c0_8 = arith.constant 0 : index
    %16 = vector.load %arg5[%c0_5, %c0_6, %c0_7, %c0_8] : memref<16x1x16x16xbf16, #tpu.memory_space<vmem>>, vector<16x1x16x16xbf16>
    tpu.vector_store %arg5[%c0_5, %c0_6, %c0_7, %c0_8], %15 {strides = array<i32>} : memref<16x1x16x16xbf16, #tpu.memory_space<vmem>>, vector<16x1x16x16xbf16>,
    return
  }
  func.func @transform_0(%arg0: i32, %arg1: i32) -> (i32, i32) {
    %c0_i32 = arith.constant 0 : i32
    %c0_i32_0 = arith.constant 0 : i32
    return %arg0, %c0_i32 : i32, i32
  }
  func.func @transform_1(%arg0: i32, %arg1: i32) -> (i32, i32) {
    %c0_i32 = arith.constant 0 : i32
    %c0_i32_0 = arith.constant 0 : i32
    %c0_i32_1 = arith.constant 0 : i32
    return %c0_i32, %c0_i32_0 : i32, i32
  }
  func.func @transform_2(%arg0: i32, %arg1: i32) -> (i32, i32) {
    %c0_i32 = arith.constant 0 : i32
    %c0_i32_0 = arith.constant 0 : i32
    %c0_i32_1 = arith.constant 0 : i32
    return %c0_i32, %c0_i32_0 : i32, i32
  }
  func.func @transform_3(%arg0: i32, %arg1: i32) -> (i32, i32, i32, i32) {
    %c0_i32 = arith.constant 0 : i32
    %c0_i32_0 = arith.constant 0 : i32
    %c0_i32_1 = arith.constant 0 : i32
    return %arg0, %arg1, %c0_i32, %c0_i32_0 : i32, i32, i32, i32
  }
}

module attributes {stable_mosaic.version = 11 : i64} {
  func.func @_mm_kernel(%arg0: i32, %arg1: i32, %arg2: i32, %arg3: memref<1024x72xbf16, #tpu.memory_space<vmem>>, %arg4: memref<72x128xbf16, #tpu.memory_space<vmem>>, %arg5: memref<1024x128xbf16, #tpu.memory_space<vmem>>, %arg6: memref<1024x128xf32, #tpu.memory_space<vmem>>) attributes {dimension_semantics = [#tpu.dimension_semantics<parallel>, #tpu.dimension_semantics<parallel>, #tpu.dimension_semantics<arbitrary>], iteration_bounds = array<i64: 2, 1, 1>, scalar_prefetch = 0 : i64, scratch_operands = 1 : i64, tpu.core_type = #tpu.core_type<tc>, window_params = [{transform_indices = @transform_0, window_bounds = array<i64: 1024, 72>}, {transform_indices = @transform_1, window_bounds = array<i64: 72, 128>}, {transform_indices = @transform_2, window_bounds = array<i64: 1024, 128>}]} {
    %c0_i32 = arith.constant 0 : i32
    %0 = arith.cmpi eq, %arg2, %c0_i32 : i32
    %1 = arith.extui %0 : i1 to i32
    %c0_i32_0 = arith.constant 0 : i32
    %2 = arith.cmpi ne, %1, %c0_i32_0 : i32
    scf.if %2 {
      %cst_10 = arith.constant 0.000000e+00 : f32
      %12 = vector.broadcast %cst_10 : f32 to vector<1024x128xf32>
      %c0_11 = arith.constant 0 : index
      %c0_12 = arith.constant 0 : index
      %13 = vector.load %arg6[%c0_11, %c0_12] : memref<1024x128xf32, #tpu.memory_space<vmem>>, vector<1024x128xf32>
      tpu.vector_store %arg6[%c0_11, %c0_12], %12 {strides = array<i32>} : memref<1024x128xf32, #tpu.memory_space<vmem>>, vector<1024x128xf32>,
    } else {
    }
    %c0 = arith.constant 0 : index
    %c0_1 = arith.constant 0 : index
    %3 = vector.load %arg6[%c0, %c0_1] : memref<1024x128xf32, #tpu.memory_space<vmem>>, vector<1024x128xf32>
    %c0_2 = arith.constant 0 : index
    %c0_3 = arith.constant 0 : index
    %4 = vector.load %arg3[%c0_2, %c0_3] : memref<1024x72xbf16, #tpu.memory_space<vmem>>, vector<1024x72xbf16>
    %c0_4 = arith.constant 0 : index
    %c0_5 = arith.constant 0 : index
    %5 = vector.load %arg4[%c0_4, %c0_5] : memref<72x128xbf16, #tpu.memory_space<vmem>>, vector<72x128xbf16>
    %cst = arith.constant dense<0.000000e+00> : vector<1024x128xf32>
    %6 = tpu.matmul %4, %5, %cst {dimension_numbers = #tpu.dot_dimension_numbers<[1], [0], [0], [1], [0, 0, 1, 1], [], []>} : vector<1024x72xbf16>, vector<72x128xbf16>, vector<1024x128xf32> -> vector<1024x128xf32>
    %7 = arith.addf %3, %6 : vector<1024x128xf32>
    %c0_6 = arith.constant 0 : index
    %c0_7 = arith.constant 0 : index
    %8 = vector.load %arg6[%c0_6, %c0_7] : memref<1024x128xf32, #tpu.memory_space<vmem>>, vector<1024x128xf32>
    tpu.vector_store %arg6[%c0_6, %c0_7], %7 {strides = array<i32>} : memref<1024x128xf32, #tpu.memory_space<vmem>>, vector<1024x128xf32>,
    %c0_i32_8 = arith.constant 0 : i32
    %9 = arith.cmpi eq, %arg2, %c0_i32_8 : i32
    %10 = arith.extui %9 : i1 to i32
    %c0_i32_9 = arith.constant 0 : i32
    %11 = arith.cmpi ne, %10, %c0_i32_9 : i32
    scf.if %11 {
      %c0_10 = arith.constant 0 : index
      %c0_11 = arith.constant 0 : index
      %12 = vector.load %arg6[%c0_10, %c0_11] : memref<1024x128xf32, #tpu.memory_space<vmem>>, vector<1024x128xf32>
      %13 = math.tanh %12 : vector<1024x128xf32>
      %14 = arith.truncf %13 : vector<1024x128xf32> to vector<1024x128xbf16>
      %c0_12 = arith.constant 0 : index
      %c0_13 = arith.constant 0 : index
      %15 = vector.load %arg5[%c0_12, %c0_13] : memref<1024x128xbf16, #tpu.memory_space<vmem>>, vector<1024x128xbf16>
      tpu.vector_store %arg5[%c0_12, %c0_13], %14 {strides = array<i32>} : memref<1024x128xbf16, #tpu.memory_space<vmem>>, vector<1024x128xbf16>,
    } else {
    }
    return
  }
  func.func @transform_0(%arg0: i32, %arg1: i32, %arg2: i32) -> (i32, i32) {
    %c0_i32 = arith.constant 0 : i32
    return %arg0, %arg2 : i32, i32
  }
  func.func @transform_1(%arg0: i32, %arg1: i32, %arg2: i32) -> (i32, i32) {
    %c0_i32 = arith.constant 0 : i32
    return %arg2, %arg1 : i32, i32
  }
  func.func @transform_2(%arg0: i32, %arg1: i32, %arg2: i32) -> (i32, i32) {
    %c0_i32 = arith.constant 0 : i32
    return %arg0, %arg1 : i32, i32
  }
}

</mosaic_0001>

<bundles_post_ra>
// kernel: tile.43
= control target key start
LH: loop header
LB: loop body
LE: loop exit
PB: predicated region body
PF: predicated region fallthrough
CT: control target
= control target key end

     0   :  { %s28_s0 = inlined_call_operand.vmem [shape: f32[128], index: 0, kind: input, shape index: {}]   ;;  %s29_s1 = inlined_call_operand.vmem [shape: f32[16,128], index: 1, kind: output, shape index: {}]  }
   0x1   :  { %v4_v0 = vld [vmem:[%s28_s0] ss:$0 sm:$0xff] }
   0x2   :  { %5 = vst [vmem:[%s29_s1] sm:$0xff] %v4_v0  ;;  %8 = vst [vmem:[%s29_s1 + $0x8] sm:$0xff] %v4_v0 }

// kernel: _generator_forward.10
= control target key start
LH: loop header
LB: loop body
LE: loop exit
PB: predicated region body
PF: predicated region fallthrough
CT: control target
= control target key end

     0   :  { %s558_s12 = smov 0   ;;  %s560_s13 = smov 0   ;;  %s603_s0 = inlined_call_operand.vmem [shape: bf16[2,2048], index: 0, kind: input, shape index: {}]   ;;  %s604_s1 = inlined_call_operand.vmem [shape: f32[1,2048], index: 1, kind: input, shape index: {}]   ;;  %s605_s2 = inlined_call_operand.vmem [shape: f32[1,2048], index: 2, kind: input, shape index: {}]   ;;  %s606_s3 = inlined_call_operand.vmem [shape: bf16[2,2048], index: 3, kind: output, shape index: {}]  }
   0x1   :  { %s562_s14 = smov 0  }
   0x2 LB: > { %s22_s15 = sadd.s32 1, %s530_s13  ;;  %p476_p0 = scmp.ge.s32.totalorder %s534_s14, 1  ;;  %s534_s14 = sphi %s562_s14, %s13_s14   ;;  %s530_s13 = sphi %s560_s13, %s608_s13   ;;  %s526_s12 = sphi %s558_s12, %s607_s12  }
   0x3   : > { %p23_p1 = scmp.ge.s32.totalorder %s22_s15, 4  ;;  %p177_p2 = scmp.lt.s32.totalorder %s534_s14, 5 }
   0x5   : > { %s610_s15 = smov (%p23_p1, %s22_s15), 0  ;;  %p178_p3 = pnand %p476_p0, %p177_p2 }
   0x6   : > { %s477_s16 = sshll.u32 (!%p178_p3), %s526_s12, 2 }
   0x7   : > { %181 = sbr.rel (%p178_p3) target bundleno = 45 (0x2d), region = 32  ;;  %p218_p4 = scmp.lt.s32.totalorder (!%p178_p3), %s477_s16, 15 }
   0xc   : > { %v247_v0 = vlaneseq  ;;  %v536_v1 = vmov 1983009808   ;;  %s612_s16 = smov (!%p218_p4, %s477_s16), 15  ;;  %v537_v33 = vmov 1966171168  }
   0xd   : > { %v266_v2 = vunpack.c.l.s4 %v536_v1  ;;  %s227_s19 = scalar_lea.vmem %s604_s1, %s612_s16  ;;  %s222_s22 = scalar_lea.vmem %s603_s0, %s612_s16  ;;  %v353_v34 = vunpack.c.l.s4 %v537_v33 }
   0xe   : > { %v248_v3 = vshrl.u32 %v247_v0, 7  ;;  %s232_s25 = scalar_lea.vmem %s605_s2, %s612_s16  ;;  %v245_v9 = vld [vmem:[%s227_s19] sm:$0xf]  ;;  %s241_s28 = scalar_lea.vmem %s606_s3, %s612_s16 }
   0xf   : > { %v267_v4 = vunpack.c.0.s8 %v266_v2  ;;  %v282_v14 = vld [vmem:[%s232_s25] sm:$0xf]  ;;  %v354_v37 = vunpack.c.0.s8 %v353_v34 }
  0x10   : > { %v249_v5 = vsub.s32 0, %v248_v3  ;;  %v253_v6 = vsub.s32 1, %v248_v3  ;;  %v257_v7 = vsub.s32 2, %v248_v3  ;;  %v261_v8 = vsub.s32 3, %v248_v3  ;;  %v243_v19 = vld [vmem:[%s222_s22] sm:$0xf] }
  0x11   : > { %v270_v13 = vsub.s32 %v267_v4, %v248_v3  ;;  %v244_v26 = vunpack.c.l.bf16 %v243_v19  ;;  %v357_v42 = vsub.s32 %v354_v37, %v248_v3 }
  0x12   : > { %v250_v10 = vrot.slane %v245_v9, %v249_v5  ;;  %v254_v11 = vrot.slane %v245_v9, %v253_v6  ;;  %v258_v12 = vrot.slane %v245_v9, %v257_v7  ;;  %v262_v15 = vrot.slane %v245_v9, %v261_v8 }
  0x13   : > { %v287_v16 = vrot.slane %v282_v14, %v249_v5  ;;  %v291_v17 = vrot.slane %v282_v14, %v253_v6  ;;  %v295_v18 = vrot.slane %v282_v14, %v257_v7  ;;  %v299_v21 = vrot.slane %v282_v14, %v261_v8 }
  0x14   : > { %v263_v20 = vcombine.low %v250_v10, %v254_v11  ;;  %v264_v22 = vcombine.low %v258_v12, %v262_v15 }
  0x15   : > { %v300_v23 = vcombine.low %v287_v16, %v291_v17  ;;  %v301_v25 = vcombine.low %v295_v18, %v299_v21 }
  0x16   : > { %v271_v24 = vrot.slane %v263_v20, %v270_v13  ;;  %v278_v27 = vrot.slane %v264_v22, %v270_v13 }
  0x17   : > { %v308_v28 = vrot.slane %v300_v23, %v270_v13  ;;  %v315_v29 = vrot.slane %v301_v25, %v270_v13 }
  0x18   : > { %v279_v30 = vcombine.low %v271_v24, %v278_v27 }
  0x19   : > { %v316_v31 = vcombine.low %v308_v28, %v315_v29 }
  0x1a   : > { %v281_v32 = vmul.f32 %v279_v30, %v244_v26 }
  0x1c   : > { %v318_v35 = vadd.f32 %v316_v31, %v281_v32 }
  0x1e   : > { %v319_v36 = vmax.f32 %v318_v35, 0.0 }
  0x20   : > { %v321_v38 = vcombine.high %v319_v36, %v319_v36  ;;  %v328_v39 = vrot.slane %v319_v36, %v270_v13 }
  0x22   : > { %v335_v40 = vrot.slane %v321_v38, %v270_v13  ;;  %v336_v41 = vcombine.high %v328_v39, %v328_v39 }
  0x24   : > { %v337_v43 = vcombine.high %v335_v40, %v335_v40  ;;  %v481_v44 = vpack.c.bf16 %v336_v41, %v328_v39 }
  0x26   : > { %v482_v45 = vpack.c.bf16 %v337_v43, %v335_v40  ;;  %v358_v46 = vrot.slane %v481_v44, %v357_v42 }
  0x28   : > { %v365_v47 = vrot.slane %v482_v45, %v357_v42 }
  0x2a   : > { %v366_v48 = vcombine.low %v358_v46, %v365_v47 }
  0x2c   : > { %483 = vst.sshfl [vmem:[%s241_s28] sm:$0x55 pattern:$0x73625140] %v366_v48 }
  0x2d PF: > { %s13_s14 = sadd.s32 1, %s534_s14   ;;  %s607_s12 = smov %s530_s13 }
  0x2e   : > { %p10_p5 = scmp.ge.s32.totalorder %s13_s14, 6   ;;  %s608_s13 = smov %s610_s15 }
  0x30   :  { %12 = sbr.rel (!%p10_p5) target bundleno = 2 (0x2), region = 68 }

// kernel: _generator_forward.9
= control target key start
LH: loop header
LB: loop body
LE: loop exit
PB: predicated region body
PF: predicated region fallthrough
CT: control target
= control target key end

     0   :  { %9 = vsyncpa [#allocation4], 0  ;;  %s1111_s0 = inlined_call_operand.vmem [shape: bf16[16,32], index: 0, kind: input, shape index: {}]   ;;  %s1112_s1 = inlined_call_operand.hbm [shape: bf16[32,2048], index: 1, kind: input, shape index: {}]   ;;  %s1113_s2 = inlined_call_operand.vmem [shape: bf16[16,2048], index: 2, kind: output, shape index: {0}]   ;;  %s1114_s3 = inlined_call_operand.vmem [shape: f32[1,2,2048], index: 3, kind: output, shape index: {1}]  }
   0x1   :  { %11 = vsyncpa [#allocation4 + $0x1], 0  ;;  %s986_s12 = smov 0   ;;  %s988_s13 = smov 0  }
   0x2   :  { %s990_s14 = smov 0   ;;  %s992_s15 = smov 0  }
   0x3   :  { %s994_s16 = smov 0   ;;  %s996_s17 = smov 0  }
   0x4 LB: > { %s768_s18 = sadd.s32 4294967295, %s958_s17   ;;  %s32_s19 = sadd.s32 1, %s954_s16  ;;  %s958_s17 = sphi %s996_s17, %s17_s17   ;;  %s954_s16 = sphi %s994_s16, %s1123_s16   ;;  %s950_s15 = sphi %s992_s15, %s1122_s15   ;;  %s946_s14 = sphi %s990_s14, %s1121_s14   ;;  %s942_s13 = sphi %s988_s13, %s1120_s13   ;;  %s938_s12 = sphi %s986_s12, %s1119_s12  }
   0x5   : > { %p34_p0 = scmp.ge.s32.totalorder %s32_s19, 4  ;;  %s73_s20 = sadd.s32 1, %s946_s14 }
   0x6   : > { %p80_p1 = scmp.ne.s32.totalorder %s946_s14, %s942_s13  ;;  %p81_p2 = scmp.eq.s32.totalorder %s958_s17, 0 }
   0x7   : > { %s1125_s19 = smov (%p34_p0, %s32_s19), 0  ;;  %p86_p4 = scmp.ne.s32.totalorder %s942_s13, %s938_s12 }
   0x8   : > { %p1022_p3 = por %p81_p2, %p80_p1  ;;  %s69_s22 = ssub.s32 %s954_s16, %s1125_s19 }
   0x9   : > { %p87_p5 = scmp.eq.s32.totalorder %s768_s18, 0  ;;  %p71_p6 = scmp.eq.s32.totalorder %s69_s22, 0 }
   0xa   : > { %p112_p7 = scmp.eq.s32.totalorder %s768_s18, 3  ;;  %p813_p10 = scmp.lt.s32.totalorder %s958_s17, 4 }
   0xb   : > { %p1029_p8 = por %p87_p5, %p86_p4  ;;  %s178_s26 = sand.u32 1, %s946_s14  }
   0xc   : > { %s1034_s24 = scalar_select %p71_p6, %s946_s14, %s73_s20  }
   0xd   : > { %p1036_p9 = por %p112_p7, %p80_p1  ;;  %s801_s27 = sshll.u32 %s954_s16, 8 }
   0xe   : > { %s773_s28 = sshll.u32 %s178_s26, 6  ;;  %s191_s4 = scalar_lea.hbm %s1112_s1, %s801_s27 }
   0xf   : > { %s182_s5 = scalar_lea.vmem [#allocation3], %s773_s28  ;;  %p1048_p11 = pnand %p813_p10, %p1022_p3 }
  0x10   : > { %s192_s6 = sshll.u32 %s182_s5, 4  ;;  %p776_p12 = scmp.ge.s32.totalorder %s958_s17, 1  ;;  %s193_s6 = int_to_ptr.vmem [resolvable:$true] %s192_s6 }
  0x11   : > { %s179_s8 = scalar_lea.sflag [#allocation4], %s178_s26  ;;  %p882_p13 = pneg %p1048_p11 }
  0x12   : > { %s893_s9 = scalar_lea.vmem %s193_s6, 1024  ;;  %s960_s10 = smov [#allocation3]  }
  0x13   : > { %p894_p0 = scmp.ne.s32.totalorder %s193_s6, %s893_s9  ;;  %s898_s11 = sshll.u32 %s960_s10, 4  ;;  %s899_s11 = int_to_ptr.vmem [resolvable:$false] %s898_s11 }
  0x14   : > { %s900_s12 = scalar_lea.vmem %s899_s11, 2048  ;;  %p901_p4 = scmp.lt.s32.totalorder %s193_s6, %s899_s11 }
  0x15   : > { %p896_p1 = pnand %p894_p0, %p882_p13  ;;  %p902_p5 = scmp.lt.s32.totalorder %s900_s12, %s893_s9 }
  0x17   : > { %p897_p2 = pneg %p896_p1  ;;  %p903_p3 = por %p902_p5, %p901_p4 }
  0x19   : > { %p904_p6 = pnand %p903_p3, %p897_p2 }
  0x1b   : > { %907 = shalt.err (!%p904_p6)
}
  0x1c   : > { %s961_s18 = smov 1024   ;;  %s962_s20 = smov 256  }
  0x1d   : > { %s963_s21 = smov 16   ;;  %p200_p7 = scmp.lt.s32.totalorder %s958_s17, 5 }
  0x1e   : > { %812 = dma.hbm_to_vmem [thread:$0]  (!%p1048_p11), %s191_s4, 1024, %s193_s6, %s179_s8, %s961_s18, %s962_s20, %s963_s21  }
  0x1f   : > { %p201_p10 = pnand %p776_p12, %p200_p7 }
  0x20   : > { %s1061_s22 = sand.u32 (!%p201_p10), 1, %s942_s13  }
  0x21   : > { %204 = sbr.rel (%p201_p10) target bundleno = 275 (0x113), region = 28  ;;  %s777_s26 = sshll.u32 (!%p201_p10), %s1061_s22, 6 }
  0x22   : > { %s207_s27 = scalar_lea.sflag (!%p201_p10), [#allocation4], %s1061_s22  ;;  %s210_s28 = scalar_lea.vmem (!%p201_p10), [#allocation3], %s777_s26 }
  0x26   : > { %933 = dma.done.wait (%p1029_p8), %s207_s27, 1024  }
  0x27   : > { %935 = vsyncadd (%p1029_p8), %s207_s27, 4294966272  ;;  %v964_v0 = vmov 0   ;;  %v867_v1 = vld [vmem:[%s210_s28 + $0x24] ss:$16 sps:$4 sm:$0xff]   ;;  %v869_v2 = vld [vmem:[%s210_s28 + $0x2c] ss:$16 sps:$4 sm:$0xff]  }
  0x28   : > { %384 = vmatprep.mubr.bf16.mxu0 %v964_v0  ;;  %427 = vmatprep.mubr.bf16.mxu1 %v964_v0  ;;  %v871_v3 = vld [vmem:[%s210_s28 + $0x20] ss:$16 sps:$4 sm:$0xff]   ;;  %v872_v4 = vld [vmem:[%s210_s28 + $0x28] ss:$16 sps:$4 sm:$0xff]   ;;  %v873_v5 = vld [vmem:[%s210_s28 + $0x4] ss:$16 sps:$4 sm:$0xff]   ;;  %v571_v0 = vlaneseq }
  0x29   : > { %364 = vmatprep.subr.bf16.mxu0 %v867_v1  ;;  %407 = vmatprep.subr.bf16.mxu1 %v869_v2  ;;  %v875_v6 = vld [vmem:[%s210_s28 + $0xc] ss:$16 sps:$4 sm:$0xff]   ;;  %v877_v7 = vld [vmem:[%s210_s28] ss:$16 sps:$4 sm:$0xff]   ;;  %v878_v8 = vld [vmem:[%s210_s28 + $0x8] ss:$16 sps:$4 sm:$0xff]  }
  0x2a   : > { %365 = vmatpush1.bf16.msra.mxu0 %v871_v3  ;;  %408 = vmatpush1.bf16.msra.mxu1 %v872_v4  ;;  %v879_v9 = vld [vmem:[%s1111_s0] sm:$0xff]   ;;  %vm348_vm0 = vcmask 261120   ;;  %s778_s30 = sshll.u32 %s1061_s22, 5  ;;  %v965_v55 = vmov 1983009808   ;;  %s779_s5 = sshll.u32 %s950_s15, 2 }
  0x2b   : > { %366 = vmatprep.subr.bf16.mxu0 %v873_v5  ;;  %409 = vmatprep.subr.bf16.mxu1 %v875_v6  ;;  %s1073_s4 = scalar_lea.vmem [#allocation5], %s778_s30  ;;  %v569_v56 = vunpack.c.l.s4 %v965_v55  ;;  %p265_p8 = scmp.lt.s32.totalorder %s779_s5, 15  ;;  %vm557_vm1 = vcmask 1040384  }
  0x2c   : > { %s806_s10 = sshll.u32 (%p1036_p9), %s950_s15, 4 }
  0x2d   : > { %s1127_s5 = smov (!%p265_p8, %s779_s5), 15  ;;  %s606_s18 = scalar_lea.vmem (%p1036_p9), %s1113_s2, %s806_s10 }
  0x2e   : > { %367 = vmatpush1.bf16.msra.mxu0 %v877_v7  ;;  %410 = vmatpush1.bf16.msra.mxu1 %v878_v8  ;;  %s780_s6 = sshll.u32 %s1127_s5, 1 }
  0x2f   : > { %s270_s9 = scalar_lea.vmem %s1114_s3, %s780_s6 }
  0x31   : > { %790 = vmatmul.mubr.msk.bf16.vlgmr.msra.gmra.mxu0 %vm348_vm0, %v879_v9  ;;  %791 = vmatmul.mubr.msk.bf16.vlgmr.msra.gmra.mxu1 %vm348_vm0, %v879_v9 }
  0xf1   : > { %v386_v10 = vpop.f32.mrf.mxu0  ;;  %v429_v11 = vpop.f32.mrf.mxu1 }
  0xf2   : > { %v521_v16 = vmul.f32 %v386_v10, %v386_v10  ;;  %v523_v17 = vmul.f32 %v429_v11, %v429_v11 }
  0xf3   : > { %v388_v12 = vpop.f32.mrf.mxu0  ;;  %v431_v13 = vpop.f32.mrf.mxu1 }
  0xf4   : > { %v802_v14 = vpack.c.bf16 %v388_v12, %v386_v10  ;;  %v803_v15 = vpack.c.bf16 %v431_v13, %v429_v11  ;;  %v522_v24 = vmul.f32 %v388_v12, %v388_v12  ;;  %v524_v25 = vmul.f32 %v431_v13, %v431_v13 }
  0xf5   : > { %v390_v18 = vpop.f32.mrf.mxu0  ;;  %v433_v19 = vpop.f32.mrf.mxu1 }
  0xf6   : > { %489 = vst [vmem:[%s1073_s4] sm:$0xff] %v802_v14  ;;  %490 = vst [vmem:[%s1073_s4 + $0x8] sm:$0xff] %v803_v15  ;;  %v493_v20 = vadd.f32 %v390_v18, %v386_v10  ;;  %v525_v21 = vmul.f32 %v390_v18, %v390_v18  ;;  %v507_v22 = vadd.f32 %v433_v19, %v429_v11  ;;  %v572_v14 = vshrl.u32 %v571_v0, 7 }
  0xf7   : > { %v527_v23 = vmul.f32 %v433_v19, %v433_v19  ;;  %v392_v26 = vpop.f32.mrf.mxu0  ;;  %v435_v27 = vpop.f32.mrf.mxu1 }
  0xf8   : > { %v494_v28 = vrot.slane %v493_v20, 4  ;;  %v529_v29 = vadd.f32 %v525_v21, %v521_v16  ;;  %v508_v30 = vrot.slane %v507_v22, 4  ;;  %v804_v32 = vpack.c.bf16 %v392_v26, %v390_v18 }
  0xf9   : > { %v543_v31 = vadd.f32 %v527_v23, %v523_v17  ;;  %v500_v33 = vadd.f32 %v392_v26, %v388_v12  ;;  %v526_v34 = vmul.f32 %v392_v26, %v392_v26  ;;  %v805_v35 = vpack.c.bf16 %v435_v27, %v433_v19 }
  0xfa   : > { %v495_v36 = vadd.f32 %v494_v28, %v493_v20  ;;  %v530_v37 = vrot.slane %v529_v29, 4  ;;  %v509_v38 = vadd.f32 %v508_v30, %v507_v22  ;;  %491 = vst [vmem:[%s1073_s4 + $0x10] sm:$0xff] %v804_v32  ;;  %v514_v42 = vadd.f32 %v435_v27, %v431_v13 }
  0xfb   : > { %v544_v39 = vrot.slane %v543_v31, 4  ;;  %v501_v40 = vrot.slane %v500_v33, 4  ;;  %v536_v41 = vadd.f32 %v526_v34, %v522_v24  ;;  %492 = vst [vmem:[%s1073_s4 + $0x18] sm:$0xff] %v805_v35  ;;  %v528_v43 = vmul.f32 %v435_v27, %v435_v27 }
  0xfc   : > { %v496_v44 = vrot.slane %v495_v36, 2  ;;  %v531_v45 = vadd.f32 %v530_v37, %v529_v29  ;;  %v510_v46 = vrot.slane %v509_v38, 2  ;;  %v515_v50 = vrot.slane %v514_v42, 4 }
  0xfd   : > { %v545_v47 = vadd.f32 %v544_v39, %v543_v31  ;;  %v502_v48 = vadd.f32 %v501_v40, %v500_v33  ;;  %v537_v49 = vrot.slane %v536_v41, 4  ;;  %v550_v51 = vadd.f32 %v528_v43, %v524_v25  ;;  %v619_v37 = vld [vmem:[%s1073_s4] sm:$0xff] (%p1036_p9) }
  0xfe   : > { %v497_v52 = vadd.f32 %v496_v44, %v495_v36  ;;  %v532_v53 = vrot.slane %v531_v45, 2  ;;  %v516_v59 = vadd.f32 %v515_v50, %v514_v42  ;;  %v511_v62 = vadd.f32 %v510_v46, %v509_v38  ;;  %v621_v38 = vld [vmem:[%s1073_s4 + $0x8] sm:$0xff] (%p1036_p9)  ;;  %620 = vst [vmem:[%s606_s18] sm:$0xff] (%p1036_p9), %v619_v37 }
  0xff   : > { %v546_v54 = vrot.slane %v545_v47, 2  ;;  %v503_v57 = vrot.slane %v502_v48, 2  ;;  %v538_v58 = vadd.f32 %v537_v49, %v536_v41  ;;  %v551_v60 = vrot.slane %v550_v51, 4  ;;  %622 = vst [vmem:[%s606_s18 + $0x8] sm:$0xff] (%p1036_p9), %v621_v38 }
 0x100   : > { %v533_v61 = vadd.f32 %v532_v53, %v531_v45  ;;  %v517_v3 = vrot.slane %v516_v59, 2  ;;  %v498_v5 = vrot.slane %v497_v52, 1  ;;  %v512_v12 = vrot.slane %v511_v62, 1 }
 0x101   : > { %v547_v63 = vadd.f32 %v546_v54, %v545_v47  ;;  %v504_v1 = vadd.f32 %v503_v57, %v502_v48  ;;  %v539_v2 = vrot.slane %v538_v58, 2  ;;  %v552_v4 = vadd.f32 %v551_v60, %v550_v51  ;;  %v623_v39 = vld [vmem:[%s1073_s4 + $0x10] sm:$0xff] (%p1036_p9) }
 0x102   : > { %v534_v6 = vrot.slane %v533_v61, 1  ;;  %v518_v10 = vadd.f32 %v517_v3, %v516_v59  ;;  %v570_v13 = vunpack.c.0.s8 %v569_v56  ;;  %v499_v19 = vadd.f32 %v498_v5, %v497_v52  ;;  %v625_v40 = vld [vmem:[%s1073_s4 + $0x18] sm:$0xff] (%p1036_p9)  ;;  %624 = vst [vmem:[%s606_s18 + $0x40] sm:$0xff] (%p1036_p9), %v623_v39 }
 0x103   : > { %v548_v7 = vrot.slane %v547_v63, 1  ;;  %v505_v8 = vrot.slane %v504_v1, 1  ;;  %v540_v9 = vadd.f32 %v539_v2, %v538_v58  ;;  %v553_v11 = vrot.slane %v552_v4, 2  ;;  %626 = vst [vmem:[%s606_s18 + $0x48] sm:$0xff] (%p1036_p9), %v625_v40 }
 0x104   : > { %v535_v15 = vadd.f32 %v534_v6, %v533_v61  ;;  %v519_v17 = vrot.slane %v518_v10, 1  ;;  %v513_v24 = vadd.f32 %v512_v12, %v511_v62  ;;  %v573_v25 = vsub.s32 %v570_v13, %v572_v14 }
 0x105   : > { %v541_v16 = vrot.slane %v540_v9, 1  ;;  %v554_v18 = vadd.f32 %v553_v11, %v552_v4  ;;  %v549_v20 = vadd.f32 %v548_v7, %v547_v63  ;;  %v506_v21 = vadd.f32 %v505_v8, %v504_v1 }
 0x106   : > { %v558_v26 = vsel %vm557_vm1, %v499_v19, %v535_v15  ;;  %v520_v28 = vadd.f32 %v519_v17, %v518_v10 }
 0x107   : > { %v542_v22 = vadd.f32 %v541_v16, %v540_v9  ;;  %v555_v23 = vrot.slane %v554_v18, 1  ;;  %v560_v31 = vsel %vm557_vm1, %v513_v24, %v549_v20 }
 0x109   : > { %v559_v27 = vsel %vm557_vm1, %v506_v21, %v542_v22  ;;  %v556_v29 = vadd.f32 %v555_v23, %v554_v18 }
 0x10a   : > { %v566_v30 = vcombine.low %v558_v26, %v559_v27 }
 0x10b   : > { %v561_v32 = vsel %vm557_vm1, %v520_v28, %v556_v29 }
 0x10c   : > { %v574_v33 = vrot.slane %v566_v30, %v573_v25  ;;  %v567_v34 = vcombine.low %v560_v31, %v561_v32 }
 0x10e   : > { %v581_v35 = vrot.slane %v567_v34, %v573_v25  ;;  %600 = sbr.rel (!%p1036_p9) target bundleno = 275 (0x113), region = 44 }
 0x110   : > { %v582_v36 = vcombine.low %v574_v33, %v581_v35 }
 0x112   : > { %584 = vst [vmem:[%s270_s9] sm:$0xff] %v582_v36 }
 0x113 PF: > { %s17_s17 = sadd.s32 1, %s958_s17   ;;  %s1119_s12 = smov %s942_s13 }
 0x114   : > { %p14_p9 = scmp.ge.s32.totalorder %s17_s17, 6   ;;  %s1120_s13 = smov %s946_s14 }
 0x115   : > { %s1121_s14 = smov %s1034_s24  ;;  %s1122_s15 = smov %s954_s16 }
 0x116   : > { %s1123_s16 = smov %s1125_s19  ;;  %16 = sbr.rel (!%p14_p9) target bundleno = 4 (0x4), region = 114 }
 0x11b   :  { %658 = vsyncpa [#allocation4], 1 }
 0x11c   :  { %660 = vsyncpa [#allocation4 + $0x1], 1 }

// kernel: tile.53
= control target key start
LH: loop header
LB: loop body
LE: loop exit
PB: predicated region body
PF: predicated region fallthrough
CT: control target
= control target key end

     0   :  { %s22_s0 = inlined_call_operand.vmem [shape: f32[64], index: 0, kind: input, shape index: {}]   ;;  %s23_s1 = inlined_call_operand.vmem [shape: f32[4,64], index: 1, kind: output, shape index: {}]  }
   0x1   :  { %v4_v0 = vld [vmem:[%s22_s0] ss:$0 sm:$0xff] }
   0x2   :  { %5 = vst [vmem:[%s23_s1] sm:$0xf] %v4_v0 }

// kernel: tile.58
= control target key start
LH: loop header
LB: loop body
LE: loop exit
PB: predicated region body
PF: predicated region fallthrough
CT: control target
= control target key end

     0   :  { %s7_s8 = smov 3  ;;  %vm9_vm0 = vcmask 523264   ;;  %s34_s9 = smov 64   ;;  %vm16_vm1 = vcmask 1048064   ;;  %s54_s0 = inlined_call_operand.vmem [shape: f32[4,64], index: 0, kind: input, shape index: {}]   ;;  %s55_s1 = inlined_call_operand.vmem [shape: f32[1,256], index: 1, kind: output, shape index: {}]  }
   0x1   :  { %v5_v0 = vld [vmem:[%s54_s0] sm:$0xf]  ;;  %s12_s0 = smov 3 }
   0x2   :  { %6 = vst [vmem:[#allocation1] sm:$0xf] %v5_v0 }
   0x9   :  { %v13_v1 = vld [vmem:[#allocation1 + $0x1] ss:$2 sm:%s12_s0]   ;;  %v8_v2 = vld [vmem:[#allocation1] ss:$2 sm:%s7_s8]  }
   0xa   :  { %14 = vrot.lane.b32.xlu0 %v13_v1, %s34_s9  ;;  %10 = vst.msk [vmem:[#allocation0] ss:$8 sm:$0x3] %vm9_vm0, %v8_v2  }
  0x7c   :  { %v15_v3 = vpop.permute.xlu0 %14  }
  0x7d   :  { %17 = vst.msk [vmem:[#allocation0] ss:$8 sm:$0x3] %vm16_vm1, %v15_v3  }
  0x84   :  { %v22_v4 = vld [vmem:[#allocation0] sm:$0x1]  ;;  %v27_v5 = vld [vmem:[#allocation0 + $0x8] sm:$0x1] }
  0x85   :  { %25 = vst [vmem:[%s55_s1] sm:$0x1] %v22_v4  ;;  %32 = vst [vmem:[%s55_s1 + $0x1] sm:$0x1] %v27_v5 }

// kernel: _generator_forward.12
= control target key start
LH: loop header
LB: loop body
LE: loop exit
PB: predicated region body
PF: predicated region fallthrough
CT: control target
= control target key end

     0   :  { %v28_v0 = vlaneseq  ;;  %s164_s0 = inlined_call_operand.vmem [shape: bf16[32,256], index: 0, kind: input, shape index: {}]   ;;  %s165_s1 = inlined_call_operand.vmem [shape: f32[1,256], index: 1, kind: input, shape index: {}]   ;;  %s166_s2 = inlined_call_operand.vmem [shape: f32[1,256], index: 2, kind: input, shape index: {}]   ;;  %s167_s3 = inlined_call_operand.vmem [shape: bf16[32,256], index: 3, kind: output, shape index: {}]  }
   0x1   :  { %v14_v1 = vld [vmem:[%s164_s0] sm:$0xff]  ;;  %v15_v3 = vld [vmem:[%s164_s0 + $0x8] sm:$0xff]  ;;  %v16_v4 = vld [vmem:[%s164_s0 + $0x10] sm:$0xff] }
   0x2   :  { %v29_v2 = vshrl.u32 %v28_v0, 7  ;;  %v17_v5 = vld [vmem:[%s164_s0 + $0x18] sm:$0xff]  ;;  %v18_v6 = vunpack.c.l.bf16 %v14_v1  ;;  %v19_v7 = vunpack.c.h.bf16 %v14_v1  ;;  %v26_v8 = vld [vmem:[%s165_s1] sm:$0x3]  ;;  %v20_v12 = vunpack.c.l.bf16 %v15_v3 }
   0x3   :  { %v46_v9 = vld [vmem:[%s166_s2] sm:$0x3]  ;;  %v21_v13 = vunpack.c.h.bf16 %v15_v3  ;;  %v22_v14 = vunpack.c.l.bf16 %v16_v4  ;;  %v23_v15 = vunpack.c.h.bf16 %v16_v4  ;;  %v24_v16 = vunpack.c.l.bf16 %v17_v5 }
   0x4   :  { %v30_v10 = vsub.s32 0, %v29_v2  ;;  %v34_v11 = vsub.s32 1, %v29_v2  ;;  %v25_v17 = vunpack.c.h.bf16 %v17_v5 }
   0x6   :  { %v31_v18 = vrot.slane %v26_v8, %v30_v10  ;;  %v35_v19 = vrot.slane %v26_v8, %v34_v11  ;;  %v51_v20 = vrot.slane %v46_v9, %v30_v10  ;;  %v55_v21 = vrot.slane %v46_v9, %v34_v11 }
   0x8   :  { %v38_v22 = vmul.f32 %v31_v18, %v18_v6  ;;  %v39_v23 = vmul.f32 %v35_v19, %v19_v7  ;;  %v40_v24 = vmul.f32 %v31_v18, %v20_v12  ;;  %v41_v25 = vmul.f32 %v35_v19, %v21_v13 }
   0x9   :  { %v42_v26 = vmul.f32 %v31_v18, %v22_v14  ;;  %v43_v27 = vmul.f32 %v35_v19, %v23_v15  ;;  %v44_v28 = vmul.f32 %v31_v18, %v24_v16  ;;  %v45_v29 = vmul.f32 %v35_v19, %v25_v17 }
   0xa   :  { %v58_v30 = vadd.f32 %v51_v20, %v38_v22  ;;  %v59_v31 = vadd.f32 %v55_v21, %v39_v23  ;;  %v60_v32 = vadd.f32 %v51_v20, %v40_v24  ;;  %v61_v33 = vadd.f32 %v55_v21, %v41_v25 }
   0xb   :  { %v62_v34 = vadd.f32 %v51_v20, %v42_v26  ;;  %v63_v35 = vadd.f32 %v55_v21, %v43_v27  ;;  %v64_v36 = vadd.f32 %v51_v20, %v44_v28  ;;  %v65_v37 = vadd.f32 %v55_v21, %v45_v29 }
   0xc   :  { %v66_v38 = vmax.f32 %v58_v30, 0.0  ;;  %v67_v39 = vmax.f32 %v59_v31, 0.0  ;;  %v68_v40 = vmax.f32 %v60_v32, 0.0  ;;  %v69_v41 = vmax.f32 %v61_v33, 0.0 }
   0xd   :  { %v70_v42 = vmax.f32 %v62_v34, 0.0  ;;  %v71_v43 = vmax.f32 %v63_v35, 0.0  ;;  %v72_v44 = vmax.f32 %v64_v36, 0.0  ;;  %v73_v45 = vmax.f32 %v65_v37, 0.0 }
   0xe   :  { %v110_v46 = vpack.c.bf16 %v67_v39, %v66_v38  ;;  %v111_v47 = vpack.c.bf16 %v69_v41, %v68_v40 }
   0xf   :  { %v112_v48 = vpack.c.bf16 %v71_v43, %v70_v42  ;;  %v113_v49 = vpack.c.bf16 %v73_v45, %v72_v44 }
  0x10   :  { %98 = vst [vmem:[%s167_s3] sm:$0xff] %v110_v46  ;;  %99 = vst [vmem:[%s167_s3 + $0x8] sm:$0xff] %v111_v47 }
  0x11   :  { %100 = vst [vmem:[%s167_s3 + $0x10] sm:$0xff] %v112_v48  ;;  %101 = vst [vmem:[%s167_s3 + $0x18] sm:$0xff] %v113_v49 }

// kernel: _generator_forward.11
= control target key start
LH: loop header
LB: loop body
LE: loop exit
PB: predicated region body
PF: predicated region fallthrough
CT: control target
= control target key end

     0   :  { %9 = vsyncpa [#allocation5], 0  ;;  %s1566_s0 = inlined_call_operand.vmem [shape: bf16[32,1152], index: 0, kind: input, shape index: {}]   ;;  %s1567_s1 = inlined_call_operand.hbm [shape: bf16[1152,256], index: 1, kind: input, shape index: {}]   ;;  %s1568_s2 = inlined_call_operand.vmem [shape: bf16[32,256], index: 2, kind: output, shape index: {0}]   ;;  %s1569_s3 = inlined_call_operand.vmem [shape: f32[1,2,256], index: 3, kind: output, shape index: {1}]  }
   0x1   :  { %11 = vsyncpa [#allocation5 + $0x1], 0  ;;  %s1397_s12 = smov 0   ;;  %s1399_s13 = smov 0  }
   0x2   :  { %s1401_s14 = smov 0   ;;  %s1403_s15 = smov 0  }
   0x3   :  { %s1405_s16 = smov 0   ;;  %s1407_s17 = smov 0  }
   0x4 LB: > { %s1066_s18 = sadd.s32 4294967295, %s1370_s17   ;;  %s29_s19 = sadd.s32 1, %s1366_s16  ;;  %s1370_s17 = sphi %s1407_s17, %s17_s17   ;;  %s1366_s16 = sphi %s1405_s16, %s1576_s16   ;;  %s1362_s15 = sphi %s1403_s15, %s1575_s15   ;;  %s1358_s14 = sphi %s1401_s14, %s1574_s14   ;;  %s1354_s13 = sphi %s1399_s13, %s1573_s13   ;;  %s1350_s12 = sphi %s1397_s12, %s1572_s12  }
   0x5   : > { %p30_p0 = scmp.ge.s32.totalorder %s29_s19, 3  ;;  %s45_s20 = sadd.s32 1, %s1358_s14 }
   0x6   : > { %p52_p1 = scmp.ne.s32.totalorder %s1358_s14, %s1354_s13  ;;  %p53_p2 = scmp.eq.s32.totalorder %s1370_s17, 0 }
   0x7   : > { %s1578_s19 = smov (%p30_p0, %s29_s19), 0  ;;  %p86_p4 = scmp.ne.s32.totalorder %s1354_s13, %s1350_s12 }
   0x8   : > { %p1433_p3 = por %p53_p2, %p52_p1  ;;  %s41_s22 = ssub.s32 %s1366_s16, %s1578_s19 }
   0x9   : > { %p87_p5 = scmp.eq.s32.totalorder %s1066_s18, 0  ;;  %p43_p6 = scmp.eq.s32.totalorder %s41_s22, 0 }
   0xa   : > { %p1068_p8 = scmp.ge.s32.totalorder %s1370_s17, 3 }
   0xb   : > { %p1440_p7 = por %p87_p5, %p86_p4 }
   0xc   : > { %s1445_s24 = scalar_select %p43_p6, %s1358_s14, %s45_s20  }
   0xd   : > { %162 = sbr.rel (%p1068_p8) target bundleno = 44 (0x2c), region = 16 }
  0x12   : > { %165 = sbr.rel (!%p1433_p3) target bundleno = 27 (0x1b), region = 20  ;;  %s167_s25 = sand.u32 (%p1433_p3), 1, %s1358_s14  }
  0x13   : > { %s1148_s26 = smul.u32 (%p1433_p3), 12, %s1366_s16 }
  0x14   : > { %s1156_s27 = smul.u32 (%p1433_p3), 48, %s167_s25 }
  0x15   : > { %s175_s30 = scalar_lea.vmem (%p1433_p3), %s1566_s0, %s1148_s26 }
  0x16   : > { %v190_v0 = vld [vmem:[%s175_s30] sm:$0xff] (%p1433_p3)  ;;  %v194_v2 = vld [vmem:[%s175_s30 + $0x48] sm:$0xff] (%p1433_p3)  ;;  %s169_s4 = scalar_lea.vmem (%p1433_p3), [#allocation3], %s1156_s27  ;;  %v1074_v6 = vld [vmem:[%s175_s30 + $0x50] sm:$0xf] (%p1433_p3) }
  0x17   : > { %v192_v1 = vld [vmem:[%s175_s30 + $0x24] sm:$0xff]  ;;  %191 = vst [vmem:[%s169_s4] sm:$0xff] %v190_v0  ;;  %195 = vst [vmem:[%s169_s4 + $0x18] sm:$0xff] %v194_v2  ;;  %v196_v3 = vld [vmem:[%s175_s30 + $0x6c] sm:$0xff] }
  0x18   : > { %193 = vst [vmem:[%s169_s4 + $0xc] sm:$0xff] %v192_v1  ;;  %v1070_v4 = vld [vmem:[%s175_s30 + $0x8] sm:$0xf]  ;;  %v1072_v5 = vld [vmem:[%s175_s30 + $0x2c] sm:$0xf]  ;;  %197 = vst [vmem:[%s169_s4 + $0x24] sm:$0xff] %v196_v3 }
  0x19   : > { %1071 = vst [vmem:[%s169_s4 + $0x8] sm:$0xf] %v1070_v4  ;;  %1073 = vst [vmem:[%s169_s4 + $0x14] sm:$0xf] %v1072_v5  ;;  %v1076_v7 = vld [vmem:[%s175_s30 + $0x74] sm:$0xf] }
  0x1a   : > { %1075 = vst [vmem:[%s169_s4 + $0x20] sm:$0xf] %v1074_v6  ;;  %1077 = vst [vmem:[%s169_s4 + $0x2c] sm:$0xf] %v1076_v7 }
  0x1b PF: > { %s220_s5 = sand.u32 1, %s1358_s14   ;;  %s1155_s6 = smul.u32 6144, %s1366_s16 }
  0x1c   : > { %s1157_s7 = smul.u32 384, %s220_s5  ;;  %s221_s18 = scalar_lea.sflag [#allocation5], %s220_s5 }
  0x1d   : > { %s233_s10 = scalar_lea.hbm %s1567_s1, %s1155_s6  ;;  %s1372_s22 = smov [#allocation4]  }
  0x1e   : > { %s224_s11 = scalar_lea.vmem [#allocation4], %s1157_s7  ;;  %s1310_s25 = sshll.u32 %s1372_s22, 4  ;;  %s1311_s25 = int_to_ptr.vmem [resolvable:$false] %s1310_s25 }
  0x1f   : > { %s234_s12 = sshll.u32 %s224_s11, 4  ;;  %s1312_s26 = scalar_lea.vmem %s1311_s25, 12288  ;;  %s235_s12 = int_to_ptr.vmem [resolvable:$true] %s234_s12 }
  0x20   : > { %s1306_s20 = scalar_lea.vmem %s235_s12, 6144  ;;  %p1313_p12 = scmp.lt.s32.totalorder %s235_s12, %s1311_s25 }
  0x21   : > { %p1307_p9 = scmp.ne.s32.totalorder %s235_s12, %s1306_s20  ;;  %p1314_p13 = scmp.lt.s32.totalorder %s1312_s26, %s1306_s20 }
  0x23   : > { %p1308_p10 = pnand %p1307_p9, %p1433_p3  ;;  %p1315_p0 = por %p1314_p13, %p1313_p12 }
  0x25   : > { %p1309_p11 = pneg %p1308_p10 }
  0x27   : > { %p1316_p1 = pnand %p1315_p0, %p1309_p11 }
  0x29   : > { %1319 = shalt.err (!%p1316_p1)
}
  0x2a   : > { %s1373_s27 = smov 128   ;;  %s1374_s28 = smov 8  }
  0x2b   : > { %1160 = dma.hbm_to_vmem [thread:$0]  (%p1433_p3), %s233_s10, 6144, %s235_s12, %s221_s18, %s1373_s27, %s1373_s27, %s1374_s28  }
  0x2c PF: > { %p1080_p2 = scmp.ge.s32.totalorder %s1370_s17, 1  ;;  %p242_p4 = scmp.lt.s32.totalorder %s1370_s17, 4 }
  0x2e   : > { %p243_p5 = pnand %p1080_p2, %p242_p4 }
  0x2f   : > { %s249_s29 = sand.u32 (!%p243_p5), 1, %s1354_s13  }
  0x30   : > { %246 = sbr.rel (%p243_p5) target bundleno = 370 (0x172), region = 50  ;;  %s256_s6 = scalar_lea.sflag (!%p243_p5), [#allocation5], %s249_s29 }
  0x31   : > { %s1158_s30 = smul.u32 (!%p243_p5), 48, %s249_s29 }
  0x32   : > { %s1159_s4 = smul.u32 (!%p243_p5), 384, %s249_s29 }
  0x33   : > { %s1467_s5 = scalar_lea.vmem (!%p243_p5), [#allocation3], %s1158_s30 }
  0x34   : > { %s1469_s7 = scalar_lea.vmem (!%p243_p5), [#allocation4], %s1159_s4 }
  0x35   : > { %1345 = dma.done.wait (%p1440_p7), %s256_s6, 6144  }
  0x36   : > { %1347 = vsyncadd (%p1440_p7), %s256_s6, 4294961152  ;;  %p1081_p3 = scmp.ne.s32.totalorder %s1362_s15, 0 }
  0x38   : > { %330 = sbr.rel (%p1081_p3) target bundleno = 66 (0x42), region = 62 }
  0x3d   : > { %v1375_v8 = vmov 0.0  }
  0x3e   : > { %331 = vst [vmem:[#allocation2 + $0x30] sm:$0xff] %v1375_v8  ;;  %332 = vst [vmem:[#allocation2] sm:$0xff] %v1375_v8 }
  0x3f   : > { %333 = vst [vmem:[#allocation2 + $0x18] sm:$0xff] %v1375_v8  ;;  %334 = vst [vmem:[#allocation2 + $0x10] sm:$0xff] %v1375_v8 }
  0x40   : > { %335 = vst [vmem:[#allocation2 + $0x8] sm:$0xff] %v1375_v8  ;;  %336 = vst [vmem:[#allocation2 + $0x20] sm:$0xff] %v1375_v8 }
  0x41   : > { %337 = vst [vmem:[#allocation2 + $0x28] sm:$0xff] %v1375_v8  ;;  %338 = vst [vmem:[#allocation2 + $0x38] sm:$0xff] %v1375_v8 }
  0x42 PF: > { %v1214_v9 = vld [vmem:[%s1469_s7 + $0x74] ss:$8 sps:$4 sm:$0xff]   ;;  %v1216_v10 = vld [vmem:[%s1469_s7 + $0x70] ss:$8 sps:$4 sm:$0xff]   ;;  %v1376_v11 = vmov 0   ;;  %p1136_p6 = scmp.ne.s32.totalorder %s1362_s15, 2 }
  0x43   : > { %760 = vmatprep.mubr.bf16.mxu1 %v1376_v11  ;;  %675 = vmatprep.subr.bf16.mxu0 %v1214_v9  ;;  %v1217_v12 = vld [vmem:[%s1469_s7 + $0x64] ss:$8 sps:$4 sm:$0xff]   ;;  %v1219_v13 = vld [vmem:[%s1469_s7 + $0x60] ss:$8 sps:$4 sm:$0xff]   ;;  %v1220_v14 = vld [vmem:[%s1469_s7 + $0x54] ss:$8 sps:$4 sm:$0xff]  }
  0x44   : > { %676 = vmatpush1.bf16.msra.mxu0 %v1216_v10  ;;  %v1222_v15 = vld [vmem:[%s1469_s7 + $0x50] ss:$8 sps:$4 sm:$0xff]   ;;  %v1223_v16 = vld [vmem:[%s1469_s7 + $0x44] ss:$8 sps:$4 sm:$0xff]   ;;  %v1235_v17 = vld [vmem:[%s1469_s7 + $0x174] ss:$8 sps:$4 sm:$0xff]  }
  0x45   : > { %677 = vmatprep.subr.bf16.mxu0 %v1217_v12  ;;  %v1237_v18 = vld [vmem:[%s1469_s7 + $0x170] ss:$8 sps:$4 sm:$0xff]   ;;  %v1225_v19 = vld [vmem:[%s1469_s7 + $0x40] ss:$8 sps:$4 sm:$0xff]   ;;  %v1226_v20 = vld [vmem:[%s1469_s7 + $0x34] ss:$8 sps:$4 sm:$0xff]   ;;  %728 = vmatprep.subr.bf16.mxu1 %v1235_v17 }
  0x46   : > { %v1241_v21 = vld [vmem:[%s1469_s7 + $0x164] ss:$8 sps:$4 sm:$0xff]   ;;  %729 = vmatpush1.bf16.msra.mxu1 %v1237_v18  ;;  %v1243_v22 = vld [vmem:[%s1469_s7 + $0x160] ss:$8 sps:$4 sm:$0xff]   ;;  %v1228_v23 = vld [vmem:[%s1469_s7 + $0x30] ss:$8 sps:$4 sm:$0xff]  }
  0x47   : > { %730 = vmatprep.subr.bf16.mxu1 %v1241_v21  ;;  %v1247_v24 = vld [vmem:[%s1469_s7 + $0x154] ss:$8 sps:$4 sm:$0xff]   ;;  %v1229_v25 = vld [vmem:[%s1469_s7 + $0x24] ss:$8 sps:$4 sm:$0xff]   ;;  %v1249_v26 = vld [vmem:[%s1469_s7 + $0x150] ss:$8 sps:$4 sm:$0xff]  }
  0x48   : > { %678 = vmatpush1.bf16.msra.mxu0 %v1219_v13  ;;  %v1253_v27 = vld [vmem:[%s1469_s7 + $0x144] ss:$8 sps:$4 sm:$0xff]   ;;  %v1231_v28 = vld [vmem:[%s1469_s7 + $0x20] ss:$8 sps:$4 sm:$0xff]   ;;  %v1232_v29 = vld [vmem:[%s1469_s7 + $0x14] ss:$8 sps:$4 sm:$0xff]  }
  0x49   : > { %679 = vmatprep.subr.bf16.mxu0 %v1220_v14  ;;  %v1255_v30 = vld [vmem:[%s1469_s7 + $0x140] ss:$8 sps:$4 sm:$0xff]   ;;  %v1259_v31 = vld [vmem:[%s1469_s7 + $0x134] ss:$8 sps:$4 sm:$0xff]   ;;  %v1234_v32 = vld [vmem:[%s1469_s7 + $0x10] ss:$8 sps:$4 sm:$0xff]  }
  0x4a   : > { %731 = vmatpush1.bf16.msra.mxu1 %v1243_v22  ;;  %v1238_v33 = vld [vmem:[%s1469_s7 + $0x4] ss:$8 sps:$4 sm:$0xff]   ;;  %v1261_v34 = vld [vmem:[%s1469_s7 + $0x130] ss:$8 sps:$4 sm:$0xff]   ;;  %v1240_v36 = vld [vmem:[%s1469_s7] ss:$8 sps:$4 sm:$0xff]  }
  0x4b   : > { %732 = vmatprep.subr.bf16.mxu1 %v1247_v24  ;;  %v1265_v35 = vld [vmem:[%s1469_s7 + $0x124] ss:$8 sps:$4 sm:$0xff]   ;;  %v1244_v37 = vld [vmem:[%s1469_s7 + $0xf4] ss:$8 sps:$4 sm:$0xff]   ;;  %v1267_v38 = vld [vmem:[%s1469_s7 + $0x120] ss:$8 sps:$4 sm:$0xff]  }
  0x4c   : > { %680 = vmatpush1.bf16.msra.mxu0 %v1222_v15  ;;  %v1271_v39 = vld [vmem:[%s1469_s7 + $0x114] ss:$8 sps:$4 sm:$0xff]   ;;  %v1246_v40 = vld [vmem:[%s1469_s7 + $0xf0] ss:$8 sps:$4 sm:$0xff]   ;;  %v1250_v41 = vld [vmem:[%s1469_s7 + $0xe4] ss:$8 sps:$4 sm:$0xff]  }
  0x4d   : > { %681 = vmatprep.subr.bf16.mxu0 %v1223_v16  ;;  %v1273_v42 = vld [vmem:[%s1469_s7 + $0x110] ss:$8 sps:$4 sm:$0xff]   ;;  %v1277_v43 = vld [vmem:[%s1469_s7 + $0x104] ss:$8 sps:$4 sm:$0xff]   ;;  %v1252_v45 = vld [vmem:[%s1469_s7 + $0xe0] ss:$8 sps:$4 sm:$0xff]  }
  0x4e   : > { %733 = vmatpush1.bf16.msra.mxu1 %v1249_v26  ;;  %v1289_v44 = vld [vmem:[%s1467_s5 + $0x4] ss:$12 sps:$4 sm:$0xff]   ;;  %v1283_v50 = vld [vmem:[%s1467_s5 + $0x8] ss:$12 sps:$4 sm:$0xff]   ;;  %v1290_v55 = vld [vmem:[%s1467_s5 + $0x20] ss:$12 sps:$4 sm:$0xff]  }
  0x4f   : > { %734 = vmatprep.subr.bf16.mxu1 %v1253_v27  ;;  %v1256_v46 = vld [vmem:[%s1469_s7 + $0xd4] ss:$8 sps:$4 sm:$0xff]   ;;  %707 = vmatprep.mubr.bf16.mxu0 %v1289_v44  ;;  %v1279_v47 = vld [vmem:[%s1469_s7 + $0x100] ss:$8 sps:$4 sm:$0xff]   ;;  %v1258_v48 = vld [vmem:[%s1469_s7 + $0xd0] ss:$8 sps:$4 sm:$0xff]  }
  0x50   : > { %682 = vmatpush1.bf16.msra.mxu0 %v1225_v19  ;;  %v1262_v49 = vld [vmem:[%s1469_s7 + $0xc4] ss:$8 sps:$4 sm:$0xff]   ;;  %v1264_v51 = vld [vmem:[%s1469_s7 + $0xc0] ss:$8 sps:$4 sm:$0xff]   ;;  %v1268_v52 = vld [vmem:[%s1469_s7 + $0xb4] ss:$8 sps:$4 sm:$0xff]  }
  0x51   : > { %683 = vmatprep.subr.bf16.mxu0 %v1226_v20  ;;  %v1270_v53 = vld [vmem:[%s1469_s7 + $0xb0] ss:$8 sps:$4 sm:$0xff]   ;;  %v1274_v54 = vld [vmem:[%s1469_s7 + $0xa4] ss:$8 sps:$4 sm:$0xff]   ;;  %v1276_v56 = vld [vmem:[%s1469_s7 + $0xa0] ss:$8 sps:$4 sm:$0xff]  }
  0x52   : > { %735 = vmatpush1.bf16.msra.mxu1 %v1255_v30  ;;  %v1280_v57 = vld [vmem:[%s1469_s7 + $0x94] ss:$8 sps:$4 sm:$0xff]   ;;  %v1282_v58 = vld [vmem:[%s1469_s7 + $0x90] ss:$8 sps:$4 sm:$0xff]   ;;  %v1284_v59 = vld [vmem:[%s1469_s7 + $0x84] ss:$8 sps:$4 sm:$0xff]  }
  0x53   : > { %736 = vmatprep.subr.bf16.mxu1 %v1259_v31  ;;  %v1286_v60 = vld [vmem:[%s1469_s7 + $0x80] ss:$8 sps:$4 sm:$0xff]   ;;  %v339_v4 = vld [vmem:[#allocation2 + $0x30] sm:$0xff]  ;;  %v341_v12 = vld [vmem:[#allocation2 + $0x18] sm:$0xff] }
  0x54   : > { %684 = vmatpush1.bf16.msra.mxu0 %v1228_v23  ;;  %v1287_v61 = vld [vmem:[%s1467_s5] ss:$12 sps:$4 sm:$0xff]   ;;  %v1291_v62 = vld [vmem:[%s1467_s5 + $0x1c] ss:$12 sps:$4 sm:$0xff]   ;;  %v1293_v63 = vld [vmem:[%s1467_s5 + $0x18] ss:$12 sps:$4 sm:$0xff]  }
  0x55   : > { %685 = vmatprep.subr.bf16.mxu0 %v1229_v25  ;;  %v340_v7 = vld [vmem:[#allocation2] sm:$0xff]  ;;  %v342_v17 = vld [vmem:[#allocation2 + $0x10] sm:$0xff]  ;;  %v343_v21 = vld [vmem:[#allocation2 + $0x8] sm:$0xff] }
  0x56   : > { %737 = vmatpush1.bf16.msra.mxu1 %v1261_v34  ;;  %v344_v26 = vld [vmem:[#allocation2 + $0x20] sm:$0xff]  ;;  %v345_v30 = vld [vmem:[#allocation2 + $0x28] sm:$0xff] }
  0x57   : > { %738 = vmatprep.subr.bf16.mxu1 %v1265_v35  ;;  %v346_v35 = vld [vmem:[#allocation2 + $0x38] sm:$0xff] }
  0x58   : > { %686 = vmatpush1.bf16.msra.mxu0 %v1231_v28 }
  0x59   : > { %687 = vmatprep.subr.bf16.mxu0 %v1232_v29 }
  0x5a   : > { %739 = vmatpush1.bf16.msra.mxu1 %v1267_v38 }
  0x5b   : > { %740 = vmatprep.subr.bf16.mxu1 %v1271_v39 }
  0x5c   : > { %688 = vmatpush1.bf16.msra.mxu0 %v1234_v32 }
  0x5d   : > { %689 = vmatprep.subr.bf16.mxu0 %v1238_v33 }
  0x5e   : > { %741 = vmatpush1.bf16.msra.mxu1 %v1273_v42 }
  0x5f   : > { %742 = vmatprep.subr.bf16.mxu1 %v1277_v43 }
  0x60   : > { %690 = vmatpush1.bf16.msra.mxu0 %v1240_v36 }
  0x61   : > { %691 = vmatprep.subr.bf16.mxu0 %v1244_v37 }
  0x62   : > { %743 = vmatpush1.bf16.msra.mxu1 %v1279_v47 }
  0x64   : > { %692 = vmatpush2.bf16.msra.mxu0 %v1246_v40 }
  0x65   : > { %693 = vmatprep.subr.bf16.mxu0 %v1250_v41  ;;  %761 = vmatmul.mubr.bf16.vlgmr.msra.gmra.mxu1 %v1283_v50 }
  0x66   : > { %770 = vmatprep.mubr.bf16.mxu1 %v1376_v11 }
  0x68   : > { %694 = vmatpush2.bf16.msra.mxu0 %v1252_v45 }
  0x69   : > { %695 = vmatprep.subr.bf16.mxu0 %v1256_v46 }
  0x6c   : > { %696 = vmatpush2.bf16.msra.mxu0 %v1258_v48 }
  0x6d   : > { %697 = vmatprep.subr.bf16.mxu0 %v1262_v49  ;;  %771 = vmatmul.mubr.bf16.gmra.mxu1 %v1290_v55 }
  0x70   : > { %698 = vmatpush2.bf16.msra.mxu0 %v1264_v51 }
  0x71   : > { %699 = vmatprep.subr.bf16.mxu0 %v1268_v52 }
  0x74   : > { %700 = vmatpush2.bf16.msra.mxu0 %v1270_v53 }
  0x75   : > { %701 = vmatprep.subr.bf16.mxu0 %v1274_v54 }
  0x78   : > { %702 = vmatpush2.bf16.msra.mxu0 %v1276_v56 }
  0x79   : > { %703 = vmatprep.subr.bf16.mxu0 %v1280_v57 }
  0x7c   : > { %704 = vmatpush2.bf16.msra.mxu0 %v1282_v58 }
  0x7d   : > { %705 = vmatprep.subr.bf16.mxu0 %v1284_v59 }
  0x80   : > { %706 = vmatpush2.bf16.msra.mxu0 %v1286_v60 }
  0x83   : > { %708 = vmatmul.mubr.bf16.vlgmr.msra.gmra.mxu0 %v1287_v61 }
  0x84   : > { %717 = vmatprep.mubr.bf16.mxu0 %v1291_v62 }
  0x8b   : > { %718 = vmatmul.mubr.bf16.gmra.mxu0 %v1293_v63 }
 0x125   : > { %v762_v0 = vpop.f32.mrf.mxu1 }
 0x127   : > { %v764_v1 = vpop.f32.mrf.mxu1 }
 0x129   : > { %v766_v2 = vpop.f32.mrf.mxu1 }
 0x12b   : > { %v768_v3 = vpop.f32.mrf.mxu1 }
 0x12d   : > { %v772_v9 = vpop.f32.mrf.mxu1 }
 0x12f   : > { %v774_v16 = vpop.f32.mrf.mxu1 }
 0x131   : > { %v776_v25 = vpop.f32.mrf.mxu1 }
 0x133   : > { %v778_v34 = vpop.f32.mrf.mxu1 }
 0x143   : > { %v709_v5 = vpop.f32.mrf.mxu0 }
 0x144   : > { %v763_v6 = vadd.f32 %v762_v0, %v709_v5 }
 0x145   : > { %v711_v8 = vpop.f32.mrf.mxu0 }
 0x146   : > { %v781_v10 = vadd.f32 %v763_v6, %v339_v4  ;;  %v765_v11 = vadd.f32 %v764_v1, %v711_v8 }
 0x147   : > { %v713_v13 = vpop.f32.mrf.mxu0 }
 0x148   : > { %789 = vst [vmem:[#allocation2 + $0x30] sm:$0xff] %v781_v10  ;;  %v782_v14 = vadd.f32 %v765_v11, %v340_v7  ;;  %v767_v15 = vadd.f32 %v766_v2, %v713_v13 }
 0x149   : > { %v715_v18 = vpop.f32.mrf.mxu0 }
 0x14a   : > { %790 = vst [vmem:[#allocation2] sm:$0xff] %v782_v14  ;;  %v783_v19 = vadd.f32 %v767_v15, %v341_v12  ;;  %v769_v20 = vadd.f32 %v768_v3, %v715_v18 }
 0x14b   : > { %v719_v22 = vpop.f32.mrf.mxu0 }
 0x14c   : > { %791 = vst [vmem:[#allocation2 + $0x18] sm:$0xff] %v783_v19  ;;  %v784_v23 = vadd.f32 %v769_v20, %v342_v17  ;;  %v773_v24 = vadd.f32 %v772_v9, %v719_v22 }
 0x14d   : > { %v721_v27 = vpop.f32.mrf.mxu0 }
 0x14e   : > { %792 = vst [vmem:[#allocation2 + $0x10] sm:$0xff] %v784_v23  ;;  %v785_v28 = vadd.f32 %v773_v24, %v343_v21  ;;  %v775_v29 = vadd.f32 %v774_v16, %v721_v27 }
 0x14f   : > { %v723_v31 = vpop.f32.mrf.mxu0 }
 0x150   : > { %793 = vst [vmem:[#allocation2 + $0x8] sm:$0xff] %v785_v28  ;;  %v786_v32 = vadd.f32 %v775_v29, %v344_v26  ;;  %v777_v33 = vadd.f32 %v776_v25, %v723_v31 }
 0x151   : > { %v725_v36 = vpop.f32.mrf.mxu0 }
 0x152   : > { %794 = vst [vmem:[#allocation2 + $0x20] sm:$0xff] %v786_v32  ;;  %v787_v37 = vadd.f32 %v777_v33, %v345_v30  ;;  %v779_v38 = vadd.f32 %v778_v34, %v725_v36  ;;  %800 = sbr.rel (%p1136_p6) target bundleno = 370 (0x172), region = 66 }
 0x154   : > { %795 = vst [vmem:[#allocation2 + $0x28] sm:$0xff] %v787_v37  ;;  %v788_v39 = vadd.f32 %v779_v38, %v346_v35 }
 0x156   : > { %796 = vst [vmem:[#allocation2 + $0x38] sm:$0xff] %v788_v39 }
 0x157   : > { %v801_v40 = vld [vmem:[#allocation2 + $0x30] sm:$0xff]  ;;  %v802_v41 = vld [vmem:[#allocation2] sm:$0xff]  ;;  %v803_v42 = vld [vmem:[#allocation2 + $0x18] sm:$0xff]  ;;  %vm881_vm0 = vcmask 1040384  }
 0x158   : > { %v1151_v43 = vpack.c.bf16 %v802_v41, %v801_v40  ;;  %v855_v44 = vmul.f32 %v801_v40, %v801_v40  ;;  %v856_v45 = vmul.f32 %v802_v41, %v802_v41  ;;  %v804_v46 = vld [vmem:[#allocation2 + $0x10] sm:$0xff]  ;;  %v837_v47 = vadd.f32 %v803_v42, %v801_v40  ;;  %v805_v48 = vld [vmem:[#allocation2 + $0x8] sm:$0xff] }
 0x159   : > { %v806_v49 = vld [vmem:[#allocation2 + $0x20] sm:$0xff]  ;;  %v1152_v50 = vpack.c.bf16 %v804_v46, %v803_v42  ;;  %v846_v51 = vadd.f32 %v804_v46, %v802_v41  ;;  %v857_v52 = vmul.f32 %v803_v42, %v803_v42  ;;  %v858_v53 = vmul.f32 %v804_v46, %v804_v46 }
 0x15a   : > { %833 = vst [vmem:[%s1568_s2] sm:$0xff] %v1151_v43  ;;  %v1153_v56 = vpack.c.bf16 %v806_v49, %v805_v48  ;;  %v838_v57 = vadd.f32 %v837_v47, %v805_v48  ;;  %v859_v58 = vmul.f32 %v805_v48, %v805_v48  ;;  %v860_v59 = vmul.f32 %v806_v49, %v806_v49 }
 0x15b   : > { %v807_v54 = vld [vmem:[#allocation2 + $0x28] sm:$0xff]  ;;  %834 = vst [vmem:[%s1568_s2 + $0x8] sm:$0xff] %v1152_v50  ;;  %v863_v60 = vadd.f32 %v857_v52, %v855_v44  ;;  %v872_v61 = vadd.f32 %v858_v53, %v856_v45  ;;  %v847_v62 = vadd.f32 %v846_v51, %v806_v49 }
 0x15c   : > { %835 = vst [vmem:[%s1568_s2 + $0x10] sm:$0xff] %v1153_v56  ;;  %v839_v0 = vadd.f32 %v838_v57, %v807_v54  ;;  %v861_v1 = vmul.f32 %v807_v54, %v807_v54 }
 0x15d   : > { %v808_v55 = vld [vmem:[#allocation2 + $0x38] sm:$0xff]  ;;  %v864_v3 = vadd.f32 %v863_v60, %v859_v58  ;;  %v873_v4 = vadd.f32 %v872_v61, %v860_v59 }
 0x15e   : > { %v1154_v63 = vpack.c.bf16 %v808_v55, %v807_v54  ;;  %v862_v2 = vmul.f32 %v808_v55, %v808_v55  ;;  %v848_v5 = vadd.f32 %v847_v62, %v808_v55  ;;  %v840_v6 = vrot.slane %v839_v0, 4 }
 0x15f   : > { %v865_v8 = vadd.f32 %v864_v3, %v861_v1 }
 0x160   : > { %836 = vst [vmem:[%s1568_s2 + $0x18] sm:$0xff] %v1154_v63  ;;  %v849_v7 = vrot.slane %v848_v5, 4  ;;  %v874_v9 = vadd.f32 %v873_v4, %v862_v2  ;;  %v841_v10 = vadd.f32 %v840_v6, %v839_v0 }
 0x161   : > { %v866_v12 = vrot.slane %v865_v8, 4 }
 0x162   : > { %v850_v11 = vadd.f32 %v849_v7, %v848_v5  ;;  %v875_v13 = vrot.slane %v874_v9, 4  ;;  %v842_v14 = vrot.slane %v841_v10, 2 }
 0x163   : > { %v867_v16 = vadd.f32 %v866_v12, %v865_v8 }
 0x164   : > { %v851_v15 = vrot.slane %v850_v11, 2  ;;  %v876_v17 = vadd.f32 %v875_v13, %v874_v9  ;;  %v843_v18 = vadd.f32 %v842_v14, %v841_v10 }
 0x165   : > { %v868_v20 = vrot.slane %v867_v16, 2 }
 0x166   : > { %v852_v19 = vadd.f32 %v851_v15, %v850_v11  ;;  %v877_v21 = vrot.slane %v876_v17, 2  ;;  %v844_v22 = vrot.slane %v843_v18, 1 }
 0x167   : > { %v869_v24 = vadd.f32 %v868_v20, %v867_v16 }
 0x168   : > { %v853_v23 = vrot.slane %v852_v19, 1  ;;  %v878_v25 = vadd.f32 %v877_v21, %v876_v17  ;;  %v845_v26 = vadd.f32 %v844_v22, %v843_v18 }
 0x169   : > { %v870_v28 = vrot.slane %v869_v24, 1 }
 0x16a   : > { %v854_v27 = vadd.f32 %v853_v23, %v852_v19  ;;  %v879_v29 = vrot.slane %v878_v25, 1 }
 0x16b   : > { %v871_v30 = vadd.f32 %v870_v28, %v869_v24 }
 0x16c   : > { %v880_v31 = vadd.f32 %v879_v29, %v878_v25 }
 0x16d   : > { %v882_v32 = vsel %vm881_vm0, %v845_v26, %v871_v30 }
 0x16e   : > { %v883_v33 = vsel %vm881_vm0, %v854_v27, %v880_v31 }
 0x16f   : > { %v886_v34 = vcombine.low %v882_v32, %v883_v33 }
 0x171   : > { %1141 = vst.sshfl [vmem:[%s1569_s3] sm:$0x33 pattern:$0x76325410] %v886_v34 }
 0x172 PF: > { %s17_s17 = sadd.s32 1, %s1370_s17   ;;  %s1572_s12 = smov %s1354_s13 }
 0x173   : > { %p14_p7 = scmp.ge.s32.totalorder %s17_s17, 5   ;;  %s1573_s13 = smov %s1358_s14 }
 0x174   : > { %s1574_s14 = smov %s1445_s24  ;;  %s1575_s15 = smov %s1366_s16 }
 0x175   : > { %s1576_s16 = smov %s1578_s19  ;;  %16 = sbr.rel (!%p14_p7) target bundleno = 4 (0x4), region = 128 }
 0x17a   :  { %954 = vsyncpa [#allocation5], 1 }
 0x17b   :  { %956 = vsyncpa [#allocation5 + $0x1], 1 }

// kernel: tile.63
= control target key start
LH: loop header
LB: loop body
LE: loop exit
PB: predicated region body
PF: predicated region fallthrough
CT: control target
= control target key end

     0   :  { %s22_s0 = inlined_call_operand.vmem [shape: f32[32], index: 0, kind: input, shape index: {}]   ;;  %s23_s1 = inlined_call_operand.vmem [shape: f32[4,32], index: 1, kind: output, shape index: {}]  }
   0x1   :  { %v4_v0 = vld [vmem:[%s22_s0] ss:$0 sm:$0xff] }
   0x2   :  { %5 = vst [vmem:[%s23_s1] sm:$0xf] %v4_v0 }

// kernel: tile.68
= control target key start
LH: loop header
LB: loop body
LE: loop exit
PB: predicated region body
PF: predicated region fallthrough
CT: control target
= control target key end

     0   :  { %vm8_vm0 = vcmask 261120   ;;  %s40_s8 = smov 32   ;;  %s41_s9 = smov 64   ;;  %vm14_vm1 = vcmask 1048320   ;;  %vm20_vm2 = vcmask 785920   ;;  %vm26_vm3 = vcmask 523520   ;;  %s58_s0 = inlined_call_operand.vmem [shape: f32[4,32], index: 0, kind: input, shape index: {}]   ;;  %s59_s1 = inlined_call_operand.vmem [shape: f32[1,128], index: 1, kind: output, shape index: {}]  }
   0x1   :  { %v5_v0 = vld [vmem:[%s58_s0] sm:$0xf]  ;;  %s39_s0 = smov 96  }
   0x2   :  { %6 = vst [vmem:[#allocation1] sm:$0xf] %v5_v0 }
   0x9   :  { %v11_v1 = vld [vmem:[#allocation1 + $0x3] sm:$0x1]   ;;  %v23_v2 = vld [vmem:[#allocation1 + $0x1] sm:$0x1]   ;;  %v7_v3 = vld [vmem:[#allocation1] sm:$0x1]  }
   0xa   :  { %12 = vrot.lane.b32.xlu0 %v11_v1, %s39_s0  ;;  %24 = vrot.lane.b32.xlu1 %v23_v2, %s40_s8  ;;  %v17_v4 = vld [vmem:[#allocation1 + $0x2] sm:$0x1]   ;;  %9 = vst.msk [vmem:[#allocation0] sm:$0x1] %vm8_vm0, %v7_v3  }
   0xe   :  { %18 = vrot.lane.b32.xlu0 %v17_v4, %s41_s9 }
  0x7c   :  { %v13_v5 = vpop.permute.xlu0 %12   ;;  %v25_v6 = vpop.permute.xlu1 %24  }
  0x7d   :  { %15 = vst.msk [vmem:[#allocation0] sm:$0x1] %vm14_vm1, %v13_v5  }
  0x80   :  { %v19_v7 = vpop.permute.xlu0 %18  }
  0x81   :  { %21 = vst.msk [vmem:[#allocation0] sm:$0x1] %vm20_vm2, %v19_v7  }
  0x82   :  { %27 = vst.msk [vmem:[#allocation0] sm:$0x1] %vm26_vm3, %v25_v6  }
  0x89   :  { %v32_v8 = vld [vmem:[#allocation0] sm:$0x1] }
  0x8a   :  { %35 = vst [vmem:[%s59_s1] sm:$0x1] %v32_v8 }

// kernel: _generator_forward.13
= control target key start
LH: loop header
LB: loop body
LE: loop exit
PB: predicated region body
PF: predicated region fallthrough
CT: control target
= control target key end

     0   :  { %vm586_vm0 = vcmask 523264   ;;  %vm1091_vm1 = vcmask 1040384   ;;  %s1869_s1 = inlined_call_operand.vmem [shape: bf16[576,128], index: 1, kind: input, shape index: {}]   ;;  %s1870_s0 = inlined_call_operand.vmem [shape: bf16[128,576], index: 0, kind: input, shape index: {}]   ;;  %s1871_s2 = inlined_call_operand.vmem [shape: bf16[128,128], index: 2, kind: output, shape index: {0}]   ;;  %s1872_s3 = inlined_call_operand.vmem [shape: f32[1,2,128], index: 3, kind: output, shape index: {1}]  }
   0x1   :  { %v1437_v0 = vld [vmem:[%s1869_s1 + $0x78] sm:$0xff]   ;;  %v1441_v4 = vld [vmem:[%s1869_s1 + $0x70] sm:$0xff]   ;;  %v1445_v8 = vld [vmem:[%s1869_s1 + $0x68] sm:$0xff]  }
   0x2   :  { %v1438_v1 = vld [vmem:[%s1869_s1 + $0xf8] sm:$0xff]   ;;  %1265 = vmatprep.subr.bf16.mxu0 %v1437_v0  ;;  %v1442_v5 = vld [vmem:[%s1869_s1 + $0xf0] sm:$0xff]   ;;  %v1446_v9 = vld [vmem:[%s1869_s1 + $0xe8] sm:$0xff]  }
   0x3   :  { %v1439_v2 = vld [vmem:[%s1869_s1 + $0x38] sm:$0xff]   ;;  %1329 = vmatprep.subr.bf16.mxu1 %v1438_v1  ;;  %v1443_v6 = vld [vmem:[%s1869_s1 + $0x30] sm:$0xff]   ;;  %v1447_v10 = vld [vmem:[%s1869_s1 + $0x28] sm:$0xff]  }
   0x4   :  { %v1440_v3 = vld [vmem:[%s1869_s1 + $0xb8] sm:$0xff]   ;;  %1266 = vmatpush3.bf16.msra.mxu0 %v1439_v2  ;;  %v1444_v7 = vld [vmem:[%s1869_s1 + $0xb0] sm:$0xff]   ;;  %v1448_v11 = vld [vmem:[%s1869_s1 + $0xa8] sm:$0xff]  }
   0x5   :  { %1330 = vmatpush3.bf16.msra.mxu1 %v1440_v3  ;;  %1267 = vmatprep.subr.bf16.mxu0 %v1441_v4  ;;  %v1449_v12 = vld [vmem:[%s1869_s1 + $0x60] sm:$0xff]   ;;  %v1453_v16 = vld [vmem:[%s1869_s1 + $0x58] sm:$0xff]   ;;  %v1457_v20 = vld [vmem:[%s1869_s1 + $0x50] sm:$0xff]  }
   0x6   :  { %1331 = vmatprep.subr.bf16.mxu1 %v1442_v5  ;;  %v1450_v13 = vld [vmem:[%s1869_s1 + $0xe0] sm:$0xff]   ;;  %v1454_v17 = vld [vmem:[%s1869_s1 + $0xd8] sm:$0xff]   ;;  %v1458_v21 = vld [vmem:[%s1869_s1 + $0xd0] sm:$0xff]  }
   0x7   :  { %v1451_v14 = vld [vmem:[%s1869_s1 + $0x20] sm:$0xff]   ;;  %v1455_v18 = vld [vmem:[%s1869_s1 + $0x18] sm:$0xff]   ;;  %v1459_v22 = vld [vmem:[%s1869_s1 + $0x10] sm:$0xff]  }
   0x8   :  { %1268 = vmatpush3.bf16.msra.mxu0 %v1443_v6  ;;  %v1452_v15 = vld [vmem:[%s1869_s1 + $0xa0] sm:$0xff]   ;;  %v1456_v19 = vld [vmem:[%s1869_s1 + $0x98] sm:$0xff]   ;;  %v1460_v23 = vld [vmem:[%s1869_s1 + $0x90] sm:$0xff]  }
   0x9   :  { %1332 = vmatpush3.bf16.msra.mxu1 %v1444_v7  ;;  %1269 = vmatprep.subr.bf16.mxu0 %v1445_v8  ;;  %v1461_v24 = vld [vmem:[%s1869_s1 + $0x48] sm:$0xff]   ;;  %v1465_v28 = vld [vmem:[%s1869_s1 + $0x40] sm:$0xff]   ;;  %v1475_v36 = vld [vmem:[%s1869_s1 + $0x118] sm:$0xff]  }
   0xa   :  { %1333 = vmatprep.subr.bf16.mxu1 %v1446_v9  ;;  %v1462_v25 = vld [vmem:[%s1869_s1 + $0xc8] sm:$0xff]   ;;  %v1466_v29 = vld [vmem:[%s1869_s1 + $0xc0] sm:$0xff]   ;;  %v1488_v42 = vld [vmem:[%s1869_s1 + $0x110] sm:$0xff]  }
   0xb   :  { %v1463_v26 = vld [vmem:[%s1869_s1 + $0x8] sm:$0xff]   ;;  %v1467_v30 = vld [vmem:[%s1869_s1] sm:$0xff]   ;;  %v1484_v43 = vld [vmem:[%s1870_s0 + $0x5c] ss:$20 sps:$4 sm:$0xff]  }
   0xc   :  { %1270 = vmatpush3.bf16.msra.mxu0 %v1447_v10  ;;  %v1464_v27 = vld [vmem:[%s1869_s1 + $0x88] sm:$0xff]   ;;  %v1468_v31 = vld [vmem:[%s1869_s1 + $0x80] sm:$0xff]   ;;  %v1489_v47 = vld [vmem:[%s1870_s0 + $0x7c] ss:$20 sps:$4 sm:$0xff]  }
   0xd   :  { %1334 = vmatpush3.bf16.msra.mxu1 %v1448_v11  ;;  %1271 = vmatprep.subr.bf16.mxu0 %v1449_v12  ;;  %v1469_v32 = vld [vmem:[%s1870_s0] ss:$20 sps:$4 sm:$0xff]   ;;  %v1471_v33 = vld [vmem:[%s1870_s0 + $0x4] ss:$20 sps:$4 sm:$0xff]   ;;  %v1472_v34 = vld [vmem:[%s1870_s0 + $0x8] ss:$20 sps:$4 sm:$0xff]  }
   0xe   :  { %1335 = vmatprep.subr.bf16.mxu1 %v1450_v13  ;;  %v1474_v35 = vld [vmem:[%s1870_s0 + $0xc] ss:$20 sps:$4 sm:$0xff]   ;;  %643 = vmatprep.mubr.bf16.mxu0 %v1471_v33  ;;  %v1478_v38 = vld [vmem:[%s1870_s0 + $0x34] ss:$20 sps:$4 sm:$0xff]   ;;  %v1481_v40 = vld [vmem:[%s1870_s0 + $0x30] ss:$20 sps:$4 sm:$0xff]  }
   0xf   :  { %740 = vmatprep.mubr.bf16.mxu1 %v1474_v35  ;;  %v1476_v37 = vld [vmem:[%s1870_s0 + $0x2c] ss:$20 sps:$4 sm:$0xff]   ;;  %v1480_v39 = vld [vmem:[%s1870_s0 + $0x28] ss:$20 sps:$4 sm:$0xff]   ;;  %v1486_v44 = vld [vmem:[%s1870_s0 + $0x50] ss:$20 sps:$4 sm:$0xff]  }
  0x10   :  { %1272 = vmatpush3.bf16.msra.mxu0 %v1451_v14  ;;  %v1482_v41 = vld [vmem:[%s1870_s0 + $0x54] ss:$20 sps:$4 sm:$0xff]   ;;  %v1487_v45 = vld [vmem:[%s1870_s0 + $0x58] ss:$20 sps:$4 sm:$0xff]   ;;  %v1514_v49 = vld [vmem:[%s1869_s1 + $0x100] sm:$0xff]  }
  0x11   :  { %1336 = vmatpush3.bf16.msra.mxu1 %v1452_v15  ;;  %1273 = vmatprep.subr.bf16.mxu0 %v1453_v16  ;;  %v1501_v46 = vld [vmem:[%s1869_s1 + $0x108] sm:$0xff]   ;;  %v1491_v48 = vld [vmem:[%s1870_s0 + $0x84] ss:$20 sps:$4 sm:$0xff]   ;;  %v1494_v51 = vld [vmem:[%s1870_s0 + $0x80] ss:$20 sps:$4 sm:$0xff]  }
  0x12   :  { %1337 = vmatprep.subr.bf16.mxu1 %v1454_v17  ;;  %v1493_v50 = vld [vmem:[%s1870_s0 + $0x78] ss:$20 sps:$4 sm:$0xff]   ;;  %v1499_v54 = vld [vmem:[%s1870_s0 + $0xa0] ss:$20 sps:$4 sm:$0xff]   ;;  %v1500_v55 = vld [vmem:[%s1870_s0 + $0xa8] ss:$20 sps:$4 sm:$0xff]  }
  0x13   :  { %v1495_v52 = vld [vmem:[%s1870_s0 + $0xa4] ss:$20 sps:$4 sm:$0xff]   ;;  %v1497_v53 = vld [vmem:[%s1870_s0 + $0xac] ss:$20 sps:$4 sm:$0xff]   ;;  %v1504_v57 = vld [vmem:[%s1870_s0 + $0xd4] ss:$20 sps:$4 sm:$0xff]  }
  0x14   :  { %1274 = vmatpush3.bf16.msra.mxu0 %v1455_v18  ;;  %v1502_v56 = vld [vmem:[%s1870_s0 + $0xcc] ss:$20 sps:$4 sm:$0xff]   ;;  %v1506_v58 = vld [vmem:[%s1870_s0 + $0xc8] ss:$20 sps:$4 sm:$0xff]   ;;  %v1507_v59 = vld [vmem:[%s1870_s0 + $0xd0] ss:$20 sps:$4 sm:$0xff]  }
  0x15   :  { %1338 = vmatpush3.bf16.msra.mxu1 %v1456_v19  ;;  %1275 = vmatprep.subr.bf16.mxu0 %v1457_v20  ;;  %v1508_v60 = vld [vmem:[%s1870_s0 + $0xf4] ss:$20 sps:$4 sm:$0xff]   ;;  %v1510_v61 = vld [vmem:[%s1870_s0 + $0xfc] ss:$20 sps:$4 sm:$0xff]   ;;  %v1513_v63 = vld [vmem:[%s1870_s0 + $0xf8] ss:$20 sps:$4 sm:$0xff]  }
  0x16   :  { %1339 = vmatprep.subr.bf16.mxu1 %v1458_v21  ;;  %v1512_v62 = vld [vmem:[%s1870_s0 + $0xf0] ss:$20 sps:$4 sm:$0xff]   ;;  %v1519_v2 = vld [vmem:[%s1870_s0 + $0x118] ss:$20 sps:$4 sm:$0xff]   ;;  %v1520_v3 = vld [vmem:[%s1870_s0 + $0x120] ss:$20 sps:$4 sm:$0xff]  }
  0x17   :  { %v1515_v0 = vld [vmem:[%s1870_s0 + $0x11c] ss:$20 sps:$4 sm:$0xff]   ;;  %v1517_v1 = vld [vmem:[%s1870_s0 + $0x124] ss:$20 sps:$4 sm:$0xff]   ;;  %v1525_v8 = vld [vmem:[%s1870_s0 + $0x60] ss:$20 sps:$4 sm:$0xff]  }
  0x18   :  { %1276 = vmatpush3.bf16.msra.mxu0 %v1459_v22  ;;  %v1521_v4 = vld [vmem:[%s1870_s0 + $0x10] ss:$20 sps:$4 sm:$0xff]   ;;  %v1523_v6 = vld [vmem:[%s1870_s0 + $0x38] ss:$20 sps:$4 sm:$0xff]   ;;  %v1526_v9 = vld [vmem:[%s1870_s0 + $0x100] ss:$20 sps:$4 sm:$0xff]  }
  0x19   :  { %1340 = vmatpush3.bf16.msra.mxu1 %v1460_v23  ;;  %1277 = vmatprep.subr.bf16.mxu0 %v1461_v24  ;;  %v1522_v5 = vld [vmem:[%s1870_s0 + $0xb0] ss:$20 sps:$4 sm:$0xff]   ;;  %v1524_v7 = vld [vmem:[%s1870_s0 + $0xd8] ss:$20 sps:$4 sm:$0xff]   ;;  %v1527_v10 = vld [vmem:[%s1870_s0 + $0x88] ss:$20 sps:$4 sm:$0xff]  }
  0x1a   :  { %1341 = vmatprep.subr.bf16.mxu1 %v1462_v25  ;;  %v1528_v11 = vld [vmem:[%s1870_s0 + $0x128] ss:$20 sps:$4 sm:$0xff]  }
  0x1c   :  { %1278 = vmatpush3.bf16.msra.mxu0 %v1463_v26 }
  0x1d   :  { %1342 = vmatpush3.bf16.msra.mxu1 %v1464_v27  ;;  %1279 = vmatprep.subr.bf16.mxu0 %v1465_v28 }
  0x1e   :  { %1343 = vmatprep.subr.bf16.mxu1 %v1466_v29 }
  0x20   :  { %1280 = vmatpush3.bf16.msra.mxu0 %v1467_v30 }
  0x21   :  { %1344 = vmatpush3.bf16.msra.mxu1 %v1468_v31  ;;  %1405 = vmatprep.subr.bf16.mxu0 %v1475_v36 }
  0x22   :  { %1429 = vmatprep.subr.bf16.mxu1 %v1475_v36 }
  0x23   :  { %644 = vmatmul.mubr.bf16.vlgmr.msra.gmra.mxu0 %v1469_v32 }
  0x24   :  { %741 = vmatmul.mubr.bf16.vlgmr.msra.gmra.mxu1 %v1472_v34  ;;  %1406 = vmatpush3.bf16.msra.mxu0 %v1475_v36 }
  0x25   :  { %651 = vmatprep.mubr.bf16.mxu0 %v1476_v37  ;;  %748 = vmatprep.mubr.bf16.mxu1 %v1478_v38 }
  0x26   :  { %1433 = vmatpush3.bf16.msra.mxu1 %v1475_v36  ;;  %1407 = vmatprep.subr.bf16.mxu0 %v1488_v42 }
  0x27   :  { %1430 = vmatprep.subr.bf16.mxu1 %v1488_v42 }
  0x28   :  { %1408 = vmatpush3.bf16.msra.mxu0 %v1488_v42 }
  0x29   :  { %1409 = vmatprep.subr.bf16.mxu0 %v1501_v46 }
  0x2a   :  { %1434 = vmatpush3.bf16.msra.mxu1 %v1488_v42 }
  0x2b   :  { %652 = vmatmul.mubr.bf16.gmra.mxu0 %v1480_v39  ;;  %1431 = vmatprep.subr.bf16.mxu1 %v1501_v46 }
  0x2c   :  { %749 = vmatmul.mubr.bf16.gmra.mxu1 %v1481_v40  ;;  %659 = vmatprep.mubr.bf16.mxu0 %v1482_v41 }
  0x2d   :  { %756 = vmatprep.mubr.bf16.mxu1 %v1484_v43  ;;  %1410 = vmatpush3.bf16.msra.mxu0 %v1501_v46 }
  0x2e   :  { %1435 = vmatpush3.bf16.msra.mxu1 %v1501_v46  ;;  %1411 = vmatprep.subr.bf16.mxu0 %v1514_v49 }
  0x2f   :  { %1432 = vmatprep.subr.bf16.mxu1 %v1514_v49 }
  0x31   :  { %1412 = vmatpush3.bf16.msra.mxu0 %v1514_v49 }
  0x32   :  { %1436 = vmatpush3.bf16.msra.mxu1 %v1514_v49 }
  0x33   :  { %660 = vmatmul.mubr.bf16.gmra.mxu0 %v1486_v44 }
  0x34   :  { %757 = vmatmul.mubr.bf16.gmra.mxu1 %v1487_v45  ;;  %667 = vmatprep.mubr.bf16.mxu0 %v1489_v47 }
  0x35   :  { %764 = vmatprep.mubr.bf16.mxu1 %v1491_v48 }
  0x3b   :  { %668 = vmatmul.mubr.bf16.gmra.mxu0 %v1493_v50 }
  0x3c   :  { %765 = vmatmul.mubr.bf16.gmra.mxu1 %v1494_v51  ;;  %675 = vmatprep.mubr.bf16.mxu0 %v1495_v52 }
  0x3d   :  { %772 = vmatprep.mubr.bf16.mxu1 %v1497_v53 }
  0x43   :  { %676 = vmatmul.mubr.bf16.gmra.mxu0 %v1499_v54 }
  0x44   :  { %773 = vmatmul.mubr.bf16.gmra.mxu1 %v1500_v55  ;;  %683 = vmatprep.mubr.bf16.mxu0 %v1502_v56 }
  0x45   :  { %780 = vmatprep.mubr.bf16.mxu1 %v1504_v57 }
  0x4b   :  { %684 = vmatmul.mubr.bf16.gmra.mxu0 %v1506_v58 }
  0x4c   :  { %781 = vmatmul.mubr.bf16.gmra.mxu1 %v1507_v59  ;;  %691 = vmatprep.mubr.bf16.mxu0 %v1508_v60 }
  0x4d   :  { %788 = vmatprep.mubr.bf16.mxu1 %v1510_v61 }
  0x53   :  { %692 = vmatmul.mubr.bf16.gmra.mxu0 %v1512_v62 }
  0x54   :  { %789 = vmatmul.mubr.bf16.gmra.mxu1 %v1513_v63  ;;  %699 = vmatprep.mubr.bf16.mxu0 %v1515_v0 }
  0x55   :  { %796 = vmatprep.mubr.bf16.mxu1 %v1517_v1 }
  0x5b   :  { %700 = vmatmul.mubr.bf16.gmra.mxu0 %v1519_v2 }
  0x5c   :  { %797 = vmatmul.mubr.bf16.gmra.mxu1 %v1520_v3  ;;  %1413 = vmatprep.mubr.msk.bf16.mxu0 %vm586_vm0, %v1521_v4 }
  0x5d   :  { %1421 = vmatprep.mubr.msk.bf16.mxu1 %vm586_vm0, %v1522_v5 }
  0x63   :  { %1414 = vmatmul.mubr.msk.bf16.vlgmr.msra.gmra.mxu0 %vm586_vm0, %v1523_v6 }
  0x64   :  { %1422 = vmatmul.mubr.msk.bf16.vlgmr.msra.gmra.mxu1 %vm586_vm0, %v1524_v7  ;;  %1417 = vmatprep.mubr.msk.bf16.mxu0 %vm586_vm0, %v1525_v8 }
  0x65   :  { %1425 = vmatprep.mubr.msk.bf16.mxu1 %vm586_vm0, %v1526_v9 }
  0x6b   :  { %1418 = vmatmul.mubr.msk.bf16.gmra.mxu0 %vm586_vm0, %v1527_v10 }
  0x6c   :  { %1426 = vmatmul.mubr.msk.bf16.gmra.mxu1 %vm586_vm0, %v1528_v11 }
  0xe3   :  { %v1281_v12 = vpop.f32.mrf.mxu0 }
  0xe4   :  { %v1345_v13 = vpop.f32.mrf.mxu1 }
  0xe5   :  { %v1282_v14 = vpop.f32.mrf.mxu0 }
  0xe6   :  { %v1283_v15 = vadd.f32 %v1282_v14, %v1281_v12  ;;  %v1346_v16 = vpop.f32.mrf.mxu1 }
  0xe7   :  { %v1347_v17 = vadd.f32 %v1346_v16, %v1345_v13  ;;  %v1284_v18 = vpop.f32.mrf.mxu0 }
  0xe8   :  { %v1348_v19 = vpop.f32.mrf.mxu1 }
  0xe9   :  { %v1285_v20 = vpop.f32.mrf.mxu0  ;;  %v1785_v21 = vadd.f32 %v1347_v17, %v1283_v15 }
  0xea   :  { %v1349_v22 = vpop.f32.mrf.mxu1  ;;  %v1286_v11 = vadd.f32 %v1285_v20, %v1284_v18 }
  0xeb   :  { %1873 = vst [vmem:[#allocation3_spill] sm:$0xff] %v1785_v21  ;;  %v1287_v23 = vpop.f32.mrf.mxu0  ;;  %v1350_v12 = vadd.f32 %v1349_v22, %v1348_v19 }
  0xec   :  { %v1351_v24 = vpop.f32.mrf.mxu1 }
  0xed   :  { %v1288_v25 = vpop.f32.mrf.mxu0 }
  0xee   :  { %v1352_v26 = vpop.f32.mrf.mxu1  ;;  %v1289_v14 = vadd.f32 %v1288_v25, %v1287_v23 }
  0xef   :  { %v1290_v27 = vpop.f32.mrf.mxu0  ;;  %v1353_v15 = vadd.f32 %v1352_v26, %v1351_v24 }
  0xf0   :  { %v1354_v28 = vpop.f32.mrf.mxu1 }
  0xf1   :  { %v1291_v29 = vpop.f32.mrf.mxu0 }
  0xf2   :  { %v1355_v30 = vpop.f32.mrf.mxu1  ;;  %v1292_v16 = vadd.f32 %v1291_v29, %v1290_v27  ;;  %v751_v27 = vadd.f32 %v1353_v15, %v1289_v14 }
  0xf3   :  { %v1293_v31 = vpop.f32.mrf.mxu0  ;;  %v1356_v17 = vadd.f32 %v1355_v30, %v1354_v28  ;;  %v746_v30 = vadd.f32 %v1350_v12, %v1286_v11 }
  0xf4   :  { %v1357_v32 = vpop.f32.mrf.mxu1 }
  0xf5   :  { %v1294_v33 = vpop.f32.mrf.mxu0  ;;  %v754_v29 = vadd.f32 %v1356_v17, %v1292_v16 }
  0xf6   :  { %v1358_v34 = vpop.f32.mrf.mxu1 }
  0xf7   :  { %v1787_v35 = vpop.f32.mrf.mxu0 }
  0xf8   :  { %1874 = vst [vmem:[#allocation4_spill] sm:$0xff] %v1787_v35  ;;  %v1789_v36 = vpop.f32.mrf.mxu1 }
  0xf9   :  { %1875 = vst [vmem:[#allocation5_spill] sm:$0xff] %v1789_v36  ;;  %v1791_v37 = vpop.f32.mrf.mxu0 }
  0xfa   :  { %1876 = vst [vmem:[#allocation6_spill] sm:$0xff] %v1791_v37  ;;  %v1793_v38 = vpop.f32.mrf.mxu1 }
  0xfb   :  { %1877 = vst [vmem:[#allocation7_spill] sm:$0xff] %v1793_v38  ;;  %v1299_v39 = vpop.f32.mrf.mxu0 }
  0xfc   :  { %v1363_v40 = vpop.f32.mrf.mxu1 }
  0xfd   :  { %v1300_v41 = vpop.f32.mrf.mxu0 }
  0xfe   :  { %v1364_v42 = vpop.f32.mrf.mxu1  ;;  %v1301_v21 = vadd.f32 %v1300_v41, %v1299_v39 }
  0xff   :  { %v1302_v43 = vpop.f32.mrf.mxu0 }
 0x100   :  { %v1366_v44 = vpop.f32.mrf.mxu1 }
 0x101   :  { %v1303_v45 = vpop.f32.mrf.mxu0 }
 0x102   :  { %v1367_v46 = vpop.f32.mrf.mxu1  ;;  %v1887_v39 = vld [vmem:[#allocation7_spill] sm:$0xff] }
 0x103   :  { %v1305_v47 = vpop.f32.mrf.mxu0  ;;  %v1368_v36 = vadd.f32 %v1367_v46, %v1366_v44 }
 0x104   :  { %v1369_v48 = vpop.f32.mrf.mxu1 }
 0x105   :  { %v1306_v49 = vpop.f32.mrf.mxu0 }
 0x106   :  { %v1370_v50 = vpop.f32.mrf.mxu1 }
 0x107   :  { %v1308_v51 = vpop.f32.mrf.mxu0  ;;  %v1371_v37 = vadd.f32 %v1370_v50, %v1369_v48  ;;  %v1888_v50 = vld [vmem:[#allocation3_spill] sm:$0xff] }
 0x108   :  { %v1372_v52 = vpop.f32.mrf.mxu1 }
 0x109   :  { %v1309_v53 = vpop.f32.mrf.mxu0 }
 0x10a   :  { %v1373_v54 = vpop.f32.mrf.mxu1  ;;  %v1310_v25 = vadd.f32 %v1309_v53, %v1308_v51 }
 0x10b   :  { %v1311_v55 = vpop.f32.mrf.mxu0  ;;  %v1374_v24 = vadd.f32 %v1373_v54, %v1372_v52 }
 0x10c   :  { %v1375_v56 = vpop.f32.mrf.mxu1 }
 0x10d   :  { %v1312_v57 = vpop.f32.mrf.mxu0  ;;  %v778_v54 = vadd.f32 %v1374_v24, %v1310_v25 }
 0x10e   :  { %v1376_v58 = vpop.f32.mrf.mxu1  ;;  %v1313_v18 = vadd.f32 %v1312_v57, %v1311_v55 }
 0x10f   :  { %v1314_v59 = vpop.f32.mrf.mxu0  ;;  %v1377_v20 = vadd.f32 %v1376_v58, %v1375_v56 }
 0x110   :  { %v1378_v60 = vpop.f32.mrf.mxu1 }
 0x111   :  { %v1315_v61 = vpop.f32.mrf.mxu0  ;;  %v783_v44 = vadd.f32 %v1377_v20, %v1313_v18 }
 0x112   :  { %v1379_v62 = vpop.f32.mrf.mxu1  ;;  %v1316_v19 = vadd.f32 %v1315_v61, %v1314_v59 }
 0x113   :  { %v1317_v63 = vpop.f32.mrf.mxu0  ;;  %v1380_v22 = vadd.f32 %v1379_v62, %v1378_v60 }
 0x114   :  { %v1795_v0 = vpop.f32.mrf.mxu1 }
 0x115   :  { %1878 = vst [vmem:[#allocation8_spill] sm:$0xff] %v1795_v0  ;;  %v1318_v1 = vpop.f32.mrf.mxu0  ;;  %v1295_v0 = vadd.f32 %v1294_v33, %v1293_v31  ;;  %v1884_v31 = vld [vmem:[#allocation4_spill] sm:$0xff] }
 0x116   :  { %v1797_v2 = vpop.f32.mrf.mxu1  ;;  %v1319_v55 = vadd.f32 %v1318_v1, %v1317_v63 }
 0x117   :  { %1879 = vst [vmem:[#allocation9_spill] sm:$0xff] %v1797_v2  ;;  %v1799_v3 = vpop.f32.mrf.mxu0 }
 0x118   :  { %1880 = vst [vmem:[#allocation10_spill] sm:$0xff] %v1799_v3  ;;  %v1801_v4 = vpop.f32.mrf.mxu1  ;;  %v1359_v3 = vadd.f32 %v1358_v34, %v1357_v32  ;;  %v1885_v32 = vld [vmem:[#allocation6_spill] sm:$0xff]  ;;  %v1886_v34 = vld [vmem:[#allocation5_spill] sm:$0xff] }
 0x119   :  { %1881 = vst [vmem:[#allocation11_spill] sm:$0xff] %v1801_v4  ;;  %v1803_v5 = vpop.f32.mrf.mxu0  ;;  %v1365_v4 = vadd.f32 %v1364_v42, %v1363_v40  ;;  %v1298_v33 = vadd.f32 %v1885_v32, %v1884_v31  ;;  %v1362_v40 = vadd.f32 %v1887_v39, %v1886_v34 }
 0x11a   :  { %1882 = vst [vmem:[#allocation12_spill] sm:$0xff] %v1803_v5  ;;  %v1805_v6 = vpop.f32.mrf.mxu1  ;;  %v1304_v5 = vadd.f32 %v1303_v45, %v1302_v43  ;;  %v759_v43 = vadd.f32 %v1359_v3, %v1295_v0 }
 0x11b   :  { %1883 = vst [vmem:[#allocation13_spill] sm:$0xff] %v1805_v6  ;;  %v1323_v7 = vpop.f32.mrf.mxu0  ;;  %v1307_v6 = vadd.f32 %v1306_v49, %v1305_v47  ;;  %v767_v42 = vadd.f32 %v1365_v4, %v1301_v21  ;;  %v786_v47 = vadd.f32 %v1380_v22, %v1316_v19 }
 0x11c   :  { %v1387_v8 = vpop.f32.mrf.mxu1  ;;  %v770_v48 = vadd.f32 %v1368_v36, %v1304_v5 }
 0x11d   :  { %v1324_v9 = vpop.f32.mrf.mxu0  ;;  %v775_v45 = vadd.f32 %v1371_v37, %v1307_v6 }
 0x11e   :  { %v1388_v10 = vpop.f32.mrf.mxu1  ;;  %v1325_v56 = vadd.f32 %v1324_v9, %v1323_v7  ;;  %v1890_v9 = vld [vmem:[#allocation9_spill] sm:$0xff] }
 0x11f   :  { %v1326_v13 = vpop.f32.mrf.mxu0  ;;  %v1389_v21 = vadd.f32 %v1388_v10, %v1387_v8  ;;  %v1889_v8 = vld [vmem:[#allocation8_spill] sm:$0xff] }
 0x120   :  { %v1390_v2 = vpop.f32.mrf.mxu1  ;;  %v1893_v12 = vld [vmem:[#allocation11_spill] sm:$0xff] }
 0x121   :  { %v1327_v38 = vpop.f32.mrf.mxu0  ;;  %v1892_v10 = vld [vmem:[#allocation12_spill] sm:$0xff]  ;;  %v799_v25 = vadd.f32 %v1389_v21, %v1325_v56 }
 0x122   :  { %v1391_v35 = vpop.f32.mrf.mxu1  ;;  %v1328_v60 = vadd.f32 %v1327_v38, %v1326_v13  ;;  %v1894_v13 = vld [vmem:[#allocation13_spill] sm:$0xff] }
 0x123   :  { %v1415_v23 = vpop.f32.mrf.mxu0  ;;  %v1392_v0 = vadd.f32 %v1391_v35, %v1390_v2  ;;  %v1383_v35 = vadd.f32 %v1890_v9, %v1889_v8  ;;  %v1891_v2 = vld [vmem:[#allocation10_spill] sm:$0xff]  ;;  %v1386_v14 = vadd.f32 %v1894_v13, %v1893_v12 }
 0x124   :  { %v1423_v26 = vpop.f32.mrf.mxu1  ;;  %v848_v49 = vadd.f32 %v1415_v23, %v751_v27  ;;  %v1322_v11 = vadd.f32 %v1892_v10, %v1891_v2  ;;  %v762_v27 = vadd.f32 %v1362_v40, %v1298_v33 }
 0x125   :  { %v839_v28 = vpop.f32.mrf.mxu0  ;;  %v1812_v57 = vadd.f32 %v1423_v26, %v783_v44  ;;  %v802_v26 = vadd.f32 %v1392_v0, %v1328_v60  ;;  %v791_v39 = vadd.f32 %v1383_v35, %v1319_v55 }
 0x126   :  { %v871_v41 = vpop.f32.mrf.mxu1  ;;  %v840_v51 = vadd.f32 %v839_v28, %v1888_v50  ;;  %v1056_v17 = vmul.f32 %v848_v49, %v848_v49 }
 0x127   :  { %v1416_v46 = vpop.f32.mrf.mxu0  ;;  %v1816_v36 = vadd.f32 %v871_v41, %v775_v45 }
 0x128   :  { %v851_v52 = vadd.f32 %v1416_v46, %v754_v29  ;;  %v1424_v53 = vpop.f32.mrf.mxu1  ;;  %v1054_v1 = vmul.f32 %v840_v51, %v840_v51 }
 0x129   :  { %v1814_v58 = vadd.f32 %v1424_v53, %v786_v47  ;;  %v842_v59 = vpop.f32.mrf.mxu0 }
 0x12a   :  { %v1226_v61 = vpack.c.bf16 %v851_v52, %v848_v49  ;;  %v843_v37 = vadd.f32 %v842_v59, %v746_v30  ;;  %v874_v62 = vpop.f32.mrf.mxu1  ;;  %v1057_v23 = vmul.f32 %v851_v52, %v851_v52 }
 0x12b   :  { %v1246_v3 = vpack.c.bf16 %v1814_v58, %v1812_v57  ;;  %v1820_v4 = vadd.f32 %v874_v62, %v778_v54  ;;  %v1419_v63 = vpop.f32.mrf.mxu0  ;;  %v1062_v62 = vmul.f32 %v1816_v36, %v1816_v36  ;;  %v1065_v8 = vmul.f32 %v1814_v58, %v1814_v58 }
 0x12c   :  { %1258 = vst [vmem:[%s1871_s2 + $0x8] sm:$0xff] %v1226_v61   ;;  %v1221_v5 = vpack.c.bf16 %v843_v37, %v840_v51  ;;  %v1033_v6 = vadd.f32 %v843_v37, %v840_v51  ;;  %v1055_v38 = vmul.f32 %v843_v37, %v843_v37  ;;  %v1427_v7 = vpop.f32.mrf.mxu1  ;;  %v864_v29 = vadd.f32 %v1419_v63, %v767_v42 }
 0x12d   :  { %1262 = vst [vmem:[%s1871_s2 + $0x28] sm:$0xff] %v1246_v3   ;;  %v1241_v15 = vpack.c.bf16 %v1820_v4, %v1816_v36  ;;  %v855_v16 = vpop.f32.mrf.mxu0  ;;  %v896_v34 = vadd.f32 %v1427_v7, %v799_v25  ;;  %v1063_v63 = vmul.f32 %v1820_v4, %v1820_v4 }
 0x12e   :  { %1222 = vst [vmem:[%s1871_s2] sm:$0xff] %v1221_v5   ;;  %v1034_v18 = vadd.f32 %v1033_v6, %v848_v49  ;;  %v1070_v20 = vadd.f32 %v1055_v38, %v1054_v1  ;;  %v856_v19 = vadd.f32 %v855_v16, %v759_v43  ;;  %v887_v22 = vpop.f32.mrf.mxu1  ;;  %v794_v43 = vadd.f32 %v1386_v14, %v1322_v11 }
 0x12f   :  { %1261 = vst [vmem:[%s1871_s2 + $0x20] sm:$0xff] %v1241_v15   ;;  %v1420_v24 = vpop.f32.mrf.mxu0  ;;  %v888_v51 = vadd.f32 %v887_v22, %v791_v39  ;;  %v1060_v55 = vmul.f32 %v864_v29, %v864_v29  ;;  %v1064_v6 = vmul.f32 %v1812_v57, %v1812_v57  ;;  %v1068_v14 = vmul.f32 %v896_v34, %v896_v34 }
 0x130   :  { %v1071_v28 = vadd.f32 %v1070_v20, %v1056_v17  ;;  %v1035_v30 = vadd.f32 %v1034_v18, %v851_v52  ;;  %v867_v31 = vadd.f32 %v1420_v24, %v770_v48  ;;  %v1428_v32 = vpop.f32.mrf.mxu1  ;;  %v1058_v46 = vmul.f32 %v856_v19, %v856_v19 }
 0x131   :  { %v899_v41 = vadd.f32 %v1428_v32, %v802_v26  ;;  %v858_v44 = vpop.f32.mrf.mxu0 }
 0x132   :  { %v1036_v45 = vadd.f32 %v1035_v30, %v856_v19  ;;  %v1072_v47 = vadd.f32 %v1071_v28, %v1057_v23  ;;  %v1236_v49 = vpack.c.bf16 %v867_v31, %v864_v29  ;;  %v890_v50 = vpop.f32.mrf.mxu1  ;;  %v859_v54 = vadd.f32 %v858_v44, %v762_v27 }
 0x133   :  { %v1256_v53 = vpack.c.bf16 %v899_v41, %v896_v34  ;;  %v891_v56 = vadd.f32 %v890_v50, %v794_v43  ;;  %v1061_v60 = vmul.f32 %v867_v31, %v867_v31  ;;  %v1069_v16 = vmul.f32 %v899_v41, %v899_v41 }
 0x134   :  { %v1073_v33 = vadd.f32 %v1072_v47, %v1058_v46  ;;  %1260 = vst [vmem:[%s1871_s2 + $0x18] sm:$0xff] %v1236_v49   ;;  %v1231_v40 = vpack.c.bf16 %v859_v54, %v856_v19  ;;  %v1037_v42 = vadd.f32 %v1036_v45, %v859_v54  ;;  %v1059_v48 = vmul.f32 %v859_v54, %v859_v54 }
 0x135   :  { %1264 = vst [vmem:[%s1871_s2 + $0x38] sm:$0xff] %v1256_v53   ;;  %v1251_v52 = vpack.c.bf16 %v891_v56, %v888_v51  ;;  %v1067_v12 = vmul.f32 %v891_v56, %v891_v56 }
 0x136   :  { %1259 = vst [vmem:[%s1871_s2 + $0x10] sm:$0xff] %v1231_v40   ;;  %v1038_v59 = vadd.f32 %v1037_v42, %v864_v29  ;;  %v1074_v21 = vadd.f32 %v1073_v33, %v1059_v48 }
 0x137   :  { %1263 = vst [vmem:[%s1871_s2 + $0x30] sm:$0xff] %v1251_v52  }
 0x138   :  { %v1039_v61 = vadd.f32 %v1038_v59, %v867_v31  ;;  %v1075_v37 = vadd.f32 %v1074_v21, %v1060_v55 }
 0x13a   :  { %v1040_v0 = vadd.f32 %v1039_v61, %v1816_v36  ;;  %v1076_v3 = vadd.f32 %v1075_v37, %v1061_v60  ;;  %v1066_v36 = vmul.f32 %v888_v51, %v888_v51 }
 0x13c   :  { %v1077_v1 = vadd.f32 %v1076_v3, %v1062_v62  ;;  %v1041_v5 = vadd.f32 %v1040_v0, %v1820_v4 }
 0x13e   :  { %v1042_v38 = vadd.f32 %v1041_v5, %v1812_v57  ;;  %v1078_v7 = vadd.f32 %v1077_v1, %v1063_v63 }
 0x140   :  { %v1043_v9 = vadd.f32 %v1042_v38, %v1814_v58  ;;  %v1079_v35 = vadd.f32 %v1078_v7, %v1064_v6 }
 0x142   :  { %v1044_v2 = vadd.f32 %v1043_v9, %v888_v51  ;;  %v1080_v10 = vadd.f32 %v1079_v35, %v1065_v8 }
 0x144   :  { %v1045_v11 = vadd.f32 %v1044_v2, %v891_v56  ;;  %v1081_v13 = vadd.f32 %v1080_v10, %v1066_v36 }
 0x146   :  { %v1046_v4 = vadd.f32 %v1045_v11, %v896_v34  ;;  %v1082_v15 = vadd.f32 %v1081_v13, %v1067_v12 }
 0x148   :  { %v1047_v17 = vadd.f32 %v1046_v4, %v899_v41  ;;  %v1083_v18 = vadd.f32 %v1082_v15, %v1068_v14 }
 0x14a   :  { %v1048_v57 = vrot.slane %v1047_v17, 4  ;;  %v1084_v20 = vadd.f32 %v1083_v18, %v1069_v16 }
 0x14c   :  { %v1049_v19 = vadd.f32 %v1048_v57, %v1047_v17  ;;  %v1085_v22 = vrot.slane %v1084_v20, 4 }
 0x14e   :  { %v1050_v23 = vrot.slane %v1049_v19, 2  ;;  %v1086_v25 = vadd.f32 %v1085_v22, %v1084_v20 }
 0x150   :  { %v1051_v58 = vadd.f32 %v1050_v23, %v1049_v19  ;;  %v1087_v24 = vrot.slane %v1086_v25, 2 }
 0x152   :  { %v1052_v26 = vrot.slane %v1051_v58, 1  ;;  %v1088_v27 = vadd.f32 %v1087_v24, %v1086_v25 }
 0x154   :  { %v1089_v28 = vrot.slane %v1088_v27, 1  ;;  %v1053_v29 = vadd.f32 %v1052_v26, %v1051_v58 }
 0x156   :  { %v1090_v30 = vadd.f32 %v1089_v28, %v1088_v27 }
 0x158   :  { %v1092_v31 = vsel %vm1091_vm1, %v1053_v29, %v1090_v30 }
 0x159   :  { %1093 = vst [vmem:[%s1872_s3] sm:$0x3] %v1092_v31 }

// kernel: _generator_forward.14
= control target key start
LH: loop header
LB: loop body
LE: loop exit
PB: predicated region body
PF: predicated region fallthrough
CT: control target
= control target key end

     0   :  { %s763_s12 = smov 0   ;;  %s765_s13 = smov 0   ;;  %s1101_s0 = inlined_call_operand.vmem [shape: bf16[128,128], index: 0, kind: input, shape index: {}]   ;;  %s1102_s1 = inlined_call_operand.vmem [shape: f32[1,128], index: 1, kind: input, shape index: {}]   ;;  %s1103_s2 = inlined_call_operand.vmem [shape: f32[1,128], index: 2, kind: input, shape index: {}]   ;;  %s1104_s3 = inlined_call_operand.vmem [shape: bf16[16,2,8,64], index: 3, kind: output, shape index: {}]  }
   0x1   :  { %s767_s14 = smov 0   ;;  %s769_s15 = smov 0  }
   0x2   :  { %s771_s16 = smov 0  }
   0x3 LB: > { %s570_s17 = sadd.s32 4294967295, %s740_s16   ;;  %s22_s18 = sadd.s32 1, %s736_s15  ;;  %s740_s16 = sphi %s771_s16, %s13_s16   ;;  %s736_s15 = sphi %s769_s15, %s1111_s15   ;;  %s732_s14 = sphi %s767_s14, %s1110_s14   ;;  %s728_s13 = sphi %s765_s13, %s1109_s13   ;;  %s724_s12 = sphi %s763_s12, %s1108_s12  }
   0x4   : > { %p23_p0 = scmp.ge.s32.totalorder %s22_s18, 2  ;;  %s102_s19 = sadd.s32 1, %s728_s13 }
   0x5   : > { %p112_p1 = scmp.ne.s32.totalorder %s728_s13, %s724_s12  ;;  %p113_p2 = scmp.eq.s32.totalorder %s570_s17, 1 }
   0x6   : > { %s1113_s18 = smov (%p23_p0, %s22_s18), 0  ;;  %p574_p4 = scmp.ge.s32.totalorder %s740_s16, 1 }
   0x7   : > { %p795_p3 = por %p113_p2, %p112_p1  ;;  %s98_s21 = ssub.s32 %s736_s15, %s1113_s18 }
   0x8   : > { %p152_p5 = scmp.lt.s32.totalorder %s740_s16, 3  ;;  %p100_p6 = scmp.eq.s32.totalorder %s98_s21, 0 }
   0xa   : > { %p153_p7 = pnand %p574_p4, %p152_p5 }
   0xb   : > { %s804_s22 = scalar_select %p100_p6, %s728_s13, %s102_s19  }
   0xc   : > { %156 = sbr.rel (%p153_p7) target bundleno = 171 (0xab), region = 32  ;;  %s742_s24 = smov (!%p153_p7), 64  }
   0xd   : > { %p276_p8 = scmp.eq.s32.totalorder (!%p153_p7), %s732_s14, 0  ;;  %s172_s26 = sand.u32 (!%p153_p7), 1, %s724_s12  }
   0xe   : > { %s575_s27 = sshll.u32 (!%p153_p7), %s172_s26, 6 }
   0xf   : > { %s982_s12 = scalar_lea.vmem (!%p153_p7), [#allocation2], %s575_s27 }
  0x11   : > { %v615_v0 = vld [vmem:[%s1101_s0 + $0x10] sm:$0xff]   ;;  %v812_v1 = vld [vmem:[%s1102_s1] ss:$0 sm:$0xff]  ;;  %v616_v5 = vld [vmem:[%s1101_s0 + $0x18] sm:$0xff]   ;;  %s277_s25 = scalar_select %p276_p8, 1, 0 }
  0x12   : > { %v592_v2 = vunpack.c.l.bf16 %v615_v0  ;;  %v593_v3 = vunpack.c.h.bf16 %v615_v0  ;;  %v583_v4 = vld [vmem:[%s1101_s0] sm:$0xff]   ;;  %v614_v6 = vld [vmem:[%s1101_s0 + $0x8] sm:$0xff]   ;;  %v596_v10 = vunpack.c.l.bf16 %v616_v5  ;;  %v597_v11 = vunpack.c.h.bf16 %v616_v5  ;;  %v620_v38 = vld [vmem:[%s1101_s0 + $0x38] sm:$0xff]   ;;  %s579_s28 = sshll.u32 (%p795_p3), %s732_s14, 2 }
  0x13   : > { %v826_v7 = vld [vmem:[%s1103_s2] ss:$0 sm:$0xff]  ;;  %v584_v8 = vunpack.c.l.bf16 %v583_v4  ;;  %v585_v9 = vunpack.c.h.bf16 %v583_v4  ;;  %v588_v14 = vunpack.c.l.bf16 %v614_v6  ;;  %v589_v15 = vunpack.c.h.bf16 %v614_v6  ;;  %v618_v28 = vld [vmem:[%s1101_s0 + $0x28] sm:$0xff]   ;;  %v619_v43 = vld [vmem:[%s1101_s0 + $0x30] sm:$0xff]   ;;  %s404_s4 = scalar_lea.vmem (%p795_p3), %s1104_s3, %s579_s28 }
  0x14   : > { %v225_v12 = vmul.f32 %v592_v2, %v812_v1  ;;  %v226_v13 = vmul.f32 %v593_v3, %v812_v1  ;;  %v227_v18 = vmul.f32 %v596_v10, %v812_v1  ;;  %v228_v19 = vmul.f32 %v597_v11, %v812_v1  ;;  %v617_v33 = vld [vmem:[%s1101_s0 + $0x20] sm:$0xff]  }
  0x15   : > { %v221_v16 = vmul.f32 %v584_v8, %v812_v1  ;;  %v222_v17 = vmul.f32 %v585_v9, %v812_v1  ;;  %v223_v22 = vmul.f32 %v588_v14, %v812_v1  ;;  %v224_v23 = vmul.f32 %v589_v15, %v812_v1 }
  0x16   : > { %v835_v20 = vadd.f32 %v826_v7, %v225_v12  ;;  %v838_v21 = vadd.f32 %v826_v7, %v226_v13  ;;  %v849_v26 = vadd.f32 %v826_v7, %v227_v18  ;;  %v852_v27 = vadd.f32 %v826_v7, %v228_v19 }
  0x17   : > { %v843_v24 = vadd.f32 %v826_v7, %v221_v16  ;;  %v846_v25 = vadd.f32 %v826_v7, %v222_v17  ;;  %v860_v31 = vadd.f32 %v826_v7, %v223_v22  ;;  %v863_v32 = vadd.f32 %v826_v7, %v224_v23 }
  0x18   : > { %v264_v29 = vmax.f32 %v835_v20, 0.0  ;;  %v265_v30 = vmax.f32 %v838_v21, 0.0  ;;  %v266_v36 = vmax.f32 %v849_v26, 0.0  ;;  %v267_v37 = vmax.f32 %v852_v27, 0.0 }
  0x19   : > { %v260_v34 = vmax.f32 %v843_v24, 0.0  ;;  %v261_v35 = vmax.f32 %v846_v25, 0.0  ;;  %v262_v40 = vmax.f32 %v860_v31, 0.0  ;;  %v263_v41 = vmax.f32 %v863_v32, 0.0 }
  0x1a   : > { %v672_v39 = vpack.i.bf16 %v265_v30, %v264_v29  ;;  %v604_v42 = vunpack.c.l.bf16 %v618_v28  ;;  %v677_v45 = vpack.i.bf16 %v267_v37, %v266_v36  ;;  %v605_v46 = vunpack.c.h.bf16 %v618_v28 }
  0x1b   : > { %v662_v44 = vpack.i.bf16 %v261_v35, %v260_v34  ;;  %v600_v47 = vunpack.c.l.bf16 %v617_v33  ;;  %v667_v48 = vpack.i.bf16 %v263_v41, %v262_v40  ;;  %v601_v50 = vunpack.c.h.bf16 %v617_v33 }
  0x1c   : > { %673 = vrot.lane.b32.xlu1 %v672_v39, %s742_s24  ;;  %v231_v49 = vmul.f32 %v604_v42, %v812_v1  ;;  %v612_v51 = vunpack.c.l.bf16 %v620_v38  ;;  %v232_v52 = vmul.f32 %v605_v46, %v812_v1  ;;  %v613_v54 = vunpack.c.h.bf16 %v620_v38 }
  0x1d   : > { %663 = vrot.lane.b32.xlu0 %v662_v44, %s742_s24  ;;  %v229_v53 = vmul.f32 %v600_v47, %v812_v1  ;;  %v608_v55 = vunpack.c.l.bf16 %v619_v43  ;;  %v230_v57 = vmul.f32 %v601_v50, %v812_v1  ;;  %v609_v59 = vunpack.c.h.bf16 %v619_v43 }
  0x1e   : > { %v902_v56 = vadd.f32 %v826_v7, %v231_v49  ;;  %v235_v58 = vmul.f32 %v612_v51, %v812_v1  ;;  %v907_v60 = vadd.f32 %v826_v7, %v232_v52  ;;  %v236_v62 = vmul.f32 %v613_v54, %v812_v1 }
  0x1f   : > { %v910_v61 = vadd.f32 %v826_v7, %v229_v53  ;;  %v233_v63 = vmul.f32 %v608_v55, %v812_v1  ;;  %v917_v2 = vadd.f32 %v826_v7, %v230_v57  ;;  %v234_v4 = vmul.f32 %v609_v59, %v812_v1 }
  0x20   : > { %678 = vrot.lane.b32.xlu1 %v677_v45, %s742_s24  ;;  %v270_v0 = vmax.f32 %v902_v56, 0.0  ;;  %v920_v3 = vadd.f32 %v826_v7, %v235_v58  ;;  %v271_v5 = vmax.f32 %v907_v60, 0.0  ;;  %v927_v8 = vadd.f32 %v826_v7, %v236_v62 }
  0x21   : > { %668 = vrot.lane.b32.xlu0 %v667_v48, %s742_s24  ;;  %v268_v6 = vmax.f32 %v910_v61, 0.0  ;;  %v930_v9 = vadd.f32 %v826_v7, %v233_v63  ;;  %v269_v10 = vmax.f32 %v917_v2, 0.0  ;;  %v935_v1 = vadd.f32 %v826_v7, %v234_v4 }
  0x22   : > { %v274_v11 = vmax.f32 %v920_v3, 0.0  ;;  %v687_v12 = vpack.i.bf16 %v271_v5, %v270_v0  ;;  %v275_v13 = vmax.f32 %v927_v8, 0.0  ;;  %v278_v18 = vstv %s277_s25 }
  0x23   : > { %v272_v14 = vmax.f32 %v930_v9, 0.0  ;;  %v682_v15 = vpack.i.bf16 %v269_v10, %v268_v6  ;;  %v273_v16 = vmax.f32 %v935_v1, 0.0  ;;  %vm962_vm0 = vcmp.eq.s32.totalorder %v278_v18, 1 }
  0x24   : > { %688 = vrot.lane.b32.xlu1 %v687_v12, %s742_s24  ;;  %v697_v7 = vpack.i.bf16 %v275_v13, %v274_v11  ;;  %vm376_vm1 = vcmask 519168  }
  0x25   : > { %683 = vrot.lane.b32.xlu0 %v682_v15, %s742_s24  ;;  %v692_v17 = vpack.i.bf16 %v273_v16, %v272_v14 }
  0x28   : > { %698 = vrot.lane.b32.xlu1 %v697_v7, %s742_s24 }
  0x29   : > { %693 = vrot.lane.b32.xlu0 %v692_v17, %s742_s24 }
  0x8e   : > { %v674_v22 = vpop.permute.xlu1 %673 }
  0x8f   : > { %v676_v23 = vunpack.i.h.bf16 %v674_v22  ;;  %v675_v28 = vunpack.i.l.bf16 %v674_v22  ;;  %v664_v33 = vpop.permute.xlu0 %663 }
  0x90   : > { %v666_v38 = vunpack.i.h.bf16 %v664_v33  ;;  %v665_v39 = vunpack.i.l.bf16 %v664_v33 }
  0x91   : > { %v349_v42 = vsel %vm962_vm0, %v265_v30, %v676_v23  ;;  %v348_v43 = vsel %vm962_vm0, %v264_v29, %v675_v28 }
  0x92   : > { %v365_v44 = vpack.c.bf16 %v349_v42, %v349_v42  ;;  %v364_v45 = vpack.c.bf16 %v348_v43, %v348_v43  ;;  %v345_v46 = vsel %vm962_vm0, %v261_v35, %v666_v38  ;;  %v344_v21 = vsel %vm962_vm0, %v260_v34, %v665_v39  ;;  %v679_v47 = vpop.permute.xlu1 %678 }
  0x93   : > { %v361_v48 = vpack.c.bf16 %v345_v46, %v345_v46  ;;  %v360_v30 = vpack.c.bf16 %v344_v21, %v344_v21  ;;  %v681_v49 = vunpack.i.h.bf16 %v679_v47  ;;  %v680_v20 = vunpack.i.l.bf16 %v679_v47  ;;  %v669_v50 = vpop.permute.xlu0 %668 }
  0x94   : > { %381 = vst.msk [vmem:[%s982_s12 + $0x10] sm:$0xf] %vm376_vm1, %v364_v45  ;;  %382 = vst.msk [vmem:[%s982_s12 + $0x14] sm:$0xf] %vm376_vm1, %v365_v44  ;;  %v671_v24 = vunpack.i.h.bf16 %v669_v50  ;;  %v670_v25 = vunpack.i.l.bf16 %v669_v50 }
  0x95   : > { %377 = vst.msk [vmem:[%s982_s12] sm:$0xf] %vm376_vm1, %v360_v30  ;;  %378 = vst.msk [vmem:[%s982_s12 + $0x4] sm:$0xf] %vm376_vm1, %v361_v48  ;;  %v351_v29 = vsel %vm962_vm0, %v267_v37, %v681_v49  ;;  %v350_v34 = vsel %vm962_vm0, %v266_v36, %v680_v20 }
  0x96   : > { %v367_v35 = vpack.c.bf16 %v351_v29, %v351_v29  ;;  %v366_v51 = vpack.c.bf16 %v350_v34, %v350_v34  ;;  %v347_v52 = vsel %vm962_vm0, %v263_v41, %v671_v24  ;;  %v346_v27 = vsel %vm962_vm0, %v262_v40, %v670_v25  ;;  %v689_v37 = vpop.permute.xlu1 %688 }
  0x97   : > { %v363_v53 = vpack.c.bf16 %v347_v52, %v347_v52  ;;  %v362_v54 = vpack.c.bf16 %v346_v27, %v346_v27  ;;  %v691_v26 = vunpack.i.h.bf16 %v689_v37  ;;  %v690_v36 = vunpack.i.l.bf16 %v689_v37  ;;  %v684_v55 = vpop.permute.xlu0 %683 }
  0x98   : > { %383 = vst.msk [vmem:[%s982_s12 + $0x18] sm:$0xf] %vm376_vm1, %v366_v51  ;;  %384 = vst.msk [vmem:[%s982_s12 + $0x1c] sm:$0xf] %vm376_vm1, %v367_v35  ;;  %v686_v31 = vunpack.i.h.bf16 %v684_v55  ;;  %v685_v32 = vunpack.i.l.bf16 %v684_v55 }
  0x99   : > { %379 = vst.msk [vmem:[%s982_s12 + $0x8] sm:$0xf] %vm376_vm1, %v362_v54  ;;  %380 = vst.msk [vmem:[%s982_s12 + $0xc] sm:$0xf] %vm376_vm1, %v363_v53  ;;  %v355_v40 = vsel %vm962_vm0, %v271_v5, %v691_v26  ;;  %v354_v41 = vsel %vm962_vm0, %v270_v0, %v690_v36 }
  0x9a   : > { %v371_v57 = vpack.c.bf16 %v355_v40, %v355_v40  ;;  %v370_v58 = vpack.c.bf16 %v354_v41, %v354_v41  ;;  %v353_v59 = vsel %vm962_vm0, %v269_v10, %v686_v31  ;;  %v352_v60 = vsel %vm962_vm0, %v268_v6, %v685_v32  ;;  %v699_v62 = vpop.permute.xlu1 %698 }
  0x9b   : > { %v369_v63 = vpack.c.bf16 %v353_v59, %v353_v59  ;;  %v368_v56 = vpack.c.bf16 %v352_v60, %v352_v60  ;;  %v701_v4 = vunpack.i.h.bf16 %v699_v62  ;;  %v700_v5 = vunpack.i.l.bf16 %v699_v62  ;;  %v694_v0 = vpop.permute.xlu0 %693 }
  0x9c   : > { %387 = vst.msk [vmem:[%s982_s12 + $0x28] sm:$0xf] %vm376_vm1, %v370_v58  ;;  %388 = vst.msk [vmem:[%s982_s12 + $0x2c] sm:$0xf] %vm376_vm1, %v371_v57  ;;  %v696_v2 = vunpack.i.h.bf16 %v694_v0  ;;  %v695_v10 = vunpack.i.l.bf16 %v694_v0  ;;  %v421_v3 = vld [vmem:[%s982_s12] sm:$0xf] (%p795_p3) }
  0x9d   : > { %385 = vst.msk [vmem:[%s982_s12 + $0x20] sm:$0xf] %vm376_vm1, %v368_v56  ;;  %386 = vst.msk [vmem:[%s982_s12 + $0x24] sm:$0xf] %vm376_vm1, %v369_v63  ;;  %v359_v61 = vsel %vm962_vm0, %v275_v13, %v701_v4  ;;  %v358_v6 = vsel %vm962_vm0, %v274_v11, %v700_v5  ;;  %399 = sbr.rel (!%p795_p3) target bundleno = 171 (0xab), region = 36 }
  0x9e   : > { %v375_v12 = vpack.c.bf16 %v359_v61, %v359_v61  ;;  %v374_v15 = vpack.c.bf16 %v358_v6, %v358_v6  ;;  %v357_v7 = vsel %vm962_vm0, %v273_v16, %v696_v2  ;;  %v356_v8 = vsel %vm962_vm0, %v272_v14, %v695_v10  ;;  %v423_v9 = vld [vmem:[%s982_s12 + $0x4] sm:$0xf] (%p795_p3)  ;;  %v429_v13 = vld [vmem:[%s982_s12 + $0x10] sm:$0xf] (%p795_p3)  ;;  %422 = vst [vmem:[%s404_s4] sm:$0xf] (%p795_p3), %v421_v3 }
  0x9f   : > { %v373_v17 = vpack.c.bf16 %v357_v7, %v357_v7  ;;  %v372_v18 = vpack.c.bf16 %v356_v8, %v356_v8  ;;  %424 = vst [vmem:[%s404_s4 + $0x8] sm:$0xf] (%p795_p3), %v423_v9  ;;  %430 = vst [vmem:[%s404_s4 + $0x20] sm:$0xf] (%p795_p3), %v429_v13  ;;  %v431_v14 = vld [vmem:[%s982_s12 + $0x14] sm:$0xf] (%p795_p3) }
  0xa0   : > { %391 = vst.msk [vmem:[%s982_s12 + $0x38] sm:$0xf] %vm376_vm1, %v374_v15  ;;  %392 = vst.msk [vmem:[%s982_s12 + $0x3c] sm:$0xf] %vm376_vm1, %v375_v12  ;;  %v425_v11 = vld [vmem:[%s982_s12 + $0x8] sm:$0xf] (%p795_p3) }
  0xa1   : > { %389 = vst.msk [vmem:[%s982_s12 + $0x30] sm:$0xf] %vm376_vm1, %v372_v18  ;;  %390 = vst.msk [vmem:[%s982_s12 + $0x34] sm:$0xf] %vm376_vm1, %v373_v17  ;;  %v427_v1 = vld [vmem:[%s982_s12 + $0xc] sm:$0xf] (%p795_p3) }
  0xa2   : > { %426 = vst [vmem:[%s404_s4 + $0x10] sm:$0xf] %v425_v11  ;;  %428 = vst [vmem:[%s404_s4 + $0x18] sm:$0xf] %v427_v1  ;;  %v433_v16 = vld [vmem:[%s982_s12 + $0x18] sm:$0xf] }
  0xa3   : > { %v435_v19 = vld [vmem:[%s982_s12 + $0x1c] sm:$0xf]  ;;  %432 = vst [vmem:[%s404_s4 + $0x28] sm:$0xf] %v431_v14  ;;  %434 = vst [vmem:[%s404_s4 + $0x30] sm:$0xf] %v433_v16 }
  0xa4   : > { %436 = vst [vmem:[%s404_s4 + $0x38] sm:$0xf] %v435_v19  ;;  %v437_v22 = vld [vmem:[%s982_s12 + $0x20] sm:$0xf]  ;;  %v439_v23 = vld [vmem:[%s982_s12 + $0x24] sm:$0xf] }
  0xa5   : > { %v441_v28 = vld [vmem:[%s982_s12 + $0x28] sm:$0xf]  ;;  %438 = vst [vmem:[%s404_s4 + $0x40] sm:$0xf] %v437_v22  ;;  %440 = vst [vmem:[%s404_s4 + $0x48] sm:$0xf] %v439_v23 }
  0xa6   : > { %442 = vst [vmem:[%s404_s4 + $0x50] sm:$0xf] %v441_v28  ;;  %v443_v33 = vld [vmem:[%s982_s12 + $0x2c] sm:$0xf] }
  0xa7   : > { %444 = vst [vmem:[%s404_s4 + $0x58] sm:$0xf] %v443_v33  ;;  %v449_v42 = vld [vmem:[%s982_s12 + $0x38] sm:$0xf]  ;;  %v451_v43 = vld [vmem:[%s982_s12 + $0x3c] sm:$0xf] }
  0xa8   : > { %v445_v38 = vld [vmem:[%s982_s12 + $0x30] sm:$0xf]  ;;  %v447_v39 = vld [vmem:[%s982_s12 + $0x34] sm:$0xf]  ;;  %450 = vst [vmem:[%s404_s4 + $0x70] sm:$0xf] %v449_v42 }
  0xa9   : > { %446 = vst [vmem:[%s404_s4 + $0x60] sm:$0xf] %v445_v38  ;;  %448 = vst [vmem:[%s404_s4 + $0x68] sm:$0xf] %v447_v39 }
  0xaa   : > { %452 = vst [vmem:[%s404_s4 + $0x78] sm:$0xf] %v451_v43 }
  0xab PF: > { %s13_s16 = sadd.s32 1, %s740_s16   ;;  %s1108_s12 = smov %s728_s13 }
  0xac   : > { %p10_p9 = scmp.ge.s32.totalorder %s13_s16, 4   ;;  %s1109_s13 = smov %s804_s22 }
  0xad   : > { %s1110_s14 = smov %s736_s15  ;;  %s1111_s15 = smov %s1113_s18 }
  0xae   :  { %12 = sbr.rel (!%p10_p9) target bundleno = 3 (0x3), region = 103 }

// kernel: tile.73
= control target key start
LH: loop header
LB: loop body
LE: loop exit
PB: predicated region body
PF: predicated region fallthrough
CT: control target
= control target key end

     0   :  { %s22_s0 = inlined_call_operand.vmem [shape: f32[8], index: 0, kind: input, shape index: {}]   ;;  %s23_s1 = inlined_call_operand.vmem [shape: f32[4,8], index: 1, kind: output, shape index: {}]  }
   0x1   :  { %v4_v0 = vld [vmem:[%s22_s0] ss:$0 sm:$0xff] }
   0x2   :  { %5 = vst [vmem:[%s23_s1] sm:$0xf] %v4_v0 }

// kernel: tile.78
= control target key start
LH: loop header
LB: loop body
LE: loop exit
PB: predicated region body
PF: predicated region fallthrough
CT: control target
= control target key end

     0   :  { %vm8_vm0 = vcmask 64512   ;;  %s40_s8 = smov 8   ;;  %s41_s9 = smov 16   ;;  %vm14_vm1 = vcmask 261312   ;;  %vm20_vm2 = vcmask 195712   ;;  %vm26_vm3 = vcmask 130112   ;;  %s58_s0 = inlined_call_operand.vmem [shape: f32[4,8], index: 0, kind: input, shape index: {}]   ;;  %s59_s1 = inlined_call_operand.vmem [shape: f32[1,32], index: 1, kind: output, shape index: {}]  }
   0x1   :  { %v5_v0 = vld [vmem:[%s58_s0] sm:$0xf]  ;;  %s39_s0 = smov 24  }
   0x2   :  { %6 = vst [vmem:[#allocation1] sm:$0xf] %v5_v0 }
   0x9   :  { %v11_v1 = vld [vmem:[#allocation1 + $0x3] sm:$0x1]   ;;  %v23_v2 = vld [vmem:[#allocation1 + $0x1] sm:$0x1]   ;;  %v7_v3 = vld [vmem:[#allocation1] sm:$0x1]  }
   0xa   :  { %12 = vrot.lane.b32.xlu0 %v11_v1, %s39_s0  ;;  %24 = vrot.lane.b32.xlu1 %v23_v2, %s40_s8  ;;  %v17_v4 = vld [vmem:[#allocation1 + $0x2] sm:$0x1]   ;;  %9 = vst.msk [vmem:[#allocation0] sm:$0x1] %vm8_vm0, %v7_v3  }
   0xe   :  { %18 = vrot.lane.b32.xlu0 %v17_v4, %s41_s9 }
  0x7c   :  { %v13_v5 = vpop.permute.xlu0 %12   ;;  %v25_v6 = vpop.permute.xlu1 %24  }
  0x7d   :  { %15 = vst.msk [vmem:[#allocation0] sm:$0x1] %vm14_vm1, %v13_v5  }
  0x80   :  { %v19_v7 = vpop.permute.xlu0 %18  }
  0x81   :  { %21 = vst.msk [vmem:[#allocation0] sm:$0x1] %vm20_vm2, %v19_v7  }
  0x82   :  { %27 = vst.msk [vmem:[#allocation0] sm:$0x1] %vm26_vm3, %v25_v6  }
  0x89   :  { %v32_v8 = vld [vmem:[#allocation0] sm:$0x1] }
  0x8a   :  { %35 = vst [vmem:[%s59_s1] sm:$0x1] %v32_v8 }

// kernel: _generator_forward.16
= control target key start
LH: loop header
LB: loop body
LE: loop exit
PB: predicated region body
PF: predicated region fallthrough
CT: control target
= control target key end

     0   :  { %s1299_s12 = smov 0   ;;  %s1301_s13 = smov 0   ;;  %s1874_s0 = inlined_call_operand.vmem [shape: bf16[512,32], index: 0, kind: input, shape index: {}]   ;;  %s1875_s1 = inlined_call_operand.vmem [shape: f32[1,32], index: 1, kind: input, shape index: {}]   ;;  %s1876_s2 = inlined_call_operand.vmem [shape: f32[1,32], index: 2, kind: input, shape index: {}]   ;;  %s1877_s3 = inlined_call_operand.vmem [shape: bf16[32,2,16,16], index: 3, kind: output, shape index: {}]  }
   0x1   :  { %s1303_s14 = smov 0   ;;  %s1305_s15 = smov 0  }
   0x2   :  { %s1307_s16 = smov 0   ;;  %s1309_s17 = smov 0  }
   0x3   :  { %s1311_s18 = smov 0  }
   0x4 LB: > { %s22_s19 = sadd.s32 1, %s1268_s16  ;;  %s25_s20 = sadd.s32 1, %s1272_s17  ;;  %s1276_s18 = sphi %s1311_s18, %s13_s18   ;;  %s1272_s17 = sphi %s1309_s17, %s1914_s17   ;;  %s1268_s16 = sphi %s1307_s16, %s1913_s16   ;;  %s1264_s15 = sphi %s1305_s15, %s1912_s15   ;;  %s1260_s14 = sphi %s1303_s14, %s1911_s14   ;;  %s1256_s13 = sphi %s1301_s13, %s1910_s13   ;;  %s1252_s12 = sphi %s1299_s12, %s1909_s12  }
   0x5   : > { %p23_p0 = scmp.ge.s32.totalorder %s22_s19, 2  ;;  %s924_s21 = sadd.s32 4294967295, %s1276_s18  }
   0x6   : > { %p112_p1 = scmp.ne.s32.totalorder %s1256_s13, %s1252_s12  ;;  %p113_p2 = scmp.eq.s32.totalorder %s924_s21, 3 }
   0x7   : > { %s1916_s19 = smov (%p23_p0, %s22_s19), 0  ;;  %s1918_s20 = smov (!%p23_p0, %s25_s20), %s1272_s17 }
   0x8   : > { %s98_s22 = ssub.s32 %s1268_s16, %s1916_s19  ;;  %p27_p3 = scmp.ge.s32.totalorder %s1918_s20, 2 }
   0x9   : > { %p928_p4 = scmp.ge.s32.totalorder %s1276_s18, 1  ;;  %p1345_p5 = por %p113_p2, %p112_p1 }
   0xa   : > { %p152_p6 = scmp.lt.s32.totalorder %s1276_s18, 5  ;;  %s1920_s20 = smov (%p27_p3, %s1918_s20), 0 }
   0xb   : > { %s97_s24 = ssub.s32 %s1272_s17, %s1920_s20  ;;  %s102_s26 = sadd.s32 1, %s1256_s13 }
   0xc   : > { %p153_p7 = pnand %p928_p4, %p152_p6  ;;  %s99_s25 = sor.u32 %s98_s22, %s97_s24 }
   0xd   : > { %p100_p8 = scmp.eq.s32.totalorder %s99_s25, 0  ;;  %s930_s28 = sshll.u32 (!%p153_p7), %s1264_s15, 5 }
   0xe   : > { %156 = sbr.rel (%p153_p7) target bundleno = 193 (0xc1), region = 32  ;;  %p176_p9 = scmp.lt.s32.totalorder (!%p153_p7), %s930_s28, 63 }
   0xf   : > { %s1356_s27 = scalar_select %p100_p8, %s1256_s13, %s102_s26  }
  0x10   : > { %s1278_s10 = smov (!%p153_p7), 112   ;;  %p356_p10 = scmp.eq.s32.totalorder (!%p153_p7), %s1260_s14, 0 }
  0x11   : > { %s172_s21 = sand.u32 (!%p153_p7), 1, %s1252_s12  }
  0x12   : > { %s929_s22 = sshll.u32 (!%p153_p7), %s172_s21, 7 }
  0x13   : > { %s1922_s28 = smov (!%p176_p9, %s930_s28), 63  ;;  %v1367_v0 = vld [vmem:[%s1875_s1] ss:$0 sm:$0xff]  ;;  %vm648_vm1 = vcmask 125952   ;;  %s1652_s12 = scalar_lea.vmem [#allocation2], %s929_s22 }
  0x14   : > { %s931_s29 = sshll.u32 %s1922_s28, 2  ;;  %v1376_v9 = vld [vmem:[%s1876_s2] ss:$0 sm:$0xff]  ;;  %s968_s24 = sshll.u32 (%p1345_p5), %s1260_s14, 1 }
  0x15   : > { %s1362_s5 = scalar_lea.vmem %s1874_s0, %s931_s29  ;;  %s1005_s25 = sshll.u32 (%p1345_p5), %s1264_s15, 6 }
  0x16   : > { %v1071_v1 = vld [vmem:[%s1362_s5 + $0x10] sm:$0xff]   ;;  %v1007_v2 = vld [vmem:[%s1362_s5] sm:$0xff]   ;;  %v1072_v3 = vld [vmem:[%s1362_s5 + $0x18] sm:$0xff]   ;;  %s357_s11 = scalar_select %p356_p10, 1, 0 }
  0x17   : > { %v1016_v4 = vunpack.c.l.bf16 %v1071_v1  ;;  %v1017_v5 = vunpack.c.h.bf16 %v1071_v1  ;;  %v1008_v6 = vunpack.c.l.bf16 %v1007_v2  ;;  %v1009_v7 = vunpack.c.h.bf16 %v1007_v2  ;;  %v1070_v8 = vld [vmem:[%s1362_s5 + $0x8] sm:$0xff]   ;;  %v1073_v35 = vld [vmem:[%s1362_s5 + $0x20] sm:$0xff]   ;;  %v1076_v40 = vld [vmem:[%s1362_s5 + $0x38] sm:$0xff]   ;;  %s691_s23 = sadd.s32 (%p1345_p5), %s1005_s25, %s968_s24 }
  0x18   : > { %v1020_v10 = vunpack.c.l.bf16 %v1072_v3  ;;  %v1021_v11 = vunpack.c.h.bf16 %v1072_v3  ;;  %v1012_v12 = vunpack.c.l.bf16 %v1070_v8  ;;  %v1013_v13 = vunpack.c.h.bf16 %v1070_v8  ;;  %v1074_v30 = vld [vmem:[%s1362_s5 + $0x28] sm:$0xff]   ;;  %v1075_v45 = vld [vmem:[%s1362_s5 + $0x30] sm:$0xff]   ;;  %s970_s26 = sshll.u32 (%p1345_p5), %s691_s23, 2 }
  0x19   : > { %v257_v14 = vmul.f32 %v1016_v4, %v1367_v0  ;;  %v258_v15 = vmul.f32 %v1017_v5, %v1367_v0  ;;  %v253_v16 = vmul.f32 %v1008_v6, %v1367_v0  ;;  %v254_v17 = vmul.f32 %v1009_v7, %v1367_v0  ;;  %v1078_v3 = vld [vmem:[%s1362_s5 + $0x48] sm:$0xff]   ;;  %s693_s30 = scalar_lea.vmem (%p1345_p5), %s1877_s3, %s970_s26 }
  0x1a   : > { %v259_v18 = vmul.f32 %v1020_v10, %v1367_v0  ;;  %v260_v19 = vmul.f32 %v1021_v11, %v1367_v0  ;;  %v255_v20 = vmul.f32 %v1012_v12, %v1367_v0  ;;  %v256_v21 = vmul.f32 %v1013_v13, %v1367_v0  ;;  %v1077_v13 = vld [vmem:[%s1362_s5 + $0x40] sm:$0xff]  }
  0x1b   : > { %v1387_v22 = vadd.f32 %v1376_v9, %v257_v14  ;;  %v1390_v23 = vadd.f32 %v1376_v9, %v258_v15  ;;  %v1393_v24 = vadd.f32 %v1376_v9, %v253_v16  ;;  %v1396_v25 = vadd.f32 %v1376_v9, %v254_v17 }
  0x1c   : > { %v1399_v26 = vadd.f32 %v1376_v9, %v259_v18  ;;  %v1402_v27 = vadd.f32 %v1376_v9, %v260_v19  ;;  %v1405_v28 = vadd.f32 %v1376_v9, %v255_v20  ;;  %v1408_v29 = vadd.f32 %v1376_v9, %v256_v21  ;;  %v1080_v18 = vld [vmem:[%s1362_s5 + $0x58] sm:$0xff]  }
  0x1d   : > { %v328_v31 = vmax.f32 %v1387_v22, 0.0  ;;  %v329_v32 = vmax.f32 %v1390_v23, 0.0  ;;  %v324_v33 = vmax.f32 %v1393_v24, 0.0  ;;  %v325_v34 = vmax.f32 %v1396_v25, 0.0 }
  0x1e   : > { %v330_v36 = vmax.f32 %v1399_v26, 0.0  ;;  %v331_v37 = vmax.f32 %v1402_v27, 0.0  ;;  %v326_v38 = vmax.f32 %v1405_v28, 0.0  ;;  %v327_v39 = vmax.f32 %v1408_v29, 0.0 }
  0x1f   : > { %v1152_v41 = vpack.i.bf16 %v329_v32, %v328_v31  ;;  %v1142_v42 = vpack.i.bf16 %v325_v34, %v324_v33  ;;  %v1028_v43 = vunpack.c.l.bf16 %v1074_v30  ;;  %v1029_v44 = vunpack.c.h.bf16 %v1074_v30 }
  0x20   : > { %v1157_v46 = vpack.i.bf16 %v331_v37, %v330_v36  ;;  %v1147_v47 = vpack.i.bf16 %v327_v39, %v326_v38  ;;  %v1024_v48 = vunpack.c.l.bf16 %v1073_v35  ;;  %v1025_v49 = vunpack.c.h.bf16 %v1073_v35  ;;  %v1079_v35 = vld [vmem:[%s1362_s5 + $0x50] sm:$0xff]  }
  0x21   : > { %1153 = vrot.lane.b32.xlu1 %v1152_v41, %s1278_s10  ;;  %1143 = vrot.lane.b32.xlu0 %v1142_v42, %s1278_s10  ;;  %v263_v50 = vmul.f32 %v1028_v43, %v1367_v0  ;;  %v264_v51 = vmul.f32 %v1029_v44, %v1367_v0  ;;  %v1036_v52 = vunpack.c.l.bf16 %v1076_v40  ;;  %v1037_v53 = vunpack.c.h.bf16 %v1076_v40 }
  0x22   : > { %v261_v54 = vmul.f32 %v1024_v48, %v1367_v0  ;;  %v262_v55 = vmul.f32 %v1025_v49, %v1367_v0  ;;  %v1032_v56 = vunpack.c.l.bf16 %v1075_v45  ;;  %v1033_v57 = vunpack.c.h.bf16 %v1075_v45 }
  0x23   : > { %v1445_v58 = vadd.f32 %v1376_v9, %v263_v50  ;;  %v1448_v59 = vadd.f32 %v1376_v9, %v264_v51  ;;  %v267_v60 = vmul.f32 %v1036_v52, %v1367_v0  ;;  %v268_v61 = vmul.f32 %v1037_v53, %v1367_v0 }
  0x24   : > { %v1453_v62 = vadd.f32 %v1376_v9, %v261_v54  ;;  %v1456_v63 = vadd.f32 %v1376_v9, %v262_v55  ;;  %v265_v1 = vmul.f32 %v1032_v56, %v1367_v0  ;;  %v266_v2 = vmul.f32 %v1033_v57, %v1367_v0  ;;  %v1082_v56 = vld [vmem:[%s1362_s5 + $0x68] sm:$0xff]  }
  0x25   : > { %1158 = vrot.lane.b32.xlu1 %v1157_v46, %s1278_s10  ;;  %1148 = vrot.lane.b32.xlu0 %v1147_v47, %s1278_s10  ;;  %v334_v4 = vmax.f32 %v1445_v58, 0.0  ;;  %v335_v5 = vmax.f32 %v1448_v59, 0.0  ;;  %v1466_v6 = vadd.f32 %v1376_v9, %v267_v60  ;;  %v1469_v7 = vadd.f32 %v1376_v9, %v268_v61 }
  0x26   : > { %v332_v8 = vmax.f32 %v1453_v62, 0.0  ;;  %v333_v10 = vmax.f32 %v1456_v63, 0.0  ;;  %v1474_v11 = vadd.f32 %v1376_v9, %v265_v1  ;;  %v1477_v12 = vadd.f32 %v1376_v9, %v266_v2 }
  0x27   : > { %v1167_v14 = vpack.i.bf16 %v335_v5, %v334_v4  ;;  %v338_v15 = vmax.f32 %v1466_v6, 0.0  ;;  %v339_v16 = vmax.f32 %v1469_v7, 0.0  ;;  %v1044_v17 = vunpack.c.l.bf16 %v1078_v3 }
  0x28   : > { %v1162_v19 = vpack.i.bf16 %v333_v10, %v332_v8  ;;  %v336_v20 = vmax.f32 %v1474_v11, 0.0  ;;  %v337_v21 = vmax.f32 %v1477_v12, 0.0  ;;  %v1045_v30 = vunpack.c.h.bf16 %v1078_v3 }
  0x29   : > { %1168 = vrot.lane.b32.xlu1 %v1167_v14, %s1278_s10  ;;  %v1177_v40 = vpack.i.bf16 %v339_v16, %v338_v15  ;;  %v271_v41 = vmul.f32 %v1044_v17, %v1367_v0  ;;  %v1040_v42 = vunpack.c.l.bf16 %v1077_v13  ;;  %v1041_v43 = vunpack.c.h.bf16 %v1077_v13 }
  0x2a   : > { %1163 = vrot.lane.b32.xlu0 %v1162_v19, %s1278_s10  ;;  %v1172_v44 = vpack.i.bf16 %v337_v21, %v336_v20  ;;  %v272_v45 = vmul.f32 %v1045_v30, %v1367_v0  ;;  %v1052_v46 = vunpack.c.l.bf16 %v1080_v18  ;;  %v1053_v47 = vunpack.c.h.bf16 %v1080_v18 }
  0x2b   : > { %v1507_v48 = vadd.f32 %v1376_v9, %v271_v41  ;;  %v269_v49 = vmul.f32 %v1040_v42, %v1367_v0  ;;  %v270_v50 = vmul.f32 %v1041_v43, %v1367_v0  ;;  %v1048_v51 = vunpack.c.l.bf16 %v1079_v35 }
  0x2c   : > { %v1512_v52 = vadd.f32 %v1376_v9, %v272_v45  ;;  %v275_v53 = vmul.f32 %v1052_v46, %v1367_v0  ;;  %v276_v54 = vmul.f32 %v1053_v47, %v1367_v0  ;;  %v1049_v55 = vunpack.c.h.bf16 %v1079_v35  ;;  %v1081_v35 = vld [vmem:[%s1362_s5 + $0x60] sm:$0xff]  }
  0x2d   : > { %1178 = vrot.lane.b32.xlu1 %v1177_v40, %s1278_s10  ;;  %v342_v57 = vmax.f32 %v1507_v48, 0.0  ;;  %v1520_v60 = vadd.f32 %v1376_v9, %v269_v49  ;;  %v1523_v61 = vadd.f32 %v1376_v9, %v270_v50  ;;  %v273_v1 = vmul.f32 %v1048_v51, %v1367_v0  ;;  %v1083_v50 = vld [vmem:[%s1362_s5 + $0x70] sm:$0xff]  }
  0x2e   : > { %1173 = vrot.lane.b32.xlu0 %v1172_v44, %s1278_s10  ;;  %v343_v2 = vmax.f32 %v1512_v52, 0.0  ;;  %v1529_v3 = vadd.f32 %v1376_v9, %v275_v53  ;;  %v1532_v13 = vadd.f32 %v1376_v9, %v276_v54  ;;  %v274_v14 = vmul.f32 %v1049_v55, %v1367_v0  ;;  %v1084_v44 = vld [vmem:[%s1362_s5 + $0x78] sm:$0xff]  }
  0x2f   : > { %v1880_v17 = vmax.f32 %v1520_v60, 0.0  ;;  %v1891_v18 = vmax.f32 %v1523_v61, 0.0  ;;  %v1538_v19 = vadd.f32 %v1376_v9, %v273_v1  ;;  %v1060_v30 = vunpack.c.l.bf16 %v1082_v56 }
  0x30   : > { %v1187_v40 = vpack.i.bf16 %v343_v2, %v342_v57  ;;  %v1878_v41 = vmax.f32 %v1529_v3, 0.0  ;;  %v1879_v42 = vmax.f32 %v1532_v13, 0.0  ;;  %v1548_v43 = vadd.f32 %v1376_v9, %v274_v14 }
  0x31   : > { %v1182_v45 = vpack.i.bf16 %v1891_v18, %v1880_v17  ;;  %v1881_v46 = vmax.f32 %v1538_v19, 0.0  ;;  %v1061_v47 = vunpack.c.h.bf16 %v1082_v56  ;;  %v279_v49 = vmul.f32 %v1060_v30, %v1367_v0 }
  0x32   : > { %1188 = vrot.lane.b32.xlu1 %v1187_v40, %s1278_s10  ;;  %v1197_v51 = vpack.i.bf16 %v1879_v42, %v1878_v41  ;;  %v1882_v53 = vmax.f32 %v1548_v43, 0.0  ;;  %v1056_v54 = vunpack.c.l.bf16 %v1081_v35  ;;  %v1057_v55 = vunpack.c.h.bf16 %v1081_v35 }
  0x33   : > { %1183 = vrot.lane.b32.xlu0 %v1182_v45, %s1278_s10  ;;  %v280_v1 = vmul.f32 %v1061_v47, %v1367_v0  ;;  %v1567_v56 = vadd.f32 %v1376_v9, %v279_v49  ;;  %v1068_v14 = vunpack.c.l.bf16 %v1084_v44  ;;  %v1069_v30 = vunpack.c.h.bf16 %v1084_v44 }
  0x34   : > { %v1192_v40 = vpack.i.bf16 %v1882_v53, %v1881_v46  ;;  %v277_v41 = vmul.f32 %v1056_v54, %v1367_v0  ;;  %v278_v42 = vmul.f32 %v1057_v55, %v1367_v0  ;;  %v1064_v17 = vunpack.c.l.bf16 %v1083_v50 }
  0x35   : > { %v1576_v35 = vadd.f32 %v1376_v9, %v280_v1  ;;  %v1887_v45 = vmax.f32 %v1567_v56, 0.0  ;;  %v283_v47 = vmul.f32 %v1068_v14, %v1367_v0  ;;  %v284_v49 = vmul.f32 %v1069_v30, %v1367_v0 }
  0x36   : > { %1198 = vrot.lane.b32.xlu1 %v1197_v51, %s1278_s10  ;;  %v1583_v44 = vadd.f32 %v1376_v9, %v277_v41  ;;  %v1586_v46 = vadd.f32 %v1376_v9, %v278_v42  ;;  %v1065_v54 = vunpack.c.h.bf16 %v1083_v50  ;;  %v281_v55 = vmul.f32 %v1064_v17, %v1367_v0 }
  0x37   : > { %1193 = vrot.lane.b32.xlu0 %v1192_v40, %s1278_s10  ;;  %v1890_v1 = vmax.f32 %v1576_v35, 0.0  ;;  %v1592_v53 = vadd.f32 %v1376_v9, %v283_v47  ;;  %v1595_v14 = vadd.f32 %v1376_v9, %v284_v49 }
  0x38   : > { %v1883_v51 = vmax.f32 %v1583_v44, 0.0  ;;  %v1886_v41 = vmax.f32 %v1586_v46, 0.0  ;;  %v282_v42 = vmul.f32 %v1065_v54, %v1367_v0  ;;  %v1601_v50 = vadd.f32 %v1376_v9, %v281_v55 }
  0x39   : > { %v1207_v17 = vpack.i.bf16 %v1890_v1, %v1887_v45  ;;  %v1884_v30 = vmax.f32 %v1592_v53, 0.0  ;;  %v1885_v40 = vmax.f32 %v1595_v14, 0.0 }
  0x3a   : > { %v1202_v47 = vpack.i.bf16 %v1886_v41, %v1883_v51  ;;  %v1614_v0 = vadd.f32 %v1376_v9, %v282_v42  ;;  %v1888_v49 = vmax.f32 %v1601_v50, 0.0  ;;  %v358_v9 = vstv %s357_s11 }
  0x3b   : > { %1208 = vrot.lane.b32.xlu1 %v1207_v17, %s1278_s10  ;;  %v1217_v54 = vpack.i.bf16 %v1885_v40, %v1884_v30  ;;  %vm1632_vm0 = vcmp.eq.s32.totalorder %v358_v9, 1 }
  0x3c   : > { %1203 = vrot.lane.b32.xlu0 %v1202_v47, %s1278_s10  ;;  %v1889_v55 = vmax.f32 %v1614_v0, 0.0 }
  0x3e   : > { %v1212_v51 = vpack.i.bf16 %v1889_v55, %v1888_v49 }
  0x3f   : > { %1218 = vrot.lane.b32.xlu1 %v1217_v54, %s1278_s10 }
  0x40   : > { %1213 = vrot.lane.b32.xlu0 %v1212_v51, %s1278_s10 }
  0x93   : > { %v1154_v17 = vpop.permute.xlu1 %1153  ;;  %v1144_v47 = vpop.permute.xlu0 %1143 }
  0x94   : > { %v1156_v30 = vunpack.i.h.bf16 %v1154_v17  ;;  %v1155_v40 = vunpack.i.l.bf16 %v1154_v17  ;;  %v1146_v41 = vunpack.i.h.bf16 %v1144_v47  ;;  %v1145_v45 = vunpack.i.l.bf16 %v1144_v47 }
  0x96   : > { %v493_v51 = vsel %vm1632_vm0, %v329_v32, %v1156_v30  ;;  %v492_v54 = vsel %vm1632_vm0, %v328_v31, %v1155_v40  ;;  %v489_v9 = vsel %vm1632_vm0, %v325_v34, %v1146_v41  ;;  %v488_v17 = vsel %vm1632_vm0, %v324_v33, %v1145_v45 }
  0x97   : > { %v978_v47 = vpack.c.bf16 %v493_v51, %v493_v51  ;;  %v977_v23 = vpack.c.bf16 %v492_v54, %v492_v54  ;;  %v974_v49 = vpack.c.bf16 %v489_v9, %v489_v9  ;;  %v973_v55 = vpack.c.bf16 %v488_v17, %v488_v17  ;;  %v1159_v32 = vpop.permute.xlu1 %1158  ;;  %v1149_v30 = vpop.permute.xlu0 %1148 }
  0x98   : > { %v1161_v22 = vunpack.i.h.bf16 %v1159_v32  ;;  %v1160_v1 = vunpack.i.l.bf16 %v1159_v32  ;;  %v1151_v18 = vunpack.i.h.bf16 %v1149_v30  ;;  %v1150_v31 = vunpack.i.l.bf16 %v1149_v30 }
  0x99   : > { %653 = vst.msk [vmem:[%s1652_s12 + $0x10] sm:$0xf] %vm648_vm1, %v977_v23  ;;  %654 = vst.msk [vmem:[%s1652_s12 + $0x14] sm:$0xf] %vm648_vm1, %v978_v47 }
  0x9a   : > { %649 = vst.msk [vmem:[%s1652_s12] sm:$0xf] %vm648_vm1, %v973_v55  ;;  %650 = vst.msk [vmem:[%s1652_s12 + $0x4] sm:$0xf] %vm648_vm1, %v974_v49  ;;  %v495_v24 = vsel %vm1632_vm0, %v331_v37, %v1161_v22  ;;  %v494_v25 = vsel %vm1632_vm0, %v330_v36, %v1160_v1  ;;  %v491_v33 = vsel %vm1632_vm0, %v327_v39, %v1151_v18 }
  0x9b   : > { %v490_v34 = vsel %vm1632_vm0, %v326_v38, %v1150_v31  ;;  %v980_v27 = vpack.c.bf16 %v495_v24, %v495_v24  ;;  %v979_v45 = vpack.c.bf16 %v494_v25, %v494_v25  ;;  %v976_v41 = vpack.c.bf16 %v491_v33, %v491_v33  ;;  %v1169_v37 = vpop.permute.xlu1 %1168 }
  0x9c   : > { %v975_v40 = vpack.c.bf16 %v490_v34, %v490_v34  ;;  %v1171_v49 = vunpack.i.h.bf16 %v1169_v37  ;;  %v1170_v26 = vunpack.i.l.bf16 %v1169_v37  ;;  %v1164_v55 = vpop.permute.xlu0 %1163  ;;  %v1895_v25 = vmax.f32 %v1523_v61, 0.0 }
  0x9d   : > { %655 = vst.msk [vmem:[%s1652_s12 + $0x18] sm:$0xf] %vm648_vm1, %v979_v45  ;;  %656 = vst.msk [vmem:[%s1652_s12 + $0x1c] sm:$0xf] %vm648_vm1, %v980_v27  ;;  %v1166_v28 = vunpack.i.h.bf16 %v1164_v55  ;;  %v1165_v29 = vunpack.i.l.bf16 %v1164_v55  ;;  %v1896_v34 = vmax.f32 %v1520_v60, 0.0  ;;  %v1897_v60 = vmax.f32 %v1532_v13, 0.0 }
  0x9e   : > { %651 = vst.msk [vmem:[%s1652_s12 + $0x8] sm:$0xf] %vm648_vm1, %v975_v40  ;;  %652 = vst.msk [vmem:[%s1652_s12 + $0xc] sm:$0xf] %vm648_vm1, %v976_v41  ;;  %v499_v36 = vsel %vm1632_vm0, %v335_v5, %v1171_v49  ;;  %v498_v38 = vsel %vm1632_vm0, %v334_v4, %v1170_v26  ;;  %v1898_v49 = vmax.f32 %v1529_v3, 0.0 }
  0x9f   : > { %v984_v39 = vpack.c.bf16 %v499_v36, %v499_v36  ;;  %v983_v18 = vpack.c.bf16 %v498_v38, %v498_v38  ;;  %v497_v1 = vsel %vm1632_vm0, %v333_v10, %v1166_v28  ;;  %v496_v59 = vsel %vm1632_vm0, %v332_v8, %v1165_v29  ;;  %v1179_v5 = vpop.permute.xlu1 %1178 }
  0xa0   : > { %v982_v51 = vpack.c.bf16 %v497_v1, %v497_v1  ;;  %v981_v58 = vpack.c.bf16 %v496_v59, %v496_v59  ;;  %v1181_v54 = vunpack.i.h.bf16 %v1179_v5  ;;  %v1180_v9 = vunpack.i.l.bf16 %v1179_v5  ;;  %v1174_v17 = vpop.permute.xlu0 %1173 }
  0xa1   : > { %659 = vst.msk [vmem:[%s1652_s12 + $0x28] sm:$0xf] %vm648_vm1, %v983_v18  ;;  %660 = vst.msk [vmem:[%s1652_s12 + $0x2c] sm:$0xf] %vm648_vm1, %v984_v39  ;;  %v1176_v63 = vunpack.i.h.bf16 %v1174_v17  ;;  %v1175_v4 = vunpack.i.l.bf16 %v1174_v17  ;;  %v1899_v29 = vmax.f32 %v1548_v43, 0.0  ;;  %v1900_v38 = vmax.f32 %v1538_v19, 0.0 }
  0xa2   : > { %657 = vst.msk [vmem:[%s1652_s12 + $0x20] sm:$0xf] %vm648_vm1, %v981_v58  ;;  %658 = vst.msk [vmem:[%s1652_s12 + $0x24] sm:$0xf] %vm648_vm1, %v982_v51  ;;  %v503_v62 = vsel %vm1632_vm0, %v339_v16, %v1181_v54  ;;  %v502_v8 = vsel %vm1632_vm0, %v338_v15, %v1180_v9  ;;  %v1901_v51 = vmax.f32 %v1576_v35, 0.0  ;;  %v1902_v54 = vmax.f32 %v1567_v56, 0.0 }
  0xa3   : > { %v988_v10 = vpack.c.bf16 %v503_v62, %v503_v62  ;;  %v987_v47 = vpack.c.bf16 %v502_v8, %v502_v8  ;;  %v501_v23 = vsel %vm1632_vm0, %v337_v21, %v1176_v63  ;;  %v500_v7 = vsel %vm1632_vm0, %v336_v20, %v1175_v4 }
  0xa4   : > { %v986_v32 = vpack.c.bf16 %v501_v23, %v501_v23  ;;  %v985_v30 = vpack.c.bf16 %v500_v7, %v500_v7  ;;  %v1189_v16 = vpop.permute.xlu1 %1188  ;;  %v1903_v4 = vmax.f32 %v1586_v46, 0.0  ;;  %v1904_v8 = vmax.f32 %v1583_v44, 0.0  ;;  %v722_v42 = vld [vmem:[%s1652_s12 + $0x18] sm:$0xff] (%p1345_p5)  }
  0xa5   : > { %663 = vst.msk [vmem:[%s1652_s12 + $0x38] sm:$0xf] %vm648_vm1, %v987_v47  ;;  %664 = vst.msk [vmem:[%s1652_s12 + $0x3c] sm:$0xf] %vm648_vm1, %v988_v10  ;;  %v1191_v6 = vunpack.i.h.bf16 %v1189_v16  ;;  %v1190_v15 = vunpack.i.l.bf16 %v1189_v16  ;;  %v1184_v22 = vpop.permute.xlu0 %1183  ;;  %v1905_v44 = vmax.f32 %v1595_v14, 0.0 }
  0xa6   : > { %661 = vst.msk [vmem:[%s1652_s12 + $0x30] sm:$0xf] %vm648_vm1, %v985_v30  ;;  %662 = vst.msk [vmem:[%s1652_s12 + $0x34] sm:$0xf] %vm648_vm1, %v986_v32  ;;  %v1186_v11 = vunpack.i.h.bf16 %v1184_v22  ;;  %v1185_v12 = vunpack.i.l.bf16 %v1184_v22 }
  0xa7   : > { %v507_v20 = vsel %vm1632_vm0, %v343_v2, %v1191_v6  ;;  %v506_v21 = vsel %vm1632_vm0, %v342_v57, %v1190_v15  ;;  %v1906_v6 = vmax.f32 %v1592_v53, 0.0  ;;  %v710_v53 = vld [vmem:[%s1652_s12] sm:$0xff] (%p1345_p5)   ;;  %723 = vst [vmem:[%s693_s30 + $0x30] sm:$0xff] (%p1345_p5), %v722_v42  }
  0xa8   : > { %v992_v31 = vpack.c.bf16 %v507_v20, %v507_v20  ;;  %v991_v24 = vpack.c.bf16 %v506_v21, %v506_v21  ;;  %v505_v33 = vsel %vm1632_vm0, %v1895_v25, %v1186_v11  ;;  %v504_v52 = vsel %vm1632_vm0, %v1896_v34, %v1185_v12  ;;  %v1199_v2 = vpop.permute.xlu1 %1198  ;;  %711 = vst [vmem:[%s693_s30] sm:$0xff] (%p1345_p5), %v710_v53  }
  0xa9   : > { %v990_v27 = vpack.c.bf16 %v505_v33, %v505_v33  ;;  %v989_v48 = vpack.c.bf16 %v504_v52, %v504_v52  ;;  %v1201_v45 = vunpack.i.h.bf16 %v1199_v2  ;;  %v1200_v41 = vunpack.i.l.bf16 %v1199_v2  ;;  %v1194_v40 = vpop.permute.xlu0 %1193  ;;  %v726_v25 = vld [vmem:[%s1652_s12 + $0x20] sm:$0xff] (%p1345_p5)   ;;  %v730_v33 = vld [vmem:[%s1652_s12 + $0x28] sm:$0xff] (%p1345_p5)  }
  0xaa   : > { %667 = vst.msk [vmem:[%s1652_s12 + $0x48] sm:$0xf] %vm648_vm1, %v991_v24  ;;  %668 = vst.msk [vmem:[%s1652_s12 + $0x4c] sm:$0xf] %vm648_vm1, %v992_v31  ;;  %v1196_v57 = vunpack.i.h.bf16 %v1194_v40  ;;  %v1195_v61 = vunpack.i.l.bf16 %v1194_v40  ;;  %v1907_v12 = vmax.f32 %v1614_v0, 0.0  ;;  %v1908_v21 = vmax.f32 %v1601_v50, 0.0 }
  0xab   : > { %665 = vst.msk [vmem:[%s1652_s12 + $0x40] sm:$0xf] %vm648_vm1, %v989_v48  ;;  %666 = vst.msk [vmem:[%s1652_s12 + $0x44] sm:$0xf] %vm648_vm1, %v990_v27  ;;  %v511_v37 = vsel %vm1632_vm0, %v1897_v60, %v1201_v45  ;;  %v510_v26 = vsel %vm1632_vm0, %v1898_v49, %v1200_v41  ;;  %v714_v50 = vld [vmem:[%s1652_s12 + $0x8] sm:$0xff] (%p1345_p5)   ;;  %v718_v0 = vld [vmem:[%s1652_s12 + $0x10] sm:$0xff] (%p1345_p5)  }
  0xac   : > { %v996_v55 = vpack.c.bf16 %v511_v37, %v511_v37  ;;  %v995_v28 = vpack.c.bf16 %v510_v26, %v510_v26  ;;  %v509_v36 = vsel %vm1632_vm0, %v1899_v29, %v1196_v57  ;;  %v508_v13 = vsel %vm1632_vm0, %v1900_v38, %v1195_v61  ;;  %v738_v52 = vld [vmem:[%s1652_s12 + $0x38] sm:$0xff] (%p1345_p5)   ;;  %715 = vst [vmem:[%s693_s30 + $0x10] sm:$0xff] (%p1345_p5), %v714_v50  }
  0xad   : > { %v994_v39 = vpack.c.bf16 %v509_v36, %v509_v36  ;;  %v993_v18 = vpack.c.bf16 %v508_v13, %v508_v13  ;;  %v1209_v1 = vpop.permute.xlu1 %1208  ;;  %v734_v34 = vld [vmem:[%s1652_s12 + $0x30] sm:$0xff] (%p1345_p5)   ;;  %719 = vst [vmem:[%s693_s30 + $0x20] sm:$0xff] (%p1345_p5), %v718_v0   ;;  %727 = vst [vmem:[%s693_s30 + $0x40] sm:$0xff] (%p1345_p5), %v726_v25  }
  0xae   : > { %671 = vst.msk [vmem:[%s1652_s12 + $0x58] sm:$0xf] %vm648_vm1, %v995_v28  ;;  %672 = vst.msk [vmem:[%s1652_s12 + $0x5c] sm:$0xf] %vm648_vm1, %v996_v55  ;;  %v1211_v3 = vunpack.i.h.bf16 %v1209_v1  ;;  %v1210_v59 = vunpack.i.l.bf16 %v1209_v1  ;;  %v1204_v5 = vpop.permute.xlu0 %1203 }
  0xaf   : > { %669 = vst.msk [vmem:[%s1652_s12 + $0x50] sm:$0xf] %vm648_vm1, %v993_v18  ;;  %670 = vst.msk [vmem:[%s1652_s12 + $0x54] sm:$0xf] %vm648_vm1, %v994_v39  ;;  %v1206_v19 = vunpack.i.h.bf16 %v1204_v5  ;;  %v1205_v43 = vunpack.i.l.bf16 %v1204_v5 }
  0xb0   : > { %v515_v58 = vsel %vm1632_vm0, %v1901_v51, %v1211_v3  ;;  %v514_v9 = vsel %vm1632_vm0, %v1902_v54, %v1210_v59  ;;  %731 = vst [vmem:[%s693_s30 + $0x50] sm:$0xff] (%p1345_p5), %v730_v33   ;;  %735 = vst [vmem:[%s693_s30 + $0x60] sm:$0xff] (%p1345_p5), %v734_v34  }
  0xb1   : > { %v1000_v17 = vpack.c.bf16 %v515_v58, %v515_v58  ;;  %v999_v63 = vpack.c.bf16 %v514_v9, %v514_v9  ;;  %v513_v62 = vsel %vm1632_vm0, %v1903_v4, %v1206_v19  ;;  %v512_v35 = vsel %vm1632_vm0, %v1904_v8, %v1205_v43  ;;  %v1219_v10 = vpop.permute.xlu1 %1218  ;;  %v746_v27 = vld [vmem:[%s1652_s12 + $0x48] sm:$0xff] (%p1345_p5)   ;;  %739 = vst [vmem:[%s693_s30 + $0x70] sm:$0xff] (%p1345_p5), %v738_v52  }
  0xb2   : > { %v998_v47 = vpack.c.bf16 %v513_v62, %v513_v62  ;;  %v997_v56 = vpack.c.bf16 %v512_v35, %v512_v35  ;;  %v1221_v23 = vunpack.i.h.bf16 %v1219_v10  ;;  %v1220_v7 = vunpack.i.l.bf16 %v1219_v10  ;;  %v1214_v32 = vpop.permute.xlu0 %1213  ;;  %v742_v2 = vld [vmem:[%s1652_s12 + $0x40] sm:$0xff] (%p1345_p5)   ;;  %747 = vst [vmem:[%s693_s30 + $0x90] sm:$0xff] (%p1345_p5), %v746_v27  }
  0xb3   : > { %675 = vst.msk [vmem:[%s1652_s12 + $0x68] sm:$0xf] %vm648_vm1, %v999_v63  ;;  %676 = vst.msk [vmem:[%s1652_s12 + $0x6c] sm:$0xf] %vm648_vm1, %v1000_v17  ;;  %v1216_v46 = vunpack.i.h.bf16 %v1214_v32  ;;  %v1215_v30 = vunpack.i.l.bf16 %v1214_v32 }
  0xb4   : > { %673 = vst.msk [vmem:[%s1652_s12 + $0x60] sm:$0xf] %vm648_vm1, %v997_v56  ;;  %674 = vst.msk [vmem:[%s1652_s12 + $0x64] sm:$0xf] %vm648_vm1, %v998_v47  ;;  %v519_v16 = vsel %vm1632_vm0, %v1905_v44, %v1221_v23  ;;  %v518_v15 = vsel %vm1632_vm0, %v1906_v6, %v1220_v7  ;;  %687 = sbr.rel (!%p1345_p5) target bundleno = 193 (0xc1), region = 36 }
  0xb5   : > { %v1004_v22 = vpack.c.bf16 %v519_v16, %v519_v16  ;;  %v1003_v11 = vpack.c.bf16 %v518_v15, %v518_v15  ;;  %v517_v20 = vsel %vm1632_vm0, %v1907_v12, %v1216_v46  ;;  %v516_v14 = vsel %vm1632_vm0, %v1908_v21, %v1215_v30  ;;  %v754_v45 = vld [vmem:[%s1652_s12 + $0x58] sm:$0xff] (%p1345_p5)   ;;  %743 = vst [vmem:[%s693_s30 + $0x80] sm:$0xff] (%p1345_p5), %v742_v2  }
  0xb6   : > { %v1002_v31 = vpack.c.bf16 %v517_v20, %v517_v20  ;;  %v1001_v24 = vpack.c.bf16 %v516_v14, %v516_v14  ;;  %v750_v48 = vld [vmem:[%s1652_s12 + $0x50] sm:$0xff] (%p1345_p5)   ;;  %755 = vst [vmem:[%s693_s30 + $0xb0] sm:$0xff] (%p1345_p5), %v754_v45  }
  0xb7   : > { %679 = vst.msk [vmem:[%s1652_s12 + $0x78] sm:$0xf] %vm648_vm1, %v1003_v11  ;;  %680 = vst.msk [vmem:[%s1652_s12 + $0x7c] sm:$0xf] %vm648_vm1, %v1004_v22 }
  0xb8   : > { %677 = vst.msk [vmem:[%s1652_s12 + $0x70] sm:$0xf] %vm648_vm1, %v1001_v24  ;;  %678 = vst.msk [vmem:[%s1652_s12 + $0x74] sm:$0xf] %vm648_vm1, %v1002_v31 }
  0xb9   : > { %751 = vst [vmem:[%s693_s30 + $0xa0] sm:$0xff] %v750_v48  }
  0xba   : > { %v762_v40 = vld [vmem:[%s1652_s12 + $0x68] sm:$0xff]  }
  0xbb   : > { %v758_v41 = vld [vmem:[%s1652_s12 + $0x60] sm:$0xff]   ;;  %763 = vst [vmem:[%s693_s30 + $0xd0] sm:$0xff] %v762_v40  }
  0xbc   : > { %759 = vst [vmem:[%s693_s30 + $0xc0] sm:$0xff] %v758_v41  }
  0xbe   : > { %v770_v61 = vld [vmem:[%s1652_s12 + $0x78] sm:$0xff]  }
  0xbf   : > { %v766_v57 = vld [vmem:[%s1652_s12 + $0x70] sm:$0xff]   ;;  %771 = vst [vmem:[%s693_s30 + $0xf0] sm:$0xff] %v770_v61  }
  0xc0   : > { %767 = vst [vmem:[%s693_s30 + $0xe0] sm:$0xff] %v766_v57  }
  0xc1 PF: > { %s13_s18 = sadd.s32 1, %s1276_s18   ;;  %s1909_s12 = smov %s1256_s13 }
  0xc2   : > { %p10_p11 = scmp.ge.s32.totalorder %s13_s18, 6   ;;  %s1910_s13 = smov %s1356_s27 }
  0xc3   : > { %s1911_s14 = smov %s1268_s16  ;;  %s1912_s15 = smov %s1272_s17 }
  0xc4   : > { %s1913_s16 = smov %s1916_s19  ;;  %s1914_s17 = smov %s1920_s20 }
  0xc5   :  { %12 = sbr.rel (!%p10_p11) target bundleno = 4 (0x4), region = 103 }

// kernel: _generator_forward.15
= control target key start
LH: loop header
LB: loop body
LE: loop exit
PB: predicated region body
PF: predicated region fallthrough
CT: control target
= control target key end

     0   :  { %v2988_v0 = vmov 0   ;;  %vm18_vm0 = vcmask 261120   ;;  %vm2025_vm1 = vcmask 257024   ;;  %vm2420_vm2 = vcmask 1040384   ;;  %s4444_s1 = inlined_call_operand.vmem [shape: bf16[288,32], index: 1, kind: input, shape index: {}]   ;;  %s4445_s0 = inlined_call_operand.vmem [shape: bf16[512,288], index: 0, kind: input, shape index: {}]   ;;  %s4446_s2 = inlined_call_operand.vmem [shape: bf16[512,32], index: 2, kind: output, shape index: {0}]   ;;  %s4447_s3 = inlined_call_operand.vmem [shape: f32[1,2,32], index: 3, kind: output, shape index: {1}]  }
   0x1   :  { %996 = vmatprep.subr.bf16.mxu0 %v2988_v0  ;;  %2808 = vmatprep.subr.bf16.mxu1 %v2988_v0  ;;  %v2842_v1 = vld [vmem:[%s4444_s1 + $0x38] sm:$0xff]   ;;  %v2843_v2 = vld [vmem:[%s4444_s1 + $0x30] sm:$0xff]   ;;  %v2844_v3 = vld [vmem:[%s4444_s1 + $0x28] sm:$0xff]   ;;  %vm2422_vm3 = vcmask 254976  }
   0x2   :  { %997 = vmatpush1.bf16.msra.mxu0 %v2842_v1  ;;  %2824 = vmatpush1.bf16.msra.mxu1 %v2842_v1  ;;  %v2845_v4 = vld [vmem:[%s4444_s1 + $0x20] sm:$0xff]   ;;  %v2846_v5 = vld [vmem:[%s4444_s1 + $0x18] sm:$0xff]   ;;  %v2847_v7 = vld [vmem:[%s4444_s1 + $0x10] sm:$0xff]  }
   0x3   :  { %998 = vmatprep.subr.bf16.mxu0 %v2988_v0  ;;  %2809 = vmatprep.subr.bf16.mxu1 %v2988_v0  ;;  %v2860_v6 = vld [vmem:[%s4445_s0 + $0x4] ss:$12 sps:$4 sm:$0xff]   ;;  %v2848_v9 = vld [vmem:[%s4444_s1 + $0x8] sm:$0xff]   ;;  %v2850_v11 = vld [vmem:[%s4444_s1 + $0x78] sm:$0xff]  }
   0x4   :  { %v2863_v8 = vld [vmem:[%s4445_s0 + $0x244] ss:$12 sps:$4 sm:$0xff]   ;;  %1028 = vmatprep.mubr.bf16.mxu0 %v2860_v6  ;;  %v2852_v13 = vld [vmem:[%s4444_s1 + $0x68] sm:$0xff]   ;;  %v2854_v15 = vld [vmem:[%s4444_s1 + $0x58] sm:$0xff]  }
   0x5   :  { %1220 = vmatprep.mubr.bf16.mxu1 %v2863_v8  ;;  %v2849_v10 = vld [vmem:[%s4444_s1] sm:$0xff]   ;;  %v2851_v12 = vld [vmem:[%s4444_s1 + $0x70] sm:$0xff]   ;;  %v2856_v17 = vld [vmem:[%s4444_s1 + $0x48] sm:$0xff]  }
   0x6   :  { %999 = vmatpush1.bf16.msra.mxu0 %v2843_v2  ;;  %2825 = vmatpush1.bf16.msra.mxu1 %v2843_v2  ;;  %v2853_v14 = vld [vmem:[%s4444_s1 + $0x60] sm:$0xff]   ;;  %v2855_v16 = vld [vmem:[%s4444_s1 + $0x50] sm:$0xff]   ;;  %v2882_v19 = vld [vmem:[%s4444_s1 + $0x88] sm:$0xff]  }
   0x7   :  { %1000 = vmatprep.subr.bf16.mxu0 %v2988_v0  ;;  %2810 = vmatprep.subr.bf16.mxu1 %v2988_v0  ;;  %v2857_v18 = vld [vmem:[%s4444_s1 + $0x40] sm:$0xff]   ;;  %v2864_v22 = vld [vmem:[%s4445_s0 + $0x1c] ss:$12 sps:$4 sm:$0xff]   ;;  %v2876_v31 = vld [vmem:[%s4445_s0 + $0x4c] ss:$12 sps:$4 sm:$0xff]  }
   0x8   :  { %v2858_v20 = vld [vmem:[%s4445_s0] ss:$12 sps:$4 sm:$0xff]   ;;  %v2866_v23 = vld [vmem:[%s4445_s0 + $0x25c] ss:$12 sps:$4 sm:$0xff]   ;;  %v2868_v25 = vld [vmem:[%s4445_s0 + $0x18] ss:$12 sps:$4 sm:$0xff]  }
   0x9   :  { %v2861_v21 = vld [vmem:[%s4445_s0 + $0x240] ss:$12 sps:$4 sm:$0xff]   ;;  %v2869_v26 = vld [vmem:[%s4445_s0 + $0x258] ss:$12 sps:$4 sm:$0xff]   ;;  %v2874_v29 = vld [vmem:[%s4445_s0 + $0x30] ss:$12 sps:$4 sm:$0xff]  }
   0xa   :  { %1001 = vmatpush1.bf16.msra.mxu0 %v2844_v3  ;;  %2826 = vmatpush1.bf16.msra.mxu1 %v2844_v3  ;;  %v2907_v24 = vld [vmem:[%s4444_s1 + $0x80] sm:$0xff]   ;;  %v2875_v30 = vld [vmem:[%s4445_s0 + $0x270] ss:$12 sps:$4 sm:$0xff]   ;;  %v2878_v32 = vld [vmem:[%s4445_s0 + $0x28c] ss:$12 sps:$4 sm:$0xff]  }
   0xb   :  { %1002 = vmatprep.subr.bf16.mxu0 %v2988_v0  ;;  %2811 = vmatprep.subr.bf16.mxu1 %v2988_v0  ;;  %v2870_v27 = vld [vmem:[%s4445_s0 + $0x34] ss:$12 sps:$4 sm:$0xff]   ;;  %v2883_v35 = vld [vmem:[%s4445_s0 + $0x64] ss:$12 sps:$4 sm:$0xff]   ;;  %v2889_v39 = vld [vmem:[%s4445_s0 + $0x7c] ss:$12 sps:$4 sm:$0xff]  }
   0xc   :  { %v2872_v28 = vld [vmem:[%s4445_s0 + $0x274] ss:$12 sps:$4 sm:$0xff]   ;;  %v2885_v36 = vld [vmem:[%s4445_s0 + $0x2a4] ss:$12 sps:$4 sm:$0xff]   ;;  %v2891_v40 = vld [vmem:[%s4445_s0 + $0x2bc] ss:$12 sps:$4 sm:$0xff]  }
   0xd   :  { %v2880_v33 = vld [vmem:[%s4445_s0 + $0x48] ss:$12 sps:$4 sm:$0xff]   ;;  %v2887_v37 = vld [vmem:[%s4445_s0 + $0x60] ss:$12 sps:$4 sm:$0xff]   ;;  %v2893_v41 = vld [vmem:[%s4445_s0 + $0x78] ss:$12 sps:$4 sm:$0xff]  }
   0xe   :  { %1003 = vmatpush1.bf16.msra.mxu0 %v2845_v4  ;;  %2827 = vmatpush1.bf16.msra.mxu1 %v2845_v4  ;;  %v2881_v34 = vld [vmem:[%s4445_s0 + $0x288] ss:$12 sps:$4 sm:$0xff]   ;;  %v2888_v38 = vld [vmem:[%s4445_s0 + $0x2a0] ss:$12 sps:$4 sm:$0xff]   ;;  %v2894_v42 = vld [vmem:[%s4445_s0 + $0x2b8] ss:$12 sps:$4 sm:$0xff]  }
   0xf   :  { %1004 = vmatprep.subr.bf16.mxu0 %v2988_v0  ;;  %2812 = vmatprep.subr.bf16.mxu1 %v2988_v0  ;;  %v2895_v43 = vld [vmem:[%s4445_s0 + $0x94] ss:$12 sps:$4 sm:$0xff]   ;;  %v2899_v45 = vld [vmem:[%s4445_s0 + $0x90] ss:$12 sps:$4 sm:$0xff]   ;;  %v2901_v47 = vld [vmem:[%s4445_s0 + $0xac] ss:$12 sps:$4 sm:$0xff]  }
  0x10   :  { %v2897_v44 = vld [vmem:[%s4445_s0 + $0x2d4] ss:$12 sps:$4 sm:$0xff]   ;;  %v2900_v46 = vld [vmem:[%s4445_s0 + $0x2d0] ss:$12 sps:$4 sm:$0xff]   ;;  %v2903_v48 = vld [vmem:[%s4445_s0 + $0x2ec] ss:$12 sps:$4 sm:$0xff]  }
  0x11   :  { %v2905_v49 = vld [vmem:[%s4445_s0 + $0xa8] ss:$12 sps:$4 sm:$0xff]   ;;  %v2908_v51 = vld [vmem:[%s4445_s0 + $0xc4] ss:$12 sps:$4 sm:$0xff]   ;;  %v2911_v53 = vld [vmem:[%s4445_s0 + $0xc0] ss:$12 sps:$4 sm:$0xff]  }
  0x12   :  { %1005 = vmatpush1.bf16.msra.mxu0 %v2846_v5  ;;  %2828 = vmatpush1.bf16.msra.mxu1 %v2846_v5  ;;  %v2906_v50 = vld [vmem:[%s4445_s0 + $0x2e8] ss:$12 sps:$4 sm:$0xff]   ;;  %v2912_v54 = vld [vmem:[%s4445_s0 + $0x20] ss:$12 sps:$4 sm:$0xff]   ;;  %v2915_v56 = vld [vmem:[%s4445_s0 + $0x38] ss:$12 sps:$4 sm:$0xff]  }
  0x13   :  { %1006 = vmatprep.subr.bf16.mxu0 %v2988_v0  ;;  %2813 = vmatprep.subr.bf16.mxu1 %v2988_v0  ;;  %v2910_v52 = vld [vmem:[%s4445_s0 + $0x8] ss:$12 sps:$4 sm:$0xff]   ;;  %v2916_v57 = vld [vmem:[%s4445_s0 + $0xd8] ss:$12 sps:$4 sm:$0xff]   ;;  %v2917_v58 = vld [vmem:[%s4445_s0 + $0x50] ss:$12 sps:$4 sm:$0xff]  }
  0x14   :  { %v2913_v55 = vld [vmem:[%s4445_s0 + $0xdc] ss:$12 sps:$4 sm:$0xff]   ;;  %v2918_v59 = vld [vmem:[%s4445_s0 + $0xf4] ss:$12 sps:$4 sm:$0xff]   ;;  %v2923_v63 = vld [vmem:[%s4445_s0 + $0x10c] ss:$12 sps:$4 sm:$0xff]  }
  0x15   :  { %v2920_v60 = vld [vmem:[%s4445_s0 + $0x68] ss:$12 sps:$4 sm:$0xff]   ;;  %v2921_v61 = vld [vmem:[%s4445_s0 + $0xf0] ss:$12 sps:$4 sm:$0xff]   ;;  %v2922_v62 = vld [vmem:[%s4445_s0 + $0x80] ss:$12 sps:$4 sm:$0xff]  }
  0x16   :  { %1007 = vmatpush1.bf16.msra.mxu0 %v2847_v7  ;;  %2829 = vmatpush1.bf16.msra.mxu1 %v2847_v7  ;;  %v2926_v1 = vld [vmem:[%s4445_s0 + $0x108] ss:$12 sps:$4 sm:$0xff]   ;;  %v2927_v2 = vld [vmem:[%s4445_s0 + $0xb0] ss:$12 sps:$4 sm:$0xff]   ;;  %v2931_v5 = vld [vmem:[%s4445_s0 + $0x120] ss:$12 sps:$4 sm:$0xff]  }
  0x17   :  { %1008 = vmatprep.subr.bf16.mxu0 %v2988_v0  ;;  %2814 = vmatprep.subr.bf16.mxu1 %v2988_v0  ;;  %v2928_v3 = vld [vmem:[%s4445_s0 + $0x124] ss:$12 sps:$4 sm:$0xff]   ;;  %v2930_v4 = vld [vmem:[%s4445_s0 + $0xc8] ss:$12 sps:$4 sm:$0xff]   ;;  %v2932_v6 = vld [vmem:[%s4445_s0 + $0xe0] ss:$12 sps:$4 sm:$0xff]  }
  0x18   :  { %v2933_v7 = vld [vmem:[%s4445_s0 + $0x13c] ss:$12 sps:$4 sm:$0xff]   ;;  %v2935_v8 = vld [vmem:[%s4445_s0 + $0xf8] ss:$12 sps:$4 sm:$0xff]  }
  0x1a   :  { %1009 = vmatpush1.bf16.msra.mxu0 %v2848_v9  ;;  %2830 = vmatpush1.bf16.msra.mxu1 %v2848_v9  ;;  %v2936_v9 = vld [vmem:[%s4445_s0 + $0x138] ss:$12 sps:$4 sm:$0xff]  }
  0x1b   :  { %1010 = vmatprep.subr.bf16.mxu0 %v2988_v0  ;;  %2815 = vmatprep.subr.bf16.mxu1 %v2988_v0 }
  0x1e   :  { %1011 = vmatpush1.bf16.msra.mxu0 %v2849_v10  ;;  %2831 = vmatpush1.bf16.msra.mxu1 %v2849_v10  ;;  %v2937_v10 = vld [vmem:[%s4445_s0 + $0x110] ss:$12 sps:$4 sm:$0xff]  }
  0x1f   :  { %1012 = vmatprep.subr.bf16.mxu0 %v2988_v0  ;;  %2816 = vmatprep.subr.bf16.mxu1 %v2988_v0 }
  0x22   :  { %1013 = vmatpush2.bf16.msra.mxu0 %v2850_v11  ;;  %2832 = vmatpush2.bf16.msra.mxu1 %v2850_v11  ;;  %v2938_v11 = vld [vmem:[%s4445_s0 + $0x154] ss:$12 sps:$4 sm:$0xff]  }
  0x23   :  { %1014 = vmatprep.subr.bf16.mxu0 %v2988_v0  ;;  %2817 = vmatprep.subr.bf16.mxu1 %v2988_v0 }
  0x26   :  { %1015 = vmatpush2.bf16.msra.mxu0 %v2851_v12  ;;  %2833 = vmatpush2.bf16.msra.mxu1 %v2851_v12  ;;  %v2940_v12 = vld [vmem:[%s4445_s0 + $0x128] ss:$12 sps:$4 sm:$0xff]  }
  0x27   :  { %1016 = vmatprep.subr.bf16.mxu0 %v2988_v0  ;;  %2818 = vmatprep.subr.bf16.mxu1 %v2988_v0 }
  0x2a   :  { %1017 = vmatpush2.bf16.msra.mxu0 %v2852_v13  ;;  %2834 = vmatpush2.bf16.msra.mxu1 %v2852_v13  ;;  %v2941_v13 = vld [vmem:[%s4445_s0 + $0x150] ss:$12 sps:$4 sm:$0xff]  }
  0x2b   :  { %1018 = vmatprep.subr.bf16.mxu0 %v2988_v0  ;;  %2819 = vmatprep.subr.bf16.mxu1 %v2988_v0 }
  0x2e   :  { %1019 = vmatpush2.bf16.msra.mxu0 %v2853_v14  ;;  %2835 = vmatpush2.bf16.msra.mxu1 %v2853_v14  ;;  %v2942_v14 = vld [vmem:[%s4445_s0 + $0x140] ss:$12 sps:$4 sm:$0xff]  }
  0x2f   :  { %1020 = vmatprep.subr.bf16.mxu0 %v2988_v0  ;;  %2820 = vmatprep.subr.bf16.mxu1 %v2988_v0 }
  0x32   :  { %1021 = vmatpush2.bf16.msra.mxu0 %v2854_v15  ;;  %2836 = vmatpush2.bf16.msra.mxu1 %v2854_v15  ;;  %v2943_v15 = vld [vmem:[%s4445_s0 + $0x16c] ss:$12 sps:$4 sm:$0xff]  }
  0x33   :  { %1022 = vmatprep.subr.bf16.mxu0 %v2988_v0  ;;  %2821 = vmatprep.subr.bf16.mxu1 %v2988_v0 }
  0x36   :  { %1023 = vmatpush2.bf16.msra.mxu0 %v2855_v16  ;;  %2837 = vmatpush2.bf16.msra.mxu1 %v2855_v16  ;;  %v2945_v16 = vld [vmem:[%s4445_s0 + $0x158] ss:$12 sps:$4 sm:$0xff]  }
  0x37   :  { %1024 = vmatprep.subr.bf16.mxu0 %v2988_v0  ;;  %2822 = vmatprep.subr.bf16.mxu1 %v2988_v0 }
  0x3a   :  { %1025 = vmatpush2.bf16.msra.mxu0 %v2856_v17  ;;  %2838 = vmatpush2.bf16.msra.mxu1 %v2856_v17  ;;  %v2946_v17 = vld [vmem:[%s4445_s0 + $0x168] ss:$12 sps:$4 sm:$0xff]  }
  0x3b   :  { %1026 = vmatprep.subr.bf16.mxu0 %v2988_v0  ;;  %2823 = vmatprep.subr.bf16.mxu1 %v2988_v0  ;;  %v2925_v0 = vld [vmem:[%s4445_s0 + $0x98] ss:$12 sps:$4 sm:$0xff]  }
  0x3e   :  { %1027 = vmatpush2.bf16.msra.mxu0 %v2857_v18  ;;  %2839 = vmatpush2.bf16.msra.mxu1 %v2857_v18  ;;  %v2947_v18 = vld [vmem:[%s4445_s0 + $0x170] ss:$12 sps:$4 sm:$0xff]  }
  0x3f   :  { %2740 = vmatprep.subr.bf16.mxu1 %v2882_v19 }
  0x41   :  { %1029 = vmatmul.mubr.bf16.vlgmr.msra.gmra.mxu0 %v2858_v20  ;;  %1221 = vmatmul.mubr.bf16.vlgmr.msra.gmra.mxu1 %v2861_v21  ;;  %v2950_v20 = vld [vmem:[%s4445_s0 + $0x188] ss:$12 sps:$4 sm:$0xff]   ;;  %v2989_v21 = vmov 0.0  }
  0x42   :  { %1036 = vmatprep.mubr.bf16.mxu0 %v2864_v22  ;;  %1228 = vmatprep.mubr.bf16.mxu1 %v2866_v23  ;;  %21 = vst.msk [vmem:[#allocation2 + $0x10] sm:$0xff] %vm18_vm0, %v2989_v21  ;;  %19 = vst.msk [vmem:[#allocation2] sm:$0xff] %vm18_vm0, %v2989_v21  ;;  %v2951_v22 = vld [vmem:[%s4445_s0 + $0x180] ss:$12 sps:$4 sm:$0xff]  }
  0x43   :  { %2741 = vmatpush3.bf16.msra.mxu1 %v2882_v19  ;;  %v2948_v19 = vld [vmem:[%s4445_s0 + $0x184] ss:$12 sps:$4 sm:$0xff]   ;;  %20 = vst.msk [vmem:[#allocation2 + $0x8] sm:$0xff] %vm18_vm0, %v2989_v21  ;;  %22 = vst.msk [vmem:[#allocation2 + $0x18] sm:$0xff] %vm18_vm0, %v2989_v21  ;;  %v2952_v23 = vld [vmem:[%s4445_s0 + $0x1a0] ss:$12 sps:$4 sm:$0xff]  }
  0x44   :  { %2742 = vmatprep.subr.bf16.mxu1 %v2907_v24  ;;  %23 = vst.msk [vmem:[#allocation2 + $0x20] sm:$0xff] %vm18_vm0, %v2989_v21  ;;  %24 = vst.msk [vmem:[#allocation2 + $0x28] sm:$0xff] %vm18_vm0, %v2989_v21 }
  0x45   :  { %25 = vst.msk [vmem:[#allocation2 + $0x30] sm:$0xff] %vm18_vm0, %v2989_v21  ;;  %26 = vst.msk [vmem:[#allocation2 + $0x38] sm:$0xff] %vm18_vm0, %v2989_v21 }
  0x46   :  { %27 = vst.msk [vmem:[#allocation2 + $0x40] sm:$0xff] %vm18_vm0, %v2989_v21  ;;  %28 = vst.msk [vmem:[#allocation2 + $0x48] sm:$0xff] %vm18_vm0, %v2989_v21 }
  0x47   :  { %2743 = vmatpush3.bf16.msra.mxu1 %v2907_v24  ;;  %29 = vst.msk [vmem:[#allocation2 + $0x50] sm:$0xff] %vm18_vm0, %v2989_v21  ;;  %30 = vst.msk [vmem:[#allocation2 + $0x58] sm:$0xff] %vm18_vm0, %v2989_v21  ;;  %v2953_v24 = vld [vmem:[%s4445_s0 + $0x19c] ss:$12 sps:$4 sm:$0xff]  }
  0x48   :  { %31 = vst.msk [vmem:[#allocation2 + $0x60] sm:$0xff] %vm18_vm0, %v2989_v21  ;;  %32 = vst.msk [vmem:[#allocation2 + $0x68] sm:$0xff] %vm18_vm0, %v2989_v21 }
  0x49   :  { %1037 = vmatmul.mubr.bf16.gmra.mxu0 %v2868_v25  ;;  %1229 = vmatmul.mubr.bf16.gmra.mxu1 %v2869_v26  ;;  %33 = vst.msk [vmem:[#allocation2 + $0x70] sm:$0xff] %vm18_vm0, %v2989_v21  ;;  %34 = vst.msk [vmem:[#allocation2 + $0x78] sm:$0xff] %vm18_vm0, %v2989_v21  ;;  %v2955_v25 = vld [vmem:[%s4445_s0 + $0x1b8] ss:$12 sps:$4 sm:$0xff]  }
  0x4a   :  { %1044 = vmatprep.mubr.bf16.mxu0 %v2870_v27  ;;  %1236 = vmatprep.mubr.bf16.mxu1 %v2872_v28  ;;  %35 = vst.msk [vmem:[#allocation2 + $0x80] sm:$0xff] %vm18_vm0, %v2989_v21  ;;  %36 = vst.msk [vmem:[#allocation2 + $0x88] sm:$0xff] %vm18_vm0, %v2989_v21  ;;  %v2956_v26 = vld [vmem:[%s4445_s0 + $0x198] ss:$12 sps:$4 sm:$0xff]   ;;  %v2957_v27 = vld [vmem:[%s4445_s0 + $0x1d0] ss:$12 sps:$4 sm:$0xff]  }
  0x4b   :  { %37 = vst.msk [vmem:[#allocation2 + $0x90] sm:$0xff] %vm18_vm0, %v2989_v21  ;;  %38 = vst.msk [vmem:[#allocation2 + $0x98] sm:$0xff] %vm18_vm0, %v2989_v21  ;;  %v2958_v28 = vld [vmem:[%s4445_s0 + $0x1b4] ss:$12 sps:$4 sm:$0xff]  }
  0x4c   :  { %39 = vst.msk [vmem:[#allocation2 + $0xa0] sm:$0xff] %vm18_vm0, %v2989_v21  ;;  %40 = vst.msk [vmem:[#allocation2 + $0xa8] sm:$0xff] %vm18_vm0, %v2989_v21 }
  0x4d   :  { %41 = vst.msk [vmem:[#allocation2 + $0xb0] sm:$0xff] %vm18_vm0, %v2989_v21  ;;  %42 = vst.msk [vmem:[#allocation2 + $0xb8] sm:$0xff] %vm18_vm0, %v2989_v21 }
  0x4e   :  { %43 = vst.msk [vmem:[#allocation2 + $0xc0] sm:$0xff] %vm18_vm0, %v2989_v21  ;;  %44 = vst.msk [vmem:[#allocation2 + $0xc8] sm:$0xff] %vm18_vm0, %v2989_v21 }
  0x4f   :  { %45 = vst.msk [vmem:[#allocation2 + $0xd0] sm:$0xff] %vm18_vm0, %v2989_v21  ;;  %46 = vst.msk [vmem:[#allocation2 + $0xd8] sm:$0xff] %vm18_vm0, %v2989_v21 }
  0x50   :  { %47 = vst.msk [vmem:[#allocation2 + $0xe0] sm:$0xff] %vm18_vm0, %v2989_v21  ;;  %48 = vst.msk [vmem:[#allocation2 + $0xe8] sm:$0xff] %vm18_vm0, %v2989_v21 }
  0x51   :  { %1045 = vmatmul.mubr.bf16.gmra.mxu0 %v2874_v29  ;;  %1237 = vmatmul.mubr.bf16.gmra.mxu1 %v2875_v30  ;;  %49 = vst.msk [vmem:[#allocation2 + $0xf0] sm:$0xff] %vm18_vm0, %v2989_v21  ;;  %50 = vst.msk [vmem:[#allocation2 + $0xf8] sm:$0xff] %vm18_vm0, %v2989_v21  ;;  %v2960_v29 = vld [vmem:[%s4445_s0 + $0x1e8] ss:$12 sps:$4 sm:$0xff]   ;;  %v2961_v30 = vld [vmem:[%s4445_s0 + $0x1b0] ss:$12 sps:$4 sm:$0xff]  }
  0x52   :  { %1052 = vmatprep.mubr.bf16.mxu0 %v2876_v31  ;;  %1244 = vmatprep.mubr.bf16.mxu1 %v2878_v32  ;;  %51 = vst.msk [vmem:[#allocation2 + $0x100] sm:$0xff] %vm18_vm0, %v2989_v21  ;;  %52 = vst.msk [vmem:[#allocation2 + $0x108] sm:$0xff] %vm18_vm0, %v2989_v21  ;;  %v2962_v31 = vld [vmem:[%s4445_s0 + $0x200] ss:$12 sps:$4 sm:$0xff]  }
  0x53   :  { %53 = vst.msk [vmem:[#allocation2 + $0x110] sm:$0xff] %vm18_vm0, %v2989_v21  ;;  %54 = vst.msk [vmem:[#allocation2 + $0x118] sm:$0xff] %vm18_vm0, %v2989_v21  ;;  %v2963_v32 = vld [vmem:[%s4445_s0 + $0x1cc] ss:$12 sps:$4 sm:$0xff]  }
  0x54   :  { %55 = vst.msk [vmem:[#allocation2 + $0x120] sm:$0xff] %vm18_vm0, %v2989_v21  ;;  %56 = vst.msk [vmem:[#allocation2 + $0x128] sm:$0xff] %vm18_vm0, %v2989_v21 }
  0x55   :  { %57 = vst.msk [vmem:[#allocation2 + $0x130] sm:$0xff] %vm18_vm0, %v2989_v21  ;;  %58 = vst.msk [vmem:[#allocation2 + $0x138] sm:$0xff] %vm18_vm0, %v2989_v21 }
  0x56   :  { %59 = vst.msk [vmem:[#allocation2 + $0x140] sm:$0xff] %vm18_vm0, %v2989_v21  ;;  %60 = vst.msk [vmem:[#allocation2 + $0x148] sm:$0xff] %vm18_vm0, %v2989_v21 }
  0x57   :  { %61 = vst.msk [vmem:[#allocation2 + $0x150] sm:$0xff] %vm18_vm0, %v2989_v21  ;;  %62 = vst.msk [vmem:[#allocation2 + $0x158] sm:$0xff] %vm18_vm0, %v2989_v21 }
  0x58   :  { %63 = vst.msk [vmem:[#allocation2 + $0x160] sm:$0xff] %vm18_vm0, %v2989_v21  ;;  %64 = vst.msk [vmem:[#allocation2 + $0x168] sm:$0xff] %vm18_vm0, %v2989_v21 }
  0x59   :  { %1053 = vmatmul.mubr.bf16.gmra.mxu0 %v2880_v33  ;;  %1245 = vmatmul.mubr.bf16.gmra.mxu1 %v2881_v34  ;;  %65 = vst.msk [vmem:[#allocation2 + $0x170] sm:$0xff] %vm18_vm0, %v2989_v21  ;;  %66 = vst.msk [vmem:[#allocation2 + $0x178] sm:$0xff] %vm18_vm0, %v2989_v21  ;;  %v2965_v33 = vld [vmem:[%s4445_s0 + $0x218] ss:$12 sps:$4 sm:$0xff]   ;;  %v2966_v34 = vld [vmem:[%s4445_s0 + $0x1c8] ss:$12 sps:$4 sm:$0xff]  }
  0x5a   :  { %1060 = vmatprep.mubr.bf16.mxu0 %v2883_v35  ;;  %1252 = vmatprep.mubr.bf16.mxu1 %v2885_v36  ;;  %67 = vst.msk [vmem:[#allocation2 + $0x180] sm:$0xff] %vm18_vm0, %v2989_v21  ;;  %68 = vst.msk [vmem:[#allocation2 + $0x188] sm:$0xff] %vm18_vm0, %v2989_v21  ;;  %v2967_v35 = vld [vmem:[%s4445_s0 + $0x230] ss:$12 sps:$4 sm:$0xff]  }
  0x5b   :  { %69 = vst.msk [vmem:[#allocation2 + $0x190] sm:$0xff] %vm18_vm0, %v2989_v21  ;;  %70 = vst.msk [vmem:[#allocation2 + $0x198] sm:$0xff] %vm18_vm0, %v2989_v21  ;;  %v2968_v36 = vld [vmem:[%s4445_s0 + $0x1e4] ss:$12 sps:$4 sm:$0xff]  }
  0x5c   :  { %71 = vst.msk [vmem:[#allocation2 + $0x1a0] sm:$0xff] %vm18_vm0, %v2989_v21  ;;  %72 = vst.msk [vmem:[#allocation2 + $0x1a8] sm:$0xff] %vm18_vm0, %v2989_v21 }
  0x5d   :  { %73 = vst.msk [vmem:[#allocation2 + $0x1b0] sm:$0xff] %vm18_vm0, %v2989_v21  ;;  %74 = vst.msk [vmem:[#allocation2 + $0x1b8] sm:$0xff] %vm18_vm0, %v2989_v21 }
  0x5e   :  { %75 = vst.msk [vmem:[#allocation2 + $0x1c0] sm:$0xff] %vm18_vm0, %v2989_v21  ;;  %76 = vst.msk [vmem:[#allocation2 + $0x1c8] sm:$0xff] %vm18_vm0, %v2989_v21 }
  0x5f   :  { %77 = vst.msk [vmem:[#allocation2 + $0x1d0] sm:$0xff] %vm18_vm0, %v2989_v21  ;;  %78 = vst.msk [vmem:[#allocation2 + $0x1d8] sm:$0xff] %vm18_vm0, %v2989_v21 }
  0x60   :  { %79 = vst.msk [vmem:[#allocation2 + $0x1e0] sm:$0xff] %vm18_vm0, %v2989_v21  ;;  %80 = vst.msk [vmem:[#allocation2 + $0x1e8] sm:$0xff] %vm18_vm0, %v2989_v21 }
  0x61   :  { %1061 = vmatmul.mubr.bf16.gmra.mxu0 %v2887_v37  ;;  %1253 = vmatmul.mubr.bf16.gmra.mxu1 %v2888_v38  ;;  %81 = vst.msk [vmem:[#allocation2 + $0x1f0] sm:$0xff] %vm18_vm0, %v2989_v21  ;;  %82 = vst.msk [vmem:[#allocation2 + $0x1f8] sm:$0xff] %vm18_vm0, %v2989_v21  ;;  %v2970_v37 = vld [vmem:[%s4445_s0 + $0x248] ss:$12 sps:$4 sm:$0xff]   ;;  %v2971_v38 = vld [vmem:[%s4445_s0 + $0x1e0] ss:$12 sps:$4 sm:$0xff]  }
  0x62   :  { %1068 = vmatprep.mubr.bf16.mxu0 %v2889_v39  ;;  %1260 = vmatprep.mubr.bf16.mxu1 %v2891_v40  ;;  %v2972_v39 = vld [vmem:[%s4445_s0 + $0x260] ss:$12 sps:$4 sm:$0xff]   ;;  %v2973_v40 = vld [vmem:[%s4445_s0 + $0x1fc] ss:$12 sps:$4 sm:$0xff]  }
  0x69   :  { %1069 = vmatmul.mubr.bf16.gmra.mxu0 %v2893_v41  ;;  %1261 = vmatmul.mubr.bf16.gmra.mxu1 %v2894_v42  ;;  %v2975_v41 = vld [vmem:[%s4445_s0 + $0x278] ss:$12 sps:$4 sm:$0xff]  }
  0x6a   :  { %1076 = vmatprep.mubr.bf16.mxu0 %v2895_v43  ;;  %1268 = vmatprep.mubr.bf16.mxu1 %v2897_v44  ;;  %v2976_v42 = vld [vmem:[%s4445_s0 + $0x1f8] ss:$12 sps:$4 sm:$0xff]   ;;  %v2977_v43 = vld [vmem:[%s4445_s0 + $0x290] ss:$12 sps:$4 sm:$0xff]   ;;  %v2978_v44 = vld [vmem:[%s4445_s0 + $0x214] ss:$12 sps:$4 sm:$0xff]  }
  0x71   :  { %1077 = vmatmul.mubr.bf16.gmra.mxu0 %v2899_v45  ;;  %1269 = vmatmul.mubr.bf16.gmra.mxu1 %v2900_v46  ;;  %v2980_v45 = vld [vmem:[%s4445_s0 + $0x2a8] ss:$12 sps:$4 sm:$0xff]   ;;  %v2981_v46 = vld [vmem:[%s4445_s0 + $0x210] ss:$12 sps:$4 sm:$0xff]  }
  0x72   :  { %1084 = vmatprep.mubr.bf16.mxu0 %v2901_v47  ;;  %1276 = vmatprep.mubr.bf16.mxu1 %v2903_v48  ;;  %v2982_v47 = vld [vmem:[%s4445_s0 + $0x2c0] ss:$12 sps:$4 sm:$0xff]  }
  0x73   :  { %v2983_v48 = vld [vmem:[%s4445_s0 + $0x22c] ss:$12 sps:$4 sm:$0xff]  }
  0x79   :  { %1085 = vmatmul.mubr.bf16.gmra.mxu0 %v2905_v49  ;;  %1277 = vmatmul.mubr.bf16.gmra.mxu1 %v2906_v50  ;;  %v2985_v49 = vld [vmem:[%s4445_s0 + $0x2d8] ss:$12 sps:$4 sm:$0xff]   ;;  %v2986_v50 = vld [vmem:[%s4445_s0 + $0x228] ss:$12 sps:$4 sm:$0xff]  }
  0x7a   :  { %1092 = vmatprep.mubr.bf16.mxu0 %v2908_v51  ;;  %2744 = vmatprep.mubr.msk.bf16.mxu1 %vm18_vm0, %v2910_v52  ;;  %v2987_v51 = vld [vmem:[%s4445_s0 + $0x2f0] ss:$12 sps:$4 sm:$0xff]  }
  0x81   :  { %1093 = vmatmul.mubr.bf16.gmra.mxu0 %v2911_v53  ;;  %2745 = vmatmul.mubr.msk.bf16.vlgmr.msra.gmra.mxu1 %vm18_vm0, %v2912_v54 }
  0x82   :  { %1100 = vmatprep.mubr.bf16.mxu0 %v2913_v55  ;;  %2748 = vmatprep.mubr.msk.bf16.mxu1 %vm18_vm0, %v2915_v56 }
  0x89   :  { %1101 = vmatmul.mubr.bf16.gmra.mxu0 %v2916_v57  ;;  %2749 = vmatmul.mubr.msk.bf16.gmra.mxu1 %vm18_vm0, %v2917_v58 }
  0x8a   :  { %1108 = vmatprep.mubr.bf16.mxu0 %v2918_v59  ;;  %2752 = vmatprep.mubr.msk.bf16.mxu1 %vm18_vm0, %v2920_v60 }
  0x91   :  { %1109 = vmatmul.mubr.bf16.gmra.mxu0 %v2921_v61  ;;  %2753 = vmatmul.mubr.msk.bf16.gmra.mxu1 %vm18_vm0, %v2922_v62 }
  0x92   :  { %1116 = vmatprep.mubr.bf16.mxu0 %v2923_v63  ;;  %2756 = vmatprep.mubr.msk.bf16.mxu1 %vm18_vm0, %v2925_v0 }
  0x99   :  { %1117 = vmatmul.mubr.bf16.gmra.mxu0 %v2926_v1  ;;  %2757 = vmatmul.mubr.msk.bf16.gmra.mxu1 %vm18_vm0, %v2927_v2 }
  0x9a   :  { %1124 = vmatprep.mubr.bf16.mxu0 %v2928_v3  ;;  %2760 = vmatprep.mubr.msk.bf16.mxu1 %vm18_vm0, %v2930_v4 }
  0xa1   :  { %1125 = vmatmul.mubr.bf16.gmra.mxu0 %v2931_v5  ;;  %2761 = vmatmul.mubr.msk.bf16.gmra.mxu1 %vm18_vm0, %v2932_v6 }
  0xa2   :  { %1132 = vmatprep.mubr.bf16.mxu0 %v2933_v7  ;;  %2764 = vmatprep.mubr.msk.bf16.mxu1 %vm18_vm0, %v2935_v8 }
  0xa9   :  { %1133 = vmatmul.mubr.bf16.gmra.mxu0 %v2936_v9  ;;  %2765 = vmatmul.mubr.msk.bf16.gmra.mxu1 %vm18_vm0, %v2937_v10 }
  0xaa   :  { %1140 = vmatprep.mubr.bf16.mxu0 %v2938_v11  ;;  %2768 = vmatprep.mubr.msk.bf16.mxu1 %vm18_vm0, %v2940_v12 }
  0xb1   :  { %1141 = vmatmul.mubr.bf16.gmra.mxu0 %v2941_v13  ;;  %2769 = vmatmul.mubr.msk.bf16.gmra.mxu1 %vm18_vm0, %v2942_v14 }
  0xb2   :  { %1148 = vmatprep.mubr.bf16.mxu0 %v2943_v15  ;;  %2772 = vmatprep.mubr.msk.bf16.mxu1 %vm18_vm0, %v2945_v16 }
  0xb9   :  { %1149 = vmatmul.mubr.bf16.gmra.mxu0 %v2946_v17  ;;  %2773 = vmatmul.mubr.msk.bf16.gmra.mxu1 %vm18_vm0, %v2947_v18 }
  0xba   :  { %1156 = vmatprep.mubr.bf16.mxu0 %v2948_v19  ;;  %2776 = vmatprep.mubr.msk.bf16.mxu1 %vm18_vm0, %v2950_v20 }
  0xc1   :  { %1157 = vmatmul.mubr.bf16.gmra.mxu0 %v2951_v22  ;;  %2777 = vmatmul.mubr.msk.bf16.gmra.mxu1 %vm18_vm0, %v2952_v23 }
  0xc2   :  { %1164 = vmatprep.mubr.bf16.mxu0 %v2953_v24  ;;  %2780 = vmatprep.mubr.msk.bf16.mxu1 %vm18_vm0, %v2955_v25 }
  0xc9   :  { %1165 = vmatmul.mubr.bf16.gmra.mxu0 %v2956_v26  ;;  %2781 = vmatmul.mubr.msk.bf16.gmra.mxu1 %vm18_vm0, %v2957_v27 }
  0xca   :  { %1172 = vmatprep.mubr.bf16.mxu0 %v2958_v28  ;;  %2784 = vmatprep.mubr.msk.bf16.mxu1 %vm18_vm0, %v2960_v29 }
  0xd1   :  { %1173 = vmatmul.mubr.bf16.gmra.mxu0 %v2961_v30  ;;  %2785 = vmatmul.mubr.msk.bf16.gmra.mxu1 %vm18_vm0, %v2962_v31 }
  0xd2   :  { %1180 = vmatprep.mubr.bf16.mxu0 %v2963_v32  ;;  %2788 = vmatprep.mubr.msk.bf16.mxu1 %vm18_vm0, %v2965_v33 }
  0xd9   :  { %1181 = vmatmul.mubr.bf16.gmra.mxu0 %v2966_v34  ;;  %2789 = vmatmul.mubr.msk.bf16.gmra.mxu1 %vm18_vm0, %v2967_v35 }
  0xda   :  { %1188 = vmatprep.mubr.bf16.mxu0 %v2968_v36  ;;  %2792 = vmatprep.mubr.msk.bf16.mxu1 %vm18_vm0, %v2970_v37 }
  0xe1   :  { %1189 = vmatmul.mubr.bf16.gmra.mxu0 %v2971_v38  ;;  %2793 = vmatmul.mubr.msk.bf16.gmra.mxu1 %vm18_vm0, %v2972_v39 }
  0xe2   :  { %1196 = vmatprep.mubr.bf16.mxu0 %v2973_v40  ;;  %2796 = vmatprep.mubr.msk.bf16.mxu1 %vm18_vm0, %v2975_v41 }
  0xe9   :  { %1197 = vmatmul.mubr.bf16.gmra.mxu0 %v2976_v42  ;;  %2797 = vmatmul.mubr.msk.bf16.gmra.mxu1 %vm18_vm0, %v2977_v43 }
  0xea   :  { %1204 = vmatprep.mubr.bf16.mxu0 %v2978_v44  ;;  %2800 = vmatprep.mubr.msk.bf16.mxu1 %vm18_vm0, %v2980_v45 }
  0xf1   :  { %1205 = vmatmul.mubr.bf16.gmra.mxu0 %v2981_v46  ;;  %2801 = vmatmul.mubr.msk.bf16.gmra.mxu1 %vm18_vm0, %v2982_v47 }
  0xf2   :  { %1212 = vmatprep.mubr.bf16.mxu0 %v2983_v48  ;;  %2804 = vmatprep.mubr.msk.bf16.mxu1 %vm18_vm0, %v2985_v49 }
  0xf9   :  { %1213 = vmatmul.mubr.bf16.gmra.mxu0 %v2986_v50  ;;  %2805 = vmatmul.mubr.msk.bf16.gmra.mxu1 %vm18_vm0, %v2987_v51 }
 0x101   :  { %v3544_v52 = vpop.f32.mrf.mxu0  ;;  %v3546_v53 = vpop.f32.mrf.mxu1 }
 0x103   :  { %v1032_v54 = vpop.f32.mrf.mxu0  ;;  %v1224_v55 = vpop.f32.mrf.mxu1 }
 0x104   :  { %v85_v55 = vld [vmem:[#allocation2 + $0x10] sm:$0xff] }
 0x105   :  { %v3548_v56 = vpop.f32.mrf.mxu0  ;;  %v3550_v57 = vpop.f32.mrf.mxu1 }
 0x107   :  { %v1035_v58 = vpop.f32.mrf.mxu0  ;;  %v1227_v59 = vpop.f32.mrf.mxu1 }
 0x109   :  { %v1038_v60 = vpop.f32.mrf.mxu0  ;;  %v3552_v61 = vpop.f32.mrf.mxu1 }
 0x10b   :  { %v1040_v62 = vpop.f32.mrf.mxu0  ;;  %v1232_v63 = vpop.f32.mrf.mxu1 }
 0x10c   :  { %v83_v63 = vld [vmem:[#allocation2] sm:$0xff] }
 0x10d   :  { %v3554_v0 = vpop.f32.mrf.mxu0  ;;  %v3556_v1 = vpop.f32.mrf.mxu1 }
 0x10f   :  { %v1043_v2 = vpop.f32.mrf.mxu0  ;;  %v1235_v3 = vpop.f32.mrf.mxu1 }
 0x111   :  { %v3558_v4 = vpop.f32.mrf.mxu0  ;;  %v3560_v5 = vpop.f32.mrf.mxu1 }
 0x113   :  { %v1048_v6 = vpop.f32.mrf.mxu0  ;;  %v1240_v7 = vpop.f32.mrf.mxu1 }
 0x115   :  { %v3562_v8 = vpop.f32.mrf.mxu0  ;;  %v3564_v9 = vpop.f32.mrf.mxu1 }
 0x117   :  { %v1051_v10 = vpop.f32.mrf.mxu0  ;;  %v1243_v11 = vpop.f32.mrf.mxu1 }
 0x118   :  { %v86_v10 = vld [vmem:[#allocation2 + $0x18] sm:$0xff] }
 0x119   :  { %v3566_v12 = vpop.f32.mrf.mxu0  ;;  %v3568_v13 = vpop.f32.mrf.mxu1 }
 0x11b   :  { %v1056_v14 = vpop.f32.mrf.mxu0  ;;  %v1248_v15 = vpop.f32.mrf.mxu1 }
 0x11d   :  { %v3570_v16 = vpop.f32.mrf.mxu0  ;;  %v3572_v17 = vpop.f32.mrf.mxu1 }
 0x11f   :  { %v1059_v18 = vpop.f32.mrf.mxu0  ;;  %v1251_v19 = vpop.f32.mrf.mxu1 }
 0x120   :  { %v84_v19 = vld [vmem:[#allocation2 + $0x8] sm:$0xff] }
 0x121   :  { %v3574_v20 = vpop.f32.mrf.mxu0  ;;  %v3576_v21 = vpop.f32.mrf.mxu1 }
 0x123   :  { %v1064_v22 = vpop.f32.mrf.mxu0  ;;  %v1256_v23 = vpop.f32.mrf.mxu1 }
 0x125   :  { %v3578_v24 = vpop.f32.mrf.mxu0  ;;  %v3580_v25 = vpop.f32.mrf.mxu1 }
 0x127   :  { %v1067_v26 = vpop.f32.mrf.mxu0  ;;  %v1259_v27 = vpop.f32.mrf.mxu1 }
 0x129   :  { %v3582_v28 = vpop.f32.mrf.mxu0  ;;  %v3584_v29 = vpop.f32.mrf.mxu1 }
 0x12b   :  { %v1072_v30 = vpop.f32.mrf.mxu0  ;;  %v1264_v31 = vpop.f32.mrf.mxu1 }
 0x12d   :  { %v3586_v32 = vpop.f32.mrf.mxu0  ;;  %v3588_v33 = vpop.f32.mrf.mxu1 }
 0x12f   :  { %v1075_v34 = vpop.f32.mrf.mxu0  ;;  %v1267_v35 = vpop.f32.mrf.mxu1 }
 0x130   :  { %v87_v35 = vld [vmem:[#allocation2 + $0x20] sm:$0xff] }
 0x131   :  { %v3590_v36 = vpop.f32.mrf.mxu0  ;;  %v3592_v37 = vpop.f32.mrf.mxu1 }
 0x133   :  { %v1080_v38 = vpop.f32.mrf.mxu0  ;;  %v1272_v39 = vpop.f32.mrf.mxu1 }
 0x135   :  { %v3594_v40 = vpop.f32.mrf.mxu0  ;;  %v3596_v41 = vpop.f32.mrf.mxu1 }
 0x137   :  { %v1083_v42 = vpop.f32.mrf.mxu0  ;;  %v1275_v43 = vpop.f32.mrf.mxu1 }
 0x139   :  { %v3598_v44 = vpop.f32.mrf.mxu0  ;;  %v3600_v45 = vpop.f32.mrf.mxu1 }
 0x13b   :  { %v1088_v46 = vpop.f32.mrf.mxu0  ;;  %v1280_v47 = vpop.f32.mrf.mxu1 }
 0x13d   :  { %v3602_v48 = vpop.f32.mrf.mxu0  ;;  %v3604_v49 = vpop.f32.mrf.mxu1 }
 0x13f   :  { %v1091_v50 = vpop.f32.mrf.mxu0  ;;  %v1283_v51 = vpop.f32.mrf.mxu1 }
 0x140   :  { %v90_v50 = vld [vmem:[#allocation2 + $0x38] sm:$0xff] }
 0x141   :  { %v3606_v54 = vpop.f32.mrf.mxu0  ;;  %v2746_v58 = vpop.f32.mrf.mxu1 }
 0x142   :  { %v1328_v59 = vadd.f32 %v2746_v58, %v1038_v60 }
 0x143   :  { %v1096_v62 = vpop.f32.mrf.mxu0  ;;  %v1319_v2 = vpop.f32.mrf.mxu1 }
 0x144   :  { %v1576_v3 = vadd.f32 %v1328_v59, %v85_v55  ;;  %v1320_v6 = vadd.f32 %v1319_v2, %v3544_v52  ;;  %v89_v52 = vld [vmem:[#allocation2 + $0x30] sm:$0xff]  ;;  %v88_v59 = vld [vmem:[#allocation2 + $0x28] sm:$0xff] }
 0x145   :  { %v3609_v7 = vpop.f32.mrf.mxu0  ;;  %v2747_v11 = vpop.f32.mrf.mxu1 }
 0x146   :  { %1640 = vst.msk [vmem:[#allocation2 + $0x10] sm:$0xff] %vm18_vm0, %v1576_v3  ;;  %v1574_v14 = vadd.f32 %v1320_v6, %v83_v63  ;;  %v1331_v15 = vadd.f32 %v2747_v11, %v3554_v0  ;;  %v93_v11 = vld [vmem:[#allocation2 + $0x50] sm:$0xff] }
 0x147   :  { %v1099_v18 = vpop.f32.mrf.mxu0  ;;  %v1322_v22 = vpop.f32.mrf.mxu1 }
 0x148   :  { %1638 = vst.msk [vmem:[#allocation2] sm:$0xff] %vm18_vm0, %v1574_v14  ;;  %v1577_v60 = vadd.f32 %v1331_v15, %v86_v10  ;;  %v1323_v23 = vadd.f32 %v1322_v22, %v3548_v56 }
 0x149   :  { %v3615_v26 = vpop.f32.mrf.mxu0  ;;  %v2750_v27 = vpop.f32.mrf.mxu1 }
 0x14a   :  { %1641 = vst.msk [vmem:[#allocation2 + $0x18] sm:$0xff] %vm18_vm0, %v1577_v60  ;;  %v1575_v30 = vadd.f32 %v1323_v23, %v84_v19  ;;  %v1344_v31 = vadd.f32 %v2750_v27, %v3566_v12 }
 0x14b   :  { %v1104_v34 = vpop.f32.mrf.mxu0  ;;  %v1335_v0 = vpop.f32.mrf.mxu1 }
 0x14c   :  { %1639 = vst.msk [vmem:[#allocation2 + $0x8] sm:$0xff] %vm18_vm0, %v1575_v30  ;;  %v1580_v38 = vadd.f32 %v1344_v31, %v89_v52  ;;  %v1336_v39 = vadd.f32 %v1335_v0, %v3558_v4  ;;  %v91_v30 = vld [vmem:[#allocation2 + $0x40] sm:$0xff] }
 0x14d   :  { %v1707_v42 = vld [vmem:[#allocation2 + $0x10] sm:$0xff]  ;;  %v3621_v56 = vpop.f32.mrf.mxu0  ;;  %v2751_v43 = vpop.f32.mrf.mxu1 }
 0x14e   :  { %v2644_v46 = vpack.c.bf16 %v1707_v42, %v1707_v42  ;;  %1644 = vst.msk [vmem:[#allocation2 + $0x30] sm:$0xff] %vm18_vm0, %v1580_v38  ;;  %v1578_v47 = vadd.f32 %v1336_v39, %v87_v35  ;;  %v1347_v12 = vadd.f32 %v2751_v43, %v3570_v16  ;;  %v2225_v14 = vmul.f32 %v1707_v42, %v1707_v42 }
 0x14f   :  { %v1705_v51 = vld [vmem:[#allocation2] sm:$0xff]  ;;  %v1107_v55 = vpop.f32.mrf.mxu0  ;;  %v1338_v58 = vpop.f32.mrf.mxu1  ;;  %v2093_v31 = vsel %vm18_vm0, %v1707_v42, 0.0 }
 0x150   :  { %2028 = vst.msk [vmem:[%s4446_s2 + $0x8] sm:$0xf] %vm2025_vm1, %v2644_v46  ;;  %v2642_v4 = vpack.c.bf16 %v1705_v51, %v1705_v51  ;;  %v1581_v63 = vadd.f32 %v1347_v12, %v90_v50  ;;  %v1339_v2 = vadd.f32 %v1338_v58, %v3562_v8  ;;  %v2223_v16 = vmul.f32 %v1705_v51, %v1705_v51  ;;  %v94_v50 = vld [vmem:[#allocation2 + $0x58] sm:$0xff] }
 0x151   :  { %1642 = vst.msk [vmem:[#allocation2 + $0x20] sm:$0xff] %vm18_vm0, %v1578_v47  ;;  %v1708_v62 = vld [vmem:[#allocation2 + $0x18] sm:$0xff]  ;;  %v3631_v3 = vpop.f32.mrf.mxu0  ;;  %v2754_v6 = vpop.f32.mrf.mxu1  ;;  %v2090_v60 = vsel %vm18_vm0, %v1705_v51, 0.0 }
 0x152   :  { %2026 = vst.msk [vmem:[%s4446_s2] sm:$0xf] %vm2025_vm1, %v2642_v4  ;;  %v2645_v10 = vpack.c.bf16 %v1708_v62, %v1708_v62  ;;  %v1579_v18 = vadd.f32 %v1339_v2, %v88_v59  ;;  %v1360_v19 = vadd.f32 %v2754_v6, %v3582_v28  ;;  %v2287_v43 = vsel %vm18_vm0, %v2223_v16, 0.0 }
 0x153   :  { %v1706_v15 = vld [vmem:[#allocation2 + $0x8] sm:$0xff]  ;;  %1645 = vst.msk [vmem:[#allocation2 + $0x38] sm:$0xff] %vm18_vm0, %v1581_v63  ;;  %v1112_v22 = vpop.f32.mrf.mxu0  ;;  %v1351_v8 = vpop.f32.mrf.mxu1  ;;  %v2226_v46 = vmul.f32 %v1708_v62, %v1708_v62  ;;  %v2290_v63 = vsel %vm18_vm0, %v2225_v14, 0.0  ;;  %v2095_v2 = vsel %vm18_vm0, %v1708_v62, 0.0  ;;  %v97_v14 = vld [vmem:[#allocation2 + $0x70] sm:$0xff] }
 0x154   :  { %2029 = vst.msk [vmem:[%s4446_s2 + $0xc] sm:$0xf] %vm2025_vm1, %v2645_v10  ;;  %v2643_v23 = vpack.c.bf16 %v1706_v15, %v1706_v15  ;;  %v2091_v52 = vsel %vm18_vm0, %v1706_v15, 0.0  ;;  %v2224_v27 = vmul.f32 %v1706_v15, %v1706_v15  ;;  %v1584_v28 = vadd.f32 %v1360_v19, %v93_v11 }
 0x155   :  { %v2092_v34 = vadd.f32 %v2091_v52, %v2090_v60  ;;  %v3646_v35 = vld [vmem:[#allocation2 + $0x30] sm:$0xff]  ;;  %1643 = vst.msk [vmem:[#allocation2 + $0x28] sm:$0xff] %vm18_vm0, %v1579_v18  ;;  %v1352_v0 = vadd.f32 %v1351_v8, %v3574_v20  ;;  %v3650_v38 = vpop.f32.mrf.mxu0  ;;  %v2755_v39 = vpop.f32.mrf.mxu1  ;;  %v92_v18 = vld [vmem:[#allocation2 + $0x48] sm:$0xff]  ;;  %v2292_v62 = vsel %vm18_vm0, %v2226_v46, 0.0 }
 0x156   :  { %2027 = vst.msk [vmem:[%s4446_s2 + $0x4] sm:$0xf] %vm2025_vm1, %v2643_v23  ;;  %v2288_v42 = vsel %vm18_vm0, %v2224_v27, 0.0  ;;  %v2648_v47 = vpack.c.bf16 %v3646_v35, %v3646_v35  ;;  %v1363_v58 = vadd.f32 %v2755_v39, %v3586_v32 }
 0x157   :  { %v2094_v51 = vadd.f32 %v2093_v31, %v2092_v34  ;;  %v2289_v12 = vadd.f32 %v2288_v42, %v2287_v43  ;;  %1648 = vst.msk [vmem:[#allocation2 + $0x50] sm:$0xff] %vm18_vm0, %v1584_v28  ;;  %v1582_v55 = vadd.f32 %v1352_v0, %v91_v30  ;;  %v1115_v4 = vpop.f32.mrf.mxu0  ;;  %v1354_v59 = vpop.f32.mrf.mxu1  ;;  %v95_v34 = vld [vmem:[#allocation2 + $0x60] sm:$0xff] }
 0x158   :  { %v1709_v20 = vld [vmem:[#allocation2 + $0x20] sm:$0xff]  ;;  %2032 = vst.msk [vmem:[%s4446_s2 + $0x18] sm:$0xf] %vm2025_vm1, %v2648_v47  ;;  %v1585_v15 = vadd.f32 %v1363_v58, %v94_v50  ;;  %v1355_v32 = vadd.f32 %v1354_v59, %v3578_v24  ;;  %v2229_v24 = vmul.f32 %v3646_v35, %v3646_v35 }
 0x159   :  { %v2646_v6 = vpack.c.bf16 %v1709_v20, %v1709_v20  ;;  %v2227_v16 = vmul.f32 %v1709_v20, %v1709_v20  ;;  %v2096_v10 = vadd.f32 %v2095_v2, %v2094_v51  ;;  %v2291_v11 = vadd.f32 %v2290_v63, %v2289_v12  ;;  %1646 = vst.msk [vmem:[#allocation2 + $0x40] sm:$0xff] %vm18_vm0, %v1582_v55  ;;  %v3670_v19 = vpop.f32.mrf.mxu0  ;;  %v2758_v22 = vpop.f32.mrf.mxu1 }
 0x15a   :  { %v2097_v8 = vsel %vm18_vm0, %v1709_v20, 0.0  ;;  %v1712_v60 = vld [vmem:[#allocation2 + $0x38] sm:$0xff]  ;;  %v1376_v23 = vadd.f32 %v2758_v22, %v3598_v44  ;;  %1649 = vst.msk [vmem:[#allocation2 + $0x58] sm:$0xff] %vm18_vm0, %v1585_v15  ;;  %v1583_v43 = vadd.f32 %v1355_v32, %v92_v18  ;;  %v2101_v63 = vsel %vm18_vm0, %v3646_v35, 0.0 }
 0x15b   :  { %2030 = vst.msk [vmem:[%s4446_s2 + $0x10] sm:$0xf] %vm2025_vm1, %v2646_v6  ;;  %v2293_v52 = vadd.f32 %v2292_v62, %v2291_v11  ;;  %v2098_v27 = vadd.f32 %v2097_v8, %v2096_v10  ;;  %v2649_v30 = vpack.c.bf16 %v1712_v60, %v1712_v60  ;;  %v1120_v31 = vpop.f32.mrf.mxu0  ;;  %v1367_v28 = vpop.f32.mrf.mxu1  ;;  %v2294_v0 = vsel %vm18_vm0, %v2227_v16, 0.0  ;;  %v98_v20 = vld [vmem:[#allocation2 + $0x78] sm:$0xff]  ;;  %v96_v11 = vld [vmem:[#allocation2 + $0x68] sm:$0xff] }
 0x15c   :  { %v1710_v39 = vld [vmem:[#allocation2 + $0x28] sm:$0xff]  ;;  %v1588_v46 = vadd.f32 %v1376_v23, %v97_v14  ;;  %v1368_v42 = vadd.f32 %v1367_v28, %v3590_v36  ;;  %1647 = vst.msk [vmem:[#allocation2 + $0x48] sm:$0xff] %vm18_vm0, %v1583_v43  ;;  %v2230_v2 = vmul.f32 %v1712_v60, %v1712_v60  ;;  %v2298_v22 = vsel %vm18_vm0, %v2229_v24, 0.0 }
 0x15d   :  { %v2295_v47 = vadd.f32 %v2294_v0, %v2293_v52  ;;  %2033 = vst.msk [vmem:[%s4446_s2 + $0x1c] sm:$0xf] %vm2025_vm1, %v2649_v30  ;;  %v2647_v44 = vpack.c.bf16 %v1710_v39, %v1710_v39  ;;  %v2099_v50 = vsel %vm18_vm0, %v1710_v39, 0.0  ;;  %v2228_v51 = vmul.f32 %v1710_v39, %v1710_v39  ;;  %v3689_v12 = vpop.f32.mrf.mxu0  ;;  %v2759_v55 = vpop.f32.mrf.mxu1 }
 0x15e   :  { %v2100_v58 = vadd.f32 %v2099_v50, %v2098_v27  ;;  %v3691_v4 = vld [vmem:[#allocation2 + $0x50] sm:$0xff]  ;;  %1652 = vst.msk [vmem:[#allocation2 + $0x70] sm:$0xff] %vm18_vm0, %v1588_v46  ;;  %v1586_v36 = vadd.f32 %v1368_v42, %v95_v34  ;;  %v1379_v59 = vadd.f32 %v2759_v55, %v3602_v48  ;;  %v2103_v62 = vsel %vm18_vm0, %v1712_v60, 0.0 }
 0x15f   :  { %2031 = vst.msk [vmem:[%s4446_s2 + $0x14] sm:$0xf] %vm2025_vm1, %v2647_v44  ;;  %v2296_v6 = vsel %vm18_vm0, %v2228_v51, 0.0  ;;  %v2652_v16 = vpack.c.bf16 %v3691_v4, %v3691_v4  ;;  %v1123_v10 = vpop.f32.mrf.mxu0  ;;  %v1370_v15 = vpop.f32.mrf.mxu1  ;;  %v101_v27 = vld [vmem:[#allocation2 + $0x90] sm:$0xff]  ;;  %v2300_v60 = vsel %vm18_vm0, %v2230_v2, 0.0  ;;  %v2233_v42 = vmul.f32 %v3691_v4, %v3691_v4 }
 0x160   :  { %v2102_v18 = vadd.f32 %v2101_v63, %v2100_v58  ;;  %v2297_v32 = vadd.f32 %v2296_v6, %v2295_v47  ;;  %v1713_v48 = vld [vmem:[#allocation2 + $0x40] sm:$0xff]  ;;  %1650 = vst.msk [vmem:[#allocation2 + $0x60] sm:$0xff] %vm18_vm0, %v1586_v36  ;;  %v1589_v35 = vadd.f32 %v1379_v59, %v98_v20  ;;  %v1371_v14 = vadd.f32 %v1370_v15, %v3594_v40 }
 0x161   :  { %2036 = vst.msk [vmem:[%s4446_s2 + $0x28] sm:$0xf] %vm2025_vm1, %v2652_v16  ;;  %v2650_v8 = vpack.c.bf16 %v1713_v48, %v1713_v48  ;;  %v2231_v23 = vmul.f32 %v1713_v48, %v1713_v48  ;;  %v3713_v52 = vpop.f32.mrf.mxu0  ;;  %v2762_v30 = vpop.f32.mrf.mxu1  ;;  %v1716_v28 = vld [vmem:[#allocation2 + $0x58] sm:$0xff]  ;;  %v2105_v0 = vsel %vm18_vm0, %v1713_v48, 0.0  ;;  %v99_v10 = vld [vmem:[#allocation2 + $0x80] sm:$0xff] }
 0x162   :  { %v2299_v31 = vadd.f32 %v2298_v22, %v2297_v32  ;;  %v2104_v34 = vadd.f32 %v2103_v62, %v2102_v18  ;;  %1653 = vst.msk [vmem:[#allocation2 + $0x78] sm:$0xff] %vm18_vm0, %v1589_v35  ;;  %v1587_v40 = vadd.f32 %v1371_v14, %v96_v11  ;;  %v1392_v24 = vadd.f32 %v2762_v30, %v3615_v26 }
 0x163   :  { %2034 = vst.msk [vmem:[%s4446_s2 + $0x20] sm:$0xf] %vm2025_vm1, %v2650_v8  ;;  %v2653_v39 = vpack.c.bf16 %v1716_v28, %v1716_v28  ;;  %v1128_v43 = vpop.f32.mrf.mxu0  ;;  %v1383_v46 = vpop.f32.mrf.mxu1  ;;  %v2302_v50 = vsel %vm18_vm0, %v2231_v23, 0.0  ;;  %v2234_v51 = vmul.f32 %v1716_v28, %v1716_v28  ;;  %v1714_v20 = vld [vmem:[#allocation2 + $0x48] sm:$0xff]  ;;  %v2306_v35 = vsel %vm18_vm0, %v2233_v42, 0.0 }
 0x164   :  { %v2106_v47 = vadd.f32 %v2105_v0, %v2104_v34  ;;  %v2301_v44 = vadd.f32 %v2300_v60, %v2299_v31  ;;  %1651 = vst.msk [vmem:[#allocation2 + $0x68] sm:$0xff] %vm18_vm0, %v1587_v40  ;;  %v1592_v26 = vadd.f32 %v1392_v24, %v101_v27  ;;  %v1384_v58 = vadd.f32 %v1383_v46, %v3606_v54  ;;  %v102_v60 = vld [vmem:[#allocation2 + $0x98] sm:$0xff]  ;;  %v100_v0 = vld [vmem:[#allocation2 + $0x88] sm:$0xff] }
 0x165   :  { %2037 = vst.msk [vmem:[%s4446_s2 + $0x2c] sm:$0xf] %vm2025_vm1, %v2653_v39  ;;  %v3731_v55 = vld [vmem:[#allocation2 + $0x70] sm:$0xff]  ;;  %v3734_v36 = vpop.f32.mrf.mxu0  ;;  %v2763_v59 = vpop.f32.mrf.mxu1  ;;  %v2651_v2 = vpack.c.bf16 %v1714_v20, %v1714_v20  ;;  %v2107_v6 = vsel %vm18_vm0, %v1714_v20, 0.0  ;;  %v2232_v16 = vmul.f32 %v1714_v20, %v1714_v20  ;;  %v2109_v54 = vsel %vm18_vm0, %v3691_v4, 0.0 }
 0x166   :  { %v2303_v63 = vadd.f32 %v2302_v50, %v2301_v44  ;;  %1656 = vst.msk [vmem:[#allocation2 + $0x90] sm:$0xff] %vm18_vm0, %v1592_v26  ;;  %v2108_v11 = vadd.f32 %v2107_v6, %v2106_v47  ;;  %v2656_v15 = vpack.c.bf16 %v3731_v55, %v3731_v55  ;;  %v2111_v62 = vsel %vm18_vm0, %v1716_v28, 0.0 }
 0x167   :  { %v1717_v18 = vld [vmem:[#allocation2 + $0x60] sm:$0xff]  ;;  %v1131_v32 = vpop.f32.mrf.mxu0  ;;  %v1386_v48 = vpop.f32.mrf.mxu1  ;;  %2035 = vst.msk [vmem:[%s4446_s2 + $0x24] sm:$0xf] %vm2025_vm1, %v2651_v2  ;;  %v2304_v14 = vsel %vm18_vm0, %v2232_v16, 0.0  ;;  %v1590_v27 = vadd.f32 %v1384_v58, %v99_v10  ;;  %v2308_v34 = vsel %vm18_vm0, %v2234_v51, 0.0  ;;  %v2237_v40 = vmul.f32 %v3731_v55, %v3731_v55 }
 0x168   :  { %v2654_v22 = vpack.c.bf16 %v1717_v18, %v1717_v18  ;;  %v2110_v8 = vadd.f32 %v2109_v54, %v2108_v11  ;;  %v2305_v23 = vadd.f32 %v2304_v14, %v2303_v63  ;;  %2040 = vst.msk [vmem:[%s4446_s2 + $0x38] sm:$0xf] %vm2025_vm1, %v2656_v15  ;;  %v2235_v28 = vmul.f32 %v1717_v18, %v1717_v18  ;;  %v105_v32 = vld [vmem:[#allocation2 + $0xb0] sm:$0xff] }
 0x169   :  { %v1720_v4 = vld [vmem:[#allocation2 + $0x78] sm:$0xff]  ;;  %v1134_v30 = vpop.f32.mrf.mxu0  ;;  %v2766_v31 = vpop.f32.mrf.mxu1  ;;  %1654 = vst.msk [vmem:[#allocation2 + $0x80] sm:$0xff] %vm18_vm0, %v1590_v27  ;;  %v1395_v42 = vadd.f32 %v2763_v59, %v3621_v56  ;;  %v1387_v47 = vadd.f32 %v1386_v48, %v3609_v7  ;;  %v2113_v50 = vsel %vm18_vm0, %v1717_v18, 0.0  ;;  %v103_v48 = vld [vmem:[#allocation2 + $0xa0] sm:$0xff] }
 0x16a   :  { %2038 = vst.msk [vmem:[%s4446_s2 + $0x30] sm:$0xf] %vm2025_vm1, %v2654_v22  ;;  %v2657_v24 = vpack.c.bf16 %v1720_v4, %v1720_v4  ;;  %v2307_v39 = vadd.f32 %v2306_v35, %v2305_v23  ;;  %v2112_v43 = vadd.f32 %v2111_v62, %v2110_v8  ;;  %v2310_v10 = vsel %vm18_vm0, %v2235_v28, 0.0  ;;  %v106_v62 = vld [vmem:[#allocation2 + $0xb8] sm:$0xff]  ;;  %v104_v23 = vld [vmem:[#allocation2 + $0xa8] sm:$0xff] }
 0x16b   :  { %v1718_v46 = vld [vmem:[#allocation2 + $0x68] sm:$0xff]  ;;  %v1136_v44 = vpop.f32.mrf.mxu0  ;;  %v1399_v26 = vpop.f32.mrf.mxu1  ;;  %v1593_v56 = vadd.f32 %v1395_v42, %v102_v60  ;;  %v1591_v59 = vadd.f32 %v1387_v47, %v100_v0  ;;  %v2238_v11 = vmul.f32 %v1720_v4, %v1720_v4  ;;  %v1408_v14 = vadd.f32 %v2766_v31, %v3670_v19 }
 0x16c   :  { %2041 = vst.msk [vmem:[%s4446_s2 + $0x3c] sm:$0xf] %vm2025_vm1, %v2657_v24  ;;  %v2655_v51 = vpack.c.bf16 %v1718_v46, %v1718_v46  ;;  %v2115_v20 = vsel %vm18_vm0, %v1718_v46, 0.0  ;;  %v2236_v58 = vmul.f32 %v1718_v46, %v1718_v46  ;;  %v2114_v63 = vadd.f32 %v2113_v50, %v2112_v43  ;;  %v109_v43 = vld [vmem:[#allocation2 + $0xd0] sm:$0xff] }
 0x16d   :  { %v2309_v2 = vadd.f32 %v2308_v34, %v2307_v39  ;;  %v3769_v6 = vld [vmem:[#allocation2 + $0x90] sm:$0xff]  ;;  %v1137_v7 = vpop.f32.mrf.mxu0  ;;  %v2767_v16 = vpop.f32.mrf.mxu1  ;;  %1657 = vst.msk [vmem:[#allocation2 + $0x98] sm:$0xff] %vm18_vm0, %v1593_v56  ;;  %1655 = vst.msk [vmem:[#allocation2 + $0x88] sm:$0xff] %vm18_vm0, %v1591_v59  ;;  %v1400_v22 = vadd.f32 %v1399_v26, %v3631_v3  ;;  %v2117_v34 = vsel %vm18_vm0, %v3731_v55, 0.0  ;;  %v2314_v28 = vsel %vm18_vm0, %v2237_v40, 0.0 }
 0x16e   :  { %2039 = vst.msk [vmem:[%s4446_s2 + $0x34] sm:$0xf] %vm2025_vm1, %v2655_v51  ;;  %v2312_v15 = vsel %vm18_vm0, %v2236_v58, 0.0  ;;  %v2660_v18 = vpack.c.bf16 %v3769_v6, %v3769_v6  ;;  %v2116_v35 = vadd.f32 %v2115_v20, %v2114_v63  ;;  %v1411_v24 = vadd.f32 %v2767_v16, %v3689_v12  ;;  %v107_v20 = vld [vmem:[#allocation2 + $0xc0] sm:$0xff] }
 0x16f   :  { %v2311_v54 = vadd.f32 %v2310_v10, %v2309_v2  ;;  %v1139_v8 = vpop.f32.mrf.mxu0  ;;  %v1402_v27 = vpop.f32.mrf.mxu1  ;;  %v1596_v60 = vadd.f32 %v1408_v14, %v105_v32  ;;  %v1594_v0 = vadd.f32 %v1400_v22, %v103_v48  ;;  %v2119_v55 = vsel %vm18_vm0, %v1720_v4, 0.0  ;;  %v110_v10 = vld [vmem:[#allocation2 + $0xd8] sm:$0xff] }
 0x170   :  { %2044 = vst.msk [vmem:[%s4446_s2 + $0x48] sm:$0xf] %vm2025_vm1, %v2660_v18  ;;  %v1403_v19 = vadd.f32 %v1402_v27, %v3650_v38  ;;  %v2118_v31 = vadd.f32 %v2117_v34, %v2116_v35  ;;  %v1721_v40 = vld [vmem:[#allocation2 + $0x80] sm:$0xff]  ;;  %v1597_v42 = vadd.f32 %v1411_v24, %v106_v62  ;;  %v2316_v26 = vsel %vm18_vm0, %v2238_v11, 0.0 }
 0x171   :  { %v2313_v3 = vadd.f32 %v2312_v15, %v2311_v54  ;;  %v3792_v39 = vpop.f32.mrf.mxu0  ;;  %v2770_v46 = vpop.f32.mrf.mxu1  ;;  %v2658_v12 = vpack.c.bf16 %v1721_v40, %v1721_v40  ;;  %1660 = vst.msk [vmem:[#allocation2 + $0xb0] sm:$0xff] %vm18_vm0, %v1596_v60  ;;  %1658 = vst.msk [vmem:[#allocation2 + $0xa0] sm:$0xff] %vm18_vm0, %v1594_v0  ;;  %v2121_v63 = vsel %vm18_vm0, %v1721_v40, 0.0  ;;  %v2239_v2 = vmul.f32 %v1721_v40, %v1721_v40 }
 0x172   :  { %v1595_v47 = vadd.f32 %v1403_v19, %v104_v23  ;;  %v1424_v44 = vadd.f32 %v2770_v46, %v1134_v30  ;;  %v2120_v51 = vadd.f32 %v2119_v55, %v2118_v31  ;;  %1661 = vst.msk [vmem:[#allocation2 + $0xb8] sm:$0xff] %vm18_vm0, %v1597_v42  ;;  %v2125_v19 = vsel %vm18_vm0, %v3769_v6, 0.0 }
 0x173   :  { %v2315_v50 = vadd.f32 %v2314_v28, %v2313_v3  ;;  %v1144_v38 = vpop.f32.mrf.mxu0  ;;  %v1415_v58 = vpop.f32.mrf.mxu1  ;;  %2042 = vst.msk [vmem:[%s4446_s2 + $0x40] sm:$0xf] %vm2025_vm1, %v2658_v12  ;;  %v2318_v15 = vsel %vm18_vm0, %v2239_v2, 0.0 }
 0x174   :  { %1659 = vst.msk [vmem:[#allocation2 + $0xa8] sm:$0xff] %vm18_vm0, %v1595_v47  ;;  %v1600_v4 = vadd.f32 %v1424_v44, %v109_v43  ;;  %v1416_v30 = vadd.f32 %v1415_v58, %v3713_v52  ;;  %v2122_v56 = vadd.f32 %v2121_v63, %v2120_v51  ;;  %v1724_v18 = vld [vmem:[#allocation2 + $0x98] sm:$0xff]  ;;  %v1722_v32 = vld [vmem:[#allocation2 + $0x88] sm:$0xff]  ;;  %v2241_v52 = vmul.f32 %v3769_v6, %v3769_v6 }
 0x175   :  { %v2317_v59 = vadd.f32 %v2316_v26, %v2315_v50  ;;  %v3806_v16 = vpop.f32.mrf.mxu0  ;;  %v2771_v11 = vpop.f32.mrf.mxu1  ;;  %v2661_v14 = vpack.c.bf16 %v1724_v18, %v1724_v18  ;;  %v2659_v8 = vpack.c.bf16 %v1722_v32, %v1722_v32  ;;  %v2123_v23 = vsel %vm18_vm0, %v1722_v32, 0.0 }
 0x176   :  { %1664 = vst.msk [vmem:[#allocation2 + $0xd0] sm:$0xff] %vm18_vm0, %v1600_v4  ;;  %v1598_v48 = vadd.f32 %v1416_v30, %v107_v20  ;;  %v1427_v54 = vadd.f32 %v2771_v11, %v1137_v7  ;;  %v2240_v27 = vmul.f32 %v1722_v32, %v1722_v32  ;;  %v2124_v7 = vadd.f32 %v2123_v23, %v2122_v56 }
 0x177   :  { %v2319_v35 = vadd.f32 %v2318_v15, %v2317_v59  ;;  %v1147_v22 = vpop.f32.mrf.mxu0  ;;  %v1418_v62 = vpop.f32.mrf.mxu1  ;;  %2045 = vst.msk [vmem:[%s4446_s2 + $0x4c] sm:$0xf] %vm2025_vm1, %v2661_v14  ;;  %v2242_v31 = vmul.f32 %v1724_v18, %v1724_v18  ;;  %2043 = vst.msk [vmem:[%s4446_s2 + $0x44] sm:$0xf] %vm2025_vm1, %v2659_v8  ;;  %v2322_v44 = vsel %vm18_vm0, %v2241_v52, 0.0  ;;  %v2127_v26 = vsel %vm18_vm0, %v1724_v18, 0.0 }
 0x178   :  { %1662 = vst.msk [vmem:[#allocation2 + $0xc0] sm:$0xff] %vm18_vm0, %v1598_v48  ;;  %v1601_v34 = vadd.f32 %v1427_v54, %v110_v10  ;;  %v2320_v3 = vsel %vm18_vm0, %v2240_v27, 0.0  ;;  %v1727_v60 = vld [vmem:[#allocation2 + $0xb0] sm:$0xff]  ;;  %v1725_v0 = vld [vmem:[#allocation2 + $0xa0] sm:$0xff]  ;;  %v2126_v43 = vadd.f32 %v2125_v19, %v2124_v7 }
 0x179   :  { %v1150_v28 = vpop.f32.mrf.mxu0  ;;  %v2774_v24 = vpop.f32.mrf.mxu1  ;;  %v2321_v46 = vadd.f32 %v2320_v3, %v2319_v35  ;;  %v2664_v55 = vpack.c.bf16 %v1727_v60, %v1727_v60  ;;  %v3826_v40 = vld [vmem:[#allocation2 + $0xb8] sm:$0xff]  ;;  %v2662_v50 = vpack.c.bf16 %v1725_v0, %v1725_v0  ;;  %v2243_v12 = vmul.f32 %v1725_v0, %v1725_v0  ;;  %v113_v7 = vld [vmem:[#allocation2 + $0xf0] sm:$0xff] }
 0x17a   :  { %1665 = vst.msk [vmem:[#allocation2 + $0xd8] sm:$0xff] %vm18_vm0, %v1601_v34  ;;  %v2128_v38 = vadd.f32 %v2127_v26, %v2126_v43  ;;  %v2665_v20 = vpack.c.bf16 %v3826_v40, %v3826_v40  ;;  %v2324_v4 = vsel %vm18_vm0, %v2242_v31, 0.0  ;;  %v2129_v30 = vsel %vm18_vm0, %v1725_v0, 0.0  ;;  %v108_v34 = vld [vmem:[#allocation2 + $0xc8] sm:$0xff] }
 0x17b   :  { %v1726_v42 = vld [vmem:[#allocation2 + $0xa8] sm:$0xff]  ;;  %v1152_v47 = vpop.f32.mrf.mxu0  ;;  %v1431_v6 = vpop.f32.mrf.mxu1  ;;  %v2323_v51 = vadd.f32 %v2322_v44, %v2321_v46  ;;  %2048 = vst.msk [vmem:[%s4446_s2 + $0x58] sm:$0xf] %vm2025_vm1, %v2664_v55  ;;  %2046 = vst.msk [vmem:[%s4446_s2 + $0x50] sm:$0xf] %vm2025_vm1, %v2662_v50  ;;  %v2326_v54 = vsel %vm18_vm0, %v2243_v12, 0.0  ;;  %v1419_v35 = vadd.f32 %v1418_v62, %v3734_v36  ;;  %v1440_v14 = vadd.f32 %v2774_v24, %v1150_v28 }
 0x17c   :  { %v2663_v56 = vpack.c.bf16 %v1726_v42, %v1726_v42  ;;  %v2130_v59 = vadd.f32 %v2129_v30, %v2128_v38  ;;  %2049 = vst.msk [vmem:[%s4446_s2 + $0x5c] sm:$0xf] %vm2025_vm1, %v2665_v20  ;;  %v2131_v11 = vsel %vm18_vm0, %v1726_v42, 0.0  ;;  %v2244_v15 = vmul.f32 %v1726_v42, %v1726_v42  ;;  %v111_v28 = vld [vmem:[#allocation2 + $0xe0] sm:$0xff]  ;;  %v114_v47 = vld [vmem:[#allocation2 + $0xf8] sm:$0xff]  ;;  %v112_v12 = vld [vmem:[#allocation2 + $0xe8] sm:$0xff] }
 0x17d   :  { %v3836_v58 = vld [vmem:[#allocation2 + $0xd0] sm:$0xff]  ;;  %v1153_v63 = vpop.f32.mrf.mxu0  ;;  %v2775_v2 = vpop.f32.mrf.mxu1  ;;  %v2325_v10 = vadd.f32 %v2324_v4, %v2323_v51  ;;  %v2245_v62 = vmul.f32 %v1727_v60, %v1727_v60  ;;  %v2133_v43 = vsel %vm18_vm0, %v1727_v60, 0.0  ;;  %v1599_v46 = vadd.f32 %v1419_v35, %v108_v34  ;;  %v115_v51 = vld [vmem:[#allocation2 + $0x100] sm:$0xff] }
 0x17e   :  { %2047 = vst.msk [vmem:[%s4446_s2 + $0x54] sm:$0xf] %vm2025_vm1, %v2663_v56  ;;  %v2668_v52 = vpack.c.bf16 %v3836_v58, %v3836_v58  ;;  %v2132_v8 = vadd.f32 %v2131_v11, %v2130_v59  ;;  %v2328_v3 = vsel %vm18_vm0, %v2244_v15, 0.0  ;;  %v1604_v55 = vadd.f32 %v1440_v14, %v113_v7 }
 0x17f   :  { %v3849_v18 = vld [vmem:[#allocation2 + $0xc0] sm:$0xff]  ;;  %v1155_v32 = vpop.f32.mrf.mxu0  ;;  %v1434_v48 = vpop.f32.mrf.mxu1  ;;  %v2327_v22 = vadd.f32 %v2326_v54, %v2325_v10  ;;  %v1432_v42 = vadd.f32 %v1431_v6, %v3792_v39  ;;  %v1443_v50 = vadd.f32 %v2775_v2, %v1153_v63  ;;  %1663 = vst.msk [vmem:[#allocation2 + $0xc8] sm:$0xff] %vm18_vm0, %v1599_v46  ;;  %v2330_v56 = vsel %vm18_vm0, %v2245_v62, 0.0  ;;  %v116_v2 = vld [vmem:[#allocation2 + $0x108] sm:$0xff] }
 0x180   :  { %v2666_v23 = vpack.c.bf16 %v3849_v18, %v3849_v18  ;;  %2052 = vst.msk [vmem:[%s4446_s2 + $0x68] sm:$0xf] %vm2025_vm1, %v2668_v52  ;;  %v2134_v44 = vadd.f32 %v2133_v43, %v2132_v8  ;;  %v1435_v4 = vadd.f32 %v1434_v48, %v3806_v16  ;;  %v2135_v39 = vsel %vm18_vm0, %v3826_v40, 0.0  ;;  %v117_v48 = vld [vmem:[#allocation2 + $0x110] sm:$0xff] }
 0x181   :  { %v3861_v27 = vld [vmem:[#allocation2 + $0xd8] sm:$0xff]  ;;  %v1158_v19 = vpop.f32.mrf.mxu0  ;;  %v2778_v31 = vpop.f32.mrf.mxu1  ;;  %v2329_v26 = vadd.f32 %v2328_v3, %v2327_v22  ;;  %1668 = vst.msk [vmem:[#allocation2 + $0xf0] sm:$0xff] %vm18_vm0, %v1604_v55  ;;  %v1602_v60 = vadd.f32 %v1432_v42, %v111_v28  ;;  %v1605_v6 = vadd.f32 %v1443_v50, %v114_v47  ;;  %v2246_v10 = vmul.f32 %v3826_v40, %v3826_v40 }
 0x182   :  { %v2669_v36 = vpack.c.bf16 %v3861_v27, %v3861_v27  ;;  %2050 = vst.msk [vmem:[%s4446_s2 + $0x60] sm:$0xf] %vm2025_vm1, %v2666_v23  ;;  %v1603_v11 = vadd.f32 %v1435_v4, %v112_v12  ;;  %v2136_v16 = vadd.f32 %v2135_v39, %v2134_v44  ;;  %v2137_v34 = vsel %vm18_vm0, %v3849_v18, 0.0 }
 0x183   :  { %v1160_v24 = vpop.f32.mrf.mxu0  ;;  %v1447_v0 = vpop.f32.mrf.mxu1  ;;  %1666 = vst.msk [vmem:[#allocation2 + $0xe0] sm:$0xff] %vm18_vm0, %v1602_v60  ;;  %v2331_v54 = vadd.f32 %v2330_v56, %v2329_v26  ;;  %1669 = vst.msk [vmem:[#allocation2 + $0xf8] sm:$0xff] %vm18_vm0, %v1605_v6  ;;  %v2332_v23 = vsel %vm18_vm0, %v2246_v10, 0.0  ;;  %v2247_v7 = vmul.f32 %v3849_v18, %v3849_v18 }
 0x184   :  { %2053 = vst.msk [vmem:[%s4446_s2 + $0x6c] sm:$0xf] %vm2025_vm1, %v2669_v36  ;;  %v1448_v30 = vadd.f32 %v1447_v0, %v1158_v19  ;;  %v2138_v3 = vadd.f32 %v2137_v34, %v2136_v16  ;;  %v119_v34 = vld [vmem:[#allocation2 + $0x120] sm:$0xff] }
 0x185   :  { %v1161_v38 = vpop.f32.mrf.mxu0  ;;  %v3880_v20 = vpop.f32.mrf.mxu1  ;;  %1667 = vst.msk [vmem:[#allocation2 + $0xe8] sm:$0xff] %vm18_vm0, %v1603_v11  ;;  %v2333_v36 = vadd.f32 %v2332_v23, %v2331_v54  ;;  %v2334_v44 = vsel %vm18_vm0, %v2247_v7, 0.0  ;;  %v2141_v11 = vsel %vm18_vm0, %v3836_v58, 0.0  ;;  %v2143_v23 = vsel %vm18_vm0, %v3861_v27, 0.0  ;;  %v120_v7 = vld [vmem:[#allocation2 + $0x128] sm:$0xff] }
 0x186   :  { %v1606_v15 = vadd.f32 %v1448_v30, %v115_v51  ;;  %v1730_v62 = vld [vmem:[#allocation2 + $0xc8] sm:$0xff] }
 0x187   :  { %v1163_v63 = vpop.f32.mrf.mxu0  ;;  %v1450_v59 = vpop.f32.mrf.mxu1  ;;  %v2667_v0 = vpack.c.bf16 %v1730_v62, %v1730_v62  ;;  %v2139_v43 = vsel %vm18_vm0, %v1730_v62, 0.0  ;;  %v2248_v46 = vmul.f32 %v1730_v62, %v1730_v62  ;;  %v2335_v12 = vadd.f32 %v2334_v44, %v2333_v36 }
 0x188   :  { %v1451_v32 = vadd.f32 %v1450_v59, %v1161_v38  ;;  %1670 = vst.msk [vmem:[#allocation2 + $0x100] sm:$0xff] %vm18_vm0, %v1606_v15  ;;  %v3904_v28 = vld [vmem:[#allocation2 + $0xf0] sm:$0xff]  ;;  %v2140_v51 = vadd.f32 %v2139_v43, %v2138_v3  ;;  %v2249_v63 = vmul.f32 %v3836_v58, %v3836_v58  ;;  %v2250_v36 = vmul.f32 %v3861_v27, %v3861_v27 }
 0x189   :  { %v1166_v52 = vpop.f32.mrf.mxu0  ;;  %v3892_v35 = vpop.f32.mrf.mxu1  ;;  %v2672_v55 = vpack.c.bf16 %v3904_v28, %v3904_v28  ;;  %2051 = vst.msk [vmem:[%s4446_s2 + $0x64] sm:$0xf] %vm2025_vm1, %v2667_v0  ;;  %v2336_v39 = vsel %vm18_vm0, %v2248_v46, 0.0 }
 0x18a   :  { %v1607_v14 = vadd.f32 %v1451_v32, %v116_v2  ;;  %v1456_v22 = vadd.f32 %v2778_v31, %v1166_v52  ;;  %v1733_v18 = vld [vmem:[#allocation2 + $0xe0] sm:$0xff]  ;;  %v3921_v50 = vld [vmem:[#allocation2 + $0xf8] sm:$0xff]  ;;  %v2142_v54 = vadd.f32 %v2141_v11, %v2140_v51  ;;  %v2337_v16 = vadd.f32 %v2336_v39, %v2335_v12 }
 0x18b   :  { %v1168_v40 = vpop.f32.mrf.mxu0  ;;  %v3896_v8 = vpop.f32.mrf.mxu1  ;;  %2056 = vst.msk [vmem:[%s4446_s2 + $0x78] sm:$0xf] %vm2025_vm1, %v2672_v55  ;;  %v2670_v26 = vpack.c.bf16 %v1733_v18, %v1733_v18  ;;  %v2673_v38 = vpack.c.bf16 %v3921_v50, %v3921_v50  ;;  %v121_v55 = vld [vmem:[#allocation2 + $0x130] sm:$0xff]  ;;  %v2340_v39 = vsel %vm18_vm0, %v2250_v36, 0.0 }
 0x18c   :  { %1671 = vst.msk [vmem:[#allocation2 + $0x108] sm:$0xff] %vm18_vm0, %v1607_v14  ;;  %v1608_v19 = vadd.f32 %v1456_v22, %v117_v48  ;;  %v1734_v60 = vld [vmem:[#allocation2 + $0xe8] sm:$0xff]  ;;  %v118_v14 = vld [vmem:[#allocation2 + $0x118] sm:$0xff]  ;;  %v2144_v46 = vadd.f32 %v2143_v23, %v2142_v54 }
 0x18d   :  { %v1169_v31 = vpop.f32.mrf.mxu0  ;;  %v3906_v24 = vpop.f32.mrf.mxu1  ;;  %2054 = vst.msk [vmem:[%s4446_s2 + $0x70] sm:$0xf] %vm2025_vm1, %v2670_v26  ;;  %v2671_v6 = vpack.c.bf16 %v1734_v60, %v1734_v60  ;;  %2057 = vst.msk [vmem:[%s4446_s2 + $0x7c] sm:$0xf] %vm2025_vm1, %v2673_v38 }
 0x18e   :  { %1672 = vst.msk [vmem:[#allocation2 + $0x110] sm:$0xff] %vm18_vm0, %v1608_v19  ;;  %v1459_v32 = vadd.f32 %v3880_v20, %v1169_v31  ;;  %v2338_v20 = vsel %vm18_vm0, %v2249_v63, 0.0 }
 0x18f   :  { %v1171_v42 = vpop.f32.mrf.mxu0  ;;  %v1466_v47 = vpop.f32.mrf.mxu1  ;;  %v3925_v4 = vld [vmem:[#allocation2 + $0x100] sm:$0xff]  ;;  %2055 = vst.msk [vmem:[%s4446_s2 + $0x74] sm:$0xf] %vm2025_vm1, %v2671_v6  ;;  %v2339_v43 = vadd.f32 %v2338_v20, %v2337_v16 }
 0x190   :  { %v2674_v15 = vpack.c.bf16 %v3925_v4, %v3925_v4  ;;  %v1609_v62 = vadd.f32 %v1459_v32, %v118_v14  ;;  %v2252_v32 = vmul.f32 %v1734_v60, %v1734_v60 }
 0x191   :  { %v1174_v30 = vpop.f32.mrf.mxu0  ;;  %v3927_v56 = vpop.f32.mrf.mxu1  ;;  %v2341_v63 = vadd.f32 %v2340_v39, %v2339_v43  ;;  %v2149_v43 = vsel %vm18_vm0, %v3904_v28, 0.0 }
 0x192   :  { %2058 = vst.msk [vmem:[%s4446_s2 + $0x80] sm:$0xf] %vm2025_vm1, %v2674_v15  ;;  %v1464_v31 = vadd.f32 %v3896_v8, %v1174_v30  ;;  %v2145_v8 = vsel %vm18_vm0, %v1733_v18, 0.0 }
 0x193   :  { %v3940_v2 = vld [vmem:[#allocation2 + $0x108] sm:$0xff]  ;;  %v1176_v59 = vpop.f32.mrf.mxu0  ;;  %v3942_v10 = vpop.f32.mrf.mxu1  ;;  %1673 = vst.msk [vmem:[#allocation2 + $0x118] sm:$0xff] %vm18_vm0, %v1609_v62  ;;  %v2146_v6 = vadd.f32 %v2145_v8, %v2144_v46 }
 0x194   :  { %v2675_v48 = vpack.c.bf16 %v3940_v2, %v3940_v2  ;;  %v1610_v26 = vadd.f32 %v1464_v31, %v119_v34  ;;  %v122_v59 = vld [vmem:[#allocation2 + $0x138] sm:$0xff] }
 0x195   :  { %v3955_v52 = vld [vmem:[#allocation2 + $0x110] sm:$0xff]  ;;  %v1177_v22 = vpop.f32.mrf.mxu0  ;;  %v3957_v58 = vpop.f32.mrf.mxu1 }
 0x196   :  { %v2676_v40 = vpack.c.bf16 %v3955_v52, %v3955_v52  ;;  %2059 = vst.msk [vmem:[%s4446_s2 + $0x84] sm:$0xf] %vm2025_vm1, %v2675_v48  ;;  %v1467_v0 = vadd.f32 %v1466_v47, %v1177_v22  ;;  %v2251_v47 = vmul.f32 %v1733_v18, %v1733_v18 }
 0x197   :  { %v1179_v19 = vpop.f32.mrf.mxu0  ;;  %v3972_v3 = vpop.f32.mrf.mxu1  ;;  %1674 = vst.msk [vmem:[#allocation2 + $0x120] sm:$0xff] %vm18_vm0, %v1610_v26 }
 0x198   :  { %2060 = vst.msk [vmem:[%s4446_s2 + $0x88] sm:$0xf] %vm2025_vm1, %v2676_v40  ;;  %v1611_v12 = vadd.f32 %v1467_v0, %v120_v7  ;;  %v2342_v48 = vsel %vm18_vm0, %v2251_v47, 0.0  ;;  %v2344_v7 = vsel %vm18_vm0, %v2252_v32, 0.0  ;;  %v2254_v47 = vmul.f32 %v3921_v50, %v3921_v50 }
 0x199   :  { %v1182_v42 = vpop.f32.mrf.mxu0  ;;  %v3981_v44 = vpop.f32.mrf.mxu1  ;;  %v2343_v22 = vadd.f32 %v2342_v48, %v2341_v63  ;;  %v134_v48 = vld [vmem:[#allocation2 + $0x198] sm:$0xff] }
 0x19a   :  { %v1472_v27 = vadd.f32 %v3892_v35, %v1182_v42  ;;  %1675 = vst.msk [vmem:[#allocation2 + $0x128] sm:$0xff] %vm18_vm0, %v1611_v12  ;;  %v2147_v35 = vsel %vm18_vm0, %v1734_v60, 0.0  ;;  %v3999_v20 = vld [vmem:[#allocation2 + $0x118] sm:$0xff] }
 0x19b   :  { %v1184_v51 = vpop.f32.mrf.mxu0  ;;  %v3985_v38 = vpop.f32.mrf.mxu1  ;;  %v2148_v40 = vadd.f32 %v2147_v35, %v2146_v6  ;;  %v2677_v60 = vpack.c.bf16 %v3999_v20, %v3999_v20  ;;  %v2345_v12 = vadd.f32 %v2344_v7, %v2343_v22  ;;  %v131_v6 = vld [vmem:[#allocation2 + $0x180] sm:$0xff] }
 0x19c   :  { %v1612_v30 = vadd.f32 %v1472_v27, %v121_v55  ;;  %v123_v55 = vld [vmem:[#allocation2 + $0x140] sm:$0xff]  ;;  %v133_v51 = vld [vmem:[#allocation2 + $0x190] sm:$0xff] }
 0x19d   :  { %v1185_v11 = vpop.f32.mrf.mxu0  ;;  %v3991_v15 = vpop.f32.mrf.mxu1  ;;  %2061 = vst.msk [vmem:[%s4446_s2 + $0x8c] sm:$0xf] %vm2025_vm1, %v2677_v60  ;;  %v2150_v26 = vadd.f32 %v2149_v43, %v2148_v40  ;;  %v2348_v60 = vsel %vm18_vm0, %v2254_v47, 0.0 }
 0x19e   :  { %1676 = vst.msk [vmem:[#allocation2 + $0x130] sm:$0xff] %vm18_vm0, %v1612_v30  ;;  %v1475_v54 = vadd.f32 %v3906_v24, %v1185_v11  ;;  %v2253_v24 = vmul.f32 %v3904_v28, %v3904_v28  ;;  %v4007_v19 = vld [vmem:[#allocation2 + $0x120] sm:$0xff]  ;;  %v2151_v11 = vsel %vm18_vm0, %v3921_v50, 0.0 }
 0x19f   :  { %v1187_v16 = vpop.f32.mrf.mxu0  ;;  %v3996_v18 = vpop.f32.mrf.mxu1  ;;  %v2678_v46 = vpack.c.bf16 %v4007_v19, %v4007_v19  ;;  %v2152_v22 = vadd.f32 %v2151_v11, %v2150_v26 }
 0x1a0   :  { %v1613_v14 = vadd.f32 %v1475_v54, %v122_v59  ;;  %v124_v54 = vld [vmem:[#allocation2 + $0x148] sm:$0xff] }
 0x1a1   :  { %v1190_v23 = vpop.f32.mrf.mxu0  ;;  %v2794_v34 = vpop.f32.mrf.mxu1  ;;  %v4009_v36 = vld [vmem:[#allocation2 + $0x128] sm:$0xff]  ;;  %2062 = vst.msk [vmem:[%s4446_s2 + $0x90] sm:$0xf] %vm2025_vm1, %v2678_v46 }
 0x1a2   :  { %1677 = vst.msk [vmem:[#allocation2 + $0x138] sm:$0xff] %vm18_vm0, %v1613_v14  ;;  %v1480_v62 = vadd.f32 %v3942_v10, %v1190_v23  ;;  %v1520_v42 = vadd.f32 %v2794_v34, %v3552_v61  ;;  %v2679_v10 = vpack.c.bf16 %v4009_v36, %v4009_v36  ;;  %v2346_v61 = vsel %vm18_vm0, %v2253_v24, 0.0 }
 0x1a3   :  { %v1192_v31 = vpop.f32.mrf.mxu0  ;;  %v1511_v0 = vpop.f32.mrf.mxu1  ;;  %v2347_v14 = vadd.f32 %v2346_v61, %v2345_v12  ;;  %v135_v12 = vld [vmem:[#allocation2 + $0x1a0] sm:$0xff] }
 0x1a4   :  { %2063 = vst.msk [vmem:[%s4446_s2 + $0x94] sm:$0xf] %vm2025_vm1, %v2679_v10  ;;  %v1614_v30 = vadd.f32 %v1480_v62, %v123_v55  ;;  %v1624_v35 = vadd.f32 %v1520_v42, %v133_v51  ;;  %v1512_v32 = vadd.f32 %v1511_v0, %v3546_v53  ;;  %v132_v62 = vld [vmem:[#allocation2 + $0x188] sm:$0xff]  ;;  %v125_v31 = vld [vmem:[#allocation2 + $0x150] sm:$0xff]  ;;  %v2255_v51 = vmul.f32 %v3925_v4, %v3925_v4 }
 0x1a5   :  { %v4023_v27 = vld [vmem:[#allocation2 + $0x130] sm:$0xff]  ;;  %v1193_v28 = vpop.f32.mrf.mxu0  ;;  %v2795_v39 = vpop.f32.mrf.mxu1 }
 0x1a6   :  { %v2680_v8 = vpack.c.bf16 %v4023_v27, %v4023_v27  ;;  %v1483_v16 = vadd.f32 %v3972_v3, %v1193_v28  ;;  %1678 = vst.msk [vmem:[#allocation2 + $0x140] sm:$0xff] %vm18_vm0, %v1614_v30  ;;  %v1523_v50 = vadd.f32 %v2795_v39, %v3556_v1  ;;  %1688 = vst.msk [vmem:[#allocation2 + $0x190] sm:$0xff] %vm18_vm0, %v1624_v35  ;;  %v137_v0 = vld [vmem:[#allocation2 + $0x1b0] sm:$0xff]  ;;  %v2153_v1 = vsel %vm18_vm0, %v3925_v4, 0.0 }
 0x1a7   :  { %v1195_v63 = vpop.f32.mrf.mxu0  ;;  %v1514_v59 = vpop.f32.mrf.mxu1  ;;  %v1622_v53 = vadd.f32 %v1512_v32, %v131_v6  ;;  %v2154_v10 = vadd.f32 %v2153_v1, %v2152_v22  ;;  %v2349_v28 = vadd.f32 %v2348_v60, %v2347_v14  ;;  %v138_v6 = vld [vmem:[#allocation2 + $0x1b8] sm:$0xff]  ;;  %v2256_v4 = vmul.f32 %v3940_v2, %v3940_v2 }
 0x1a8   :  { %2064 = vst.msk [vmem:[%s4446_s2 + $0x98] sm:$0xf] %vm2025_vm1, %v2680_v8  ;;  %v1615_v3 = vadd.f32 %v1483_v16, %v124_v54  ;;  %v1625_v24 = vadd.f32 %v1523_v50, %v134_v48  ;;  %v1515_v55 = vadd.f32 %v1514_v59, %v3550_v57  ;;  %v126_v8 = vld [vmem:[#allocation2 + $0x158] sm:$0xff]  ;;  %v2155_v63 = vsel %vm18_vm0, %v3940_v2, 0.0  ;;  %v136_v54 = vld [vmem:[#allocation2 + $0x1a8] sm:$0xff] }
 0x1a9   :  { %v4046_v40 = vld [vmem:[#allocation2 + $0x138] sm:$0xff]  ;;  %v1198_v23 = vpop.f32.mrf.mxu0  ;;  %v2798_v34 = vpop.f32.mrf.mxu1  ;;  %1686 = vst.msk [vmem:[#allocation2 + $0x180] sm:$0xff] %vm18_vm0, %v1622_v53  ;;  %v2350_v48 = vsel %vm18_vm0, %v2255_v51, 0.0  ;;  %v2157_v2 = vsel %vm18_vm0, %v3955_v52, 0.0  ;;  %v2352_v60 = vsel %vm18_vm0, %v2256_v4, 0.0 }
 0x1aa   :  { %v2681_v7 = vpack.c.bf16 %v4046_v40, %v4046_v40  ;;  %v1488_v42 = vadd.f32 %v3927_v56, %v1198_v23  ;;  %v1536_v26 = vadd.f32 %v2798_v34, %v3568_v13  ;;  %1679 = vst.msk [vmem:[#allocation2 + $0x148] sm:$0xff] %vm18_vm0, %v1615_v3  ;;  %1689 = vst.msk [vmem:[#allocation2 + $0x198] sm:$0xff] %vm18_vm0, %v1625_v24 }
 0x1ab   :  { %v1200_v43 = vpop.f32.mrf.mxu0  ;;  %v1527_v46 = vpop.f32.mrf.mxu1  ;;  %v1623_v57 = vadd.f32 %v1515_v55, %v132_v62  ;;  %v2351_v34 = vadd.f32 %v2350_v48, %v2349_v28  ;;  %v127_v62 = vld [vmem:[#allocation2 + $0x160] sm:$0xff] }
 0x1ac   :  { %2065 = vst.msk [vmem:[%s4446_s2 + $0x9c] sm:$0xf] %vm2025_vm1, %v2681_v7  ;;  %v1528_v39 = vadd.f32 %v1527_v46, %v3560_v5  ;;  %v1616_v30 = vadd.f32 %v1488_v42, %v125_v31  ;;  %v1628_v56 = vadd.f32 %v1536_v26, %v137_v0  ;;  %v2156_v7 = vadd.f32 %v2155_v63, %v2154_v10  ;;  %v141_v42 = vld [vmem:[#allocation2 + $0x1d0] sm:$0xff] }
 0x1ad   :  { %v1201_v61 = vpop.f32.mrf.mxu0  ;;  %v2799_v47 = vpop.f32.mrf.mxu1  ;;  %v4075_v32 = vld [vmem:[#allocation2 + $0x140] sm:$0xff]  ;;  %1687 = vst.msk [vmem:[#allocation2 + $0x188] sm:$0xff] %vm18_vm0, %v1623_v57  ;;  %v4086_v14 = vld [vmem:[#allocation2 + $0x190] sm:$0xff]  ;;  %v2353_v51 = vadd.f32 %v2352_v60, %v2351_v34  ;;  %v2261_v34 = vmul.f32 %v4023_v27, %v4023_v27 }
 0x1ae   :  { %v1491_v13 = vadd.f32 %v3957_v58, %v1201_v61  ;;  %v1626_v59 = vadd.f32 %v1528_v39, %v135_v12  ;;  %v1539_v11 = vadd.f32 %v2799_v47, %v3572_v17  ;;  %1680 = vst.msk [vmem:[#allocation2 + $0x150] sm:$0xff] %vm18_vm0, %v1616_v30  ;;  %1692 = vst.msk [vmem:[#allocation2 + $0x1b0] sm:$0xff] %vm18_vm0, %v1628_v56 }
 0x1af   :  { %v1203_v35 = vpop.f32.mrf.mxu0  ;;  %v1530_v5 = vpop.f32.mrf.mxu1  ;;  %v2682_v17 = vpack.c.bf16 %v4075_v32, %v4075_v32  ;;  %v2692_v53 = vpack.c.bf16 %v4086_v14, %v4086_v14  ;;  %v2158_v28 = vadd.f32 %v2157_v2, %v2156_v7  ;;  %v2259_v61 = vmul.f32 %v4007_v19, %v4007_v19 }
 0x1b0   :  { %v1617_v58 = vadd.f32 %v1491_v13, %v126_v8  ;;  %v1531_v16 = vadd.f32 %v1530_v5, %v3564_v9  ;;  %1690 = vst.msk [vmem:[#allocation2 + $0x1a0] sm:$0xff] %vm18_vm0, %v1626_v59  ;;  %v1629_v22 = vadd.f32 %v1539_v11, %v138_v6  ;;  %v2257_v9 = vmul.f32 %v3955_v52, %v3955_v52  ;;  %v4099_v3 = vld [vmem:[#allocation2 + $0x180] sm:$0xff] }
 0x1b1   :  { %v1206_v50 = vpop.f32.mrf.mxu0  ;;  %v2802_v23 = vpop.f32.mrf.mxu1  ;;  %2066 = vst.msk [vmem:[%s4446_s2 + $0xa0] sm:$0xf] %vm2025_vm1, %v2682_v17  ;;  %2076 = vst.msk [vmem:[%s4446_s2 + $0xc8] sm:$0xf] %vm2025_vm1, %v2692_v53  ;;  %v2690_v46 = vpack.c.bf16 %v4099_v3, %v4099_v3  ;;  %v4112_v1 = vld [vmem:[#allocation2 + $0x148] sm:$0xff]  ;;  %v4114_v55 = vld [vmem:[#allocation2 + $0x198] sm:$0xff]  ;;  %v2260_v5 = vmul.f32 %v4009_v36, %v4009_v36 }
 0x1b2   :  { %1681 = vst.msk [vmem:[#allocation2 + $0x158] sm:$0xff] %vm18_vm0, %v1617_v58  ;;  %1693 = vst.msk [vmem:[#allocation2 + $0x1b8] sm:$0xff] %vm18_vm0, %v1629_v22  ;;  %v1627_v24 = vadd.f32 %v1531_v16, %v136_v54  ;;  %v1496_v52 = vadd.f32 %v3985_v38, %v1206_v50  ;;  %v1552_v31 = vadd.f32 %v2802_v23, %v3584_v29  ;;  %v2159_v38 = vsel %vm18_vm0, %v3999_v20, 0.0 }
 0x1b3   :  { %v1208_v0 = vpop.f32.mrf.mxu0  ;;  %v4104_v43 = vpop.f32.mrf.mxu1  ;;  %v2258_v29 = vmul.f32 %v3999_v20, %v3999_v20  ;;  %v2683_v26 = vpack.c.bf16 %v4112_v1, %v4112_v1  ;;  %v2354_v39 = vsel %vm18_vm0, %v2257_v9, 0.0  ;;  %2074 = vst.msk [vmem:[%s4446_s2 + $0xc0] sm:$0xf] %vm2025_vm1, %v2690_v46  ;;  %v2693_v20 = vpack.c.bf16 %v4114_v55, %v4114_v55 }
 0x1b4   :  { %1691 = vst.msk [vmem:[#allocation2 + $0x1a8] sm:$0xff] %vm18_vm0, %v1627_v24  ;;  %v2161_v8 = vsel %vm18_vm0, %v4007_v19, 0.0  ;;  %v4142_v47 = vld [vmem:[#allocation2 + $0x188] sm:$0xff]  ;;  %v1618_v56 = vadd.f32 %v1496_v52, %v127_v62  ;;  %v1632_v13 = vadd.f32 %v1552_v31, %v141_v42  ;;  %v2160_v4 = vadd.f32 %v2159_v38, %v2158_v28 }
 0x1b5   :  { %v4123_v12 = vpop.f32.mrf.mxu0  ;;  %v4125_v10 = vpop.f32.mrf.mxu1  ;;  %2067 = vst.msk [vmem:[%s4446_s2 + $0xa4] sm:$0xf] %vm2025_vm1, %v2683_v26  ;;  %v4144_v57 = vld [vmem:[#allocation2 + $0x150] sm:$0xff]  ;;  %2077 = vst.msk [vmem:[%s4446_s2 + $0xcc] sm:$0xf] %vm2025_vm1, %v2693_v20  ;;  %v2691_v19 = vpack.c.bf16 %v4142_v47, %v4142_v47  ;;  %v2356_v11 = vsel %vm18_vm0, %v2258_v29, 0.0  ;;  %v2355_v2 = vadd.f32 %v2354_v39, %v2353_v51  ;;  %v2262_v29 = vmul.f32 %v4046_v40, %v4046_v40 }
 0x1b6   :  { %v4146_v30 = vld [vmem:[#allocation2 + $0x1b0] sm:$0xff]  ;;  %v2163_v35 = vsel %vm18_vm0, %v4009_v36, 0.0  ;;  %v2684_v58 = vpack.c.bf16 %v4144_v57, %v4144_v57  ;;  %1682 = vst.msk [vmem:[#allocation2 + $0x160] sm:$0xff] %vm18_vm0, %v1618_v56  ;;  %1696 = vst.msk [vmem:[#allocation2 + $0x1d0] sm:$0xff] %vm18_vm0, %v1632_v13  ;;  %v2162_v17 = vadd.f32 %v2161_v8, %v2160_v4  ;;  %v2358_v50 = vsel %vm18_vm0, %v2259_v61, 0.0  ;;  %v128_v8 = vld [vmem:[#allocation2 + $0x168] sm:$0xff] }
 0x1b7   :  { %v1211_v6 = vpop.f32.mrf.mxu0  ;;  %v4148_v63 = vpop.f32.mrf.mxu1  ;;  %v4156_v59 = vld [vmem:[#allocation2 + $0x1a0] sm:$0xff]  ;;  %2075 = vst.msk [vmem:[%s4446_s2 + $0xc4] sm:$0xf] %vm2025_vm1, %v2691_v19  ;;  %v2696_v36 = vpack.c.bf16 %v4146_v30, %v4146_v30  ;;  %v2165_v23 = vsel %vm18_vm0, %v4023_v27, 0.0  ;;  %v2357_v60 = vadd.f32 %v2356_v11, %v2355_v2  ;;  %v2360_v52 = vsel %vm18_vm0, %v2260_v5, 0.0  ;;  %v142_v11 = vld [vmem:[#allocation2 + $0x1d8] sm:$0xff] }
 0x1b8   :  { %2068 = vst.msk [vmem:[%s4446_s2 + $0xa8] sm:$0xf] %vm2025_vm1, %v2684_v58  ;;  %v2694_v7 = vpack.c.bf16 %v4156_v59, %v4156_v59  ;;  %v2164_v24 = vadd.f32 %v2163_v35, %v2162_v17  ;;  %v2167_v31 = vsel %vm18_vm0, %v4046_v40, 0.0  ;;  %v2362_v51 = vsel %vm18_vm0, %v2261_v34, 0.0  ;;  %v139_v40 = vld [vmem:[#allocation2 + $0x1c0] sm:$0xff] }
 0x1b9   :  { %v4165_v54 = vld [vmem:[#allocation2 + $0x158] sm:$0xff]  ;;  %v4169_v16 = vpop.f32.mrf.mxu0  ;;  %v4171_v48 = vpop.f32.mrf.mxu1  ;;  %2080 = vst.msk [vmem:[%s4446_s2 + $0xd8] sm:$0xf] %vm2025_vm1, %v2696_v36  ;;  %v2359_v42 = vadd.f32 %v2358_v50, %v2357_v60  ;;  %v2169_v28 = vsel %vm18_vm0, %v4075_v32, 0.0  ;;  %v2263_v39 = vmul.f32 %v4075_v32, %v4075_v32  ;;  %v1544_v20 = vadd.f32 %v4104_v43, %v3576_v21  ;;  %v140_v50 = vld [vmem:[#allocation2 + $0x1c8] sm:$0xff] }
 0x1ba   :  { %v4179_v22 = vld [vmem:[#allocation2 + $0x1b8] sm:$0xff]  ;;  %v2685_v27 = vpack.c.bf16 %v4165_v54, %v4165_v54  ;;  %2078 = vst.msk [vmem:[%s4446_s2 + $0xd0] sm:$0xf] %vm2025_vm1, %v2694_v7  ;;  %v2166_v38 = vadd.f32 %v2165_v23, %v2164_v24  ;;  %v1499_v19 = vadd.f32 %v3996_v18, %v4123_v12  ;;  %v1555_v21 = vadd.f32 %v4125_v10, %v3588_v33  ;;  %v129_v33 = vld [vmem:[#allocation2 + $0x170] sm:$0xff]  ;;  %v143_v24 = vld [vmem:[#allocation2 + $0x1e0] sm:$0xff] }
 0x1bb   :  { %v1216_v9 = vpop.f32.mrf.mxu0  ;;  %v1559_v53 = vpop.f32.mrf.mxu1  ;;  %v4198_v62 = vld [vmem:[#allocation2 + $0x1a8] sm:$0xff]  ;;  %v2697_v0 = vpack.c.bf16 %v4179_v22, %v4179_v22  ;;  %v2361_v13 = vadd.f32 %v2360_v52, %v2359_v42  ;;  %v2364_v5 = vsel %vm18_vm0, %v2262_v29, 0.0  ;;  %v2366_v17 = vsel %vm18_vm0, %v2263_v39, 0.0  ;;  %v145_v10 = vld [vmem:[#allocation2 + $0x1f0] sm:$0xff]  ;;  %v146_v52 = vld [vmem:[#allocation2 + $0x1f8] sm:$0xff] }
 0x1bc   :  { %2069 = vst.msk [vmem:[%s4446_s2 + $0xac] sm:$0xf] %vm2025_vm1, %v2685_v27  ;;  %v2695_v26 = vpack.c.bf16 %v4198_v62, %v4198_v62  ;;  %v2168_v6 = vadd.f32 %v2167_v31, %v2166_v38  ;;  %v1630_v18 = vadd.f32 %v1544_v20, %v139_v40  ;;  %v1619_v12 = vadd.f32 %v1499_v19, %v128_v8  ;;  %v130_v27 = vld [vmem:[#allocation2 + $0x178] sm:$0xff] }
 0x1bd   :  { %v1217_v46 = vpop.f32.mrf.mxu0  ;;  %2081 = vst.msk [vmem:[%s4446_s2 + $0xdc] sm:$0xf] %vm2025_vm1, %v2697_v0  ;;  %v2807_v61 = vpop.f32.mrf.mxu1  ;;  %v1749_v32 = vld [vmem:[#allocation2 + $0x160] sm:$0xff]  ;;  %v4232_v4 = vld [vmem:[#allocation2 + $0x1d0] sm:$0xff]  ;;  %v2363_v35 = vadd.f32 %v2362_v51, %v2361_v13  ;;  %v1633_v36 = vadd.f32 %v1555_v21, %v142_v11  ;;  %v2171_v34 = vsel %vm18_vm0, %v4112_v1, 0.0  ;;  %v2264_v7 = vmul.f32 %v4112_v1, %v4112_v1 }
 0x1be   :  { %2079 = vst.msk [vmem:[%s4446_s2 + $0xd4] sm:$0xf] %vm2025_vm1, %v2695_v26  ;;  %v2686_v43 = vpack.c.bf16 %v1749_v32, %v1749_v32  ;;  %v2170_v58 = vadd.f32 %v2169_v28, %v2168_v6  ;;  %v2700_v2 = vpack.c.bf16 %v4232_v4, %v4232_v4  ;;  %v1547_v9 = vadd.f32 %v4148_v63, %v3580_v25  ;;  %v144_v63 = vld [vmem:[#allocation2 + $0x1e8] sm:$0xff] }
 0x1bf   :  { %v1219_v56 = vpop.f32.mrf.mxu0  ;;  %v1562_v23 = vpop.f32.mrf.mxu1  ;;  %v1504_v60 = vadd.f32 %v3981_v44, %v4169_v16  ;;  %1694 = vst.msk [vmem:[#allocation2 + $0x1c0] sm:$0xff] %vm18_vm0, %v1630_v18  ;;  %1683 = vst.msk [vmem:[#allocation2 + $0x168] sm:$0xff] %vm18_vm0, %v1619_v12  ;;  %v1568_v1 = vadd.f32 %v4171_v48, %v3600_v45  ;;  %v1560_v31 = vadd.f32 %v1559_v53, %v3592_v37  ;;  %v2173_v37 = vsel %vm18_vm0, %v4144_v57, 0.0 }
 0x1c0   :  { %2070 = vst.msk [vmem:[%s4446_s2 + $0xb0] sm:$0xf] %vm2025_vm1, %v2686_v43  ;;  %2084 = vst.msk [vmem:[%s4446_s2 + $0xe8] sm:$0xf] %vm2025_vm1, %v2700_v2  ;;  %v1507_v0 = vadd.f32 %v3991_v15, %v1217_v46  ;;  %v1571_v25 = vadd.f32 %v2807_v61, %v3604_v49  ;;  %v2265_v44 = vmul.f32 %v4144_v57, %v4144_v57  ;;  %v2368_v15 = vsel %vm18_vm0, %v2264_v7, 0.0 }
 0x1c1   :  { %1697 = vst.msk [vmem:[#allocation2 + $0x1d8] sm:$0xff] %vm18_vm0, %v1633_v36  ;;  %v1631_v16 = vadd.f32 %v1547_v9, %v140_v50  ;;  %v1620_v42 = vadd.f32 %v1504_v60, %v129_v33  ;;  %v1563_v38 = vadd.f32 %v1562_v23, %v3596_v41  ;;  %v1636_v29 = vadd.f32 %v1568_v1, %v145_v10 }
 0x1c2   :  { %v1634_v26 = vadd.f32 %v1560_v31, %v143_v24  ;;  %v1621_v51 = vadd.f32 %v1507_v0, %v130_v27  ;;  %v1637_v28 = vadd.f32 %v1571_v25, %v146_v52  ;;  %v2365_v39 = vadd.f32 %v2364_v5, %v2363_v35 }
 0x1c3   :  { %1695 = vst.msk [vmem:[#allocation2 + $0x1c8] sm:$0xff] %vm18_vm0, %v1631_v16  ;;  %1684 = vst.msk [vmem:[#allocation2 + $0x170] sm:$0xff] %vm18_vm0, %v1620_v42  ;;  %v1635_v45 = vadd.f32 %v1563_v38, %v144_v63  ;;  %v2172_v49 = vadd.f32 %v2171_v34, %v2170_v58  ;;  %v2266_v48 = vmul.f32 %v4165_v54, %v4165_v54  ;;  %v2175_v57 = vsel %vm18_vm0, %v4165_v54, 0.0 }
 0x1c4   :  { %1700 = vst.msk [vmem:[#allocation2 + $0x1f0] sm:$0xff] %vm18_vm0, %v1636_v29  ;;  %1698 = vst.msk [vmem:[#allocation2 + $0x1e0] sm:$0xff] %vm18_vm0, %v1634_v26  ;;  %v2367_v41 = vadd.f32 %v2366_v17, %v2365_v39  ;;  %v2370_v46 = vsel %vm18_vm0, %v2265_v44, 0.0  ;;  %v2267_v40 = vmul.f32 %v1749_v32, %v1749_v32  ;;  %v2177_v8 = vsel %vm18_vm0, %v1749_v32, 0.0 }
 0x1c5   :  { %1685 = vst.msk [vmem:[#allocation2 + $0x178] sm:$0xff] %vm18_vm0, %v1621_v51  ;;  %1701 = vst.msk [vmem:[#allocation2 + $0x1f8] sm:$0xff] %vm18_vm0, %v1637_v28  ;;  %v2174_v53 = vadd.f32 %v2173_v37, %v2172_v49  ;;  %v2372_v19 = vsel %vm18_vm0, %v2266_v48, 0.0  ;;  %v2271_v16 = vmul.f32 %v4099_v3, %v4099_v3  ;;  %v2185_v29 = vsel %vm18_vm0, %v4099_v3, 0.0 }
 0x1c6   :  { %1699 = vst.msk [vmem:[#allocation2 + $0x1e8] sm:$0xff] %vm18_vm0, %v1635_v45  ;;  %v2369_v20 = vadd.f32 %v2368_v15, %v2367_v41  ;;  %v4285_v61 = vld [vmem:[#allocation2 + $0x1c0] sm:$0xff]  ;;  %v1750_v56 = vld [vmem:[#allocation2 + $0x168] sm:$0xff]  ;;  %v2374_v58 = vsel %vm18_vm0, %v2267_v40, 0.0  ;;  %v2272_v28 = vmul.f32 %v4142_v47, %v4142_v47  ;;  %v2187_v3 = vsel %vm18_vm0, %v4142_v47, 0.0 }
 0x1c7   :  { %v2176_v6 = vadd.f32 %v2175_v57, %v2174_v53  ;;  %v2698_v54 = vpack.c.bf16 %v4285_v61, %v4285_v61  ;;  %v2687_v11 = vpack.c.bf16 %v1750_v56, %v1750_v56  ;;  %v2179_v43 = vsel %vm18_vm0, %v1750_v56, 0.0 }
 0x1c8   :  { %v4287_v13 = vld [vmem:[#allocation2 + $0x1d8] sm:$0xff]  ;;  %v2371_v21 = vadd.f32 %v2370_v46, %v2369_v20  ;;  %v2268_v35 = vmul.f32 %v1750_v56, %v1750_v56  ;;  %v2273_v15 = vmul.f32 %v4086_v14, %v4086_v14  ;;  %v2382_v48 = vsel %vm18_vm0, %v2271_v16, 0.0 }
 0x1c9   :  { %v2701_v5 = vpack.c.bf16 %v4287_v13, %v4287_v13  ;;  %v2178_v32 = vadd.f32 %v2177_v8, %v2176_v6  ;;  %2082 = vst.msk [vmem:[%s4446_s2 + $0xe0] sm:$0xf] %vm2025_vm1, %v2698_v54  ;;  %2071 = vst.msk [vmem:[%s4446_s2 + $0xb4] sm:$0xf] %vm2025_vm1, %v2687_v11  ;;  %v2189_v47 = vsel %vm18_vm0, %v4086_v14, 0.0  ;;  %v2274_v53 = vmul.f32 %v4114_v55, %v4114_v55 }
 0x1ca   :  { %v4304_v2 = vld [vmem:[#allocation2 + $0x1c8] sm:$0xff]  ;;  %v1751_v17 = vld [vmem:[#allocation2 + $0x170] sm:$0xff]  ;;  %v2373_v18 = vadd.f32 %v2372_v19, %v2371_v21  ;;  %v2376_v10 = vsel %vm18_vm0, %v2268_v35, 0.0  ;;  %v2384_v46 = vsel %vm18_vm0, %v2272_v28, 0.0  ;;  %v2191_v20 = vsel %vm18_vm0, %v4114_v55, 0.0 }
 0x1cb   :  { %2085 = vst.msk [vmem:[%s4446_s2 + $0xec] sm:$0xf] %vm2025_vm1, %v2701_v5  ;;  %v2699_v12 = vpack.c.bf16 %v4304_v2, %v4304_v2  ;;  %v4312_v36 = vld [vmem:[#allocation2 + $0x1f0] sm:$0xff]  ;;  %v4314_v50 = vld [vmem:[#allocation2 + $0x1e0] sm:$0xff]  ;;  %v2180_v33 = vadd.f32 %v2179_v43, %v2178_v32  ;;  %v2688_v23 = vpack.c.bf16 %v1751_v17, %v1751_v17  ;;  %v2181_v34 = vsel %vm18_vm0, %v1751_v17, 0.0 }
 0x1cc   :  { %v1752_v7 = vld [vmem:[#allocation2 + $0x178] sm:$0xff]  ;;  %v2375_v9 = vadd.f32 %v2374_v58, %v2373_v18  ;;  %v2269_v60 = vmul.f32 %v1751_v17, %v1751_v17  ;;  %v2704_v24 = vpack.c.bf16 %v4312_v36, %v4312_v36  ;;  %v2702_v52 = vpack.c.bf16 %v4314_v50, %v4314_v50 }
 0x1cd   :  { %2083 = vst.msk [vmem:[%s4446_s2 + $0xe4] sm:$0xf] %vm2025_vm1, %v2699_v12  ;;  %2072 = vst.msk [vmem:[%s4446_s2 + $0xb8] sm:$0xf] %vm2025_vm1, %v2688_v23  ;;  %v2182_v27 = vadd.f32 %v2181_v34, %v2180_v33  ;;  %v4330_v1 = vld [vmem:[#allocation2 + $0x1f8] sm:$0xff]  ;;  %v2689_v25 = vpack.c.bf16 %v1752_v7, %v1752_v7  ;;  %v2183_v63 = vsel %vm18_vm0, %v1752_v7, 0.0  ;;  %v2270_v38 = vmul.f32 %v1752_v7, %v1752_v7 }
 0x1ce   :  { %v2377_v31 = vadd.f32 %v2376_v10, %v2375_v9  ;;  %v2378_v0 = vsel %vm18_vm0, %v2269_v60, 0.0  ;;  %2088 = vst.msk [vmem:[%s4446_s2 + $0xf8] sm:$0xf] %vm2025_vm1, %v2704_v24  ;;  %v4338_v44 = vld [vmem:[#allocation2 + $0x1e8] sm:$0xff]  ;;  %2086 = vst.msk [vmem:[%s4446_s2 + $0xf0] sm:$0xf] %vm2025_vm1, %v2702_v52  ;;  %v2705_v51 = vpack.c.bf16 %v4330_v1, %v4330_v1  ;;  %v2275_v6 = vmul.f32 %v4156_v59, %v4156_v59 }
 0x1cf   :  { %v2184_v42 = vadd.f32 %v2183_v63, %v2182_v27  ;;  %2073 = vst.msk [vmem:[%s4446_s2 + $0xbc] sm:$0xf] %vm2025_vm1, %v2689_v25  ;;  %v2380_v37 = vsel %vm18_vm0, %v2270_v38, 0.0  ;;  %v2703_v45 = vpack.c.bf16 %v4338_v44, %v4338_v44  ;;  %v2386_v56 = vsel %vm18_vm0, %v2273_v15, 0.0 }
 0x1d0   :  { %v2379_v26 = vadd.f32 %v2378_v0, %v2377_v31  ;;  %2089 = vst.msk [vmem:[%s4446_s2 + $0xfc] sm:$0xf] %vm2025_vm1, %v2705_v51  ;;  %v2193_v14 = vsel %vm18_vm0, %v4156_v59, 0.0  ;;  %v2388_v11 = vsel %vm18_vm0, %v2274_v53, 0.0  ;;  %v2276_v21 = vmul.f32 %v4198_v62, %v4198_v62 }
 0x1d1   :  { %v2186_v39 = vadd.f32 %v2185_v29, %v2184_v42  ;;  %2087 = vst.msk [vmem:[%s4446_s2 + $0xf4] sm:$0xf] %vm2025_vm1, %v2703_v45  ;;  %v2195_v55 = vsel %vm18_vm0, %v4198_v62, 0.0  ;;  %v2277_v5 = vmul.f32 %v4146_v30, %v4146_v30  ;;  %v2390_v32 = vsel %vm18_vm0, %v2275_v6, 0.0 }
 0x1d2   :  { %v2381_v49 = vadd.f32 %v2380_v37, %v2379_v26  ;;  %v2197_v59 = vsel %vm18_vm0, %v4146_v30, 0.0  ;;  %v2278_v18 = vmul.f32 %v4179_v22, %v4179_v22  ;;  %v2392_v12 = vsel %vm18_vm0, %v2276_v21, 0.0 }
 0x1d3   :  { %v2188_v41 = vadd.f32 %v2187_v3, %v2186_v39  ;;  %v2199_v62 = vsel %vm18_vm0, %v4179_v22, 0.0  ;;  %v2394_v23 = vsel %vm18_vm0, %v2277_v5, 0.0  ;;  %v2279_v34 = vmul.f32 %v4285_v61, %v4285_v61 }
 0x1d4   :  { %v2383_v57 = vadd.f32 %v2382_v48, %v2381_v49  ;;  %v2201_v30 = vsel %vm18_vm0, %v4285_v61, 0.0  ;;  %v2396_v60 = vsel %vm18_vm0, %v2278_v18, 0.0  ;;  %v2280_v24 = vmul.f32 %v4304_v2, %v4304_v2 }
 0x1d5   :  { %v2190_v40 = vadd.f32 %v2189_v47, %v2188_v41  ;;  %v2203_v22 = vsel %vm18_vm0, %v4304_v2, 0.0  ;;  %v2281_v31 = vmul.f32 %v4232_v4, %v4232_v4  ;;  %v2398_v0 = vsel %vm18_vm0, %v2279_v34, 0.0 }
 0x1d6   :  { %v2385_v8 = vadd.f32 %v2384_v46, %v2383_v57  ;;  %v2205_v61 = vsel %vm18_vm0, %v4232_v4, 0.0  ;;  %v2282_v16 = vmul.f32 %v4287_v13, %v4287_v13  ;;  %v2400_v42 = vsel %vm18_vm0, %v2280_v24, 0.0 }
 0x1d7   :  { %v2192_v19 = vadd.f32 %v2191_v20, %v2190_v40  ;;  %v2207_v2 = vsel %vm18_vm0, %v4287_v13, 0.0  ;;  %v2402_v26 = vsel %vm18_vm0, %v2281_v31, 0.0  ;;  %v2283_v51 = vmul.f32 %v4314_v50, %v4314_v50 }
 0x1d8   :  { %v2387_v54 = vadd.f32 %v2386_v56, %v2385_v8  ;;  %v2209_v4 = vsel %vm18_vm0, %v4314_v50, 0.0  ;;  %v2404_v37 = vsel %vm18_vm0, %v2282_v16, 0.0  ;;  %v2284_v3 = vmul.f32 %v4338_v44, %v4338_v44 }
 0x1d9   :  { %v2194_v43 = vadd.f32 %v2193_v14, %v2192_v19  ;;  %v2211_v13 = vsel %vm18_vm0, %v4338_v44, 0.0  ;;  %v2285_v15 = vmul.f32 %v4312_v36, %v4312_v36  ;;  %v2406_v48 = vsel %vm18_vm0, %v2283_v51, 0.0 }
 0x1da   :  { %v2389_v35 = vadd.f32 %v2388_v11, %v2387_v54  ;;  %v2213_v50 = vsel %vm18_vm0, %v4312_v36, 0.0  ;;  %v2286_v57 = vmul.f32 %v4330_v1, %v4330_v1  ;;  %v2408_v46 = vsel %vm18_vm0, %v2284_v3, 0.0 }
 0x1db   :  { %v2196_v58 = vadd.f32 %v2195_v55, %v2194_v43  ;;  %v2215_v44 = vsel %vm18_vm0, %v4330_v1, 0.0  ;;  %v2410_v20 = vsel %vm18_vm0, %v2285_v15, 0.0 }
 0x1dc   :  { %v2391_v17 = vadd.f32 %v2390_v32, %v2389_v35  ;;  %v2412_v6 = vsel %vm18_vm0, %v2286_v57, 0.0 }
 0x1dd   :  { %v2198_v33 = vadd.f32 %v2197_v59, %v2196_v58 }
 0x1de   :  { %v2393_v10 = vadd.f32 %v2392_v12, %v2391_v17 }
 0x1df   :  { %v2200_v7 = vadd.f32 %v2199_v62, %v2198_v33 }
 0x1e0   :  { %v2395_v9 = vadd.f32 %v2394_v23, %v2393_v10 }
 0x1e1   :  { %v2202_v27 = vadd.f32 %v2201_v30, %v2200_v7 }
 0x1e2   :  { %v2397_v52 = vadd.f32 %v2396_v60, %v2395_v9 }
 0x1e3   :  { %v2204_v25 = vadd.f32 %v2203_v22, %v2202_v27 }
 0x1e4   :  { %v2399_v63 = vadd.f32 %v2398_v0, %v2397_v52 }
 0x1e5   :  { %v2206_v38 = vadd.f32 %v2205_v61, %v2204_v25 }
 0x1e6   :  { %v2401_v29 = vadd.f32 %v2400_v42, %v2399_v63 }
 0x1e7   :  { %v2208_v28 = vadd.f32 %v2207_v2, %v2206_v38 }
 0x1e8   :  { %v2403_v39 = vadd.f32 %v2402_v26, %v2401_v29 }
 0x1e9   :  { %v2210_v45 = vadd.f32 %v2209_v4, %v2208_v28 }
 0x1ea   :  { %v2405_v49 = vadd.f32 %v2404_v37, %v2403_v39 }
 0x1eb   :  { %v2212_v41 = vadd.f32 %v2211_v13, %v2210_v45 }
 0x1ec   :  { %v2407_v47 = vadd.f32 %v2406_v48, %v2405_v49 }
 0x1ed   :  { %v2214_v53 = vadd.f32 %v2213_v50, %v2212_v41 }
 0x1ee   :  { %v2409_v40 = vadd.f32 %v2408_v46, %v2407_v47 }
 0x1ef   :  { %v2216_v8 = vadd.f32 %v2215_v44, %v2214_v53 }
 0x1f0   :  { %v2411_v56 = vadd.f32 %v2410_v20, %v2409_v40 }
 0x1f1   :  { %v2217_v19 = vrot.slane %v2216_v8, 4 }
 0x1f2   :  { %v2413_v14 = vadd.f32 %v2412_v6, %v2411_v56 }
 0x1f3   :  { %v2218_v36 = vadd.f32 %v2217_v19, %v2216_v8 }
 0x1f4   :  { %v2414_v54 = vrot.slane %v2413_v14, 4 }
 0x1f5   :  { %v2219_v11 = vrot.slane %v2218_v36, 2 }
 0x1f6   :  { %v2415_v21 = vadd.f32 %v2414_v54, %v2413_v14 }
 0x1f7   :  { %v2220_v43 = vadd.f32 %v2219_v11, %v2218_v36 }
 0x1f8   :  { %v2416_v55 = vrot.slane %v2415_v21, 2 }
 0x1f9   :  { %v2221_v35 = vrot.slane %v2220_v43, 1 }
 0x1fa   :  { %v2417_v5 = vadd.f32 %v2416_v55, %v2415_v21 }
 0x1fb   :  { %v2222_v1 = vadd.f32 %v2221_v35, %v2220_v43 }
 0x1fc   :  { %v2418_v32 = vrot.slane %v2417_v5, 1 }
 0x1fe   :  { %v2419_v58 = vadd.f32 %v2418_v32, %v2417_v5 }
 0x200   :  { %v2421_v59 = vsel %vm2420_vm2, %v2222_v1, %v2419_v58 }
 0x201   :  { %2423 = vst.msk [vmem:[%s4447_s3] sm:$0x3] %vm2422_vm3, %v2421_v59 }

// kernel: _generator_forward.17
= control target key start
LH: loop header
LB: loop body
LE: loop exit
PB: predicated region body
PF: predicated region fallthrough
CT: control target
= control target key end

     0   :  { %s4350_s9 = smov 0   ;;  %s4352_s10 = smov 0   ;;  %s4601_s0 = inlined_call_operand.vmem [shape: bf16[2048,72], index: 0, kind: input, shape index: {}]   ;;  %s4602_s1 = inlined_call_operand.vmem [shape: bf16[72,128], index: 1, kind: input, shape index: {}]   ;;  %s4603_s2 = inlined_call_operand.vmem [shape: bf16[2048,128], index: 2, kind: output, shape index: {}]  }
   0x1   :  { %s4354_s11 = smov 0  }
   0x2 LB: > { %s31_s12 = sadd.s32 1, %s4329_s10  ;;  %p2964_p0 = scmp.ge.s32.totalorder %s4333_s11, 1  ;;  %s4333_s11 = sphi %s4354_s11, %s12_s11   ;;  %s4329_s10 = sphi %s4352_s10, %s4605_s10   ;;  %s4325_s9 = sphi %s4350_s9, %s4604_s9  }
   0x3   : > { %p33_p1 = scmp.ge.s32.totalorder %s31_s12, 2  ;;  %p155_p2 = scmp.lt.s32.totalorder %s4333_s11, 3 }
   0x5   : > { %s4607_s12 = smov (%p33_p1, %s31_s12), 0  ;;  %p156_p3 = pnand %p2964_p0, %p155_p2 }
   0x6   : > { %s2965_s17 = sshll.u32 (!%p156_p3), %s4325_s9, 7 }
   0x7   : > { %159 = sbr.rel (%p156_p3) target bundleno = 370 (0x172), region = 28  ;;  %p192_p4 = scmp.lt.s32.totalorder (!%p156_p3), %s2965_s17, 255 }
   0xc   : > { %v3986_v0 = vld [vmem:[%s4602_s1 + $0x20] ss:$0 sps:$4 sm:$0xff]   ;;  %vm1156_vm0 = vcmask 1043456   ;;  %v3987_v1 = vld [vmem:[%s4602_s1 + $0x18] sm:$0xff]   ;;  %v3988_v3 = vld [vmem:[%s4602_s1 + $0x10] sm:$0xff]   ;;  %s4609_s17 = smov (!%p192_p4, %s2965_s17), 255 }
   0xd   : > { %3960 = vmatprep.subr.msk.bf16.mxu0 %vm1156_vm0, %v3986_v0  ;;  %3961 = vmatprep.subr.msk.bf16.mxu1 %vm1156_vm0, %v3986_v0  ;;  %v1158_v2 = vsel %vm1156_vm0, %v3986_v0, 0  ;;  %v3989_v4 = vld [vmem:[%s4602_s1 + $0x8] sm:$0xff]   ;;  %s2966_s22 = sshll.u32 %s4609_s17, 2  ;;  %vm963_vm1 = vcmask 588800   ;;  %v3990_v7 = vld [vmem:[%s4602_s1] sm:$0xff]  }
   0xe   : > { %3813 = vmatpush3.bf16.msra.mxu0 %v1158_v2  ;;  %3955 = vmatpush3.bf16.msra.mxu1 %v1158_v2  ;;  %s4388_s25 = scalar_lea.vmem %s4601_s0, %s2966_s22  ;;  %s4526_s30 = scalar_lea.vmem %s4603_s2, %s2966_s22 }
   0xf   : > { %3814 = vmatprep.subr.bf16.mxu0 %v3987_v1  ;;  %3951 = vmatprep.subr.bf16.mxu1 %v3987_v1  ;;  %v3991_v5 = vld [vmem:[%s4388_s25] sm:$0xff]   ;;  %v3993_v8 = vld [vmem:[%s4388_s25 + $0x8] sm:$0xff]   ;;  %v3995_v10 = vld [vmem:[%s4388_s25 + $0x10] sm:$0xff]  }
  0x10   : > { %v3992_v6 = vld [vmem:[%s4388_s25 + $0x100] sm:$0xff]   ;;  %3822 = vmatprep.mubr.msk.bf16.mxu0 %vm963_vm1, %v3991_v5  ;;  %v3994_v9 = vld [vmem:[%s4388_s25 + $0x108] sm:$0xff]   ;;  %v3996_v11 = vld [vmem:[%s4388_s25 + $0x110] sm:$0xff]  }
  0x11   : > { %3886 = vmatprep.mubr.msk.bf16.mxu1 %vm963_vm1, %v3992_v6  ;;  %v3997_v12 = vld [vmem:[%s4388_s25 + $0x18] sm:$0xff]   ;;  %v3999_v14 = vld [vmem:[%s4388_s25 + $0x20] sm:$0xff]   ;;  %v4001_v16 = vld [vmem:[%s4388_s25 + $0x28] sm:$0xff]  }
  0x12   : > { %3815 = vmatpush3.bf16.msra.mxu0 %v3987_v1  ;;  %3956 = vmatpush3.bf16.msra.mxu1 %v3987_v1  ;;  %v3998_v13 = vld [vmem:[%s4388_s25 + $0x118] sm:$0xff]   ;;  %v4000_v15 = vld [vmem:[%s4388_s25 + $0x120] sm:$0xff]   ;;  %v4002_v17 = vld [vmem:[%s4388_s25 + $0x128] sm:$0xff]  }
  0x13   : > { %3816 = vmatprep.subr.bf16.mxu0 %v3988_v3  ;;  %3952 = vmatprep.subr.bf16.mxu1 %v3988_v3  ;;  %v4003_v18 = vld [vmem:[%s4388_s25 + $0x30] sm:$0xff]   ;;  %v4005_v20 = vld [vmem:[%s4388_s25 + $0x38] sm:$0xff]   ;;  %v4007_v22 = vld [vmem:[%s4388_s25 + $0x40] sm:$0xff]  }
  0x14   : > { %v4004_v19 = vld [vmem:[%s4388_s25 + $0x130] sm:$0xff]   ;;  %v4006_v21 = vld [vmem:[%s4388_s25 + $0x138] sm:$0xff]   ;;  %v4008_v23 = vld [vmem:[%s4388_s25 + $0x140] sm:$0xff]  }
  0x15   : > { %v4009_v24 = vld [vmem:[%s4388_s25 + $0x48] sm:$0xff]   ;;  %v4011_v26 = vld [vmem:[%s4388_s25 + $0x50] sm:$0xff]   ;;  %v4013_v28 = vld [vmem:[%s4388_s25 + $0x58] sm:$0xff]  }
  0x16   : > { %3817 = vmatpush3.bf16.msra.mxu0 %v3988_v3  ;;  %3957 = vmatpush3.bf16.msra.mxu1 %v3988_v3  ;;  %v4010_v25 = vld [vmem:[%s4388_s25 + $0x148] sm:$0xff]   ;;  %v4012_v27 = vld [vmem:[%s4388_s25 + $0x150] sm:$0xff]   ;;  %v4014_v29 = vld [vmem:[%s4388_s25 + $0x158] sm:$0xff]  }
  0x17   : > { %3818 = vmatprep.subr.bf16.mxu0 %v3989_v4  ;;  %3953 = vmatprep.subr.bf16.mxu1 %v3989_v4  ;;  %v4015_v30 = vld [vmem:[%s4388_s25 + $0x60] sm:$0xff]   ;;  %v4017_v32 = vld [vmem:[%s4388_s25 + $0x68] sm:$0xff]   ;;  %v4019_v34 = vld [vmem:[%s4388_s25 + $0x70] sm:$0xff]  }
  0x18   : > { %v4016_v31 = vld [vmem:[%s4388_s25 + $0x160] sm:$0xff]   ;;  %v4018_v33 = vld [vmem:[%s4388_s25 + $0x168] sm:$0xff]   ;;  %v4020_v35 = vld [vmem:[%s4388_s25 + $0x170] sm:$0xff]  }
  0x19   : > { %v4021_v36 = vld [vmem:[%s4388_s25 + $0x78] sm:$0xff]   ;;  %v4023_v38 = vld [vmem:[%s4388_s25 + $0x80] sm:$0xff]   ;;  %v4025_v40 = vld [vmem:[%s4388_s25 + $0x88] sm:$0xff]  }
  0x1a   : > { %3819 = vmatpush3.bf16.msra.mxu0 %v3989_v4  ;;  %3958 = vmatpush3.bf16.msra.mxu1 %v3989_v4  ;;  %v4022_v37 = vld [vmem:[%s4388_s25 + $0x178] sm:$0xff]   ;;  %v4024_v39 = vld [vmem:[%s4388_s25 + $0x180] sm:$0xff]   ;;  %v4026_v41 = vld [vmem:[%s4388_s25 + $0x188] sm:$0xff]  }
  0x1b   : > { %3820 = vmatprep.subr.bf16.mxu0 %v3990_v7  ;;  %3954 = vmatprep.subr.bf16.mxu1 %v3990_v7  ;;  %v4027_v42 = vld [vmem:[%s4388_s25 + $0x90] sm:$0xff]   ;;  %v4029_v44 = vld [vmem:[%s4388_s25 + $0x98] sm:$0xff]   ;;  %v4031_v46 = vld [vmem:[%s4388_s25 + $0xa0] sm:$0xff]  }
  0x1c   : > { %v4028_v43 = vld [vmem:[%s4388_s25 + $0x190] sm:$0xff]   ;;  %v4030_v45 = vld [vmem:[%s4388_s25 + $0x198] sm:$0xff]   ;;  %v4032_v47 = vld [vmem:[%s4388_s25 + $0x1a0] sm:$0xff]  }
  0x1d   : > { %v4033_v48 = vld [vmem:[%s4388_s25 + $0xa8] sm:$0xff]   ;;  %v4035_v50 = vld [vmem:[%s4388_s25 + $0xb0] sm:$0xff]   ;;  %v4037_v52 = vld [vmem:[%s4388_s25 + $0xb8] sm:$0xff]  }
  0x1e   : > { %3821 = vmatpush3.bf16.msra.mxu0 %v3990_v7  ;;  %3959 = vmatpush3.bf16.msra.mxu1 %v3990_v7  ;;  %v4034_v49 = vld [vmem:[%s4388_s25 + $0x1a8] sm:$0xff]   ;;  %v4036_v51 = vld [vmem:[%s4388_s25 + $0x1b0] sm:$0xff]   ;;  %v4038_v53 = vld [vmem:[%s4388_s25 + $0x1b8] sm:$0xff]  }
  0x1f   : > { %v4039_v54 = vld [vmem:[%s4388_s25 + $0xc0] sm:$0xff]   ;;  %v4041_v56 = vld [vmem:[%s4388_s25 + $0xc8] sm:$0xff]   ;;  %v4043_v58 = vld [vmem:[%s4388_s25 + $0xd0] sm:$0xff]  }
  0x20   : > { %v4040_v55 = vld [vmem:[%s4388_s25 + $0x1c0] sm:$0xff]   ;;  %v4042_v57 = vld [vmem:[%s4388_s25 + $0x1c8] sm:$0xff]   ;;  %v4044_v59 = vld [vmem:[%s4388_s25 + $0x1d0] sm:$0xff]  }
  0x21   : > { %3823 = vmatmul.mubr.msk.bf16.vlgmr.msra.gmra.mxu0 %vm963_vm1, %v3993_v8  ;;  %3887 = vmatmul.mubr.msk.bf16.vlgmr.msra.gmra.mxu1 %vm963_vm1, %v3994_v9  ;;  %v4045_v60 = vld [vmem:[%s4388_s25 + $0xd8] sm:$0xff]   ;;  %v4047_v62 = vld [vmem:[%s4388_s25 + $0xe0] sm:$0xff]   ;;  %v4049_v0 = vld [vmem:[%s4388_s25 + $0xe8] sm:$0xff]  }
  0x22   : > { %3826 = vmatprep.mubr.msk.bf16.mxu0 %vm963_vm1, %v3995_v10  ;;  %3890 = vmatprep.mubr.msk.bf16.mxu1 %vm963_vm1, %v3996_v11  ;;  %v4046_v61 = vld [vmem:[%s4388_s25 + $0x1d8] sm:$0xff]   ;;  %v4048_v63 = vld [vmem:[%s4388_s25 + $0x1e0] sm:$0xff]   ;;  %v4050_v1 = vld [vmem:[%s4388_s25 + $0x1e8] sm:$0xff]  }
  0x23   : > { %v4051_v2 = vld [vmem:[%s4388_s25 + $0xf0] sm:$0xff]   ;;  %v4053_v4 = vld [vmem:[%s4388_s25 + $0xf8] sm:$0xff]  }
  0x24   : > { %v4052_v3 = vld [vmem:[%s4388_s25 + $0x1f0] sm:$0xff]   ;;  %v4054_v5 = vld [vmem:[%s4388_s25 + $0x1f8] sm:$0xff]  }
  0x29   : > { %3827 = vmatmul.mubr.msk.bf16.gmra.mxu0 %vm963_vm1, %v3997_v12  ;;  %3891 = vmatmul.mubr.msk.bf16.gmra.mxu1 %vm963_vm1, %v3998_v13 }
  0x2a   : > { %3830 = vmatprep.mubr.msk.bf16.mxu0 %vm963_vm1, %v3999_v14  ;;  %3894 = vmatprep.mubr.msk.bf16.mxu1 %vm963_vm1, %v4000_v15 }
  0x31   : > { %3831 = vmatmul.mubr.msk.bf16.gmra.mxu0 %vm963_vm1, %v4001_v16  ;;  %3895 = vmatmul.mubr.msk.bf16.gmra.mxu1 %vm963_vm1, %v4002_v17 }
  0x32   : > { %3834 = vmatprep.mubr.msk.bf16.mxu0 %vm963_vm1, %v4003_v18  ;;  %3898 = vmatprep.mubr.msk.bf16.mxu1 %vm963_vm1, %v4004_v19 }
  0x39   : > { %3835 = vmatmul.mubr.msk.bf16.gmra.mxu0 %vm963_vm1, %v4005_v20  ;;  %3899 = vmatmul.mubr.msk.bf16.gmra.mxu1 %vm963_vm1, %v4006_v21 }
  0x3a   : > { %3838 = vmatprep.mubr.msk.bf16.mxu0 %vm963_vm1, %v4007_v22  ;;  %3902 = vmatprep.mubr.msk.bf16.mxu1 %vm963_vm1, %v4008_v23 }
  0x41   : > { %3839 = vmatmul.mubr.msk.bf16.gmra.mxu0 %vm963_vm1, %v4009_v24  ;;  %3903 = vmatmul.mubr.msk.bf16.gmra.mxu1 %vm963_vm1, %v4010_v25 }
  0x42   : > { %3842 = vmatprep.mubr.msk.bf16.mxu0 %vm963_vm1, %v4011_v26  ;;  %3906 = vmatprep.mubr.msk.bf16.mxu1 %vm963_vm1, %v4012_v27 }
  0x49   : > { %3843 = vmatmul.mubr.msk.bf16.gmra.mxu0 %vm963_vm1, %v4013_v28  ;;  %3907 = vmatmul.mubr.msk.bf16.gmra.mxu1 %vm963_vm1, %v4014_v29 }
  0x4a   : > { %3846 = vmatprep.mubr.msk.bf16.mxu0 %vm963_vm1, %v4015_v30  ;;  %3910 = vmatprep.mubr.msk.bf16.mxu1 %vm963_vm1, %v4016_v31 }
  0x51   : > { %3847 = vmatmul.mubr.msk.bf16.gmra.mxu0 %vm963_vm1, %v4017_v32  ;;  %3911 = vmatmul.mubr.msk.bf16.gmra.mxu1 %vm963_vm1, %v4018_v33 }
  0x52   : > { %3850 = vmatprep.mubr.msk.bf16.mxu0 %vm963_vm1, %v4019_v34  ;;  %3914 = vmatprep.mubr.msk.bf16.mxu1 %vm963_vm1, %v4020_v35 }
  0x59   : > { %3851 = vmatmul.mubr.msk.bf16.gmra.mxu0 %vm963_vm1, %v4021_v36  ;;  %3915 = vmatmul.mubr.msk.bf16.gmra.mxu1 %vm963_vm1, %v4022_v37 }
  0x5a   : > { %3854 = vmatprep.mubr.msk.bf16.mxu0 %vm963_vm1, %v4023_v38  ;;  %3918 = vmatprep.mubr.msk.bf16.mxu1 %vm963_vm1, %v4024_v39 }
  0x61   : > { %3855 = vmatmul.mubr.msk.bf16.gmra.mxu0 %vm963_vm1, %v4025_v40  ;;  %3919 = vmatmul.mubr.msk.bf16.gmra.mxu1 %vm963_vm1, %v4026_v41 }
  0x62   : > { %3858 = vmatprep.mubr.msk.bf16.mxu0 %vm963_vm1, %v4027_v42  ;;  %3922 = vmatprep.mubr.msk.bf16.mxu1 %vm963_vm1, %v4028_v43 }
  0x69   : > { %3859 = vmatmul.mubr.msk.bf16.gmra.mxu0 %vm963_vm1, %v4029_v44  ;;  %3923 = vmatmul.mubr.msk.bf16.gmra.mxu1 %vm963_vm1, %v4030_v45 }
  0x6a   : > { %3862 = vmatprep.mubr.msk.bf16.mxu0 %vm963_vm1, %v4031_v46  ;;  %3926 = vmatprep.mubr.msk.bf16.mxu1 %vm963_vm1, %v4032_v47 }
  0x71   : > { %3863 = vmatmul.mubr.msk.bf16.gmra.mxu0 %vm963_vm1, %v4033_v48  ;;  %3927 = vmatmul.mubr.msk.bf16.gmra.mxu1 %vm963_vm1, %v4034_v49 }
  0x72   : > { %3866 = vmatprep.mubr.msk.bf16.mxu0 %vm963_vm1, %v4035_v50  ;;  %3930 = vmatprep.mubr.msk.bf16.mxu1 %vm963_vm1, %v4036_v51 }
  0x79   : > { %3867 = vmatmul.mubr.msk.bf16.gmra.mxu0 %vm963_vm1, %v4037_v52  ;;  %3931 = vmatmul.mubr.msk.bf16.gmra.mxu1 %vm963_vm1, %v4038_v53 }
  0x7a   : > { %3870 = vmatprep.mubr.msk.bf16.mxu0 %vm963_vm1, %v4039_v54  ;;  %3934 = vmatprep.mubr.msk.bf16.mxu1 %vm963_vm1, %v4040_v55 }
  0x81   : > { %3871 = vmatmul.mubr.msk.bf16.gmra.mxu0 %vm963_vm1, %v4041_v56  ;;  %3935 = vmatmul.mubr.msk.bf16.gmra.mxu1 %vm963_vm1, %v4042_v57 }
  0x82   : > { %3874 = vmatprep.mubr.msk.bf16.mxu0 %vm963_vm1, %v4043_v58  ;;  %3938 = vmatprep.mubr.msk.bf16.mxu1 %vm963_vm1, %v4044_v59 }
  0x89   : > { %3875 = vmatmul.mubr.msk.bf16.gmra.mxu0 %vm963_vm1, %v4045_v60  ;;  %3939 = vmatmul.mubr.msk.bf16.gmra.mxu1 %vm963_vm1, %v4046_v61 }
  0x8a   : > { %3878 = vmatprep.mubr.msk.bf16.mxu0 %vm963_vm1, %v4047_v62  ;;  %3942 = vmatprep.mubr.msk.bf16.mxu1 %vm963_vm1, %v4048_v63 }
  0x91   : > { %3879 = vmatmul.mubr.msk.bf16.gmra.mxu0 %vm963_vm1, %v4049_v0  ;;  %3943 = vmatmul.mubr.msk.bf16.gmra.mxu1 %vm963_vm1, %v4050_v1 }
  0x92   : > { %3882 = vmatprep.mubr.msk.bf16.mxu0 %vm963_vm1, %v4051_v2  ;;  %3946 = vmatprep.mubr.msk.bf16.mxu1 %vm963_vm1, %v4052_v3 }
  0x99   : > { %3883 = vmatmul.mubr.msk.bf16.gmra.mxu0 %vm963_vm1, %v4053_v4  ;;  %3947 = vmatmul.mubr.msk.bf16.gmra.mxu1 %vm963_vm1, %v4054_v5 }
  0xe1   : > { %v3824_v6 = vpop.f32.mrf.mxu0  ;;  %v3888_v7 = vpop.f32.mrf.mxu1 }
  0xe2   : > { %4055 = vtanh.f32 %v3824_v6 }
  0xe3   : > { %4057 = vtanh.f32 %v3888_v7  ;;  %v1194_v8 = vpop.f32.mrf.mxu0  ;;  %v1450_v9 = vpop.f32.mrf.mxu1 }
  0xe4   : > { %4059 = vtanh.f32 %v1194_v8 }
  0xe5   : > { %4061 = vtanh.f32 %v1450_v9  ;;  %v3825_v10 = vpop.f32.mrf.mxu0  ;;  %v3889_v11 = vpop.f32.mrf.mxu1 }
  0xe6   : > { %4063 = vtanh.f32 %v3825_v10 }
  0xe7   : > { %4065 = vtanh.f32 %v3889_v11  ;;  %v1197_v12 = vpop.f32.mrf.mxu0  ;;  %v1453_v13 = vpop.f32.mrf.mxu1 }
  0xe8   : > { %4067 = vtanh.f32 %v1197_v12 }
  0xe9   : > { %4069 = vtanh.f32 %v1453_v13  ;;  %v3828_v14 = vpop.f32.mrf.mxu0  ;;  %v3892_v15 = vpop.f32.mrf.mxu1 }
  0xea   : > { %4071 = vtanh.f32 %v3828_v14 }
  0xeb   : > { %4073 = vtanh.f32 %v3892_v15  ;;  %v1210_v16 = vpop.f32.mrf.mxu0  ;;  %v1466_v17 = vpop.f32.mrf.mxu1 }
  0xec   : > { %4075 = vtanh.f32 %v1210_v16 }
  0xed   : > { %4077 = vtanh.f32 %v1466_v17  ;;  %v3829_v18 = vpop.f32.mrf.mxu0  ;;  %v3893_v19 = vpop.f32.mrf.mxu1 }
  0xee   : > { %4079 = vtanh.f32 %v3829_v18 }
  0xef   : > { %v4056_v20 = vpop.eup %4055  ;;  %4081 = vtanh.f32 %v3893_v19  ;;  %v1213_v21 = vpop.f32.mrf.mxu0 }
  0xf0   : > { %v1469_v22 = vpop.f32.mrf.mxu1  ;;  %v4058_v23 = vpop.eup %4057  ;;  %4083 = vtanh.f32 %v1213_v21 }
  0xf1   : > { %v4060_v24 = vpop.eup %4059  ;;  %4085 = vtanh.f32 %v1469_v22  ;;  %v3832_v25 = vpop.f32.mrf.mxu0 }
  0xf2   : > { %v3896_v26 = vpop.f32.mrf.mxu1  ;;  %v4062_v27 = vpop.eup %4061  ;;  %4087 = vtanh.f32 %v3832_v25 }
  0xf3   : > { %v4064_v28 = vpop.eup %4063  ;;  %4089 = vtanh.f32 %v3896_v26  ;;  %v1226_v29 = vpop.f32.mrf.mxu0 }
  0xf4   : > { %v1482_v30 = vpop.f32.mrf.mxu1  ;;  %v4066_v31 = vpop.eup %4065  ;;  %v3368_v32 = vpack.c.bf16 %v4064_v28, %v4056_v20  ;;  %4091 = vtanh.f32 %v1226_v29 }
  0xf5   : > { %v4068_v33 = vpop.eup %4067  ;;  %v3528_v34 = vpack.c.bf16 %v4066_v31, %v4058_v23  ;;  %4093 = vtanh.f32 %v1482_v30  ;;  %v3833_v35 = vpop.f32.mrf.mxu0 }
  0xf6   : > { %v3897_v36 = vpop.f32.mrf.mxu1  ;;  %v4070_v37 = vpop.eup %4069  ;;  %3680 = vst [vmem:[%s4526_s30 + $0x8] sm:$0xff] %v3368_v32   ;;  %v3363_v38 = vpack.c.bf16 %v4068_v33, %v4060_v24  ;;  %4095 = vtanh.f32 %v3833_v35 }
  0xf7   : > { %v4072_v39 = vpop.eup %4071  ;;  %3712 = vst [vmem:[%s4526_s30 + $0x108] sm:$0xff] %v3528_v34   ;;  %v3523_v40 = vpack.c.bf16 %v4070_v37, %v4062_v27  ;;  %4097 = vtanh.f32 %v3897_v36  ;;  %v1229_v41 = vpop.f32.mrf.mxu0 }
  0xf8   : > { %v1485_v42 = vpop.f32.mrf.mxu1  ;;  %v4074_v43 = vpop.eup %4073  ;;  %3364 = vst [vmem:[%s4526_s30] sm:$0xff] %v3363_v38   ;;  %4099 = vtanh.f32 %v1229_v41 }
  0xf9   : > { %v4076_v44 = vpop.eup %4075  ;;  %3711 = vst [vmem:[%s4526_s30 + $0x100] sm:$0xff] %v3523_v40   ;;  %4101 = vtanh.f32 %v1485_v42  ;;  %v3836_v45 = vpop.f32.mrf.mxu0 }
  0xfa   : > { %v3900_v46 = vpop.f32.mrf.mxu1  ;;  %v4078_v47 = vpop.eup %4077  ;;  %4103 = vtanh.f32 %v3836_v45 }
  0xfb   : > { %v4080_v48 = vpop.eup %4079  ;;  %4105 = vtanh.f32 %v3900_v46  ;;  %v1242_v49 = vpop.f32.mrf.mxu0 }
  0xfc   : > { %v1498_v50 = vpop.f32.mrf.mxu1  ;;  %v4082_v51 = vpop.eup %4081  ;;  %v3378_v52 = vpack.c.bf16 %v4080_v48, %v4072_v39  ;;  %4107 = vtanh.f32 %v1242_v49 }
  0xfd   : > { %v4084_v53 = vpop.eup %4083  ;;  %v3538_v54 = vpack.c.bf16 %v4082_v51, %v4074_v43  ;;  %4109 = vtanh.f32 %v1498_v50  ;;  %v3837_v55 = vpop.f32.mrf.mxu0 }
  0xfe   : > { %v3901_v56 = vpop.f32.mrf.mxu1  ;;  %v4086_v57 = vpop.eup %4085  ;;  %3682 = vst [vmem:[%s4526_s30 + $0x18] sm:$0xff] %v3378_v52   ;;  %v3373_v58 = vpack.c.bf16 %v4084_v53, %v4076_v44  ;;  %4111 = vtanh.f32 %v3837_v55 }
  0xff   : > { %v4088_v59 = vpop.eup %4087  ;;  %3714 = vst [vmem:[%s4526_s30 + $0x118] sm:$0xff] %v3538_v54   ;;  %v3533_v60 = vpack.c.bf16 %v4086_v57, %v4078_v47  ;;  %4113 = vtanh.f32 %v3901_v56  ;;  %v1245_v61 = vpop.f32.mrf.mxu0 }
 0x100   : > { %v1501_v62 = vpop.f32.mrf.mxu1  ;;  %v4090_v63 = vpop.eup %4089  ;;  %3681 = vst [vmem:[%s4526_s30 + $0x10] sm:$0xff] %v3373_v58   ;;  %4115 = vtanh.f32 %v1245_v61 }
 0x101   : > { %v4092_v0 = vpop.eup %4091  ;;  %3713 = vst [vmem:[%s4526_s30 + $0x110] sm:$0xff] %v3533_v60   ;;  %4117 = vtanh.f32 %v1501_v62  ;;  %v3840_v1 = vpop.f32.mrf.mxu0 }
 0x102   : > { %v3904_v2 = vpop.f32.mrf.mxu1  ;;  %v4094_v3 = vpop.eup %4093  ;;  %4119 = vtanh.f32 %v3840_v1 }
 0x103   : > { %v4096_v4 = vpop.eup %4095  ;;  %4121 = vtanh.f32 %v3904_v2  ;;  %v1258_v5 = vpop.f32.mrf.mxu0 }
 0x104   : > { %v1514_v6 = vpop.f32.mrf.mxu1  ;;  %v4098_v7 = vpop.eup %4097  ;;  %v3388_v8 = vpack.c.bf16 %v4096_v4, %v4088_v59  ;;  %4123 = vtanh.f32 %v1258_v5 }
 0x105   : > { %v4100_v9 = vpop.eup %4099  ;;  %v3548_v10 = vpack.c.bf16 %v4098_v7, %v4090_v63  ;;  %4125 = vtanh.f32 %v1514_v6  ;;  %v3841_v11 = vpop.f32.mrf.mxu0 }
 0x106   : > { %v3905_v12 = vpop.f32.mrf.mxu1  ;;  %v4102_v13 = vpop.eup %4101  ;;  %3684 = vst [vmem:[%s4526_s30 + $0x28] sm:$0xff] %v3388_v8   ;;  %v3383_v14 = vpack.c.bf16 %v4100_v9, %v4092_v0  ;;  %4127 = vtanh.f32 %v3841_v11 }
 0x107   : > { %v4104_v15 = vpop.eup %4103  ;;  %3716 = vst [vmem:[%s4526_s30 + $0x128] sm:$0xff] %v3548_v10   ;;  %v3543_v16 = vpack.c.bf16 %v4102_v13, %v4094_v3  ;;  %4129 = vtanh.f32 %v3905_v12  ;;  %v1261_v17 = vpop.f32.mrf.mxu0 }
 0x108   : > { %v1517_v18 = vpop.f32.mrf.mxu1  ;;  %v4106_v19 = vpop.eup %4105  ;;  %3683 = vst [vmem:[%s4526_s30 + $0x20] sm:$0xff] %v3383_v14   ;;  %4131 = vtanh.f32 %v1261_v17 }
 0x109   : > { %v4108_v20 = vpop.eup %4107  ;;  %3715 = vst [vmem:[%s4526_s30 + $0x120] sm:$0xff] %v3543_v16   ;;  %4133 = vtanh.f32 %v1517_v18  ;;  %v3844_v21 = vpop.f32.mrf.mxu0 }
 0x10a   : > { %v3908_v22 = vpop.f32.mrf.mxu1  ;;  %v4110_v23 = vpop.eup %4109  ;;  %4135 = vtanh.f32 %v3844_v21 }
 0x10b   : > { %v4112_v24 = vpop.eup %4111  ;;  %4137 = vtanh.f32 %v3908_v22  ;;  %v1274_v25 = vpop.f32.mrf.mxu0 }
 0x10c   : > { %v1530_v26 = vpop.f32.mrf.mxu1  ;;  %v4114_v27 = vpop.eup %4113  ;;  %v3398_v28 = vpack.c.bf16 %v4112_v24, %v4104_v15  ;;  %4139 = vtanh.f32 %v1274_v25 }
 0x10d   : > { %v4116_v29 = vpop.eup %4115  ;;  %v3558_v30 = vpack.c.bf16 %v4114_v27, %v4106_v19  ;;  %4141 = vtanh.f32 %v1530_v26  ;;  %v3845_v31 = vpop.f32.mrf.mxu0 }
 0x10e   : > { %v3909_v32 = vpop.f32.mrf.mxu1  ;;  %v4118_v33 = vpop.eup %4117  ;;  %3686 = vst [vmem:[%s4526_s30 + $0x38] sm:$0xff] %v3398_v28   ;;  %v3393_v34 = vpack.c.bf16 %v4116_v29, %v4108_v20  ;;  %4143 = vtanh.f32 %v3845_v31 }
 0x10f   : > { %v4120_v35 = vpop.eup %4119  ;;  %3718 = vst [vmem:[%s4526_s30 + $0x138] sm:$0xff] %v3558_v30   ;;  %v3553_v36 = vpack.c.bf16 %v4118_v33, %v4110_v23  ;;  %4145 = vtanh.f32 %v3909_v32  ;;  %v1277_v37 = vpop.f32.mrf.mxu0 }
 0x110   : > { %v1533_v38 = vpop.f32.mrf.mxu1  ;;  %v4122_v39 = vpop.eup %4121  ;;  %3685 = vst [vmem:[%s4526_s30 + $0x30] sm:$0xff] %v3393_v34   ;;  %4147 = vtanh.f32 %v1277_v37 }
 0x111   : > { %v4124_v40 = vpop.eup %4123  ;;  %3717 = vst [vmem:[%s4526_s30 + $0x130] sm:$0xff] %v3553_v36   ;;  %4149 = vtanh.f32 %v1533_v38  ;;  %v3848_v41 = vpop.f32.mrf.mxu0 }
 0x112   : > { %v3912_v42 = vpop.f32.mrf.mxu1  ;;  %v4126_v43 = vpop.eup %4125  ;;  %4151 = vtanh.f32 %v3848_v41 }
 0x113   : > { %v4128_v44 = vpop.eup %4127  ;;  %4153 = vtanh.f32 %v3912_v42  ;;  %v1290_v45 = vpop.f32.mrf.mxu0 }
 0x114   : > { %v1546_v46 = vpop.f32.mrf.mxu1  ;;  %v4130_v47 = vpop.eup %4129  ;;  %v3408_v48 = vpack.c.bf16 %v4128_v44, %v4120_v35  ;;  %4155 = vtanh.f32 %v1290_v45 }
 0x115   : > { %v4132_v49 = vpop.eup %4131  ;;  %v3568_v50 = vpack.c.bf16 %v4130_v47, %v4122_v39  ;;  %4157 = vtanh.f32 %v1546_v46  ;;  %v3849_v51 = vpop.f32.mrf.mxu0 }
 0x116   : > { %v3913_v52 = vpop.f32.mrf.mxu1  ;;  %v4134_v53 = vpop.eup %4133  ;;  %3688 = vst [vmem:[%s4526_s30 + $0x48] sm:$0xff] %v3408_v48   ;;  %v3403_v54 = vpack.c.bf16 %v4132_v49, %v4124_v40  ;;  %4159 = vtanh.f32 %v3849_v51 }
 0x117   : > { %v4136_v55 = vpop.eup %4135  ;;  %3720 = vst [vmem:[%s4526_s30 + $0x148] sm:$0xff] %v3568_v50   ;;  %v3563_v56 = vpack.c.bf16 %v4134_v53, %v4126_v43  ;;  %4161 = vtanh.f32 %v3913_v52  ;;  %v1293_v57 = vpop.f32.mrf.mxu0 }
 0x118   : > { %v1549_v58 = vpop.f32.mrf.mxu1  ;;  %v4138_v59 = vpop.eup %4137  ;;  %3687 = vst [vmem:[%s4526_s30 + $0x40] sm:$0xff] %v3403_v54   ;;  %4163 = vtanh.f32 %v1293_v57 }
 0x119   : > { %v4140_v60 = vpop.eup %4139  ;;  %3719 = vst [vmem:[%s4526_s30 + $0x140] sm:$0xff] %v3563_v56   ;;  %4165 = vtanh.f32 %v1549_v58  ;;  %v3852_v61 = vpop.f32.mrf.mxu0 }
 0x11a   : > { %v3916_v62 = vpop.f32.mrf.mxu1  ;;  %v4142_v63 = vpop.eup %4141  ;;  %4167 = vtanh.f32 %v3852_v61 }
 0x11b   : > { %v4144_v0 = vpop.eup %4143  ;;  %4169 = vtanh.f32 %v3916_v62  ;;  %v1306_v1 = vpop.f32.mrf.mxu0 }
 0x11c   : > { %v1562_v2 = vpop.f32.mrf.mxu1  ;;  %v4146_v3 = vpop.eup %4145  ;;  %v3418_v4 = vpack.c.bf16 %v4144_v0, %v4136_v55  ;;  %4171 = vtanh.f32 %v1306_v1 }
 0x11d   : > { %v4148_v5 = vpop.eup %4147  ;;  %v3578_v6 = vpack.c.bf16 %v4146_v3, %v4138_v59  ;;  %4173 = vtanh.f32 %v1562_v2  ;;  %v3853_v7 = vpop.f32.mrf.mxu0 }
 0x11e   : > { %v3917_v8 = vpop.f32.mrf.mxu1  ;;  %v4150_v9 = vpop.eup %4149  ;;  %3690 = vst [vmem:[%s4526_s30 + $0x58] sm:$0xff] %v3418_v4   ;;  %v3413_v10 = vpack.c.bf16 %v4148_v5, %v4140_v60  ;;  %4175 = vtanh.f32 %v3853_v7 }
 0x11f   : > { %v4152_v11 = vpop.eup %4151  ;;  %3722 = vst [vmem:[%s4526_s30 + $0x158] sm:$0xff] %v3578_v6   ;;  %v3573_v12 = vpack.c.bf16 %v4150_v9, %v4142_v63  ;;  %4177 = vtanh.f32 %v3917_v8  ;;  %v1309_v13 = vpop.f32.mrf.mxu0 }
 0x120   : > { %v1565_v14 = vpop.f32.mrf.mxu1  ;;  %v4154_v15 = vpop.eup %4153  ;;  %3689 = vst [vmem:[%s4526_s30 + $0x50] sm:$0xff] %v3413_v10   ;;  %4179 = vtanh.f32 %v1309_v13 }
 0x121   : > { %v4156_v16 = vpop.eup %4155  ;;  %3721 = vst [vmem:[%s4526_s30 + $0x150] sm:$0xff] %v3573_v12   ;;  %4181 = vtanh.f32 %v1565_v14  ;;  %v3856_v17 = vpop.f32.mrf.mxu0 }
 0x122   : > { %v3920_v18 = vpop.f32.mrf.mxu1  ;;  %v4158_v19 = vpop.eup %4157  ;;  %4183 = vtanh.f32 %v3856_v17 }
 0x123   : > { %v4160_v20 = vpop.eup %4159  ;;  %4185 = vtanh.f32 %v3920_v18  ;;  %v1322_v21 = vpop.f32.mrf.mxu0 }
 0x124   : > { %v1578_v22 = vpop.f32.mrf.mxu1  ;;  %v4162_v23 = vpop.eup %4161  ;;  %v3428_v24 = vpack.c.bf16 %v4160_v20, %v4152_v11  ;;  %4187 = vtanh.f32 %v1322_v21 }
 0x125   : > { %v4164_v25 = vpop.eup %4163  ;;  %v3588_v26 = vpack.c.bf16 %v4162_v23, %v4154_v15  ;;  %4189 = vtanh.f32 %v1578_v22  ;;  %v3857_v27 = vpop.f32.mrf.mxu0 }
 0x126   : > { %v3921_v28 = vpop.f32.mrf.mxu1  ;;  %v4166_v29 = vpop.eup %4165  ;;  %3692 = vst [vmem:[%s4526_s30 + $0x68] sm:$0xff] %v3428_v24   ;;  %v3423_v30 = vpack.c.bf16 %v4164_v25, %v4156_v16  ;;  %4191 = vtanh.f32 %v3857_v27 }
 0x127   : > { %v4168_v31 = vpop.eup %4167  ;;  %3724 = vst [vmem:[%s4526_s30 + $0x168] sm:$0xff] %v3588_v26   ;;  %v3583_v32 = vpack.c.bf16 %v4166_v29, %v4158_v19  ;;  %4193 = vtanh.f32 %v3921_v28  ;;  %v1325_v33 = vpop.f32.mrf.mxu0 }
 0x128   : > { %v1581_v34 = vpop.f32.mrf.mxu1  ;;  %v4170_v35 = vpop.eup %4169  ;;  %3691 = vst [vmem:[%s4526_s30 + $0x60] sm:$0xff] %v3423_v30   ;;  %4195 = vtanh.f32 %v1325_v33 }
 0x129   : > { %v4172_v36 = vpop.eup %4171  ;;  %3723 = vst [vmem:[%s4526_s30 + $0x160] sm:$0xff] %v3583_v32   ;;  %4197 = vtanh.f32 %v1581_v34  ;;  %v3860_v37 = vpop.f32.mrf.mxu0 }
 0x12a   : > { %v3924_v38 = vpop.f32.mrf.mxu1  ;;  %v4174_v39 = vpop.eup %4173  ;;  %4199 = vtanh.f32 %v3860_v37 }
 0x12b   : > { %v4176_v40 = vpop.eup %4175  ;;  %4201 = vtanh.f32 %v3924_v38  ;;  %v1338_v41 = vpop.f32.mrf.mxu0 }
 0x12c   : > { %v1594_v42 = vpop.f32.mrf.mxu1  ;;  %v4178_v43 = vpop.eup %4177  ;;  %v3438_v44 = vpack.c.bf16 %v4176_v40, %v4168_v31  ;;  %4203 = vtanh.f32 %v1338_v41 }
 0x12d   : > { %v4180_v45 = vpop.eup %4179  ;;  %v3598_v46 = vpack.c.bf16 %v4178_v43, %v4170_v35  ;;  %4205 = vtanh.f32 %v1594_v42  ;;  %v3861_v47 = vpop.f32.mrf.mxu0 }
 0x12e   : > { %v3925_v48 = vpop.f32.mrf.mxu1  ;;  %v4182_v49 = vpop.eup %4181  ;;  %3694 = vst [vmem:[%s4526_s30 + $0x78] sm:$0xff] %v3438_v44   ;;  %v3433_v50 = vpack.c.bf16 %v4180_v45, %v4172_v36  ;;  %4207 = vtanh.f32 %v3861_v47 }
 0x12f   : > { %v4184_v51 = vpop.eup %4183  ;;  %3726 = vst [vmem:[%s4526_s30 + $0x178] sm:$0xff] %v3598_v46   ;;  %v3593_v52 = vpack.c.bf16 %v4182_v49, %v4174_v39  ;;  %4209 = vtanh.f32 %v3925_v48  ;;  %v1341_v53 = vpop.f32.mrf.mxu0 }
 0x130   : > { %v1597_v54 = vpop.f32.mrf.mxu1  ;;  %v4186_v55 = vpop.eup %4185  ;;  %3693 = vst [vmem:[%s4526_s30 + $0x70] sm:$0xff] %v3433_v50   ;;  %4211 = vtanh.f32 %v1341_v53 }
 0x131   : > { %v4188_v56 = vpop.eup %4187  ;;  %3725 = vst [vmem:[%s4526_s30 + $0x170] sm:$0xff] %v3593_v52   ;;  %4213 = vtanh.f32 %v1597_v54  ;;  %v3864_v57 = vpop.f32.mrf.mxu0 }
 0x132   : > { %v3928_v58 = vpop.f32.mrf.mxu1  ;;  %v4190_v59 = vpop.eup %4189  ;;  %4215 = vtanh.f32 %v3864_v57 }
 0x133   : > { %v4192_v60 = vpop.eup %4191  ;;  %4217 = vtanh.f32 %v3928_v58  ;;  %v1354_v61 = vpop.f32.mrf.mxu0 }
 0x134   : > { %v1610_v62 = vpop.f32.mrf.mxu1  ;;  %v4194_v63 = vpop.eup %4193  ;;  %v3448_v0 = vpack.c.bf16 %v4192_v60, %v4184_v51  ;;  %4219 = vtanh.f32 %v1354_v61 }
 0x135   : > { %v4196_v1 = vpop.eup %4195  ;;  %v3608_v2 = vpack.c.bf16 %v4194_v63, %v4186_v55  ;;  %4221 = vtanh.f32 %v1610_v62  ;;  %v3865_v3 = vpop.f32.mrf.mxu0 }
 0x136   : > { %v3929_v4 = vpop.f32.mrf.mxu1  ;;  %v4198_v5 = vpop.eup %4197  ;;  %3696 = vst [vmem:[%s4526_s30 + $0x88] sm:$0xff] %v3448_v0   ;;  %v3443_v6 = vpack.c.bf16 %v4196_v1, %v4188_v56  ;;  %4223 = vtanh.f32 %v3865_v3 }
 0x137   : > { %v4200_v7 = vpop.eup %4199  ;;  %3728 = vst [vmem:[%s4526_s30 + $0x188] sm:$0xff] %v3608_v2   ;;  %v3603_v8 = vpack.c.bf16 %v4198_v5, %v4190_v59  ;;  %4225 = vtanh.f32 %v3929_v4  ;;  %v1357_v9 = vpop.f32.mrf.mxu0 }
 0x138   : > { %v1613_v10 = vpop.f32.mrf.mxu1  ;;  %v4202_v11 = vpop.eup %4201  ;;  %3695 = vst [vmem:[%s4526_s30 + $0x80] sm:$0xff] %v3443_v6   ;;  %4227 = vtanh.f32 %v1357_v9 }
 0x139   : > { %v4204_v12 = vpop.eup %4203  ;;  %3727 = vst [vmem:[%s4526_s30 + $0x180] sm:$0xff] %v3603_v8   ;;  %4229 = vtanh.f32 %v1613_v10  ;;  %v3868_v13 = vpop.f32.mrf.mxu0 }
 0x13a   : > { %v3932_v14 = vpop.f32.mrf.mxu1  ;;  %v4206_v15 = vpop.eup %4205  ;;  %4231 = vtanh.f32 %v3868_v13 }
 0x13b   : > { %v4208_v16 = vpop.eup %4207  ;;  %4233 = vtanh.f32 %v3932_v14  ;;  %v1370_v17 = vpop.f32.mrf.mxu0 }
 0x13c   : > { %v1626_v18 = vpop.f32.mrf.mxu1  ;;  %v4210_v19 = vpop.eup %4209  ;;  %v3458_v20 = vpack.c.bf16 %v4208_v16, %v4200_v7  ;;  %4235 = vtanh.f32 %v1370_v17 }
 0x13d   : > { %v4212_v21 = vpop.eup %4211  ;;  %v3618_v22 = vpack.c.bf16 %v4210_v19, %v4202_v11  ;;  %4237 = vtanh.f32 %v1626_v18  ;;  %v3869_v23 = vpop.f32.mrf.mxu0 }
 0x13e   : > { %v3933_v24 = vpop.f32.mrf.mxu1  ;;  %v4214_v25 = vpop.eup %4213  ;;  %3698 = vst [vmem:[%s4526_s30 + $0x98] sm:$0xff] %v3458_v20   ;;  %v3453_v26 = vpack.c.bf16 %v4212_v21, %v4204_v12  ;;  %4239 = vtanh.f32 %v3869_v23 }
 0x13f   : > { %v4216_v27 = vpop.eup %4215  ;;  %3730 = vst [vmem:[%s4526_s30 + $0x198] sm:$0xff] %v3618_v22   ;;  %v3613_v28 = vpack.c.bf16 %v4214_v25, %v4206_v15  ;;  %4241 = vtanh.f32 %v3933_v24  ;;  %v1373_v29 = vpop.f32.mrf.mxu0 }
 0x140   : > { %v1629_v30 = vpop.f32.mrf.mxu1  ;;  %v4218_v31 = vpop.eup %4217  ;;  %3697 = vst [vmem:[%s4526_s30 + $0x90] sm:$0xff] %v3453_v26   ;;  %4243 = vtanh.f32 %v1373_v29 }
 0x141   : > { %v4220_v32 = vpop.eup %4219  ;;  %3729 = vst [vmem:[%s4526_s30 + $0x190] sm:$0xff] %v3613_v28   ;;  %4245 = vtanh.f32 %v1629_v30  ;;  %v3872_v33 = vpop.f32.mrf.mxu0 }
 0x142   : > { %v3936_v34 = vpop.f32.mrf.mxu1  ;;  %v4222_v35 = vpop.eup %4221  ;;  %4247 = vtanh.f32 %v3872_v33 }
 0x143   : > { %v4224_v36 = vpop.eup %4223  ;;  %4249 = vtanh.f32 %v3936_v34  ;;  %v1386_v37 = vpop.f32.mrf.mxu0 }
 0x144   : > { %v1642_v38 = vpop.f32.mrf.mxu1  ;;  %v4226_v39 = vpop.eup %4225  ;;  %v3468_v40 = vpack.c.bf16 %v4224_v36, %v4216_v27  ;;  %4251 = vtanh.f32 %v1386_v37 }
 0x145   : > { %v4228_v41 = vpop.eup %4227  ;;  %v3628_v42 = vpack.c.bf16 %v4226_v39, %v4218_v31  ;;  %4253 = vtanh.f32 %v1642_v38  ;;  %v3873_v43 = vpop.f32.mrf.mxu0 }
 0x146   : > { %v3937_v44 = vpop.f32.mrf.mxu1  ;;  %v4230_v45 = vpop.eup %4229  ;;  %3700 = vst [vmem:[%s4526_s30 + $0xa8] sm:$0xff] %v3468_v40   ;;  %v3463_v46 = vpack.c.bf16 %v4228_v41, %v4220_v32  ;;  %4255 = vtanh.f32 %v3873_v43 }
 0x147   : > { %v4232_v47 = vpop.eup %4231  ;;  %3732 = vst [vmem:[%s4526_s30 + $0x1a8] sm:$0xff] %v3628_v42   ;;  %v3623_v48 = vpack.c.bf16 %v4230_v45, %v4222_v35  ;;  %4257 = vtanh.f32 %v3937_v44  ;;  %v1389_v49 = vpop.f32.mrf.mxu0 }
 0x148   : > { %v1645_v50 = vpop.f32.mrf.mxu1  ;;  %v4234_v51 = vpop.eup %4233  ;;  %3699 = vst [vmem:[%s4526_s30 + $0xa0] sm:$0xff] %v3463_v46   ;;  %4259 = vtanh.f32 %v1389_v49 }
 0x149   : > { %v4236_v52 = vpop.eup %4235  ;;  %3731 = vst [vmem:[%s4526_s30 + $0x1a0] sm:$0xff] %v3623_v48   ;;  %4261 = vtanh.f32 %v1645_v50  ;;  %v3876_v53 = vpop.f32.mrf.mxu0 }
 0x14a   : > { %v3940_v54 = vpop.f32.mrf.mxu1  ;;  %v4238_v55 = vpop.eup %4237  ;;  %4263 = vtanh.f32 %v3876_v53 }
 0x14b   : > { %v4240_v56 = vpop.eup %4239  ;;  %4265 = vtanh.f32 %v3940_v54  ;;  %v1402_v57 = vpop.f32.mrf.mxu0 }
 0x14c   : > { %v1658_v58 = vpop.f32.mrf.mxu1  ;;  %v4242_v59 = vpop.eup %4241  ;;  %v3478_v60 = vpack.c.bf16 %v4240_v56, %v4232_v47  ;;  %4267 = vtanh.f32 %v1402_v57 }
 0x14d   : > { %v4244_v61 = vpop.eup %4243  ;;  %v3638_v62 = vpack.c.bf16 %v4242_v59, %v4234_v51  ;;  %4269 = vtanh.f32 %v1658_v58  ;;  %v3877_v63 = vpop.f32.mrf.mxu0 }
 0x14e   : > { %v3941_v0 = vpop.f32.mrf.mxu1  ;;  %v4246_v1 = vpop.eup %4245  ;;  %3702 = vst [vmem:[%s4526_s30 + $0xb8] sm:$0xff] %v3478_v60   ;;  %v3473_v2 = vpack.c.bf16 %v4244_v61, %v4236_v52  ;;  %4271 = vtanh.f32 %v3877_v63 }
 0x14f   : > { %v4248_v3 = vpop.eup %4247  ;;  %3734 = vst [vmem:[%s4526_s30 + $0x1b8] sm:$0xff] %v3638_v62   ;;  %v3633_v4 = vpack.c.bf16 %v4246_v1, %v4238_v55  ;;  %4273 = vtanh.f32 %v3941_v0  ;;  %v1405_v5 = vpop.f32.mrf.mxu0 }
 0x150   : > { %v1661_v6 = vpop.f32.mrf.mxu1  ;;  %v4250_v7 = vpop.eup %4249  ;;  %3701 = vst [vmem:[%s4526_s30 + $0xb0] sm:$0xff] %v3473_v2   ;;  %4275 = vtanh.f32 %v1405_v5 }
 0x151   : > { %v4252_v8 = vpop.eup %4251  ;;  %3733 = vst [vmem:[%s4526_s30 + $0x1b0] sm:$0xff] %v3633_v4   ;;  %4277 = vtanh.f32 %v1661_v6  ;;  %v3880_v9 = vpop.f32.mrf.mxu0 }
 0x152   : > { %v3944_v10 = vpop.f32.mrf.mxu1  ;;  %v4254_v11 = vpop.eup %4253  ;;  %4279 = vtanh.f32 %v3880_v9 }
 0x153   : > { %v4256_v12 = vpop.eup %4255  ;;  %4281 = vtanh.f32 %v3944_v10  ;;  %v1418_v13 = vpop.f32.mrf.mxu0 }
 0x154   : > { %v1674_v14 = vpop.f32.mrf.mxu1  ;;  %v4258_v15 = vpop.eup %4257  ;;  %v3488_v16 = vpack.c.bf16 %v4256_v12, %v4248_v3  ;;  %4283 = vtanh.f32 %v1418_v13 }
 0x155   : > { %v4260_v17 = vpop.eup %4259  ;;  %v3648_v18 = vpack.c.bf16 %v4258_v15, %v4250_v7  ;;  %4285 = vtanh.f32 %v1674_v14  ;;  %v3881_v19 = vpop.f32.mrf.mxu0 }
 0x156   : > { %v3945_v20 = vpop.f32.mrf.mxu1  ;;  %v4262_v21 = vpop.eup %4261  ;;  %3704 = vst [vmem:[%s4526_s30 + $0xc8] sm:$0xff] %v3488_v16   ;;  %v3483_v22 = vpack.c.bf16 %v4260_v17, %v4252_v8  ;;  %4287 = vtanh.f32 %v3881_v19 }
 0x157   : > { %v4264_v23 = vpop.eup %4263  ;;  %3736 = vst [vmem:[%s4526_s30 + $0x1c8] sm:$0xff] %v3648_v18   ;;  %v3643_v24 = vpack.c.bf16 %v4262_v21, %v4254_v11  ;;  %4289 = vtanh.f32 %v3945_v20  ;;  %v1421_v25 = vpop.f32.mrf.mxu0 }
 0x158   : > { %v1677_v26 = vpop.f32.mrf.mxu1  ;;  %v4266_v27 = vpop.eup %4265  ;;  %3703 = vst [vmem:[%s4526_s30 + $0xc0] sm:$0xff] %v3483_v22   ;;  %4291 = vtanh.f32 %v1421_v25 }
 0x159   : > { %v4268_v28 = vpop.eup %4267  ;;  %3735 = vst [vmem:[%s4526_s30 + $0x1c0] sm:$0xff] %v3643_v24   ;;  %4293 = vtanh.f32 %v1677_v26  ;;  %v3884_v29 = vpop.f32.mrf.mxu0 }
 0x15a   : > { %v3948_v30 = vpop.f32.mrf.mxu1  ;;  %v4270_v31 = vpop.eup %4269  ;;  %4295 = vtanh.f32 %v3884_v29 }
 0x15b   : > { %v4272_v32 = vpop.eup %4271  ;;  %4297 = vtanh.f32 %v3948_v30  ;;  %v1434_v33 = vpop.f32.mrf.mxu0 }
 0x15c   : > { %v1690_v34 = vpop.f32.mrf.mxu1  ;;  %v4274_v35 = vpop.eup %4273  ;;  %v3498_v36 = vpack.c.bf16 %v4272_v32, %v4264_v23  ;;  %4299 = vtanh.f32 %v1434_v33 }
 0x15d   : > { %v4276_v37 = vpop.eup %4275  ;;  %v3658_v38 = vpack.c.bf16 %v4274_v35, %v4266_v27  ;;  %4301 = vtanh.f32 %v1690_v34  ;;  %v3885_v39 = vpop.f32.mrf.mxu0 }
 0x15e   : > { %v3949_v40 = vpop.f32.mrf.mxu1  ;;  %v4278_v41 = vpop.eup %4277  ;;  %3706 = vst [vmem:[%s4526_s30 + $0xd8] sm:$0xff] %v3498_v36   ;;  %v3493_v42 = vpack.c.bf16 %v4276_v37, %v4268_v28  ;;  %4303 = vtanh.f32 %v3885_v39 }
 0x15f   : > { %v4280_v43 = vpop.eup %4279  ;;  %3738 = vst [vmem:[%s4526_s30 + $0x1d8] sm:$0xff] %v3658_v38   ;;  %v3653_v44 = vpack.c.bf16 %v4278_v41, %v4270_v31  ;;  %4305 = vtanh.f32 %v3949_v40  ;;  %v1437_v45 = vpop.f32.mrf.mxu0 }
 0x160   : > { %v1693_v46 = vpop.f32.mrf.mxu1  ;;  %v4282_v47 = vpop.eup %4281  ;;  %3705 = vst [vmem:[%s4526_s30 + $0xd0] sm:$0xff] %v3493_v42   ;;  %4307 = vtanh.f32 %v1437_v45 }
 0x161   : > { %v4284_v48 = vpop.eup %4283  ;;  %3737 = vst [vmem:[%s4526_s30 + $0x1d0] sm:$0xff] %v3653_v44   ;;  %4309 = vtanh.f32 %v1693_v46 }
 0x162   : > { %v4286_v49 = vpop.eup %4285 }
 0x163   : > { %v4288_v50 = vpop.eup %4287 }
 0x164   : > { %v4290_v51 = vpop.eup %4289  ;;  %v3508_v52 = vpack.c.bf16 %v4288_v50, %v4280_v43 }
 0x165   : > { %v4292_v53 = vpop.eup %4291  ;;  %v3668_v54 = vpack.c.bf16 %v4290_v51, %v4282_v47 }
 0x166   : > { %v4294_v55 = vpop.eup %4293  ;;  %3708 = vst [vmem:[%s4526_s30 + $0xe8] sm:$0xff] %v3508_v52   ;;  %v3503_v56 = vpack.c.bf16 %v4292_v53, %v4284_v48 }
 0x167   : > { %v4296_v57 = vpop.eup %4295  ;;  %3740 = vst [vmem:[%s4526_s30 + $0x1e8] sm:$0xff] %v3668_v54   ;;  %v3663_v58 = vpack.c.bf16 %v4294_v55, %v4286_v49 }
 0x168   : > { %v4298_v59 = vpop.eup %4297  ;;  %3707 = vst [vmem:[%s4526_s30 + $0xe0] sm:$0xff] %v3503_v56  }
 0x169   : > { %v4300_v60 = vpop.eup %4299  ;;  %3739 = vst [vmem:[%s4526_s30 + $0x1e0] sm:$0xff] %v3663_v58  }
 0x16a   : > { %v4302_v61 = vpop.eup %4301 }
 0x16b   : > { %v4304_v62 = vpop.eup %4303 }
 0x16c   : > { %v4306_v63 = vpop.eup %4305  ;;  %v3518_v0 = vpack.c.bf16 %v4304_v62, %v4296_v57 }
 0x16d   : > { %v4308_v1 = vpop.eup %4307  ;;  %v3678_v2 = vpack.c.bf16 %v4306_v63, %v4298_v59 }
 0x16e   : > { %v4310_v3 = vpop.eup %4309  ;;  %3710 = vst [vmem:[%s4526_s30 + $0xf8] sm:$0xff] %v3518_v0   ;;  %v3513_v4 = vpack.c.bf16 %v4308_v1, %v4300_v60 }
 0x16f   : > { %3742 = vst [vmem:[%s4526_s30 + $0x1f8] sm:$0xff] %v3678_v2   ;;  %v3673_v5 = vpack.c.bf16 %v4310_v3, %v4302_v61 }
 0x170   : > { %3709 = vst [vmem:[%s4526_s30 + $0xf0] sm:$0xff] %v3513_v4  }
 0x171   : > { %3741 = vst [vmem:[%s4526_s30 + $0x1f0] sm:$0xff] %v3673_v5  }
 0x172 PF: > { %s12_s11 = sadd.s32 1, %s4333_s11   ;;  %s4604_s9 = smov %s4329_s10 }
 0x173   : > { %p9_p5 = scmp.ge.s32.totalorder %s12_s11, 4   ;;  %s4605_s10 = smov %s4607_s12 }
 0x175   :  { %11 = sbr.rel (!%p9_p5) target bundleno = 2 (0x2), region = 69 }

</bundles_post_ra>
